<compile_context>
chip_gen: v5e
topology: v5e:2x2
jax: 0.10.0
libtpu: 0.0.40
codegen_flags: <defaults>
</compile_context>

<pallas_src>
import jax
import jax.numpy as jnp
from jax.experimental import pallas as pl
from jax.experimental.pallas import tpu as pltpu


# ---------------------------------------------------------------------------
# Static network configuration implied by the layer_list
# (16x16 input so that 4 * 7 * 7 == 196, the 'View' size).
# ---------------------------------------------------------------------------
IN_H = IN_W = 16
KH = KW = 3
OC = 4
OH, OW = IN_H - KH + 1, IN_W - KW + 1      # 14, 14
POOL = 2
PH, PW = OH // POOL, OW // POOL            # 7, 7
HID = 32
OUT = 10

GROUP = 8                                  # packed feature stride per (c, h): 7 real + 1 pad
K_PAD = OC * PH * GROUP                    # 224 -- padded/aligned fc1 contraction dim

assert POOL == 2
assert OH % POOL == 0 and OW % POOL == 0   # max-pool must not drop rows/cols
assert OC * PH * PW == 196


def _cdiv(a, b):
    return -(-a // b)


def _round_up(v, m):
    return (v + m - 1) // m * m


# ---------------------------------------------------------------------------
# Fused forward kernel (one batch block per grid step, batch on lanes)
# ---------------------------------------------------------------------------
def _fused_forward_kernel(wc_ref, bc_ref, xe_ref, xo_ref, w1t_ref, b1_ref,
                          w2t_ref, b2_ref, o_ref, feat_ref):
    """Whole network for one batch block.

    wc_ref : (OC, KH*KW) f32 SMEM    conv weights (scalars)
    bc_ref : (OC,)       f32 SMEM    conv bias    (scalars)
    xe_ref : (IN_H, IN_W//2, bn)     even input columns, batch on lanes
    xo_ref : (IN_H, IN_W//2, bn)     odd  input columns, batch on lanes
    w1t_ref: (HID, K_PAD)            fc1 weights, transposed + group-padded
    b1_ref : (HID, 1)
    w2t_ref: (OUT, HID)              fc2 weights, transposed
    b2_ref : (OUT, 1)
    o_ref  : (OUT, bn)               lane-dense output block
    feat_ref: (K_PAD, bn) f32 VMEM   pooled-feature scratch
    """
    bn = xe_ref.shape[2]

    # Hoist all conv scalars out of the unrolled loops (36 weights + 4 biases,
    # read from SMEM exactly once).
    wcs = [[wc_ref[oc, k] for k in range(KH * KW)] for oc in range(OC)]
    bcs = [bc_ref[oc] for oc in range(OC)]

    # Zero the per-group padding rows of the feature scratch so the zero
    # fc1-weight columns never multiply uninitialized VMEM (0 * NaN == NaN).
    zrow = jnp.zeros((1, bn), jnp.float32)
    for g in range(OC * PH):
        feat_ref[g * GROUP + PW:g * GROUP + PW + 1, :] = zrow

    # Kernel taps (j = 0, 1, 2) expressed over the even/odd column split:
    #   even output col 2*pw   uses input cols 2pw, 2pw+1, 2pw+2
    #   odd  output col 2*pw+1 uses input cols 2pw+1, 2pw+2, 2pw+3
    EVEN_TAPS = ("e0", "o0", "e1")
    ODD_TAPS = ("o0", "e1", "o1")

    for ph in range(PH):                       # pooled rows, fully unrolled
        # Input slabs shared across output channels for this pooled row:
        # image rows 2ph .. 2ph+3, four unit-stride 7-wide column windows.
        slab = {}
        for r in range(2 * ph, 2 * ph + POOL + KH - 1):    # 4 rows
            slab[(r, "e0")] = xe_ref[r, 0:PW, :]           # cols 0,2,...,12
            slab[(r, "e1")] = xe_ref[r, 1:PW + 1, :]       # cols 2,4,...,14
            slab[(r, "o0")] = xo_ref[r, 0:PW, :]           # cols 1,3,...,13
            slab[(r, "o1")] = xo_ref[r, 1:PW + 1, :]       # cols 3,5,...,15

        for oc in range(OC):
            w = wcs[oc]
            m = None                           # running max over the 2x2 window
            for d in range(POOL):              # the two conv rows in the window
                rr = 2 * ph + d
                for taps in (EVEN_TAPS, ODD_TAPS):   # the two conv columns
                    acc = None
                    for i in range(KH):
                        for j in range(KW):
                            t = slab[(rr + i, taps[j])] * w[i * KW + j]
                            acc = t if acc is None else acc + t
                    m = acc if m is None else jnp.maximum(m, acc)
            # bias + ReLU after the max (bias is shared by the 2x2 window and
            # ReLU is monotone, so this equals relu(conv+bias) -> maxpool).
            pooled = jnp.maximum(m + bcs[oc], 0.0)          # (PW, bn)
            base = (oc * PH + ph) * GROUP                   # 8-aligned
            feat_ref[base:base + PW, :] = pooled

    # fc1 as one consolidated MXU matmul + bias + ReLU, then fc2 + sigmoid.
    h1 = jnp.dot(w1t_ref[...], feat_ref[...],
                 preferred_element_type=jnp.float32)        # (HID, bn)
    h1 = jnp.maximum(h1 + b1_ref[...], 0.0)
    logits = jnp.dot(w2t_ref[...], h1,
                     preferred_element_type=jnp.float32) + b2_ref[...]
    o_ref[...] = jax.nn.sigmoid(logits).astype(o_ref.dtype)  # (OUT, bn), lane-dense


# ---------------------------------------------------------------------------
# Parameter / input packing (one-time) and forward wrapper
# ---------------------------------------------------------------------------
def pack_params(params):
    """One-time repack of PyTorch-layout params into the kernel layout.

    fc1 feature index (NCHW 'View' flatten) is c*49 + h*7 + w; it is remapped
    to the 8-aligned group layout (c*PH + h)*8 + w, with the 8th row of every
    group zero.  Linear weights are stored transposed (out, in) so the batch
    stays on the lane axis through both matmuls.
    """
    wc = params["conv_w"].reshape(OC, KH * KW)          # (4, 9)  -> SMEM scalars
    bc = params["conv_b"]                               # (4,)    -> SMEM scalars
    w1 = params["fc1_w"].reshape(OC, PH, PW, HID)       # (c, h, w, out)
    w1p = jnp.zeros((OC, PH, GROUP, HID), params["fc1_w"].dtype)
    w1p = w1p.at[:, :, :PW, :].set(w1)
    w1t = w1p.reshape(K_PAD, HID).T                     # (HID, K_PAD)
    return {
        "wc": wc,
        "bc": bc,
        "w1t": w1t,
        "b1": params["fc1_b"].reshape(HID, 1),
        "w2t": params["fc2_w"].T,                       # (OUT, HID)
        "b2": params["fc2_b"].reshape(OUT, 1),
    }


def prepare_inputs(x):
    """Single re-layout pass: batch -> lanes, even/odd column split so the
    stride-2 pool column select is a unit-stride sublane slice in-kernel.
    Hoist this call if the same x is reused across forward() calls.
    """
    # TODO(synk): do this re-layout in-kernel to drop the extra HBM round trip
    # at very large batch (kernel is otherwise input-bandwidth bound).
    img = x[:, 0]                                        # (N, H, W)
    xe = jnp.transpose(img[:, :, 0::2], (1, 2, 0))       # (H, W/2, N)
    xo = jnp.transpose(img[:, :, 1::2], (1, 2, 0))       # (H, W/2, N)
    return xe, xo


def forward(packed, x, *, block_n=None):
    """packed: output of pack_params(); x: (N, 1, 16, 16) float32."""
    n = x.shape[0]
    assert x.shape[1:] == (1, IN_H, IN_W), x.shape

    if block_n is None:
        if n <= 128:
            block_n = n            # single block; lane dim == full batch (allowed)
        else:
            # >= 2 blocks so both v7x TensorCores get work; lane dim a multiple
            # of 128; large blocks amortize the ~0.35us per-grid-step overhead.
            # (VMEM use at block_n=1024 is only ~3 MiB, far under 64 MiB.)
            block_n = min(1024, _round_up(_cdiv(n, 2), 128))
    num_blocks = _cdiv(n, block_n)
    # Ragged-tail note: when n % block_n != 0 the last block reads garbage
    # batch lanes; every op is lane-independent (conv/pool elementwise, the
    # matmuls contract over sublanes only), so garbage stays in its own lane
    # and is masked away by the clipped output store.

    xe, xo = prepare_inputs(x)

    out_t = pl.pallas_call(
        _fused_forward_kernel,
        out_shape=jax.ShapeDtypeStruct((OUT, n), x.dtype),
        grid=(num_blocks,),
        in_specs=[
            pl.BlockSpec(memory_space=pltpu.MemorySpace.SMEM),          # conv w
            pl.BlockSpec(memory_space=pltpu.MemorySpace.SMEM),          # conv b
            pl.BlockSpec((IN_H, IN_W // 2, block_n), lambda i: (0, 0, i)),
            pl.BlockSpec((IN_H, IN_W // 2, block_n), lambda i: (0, 0, i)),
            pl.BlockSpec((HID, K_PAD), lambda i: (0, 0)),
            pl.BlockSpec((HID, 1), lambda i: (0, 0)),
            pl.BlockSpec((OUT, HID), lambda i: (0, 0)),
            pl.BlockSpec((OUT, 1), lambda i: (0, 0)),
        ],
        out_specs=pl.BlockSpec((OUT, block_n), lambda i: (0, i)),
        scratch_shapes=[pltpu.VMEM((K_PAD, block_n), jnp.float32)],
        compiler_params=pltpu.CompilerParams(
            dimension_semantics=("parallel",)),       # v7x: 2 TCs share batch
    )(packed["wc"], packed["bc"], xe, xo, packed["w1t"], packed["b1"],
      packed["w2t"], packed["b2"])

    return out_t.T                                    # (N, OUT)


# ---------------------------------------------------------------------------
# Pure-JAX reference (PyTorch-layout params) and parameter init
# ---------------------------------------------------------------------------
def reference(params, x):
    y = jax.lax.conv_general_dilated(
        x, params["conv_w"], (1, 1), "VALID",
        dimension_numbers=("NCHW", "OIHW", "NCHW"))
    y = y + params["conv_b"][None, :, None, None]
    y = jnp.maximum(y, 0.0)
    y = jax.lax.reduce_window(y, -jnp.inf, jax.lax.max,
                              (1, 1, 2, 2), (1, 1, 2, 2), "VALID")
    y = y.reshape(-1, OC * PH * PW)
    y = jnp.maximum(y @ params["fc1_w"] + params["fc1_b"], 0.0)
    y = jax.nn.sigmoid(y @ params["fc2_w"] + params["fc2_b"])
    return y


def init_params(key):
    """Deterministic synthetic parameters (shapes from the layer_list).
    Linear weights are stored as (in, out), i.e. already transposed vs PyTorch."""
    k = jax.random.split(key, 6)
    f32 = jnp.float32
    return {
        "conv_w": 0.2 * jax.random.normal(k[0], (OC, 1, KH, KW), f32),
        "conv_b": 0.1 * jax.random.normal(k[1], (OC,), f32),
        "fc1_w": 0.1 * jax.random.normal(k[2], (OC * PH * PW, HID), f32),
        "fc1_b": 0.1 * jax.random.normal(k[3], (HID,), f32),
        "fc2_w": 0.1 * jax.random.normal(k[4], (HID, OUT), f32),
        "fc2_b": 0.1 * jax.random.normal(k[5], (OUT,), f32),
    }


if __name__ == "__main__":
    key = jax.random.PRNGKey(0)
    pkey, xkey = jax.random.split(key)
    params = init_params(pkey)
    packed = jax.tree_util.tree_map(jnp.asarray, pack_params(params))
    fwd = jax.jit(forward)

    # 1) Small demo batch (single block, batch on lanes).
    x = jax.random.normal(xkey, (2, 1, IN_H, IN_W), jnp.float32)
    out = jax.block_until_ready(fwd(packed, x))
    ref = jax.block_until_ready(reference(params, x))
    assert out.shape == (2, OUT), out.shape
    assert jnp.allclose(out, ref, atol=2e-4, rtol=2e-4), (
        f"max abs diff {jnp.max(jnp.abs(out - ref))}")

    # 2) Multi-block + ragged-tail path (2 blocks of 128 lanes on batch 300).
    xl = jax.random.normal(jax.random.PRNGKey(1), (300, 1, IN_H, IN_W),
                           jnp.float32)
    outl = jax.block_until_ready(fwd(packed, xl))
    refl = jax.block_until_ready(reference(params, xl))
    assert outl.shape == (300, OUT), outl.shape
    assert jnp.allclose(outl, refl, atol=2e-4, rtol=2e-4), (
        f"max abs diff {jnp.max(jnp.abs(outl - refl))}")

    print("KERNEL_OK")
</pallas_src>

<mosaic_0001>
module attributes {stable_mosaic.version = 11 : i64} {
  func.func @_fused_forward_kernel(%arg0: i32, %arg1: memref<4x9xf32, #tpu.memory_space<smem>>, %arg2: memref<4xf32, #tpu.memory_space<smem>>, %arg3: memref<16x8x2xf32, #tpu.memory_space<vmem>>, %arg4: memref<16x8x2xf32, #tpu.memory_space<vmem>>, %arg5: memref<32x224xf32, #tpu.memory_space<vmem>>, %arg6: memref<32x1xf32, #tpu.memory_space<vmem>>, %arg7: memref<10x32xf32, #tpu.memory_space<vmem>>, %arg8: memref<10x1xf32, #tpu.memory_space<vmem>>, %arg9: memref<10x2xf32, #tpu.memory_space<vmem>>, %arg10: memref<224x2xf32, #tpu.memory_space<vmem>>) attributes {dimension_semantics = [#tpu.dimension_semantics<parallel>], iteration_bounds = array<i64: 1>, scalar_prefetch = 0 : i64, scratch_operands = 1 : i64, tpu.core_type = #tpu.core_type<tc>, window_params = [{transform_indices = @transform_0, window_bounds = array<i64: 4, 9>}, {transform_indices = @transform_1, window_bounds = array<i64: 4>}, {transform_indices = @transform_2, window_bounds = array<i64: 16, 8, 2>}, {transform_indices = @transform_3, window_bounds = array<i64: 16, 8, 2>}, {pipeline_mode = #tpu.pipeline_mode<synchronous>, transform_indices = @transform_4, window_bounds = array<i64: 32, 224>}, {pipeline_mode = #tpu.pipeline_mode<synchronous>, transform_indices = @transform_5, window_bounds = array<i64: 32, 1>}, {pipeline_mode = #tpu.pipeline_mode<synchronous>, transform_indices = @transform_6, window_bounds = array<i64: 10, 32>}, {pipeline_mode = #tpu.pipeline_mode<synchronous>, transform_indices = @transform_7, window_bounds = array<i64: 10, 1>}, {transform_indices = @transform_8, window_bounds = array<i64: 10, 2>}]} {
    %c0 = arith.constant 0 : index
    %c0_0 = arith.constant 0 : index
    %0 = memref.load %arg1[%c0, %c0_0] : memref<4x9xf32, #tpu.memory_space<smem>>
    %c0_1 = arith.constant 0 : index
    %c1 = arith.constant 1 : index
    %1 = memref.load %arg1[%c0_1, %c1] : memref<4x9xf32, #tpu.memory_space<smem>>
    %c0_2 = arith.constant 0 : index
    %c2 = arith.constant 2 : index
    %2 = memref.load %arg1[%c0_2, %c2] : memref<4x9xf32, #tpu.memory_space<smem>>
    %c0_3 = arith.constant 0 : index
    %c3 = arith.constant 3 : index
    %3 = memref.load %arg1[%c0_3, %c3] : memref<4x9xf32, #tpu.memory_space<smem>>
    %c0_4 = arith.constant 0 : index
    %c4 = arith.constant 4 : index
    %4 = memref.load %arg1[%c0_4, %c4] : memref<4x9xf32, #tpu.memory_space<smem>>
    %c0_5 = arith.constant 0 : index
    %c5 = arith.constant 5 : index
    %5 = memref.load %arg1[%c0_5, %c5] : memref<4x9xf32, #tpu.memory_space<smem>>
    %c0_6 = arith.constant 0 : index
    %c6 = arith.constant 6 : index
    %6 = memref.load %arg1[%c0_6, %c6] : memref<4x9xf32, #tpu.memory_space<smem>>
    %c0_7 = arith.constant 0 : index
    %c7 = arith.constant 7 : index
    %7 = memref.load %arg1[%c0_7, %c7] : memref<4x9xf32, #tpu.memory_space<smem>>
    %c0_8 = arith.constant 0 : index
    %c8 = arith.constant 8 : index
    %8 = memref.load %arg1[%c0_8, %c8] : memref<4x9xf32, #tpu.memory_space<smem>>
    %c1_9 = arith.constant 1 : index
    %c0_10 = arith.constant 0 : index
    %9 = memref.load %arg1[%c1_9, %c0_10] : memref<4x9xf32, #tpu.memory_space<smem>>
    %c1_11 = arith.constant 1 : index
    %c1_12 = arith.constant 1 : index
    %10 = memref.load %arg1[%c1_11, %c1_12] : memref<4x9xf32, #tpu.memory_space<smem>>
    %c1_13 = arith.constant 1 : index
    %c2_14 = arith.constant 2 : index
    %11 = memref.load %arg1[%c1_13, %c2_14] : memref<4x9xf32, #tpu.memory_space<smem>>
    %c1_15 = arith.constant 1 : index
    %c3_16 = arith.constant 3 : index
    %12 = memref.load %arg1[%c1_15, %c3_16] : memref<4x9xf32, #tpu.memory_space<smem>>
    %c1_17 = arith.constant 1 : index
    %c4_18 = arith.constant 4 : index
    %13 = memref.load %arg1[%c1_17, %c4_18] : memref<4x9xf32, #tpu.memory_space<smem>>
    %c1_19 = arith.constant 1 : index
    %c5_20 = arith.constant 5 : index
    %14 = memref.load %arg1[%c1_19, %c5_20] : memref<4x9xf32, #tpu.memory_space<smem>>
    %c1_21 = arith.constant 1 : index
    %c6_22 = arith.constant 6 : index
    %15 = memref.load %arg1[%c1_21, %c6_22] : memref<4x9xf32, #tpu.memory_space<smem>>
    %c1_23 = arith.constant 1 : index
    %c7_24 = arith.constant 7 : index
    %16 = memref.load %arg1[%c1_23, %c7_24] : memref<4x9xf32, #tpu.memory_space<smem>>
    %c1_25 = arith.constant 1 : index
    %c8_26 = arith.constant 8 : index
    %17 = memref.load %arg1[%c1_25, %c8_26] : memref<4x9xf32, #tpu.memory_space<smem>>
    %c2_27 = arith.constant 2 : index
    %c0_28 = arith.constant 0 : index
    %18 = memref.load %arg1[%c2_27, %c0_28] : memref<4x9xf32, #tpu.memory_space<smem>>
    %c2_29 = arith.constant 2 : index
    %c1_30 = arith.constant 1 : index
    %19 = memref.load %arg1[%c2_29, %c1_30] : memref<4x9xf32, #tpu.memory_space<smem>>
    %c2_31 = arith.constant 2 : index
    %c2_32 = arith.constant 2 : index
    %20 = memref.load %arg1[%c2_31, %c2_32] : memref<4x9xf32, #tpu.memory_space<smem>>
    %c2_33 = arith.constant 2 : index
    %c3_34 = arith.constant 3 : index
    %21 = memref.load %arg1[%c2_33, %c3_34] : memref<4x9xf32, #tpu.memory_space<smem>>
    %c2_35 = arith.constant 2 : index
    %c4_36 = arith.constant 4 : index
    %22 = memref.load %arg1[%c2_35, %c4_36] : memref<4x9xf32, #tpu.memory_space<smem>>
    %c2_37 = arith.constant 2 : index
    %c5_38 = arith.constant 5 : index
    %23 = memref.load %arg1[%c2_37, %c5_38] : memref<4x9xf32, #tpu.memory_space<smem>>
    %c2_39 = arith.constant 2 : index
    %c6_40 = arith.constant 6 : index
    %24 = memref.load %arg1[%c2_39, %c6_40] : memref<4x9xf32, #tpu.memory_space<smem>>
    %c2_41 = arith.constant 2 : index
    %c7_42 = arith.constant 7 : index
    %25 = memref.load %arg1[%c2_41, %c7_42] : memref<4x9xf32, #tpu.memory_space<smem>>
    %c2_43 = arith.constant 2 : index
    %c8_44 = arith.constant 8 : index
    %26 = memref.load %arg1[%c2_43, %c8_44] : memref<4x9xf32, #tpu.memory_space<smem>>
    %c3_45 = arith.constant 3 : index
    %c0_46 = arith.constant 0 : index
    %27 = memref.load %arg1[%c3_45, %c0_46] : memref<4x9xf32, #tpu.memory_space<smem>>
    %c3_47 = arith.constant 3 : index
    %c1_48 = arith.constant 1 : index
    %28 = memref.load %arg1[%c3_47, %c1_48] : memref<4x9xf32, #tpu.memory_space<smem>>
    %c3_49 = arith.constant 3 : index
    %c2_50 = arith.constant 2 : index
    %29 = memref.load %arg1[%c3_49, %c2_50] : memref<4x9xf32, #tpu.memory_space<smem>>
    %c3_51 = arith.constant 3 : index
    %c3_52 = arith.constant 3 : index
    %30 = memref.load %arg1[%c3_51, %c3_52] : memref<4x9xf32, #tpu.memory_space<smem>>
    %c3_53 = arith.constant 3 : index
    %c4_54 = arith.constant 4 : index
    %31 = memref.load %arg1[%c3_53, %c4_54] : memref<4x9xf32, #tpu.memory_space<smem>>
    %c3_55 = arith.constant 3 : index
    %c5_56 = arith.constant 5 : index
    %32 = memref.load %arg1[%c3_55, %c5_56] : memref<4x9xf32, #tpu.memory_space<smem>>
    %c3_57 = arith.constant 3 : index
    %c6_58 = arith.constant 6 : index
    %33 = memref.load %arg1[%c3_57, %c6_58] : memref<4x9xf32, #tpu.memory_space<smem>>
    %c3_59 = arith.constant 3 : index
    %c7_60 = arith.constant 7 : index
    %34 = memref.load %arg1[%c3_59, %c7_60] : memref<4x9xf32, #tpu.memory_space<smem>>
    %c3_61 = arith.constant 3 : index
    %c8_62 = arith.constant 8 : index
    %35 = memref.load %arg1[%c3_61, %c8_62] : memref<4x9xf32, #tpu.memory_space<smem>>
    %c0_63 = arith.constant 0 : index
    %36 = memref.load %arg2[%c0_63] : memref<4xf32, #tpu.memory_space<smem>>
    %c1_64 = arith.constant 1 : index
    %37 = memref.load %arg2[%c1_64] : memref<4xf32, #tpu.memory_space<smem>>
    %c2_65 = arith.constant 2 : index
    %38 = memref.load %arg2[%c2_65] : memref<4xf32, #tpu.memory_space<smem>>
    %c3_66 = arith.constant 3 : index
    %39 = memref.load %arg2[%c3_66] : memref<4xf32, #tpu.memory_space<smem>>
    %cst = arith.constant 0.000000e+00 : f32
    %40 = vector.broadcast %cst : f32 to vector<1x2xf32>
    %c7_67 = arith.constant 7 : index
    %c0_68 = arith.constant 0 : index
    %41 = vector.load %arg10[%c7_67, %c0_68] : memref<224x2xf32, #tpu.memory_space<vmem>>, vector<1x2xf32>
    tpu.vector_store %arg10[%c7_67, %c0_68], %40 {strides = array<i32>} : memref<224x2xf32, #tpu.memory_space<vmem>>, vector<1x2xf32>,
    %c15 = arith.constant 15 : index
    %c0_69 = arith.constant 0 : index
    %42 = vector.load %arg10[%c15, %c0_69] : memref<224x2xf32, #tpu.memory_space<vmem>>, vector<1x2xf32>
    tpu.vector_store %arg10[%c15, %c0_69], %40 {strides = array<i32>} : memref<224x2xf32, #tpu.memory_space<vmem>>, vector<1x2xf32>,
    %c23 = arith.constant 23 : index
    %c0_70 = arith.constant 0 : index
    %43 = vector.load %arg10[%c23, %c0_70] : memref<224x2xf32, #tpu.memory_space<vmem>>, vector<1x2xf32>
    tpu.vector_store %arg10[%c23, %c0_70], %40 {strides = array<i32>} : memref<224x2xf32, #tpu.memory_space<vmem>>, vector<1x2xf32>,
    %c31 = arith.constant 31 : index
    %c0_71 = arith.constant 0 : index
    %44 = vector.load %arg10[%c31, %c0_71] : memref<224x2xf32, #tpu.memory_space<vmem>>, vector<1x2xf32>
    tpu.vector_store %arg10[%c31, %c0_71], %40 {strides = array<i32>} : memref<224x2xf32, #tpu.memory_space<vmem>>, vector<1x2xf32>,
    %c39 = arith.constant 39 : index
    %c0_72 = arith.constant 0 : index
    %45 = vector.load %arg10[%c39, %c0_72] : memref<224x2xf32, #tpu.memory_space<vmem>>, vector<1x2xf32>
    tpu.vector_store %arg10[%c39, %c0_72], %40 {strides = array<i32>} : memref<224x2xf32, #tpu.memory_space<vmem>>, vector<1x2xf32>,
    %c47 = arith.constant 47 : index
    %c0_73 = arith.constant 0 : index
    %46 = vector.load %arg10[%c47, %c0_73] : memref<224x2xf32, #tpu.memory_space<vmem>>, vector<1x2xf32>
    tpu.vector_store %arg10[%c47, %c0_73], %40 {strides = array<i32>} : memref<224x2xf32, #tpu.memory_space<vmem>>, vector<1x2xf32>,
    %c55 = arith.constant 55 : index
    %c0_74 = arith.constant 0 : index
    %47 = vector.load %arg10[%c55, %c0_74] : memref<224x2xf32, #tpu.memory_space<vmem>>, vector<1x2xf32>
    tpu.vector_store %arg10[%c55, %c0_74], %40 {strides = array<i32>} : memref<224x2xf32, #tpu.memory_space<vmem>>, vector<1x2xf32>,
    %c63 = arith.constant 63 : index
    %c0_75 = arith.constant 0 : index
    %48 = vector.load %arg10[%c63, %c0_75] : memref<224x2xf32, #tpu.memory_space<vmem>>, vector<1x2xf32>
    tpu.vector_store %arg10[%c63, %c0_75], %40 {strides = array<i32>} : memref<224x2xf32, #tpu.memory_space<vmem>>, vector<1x2xf32>,
    %c71 = arith.constant 71 : index
    %c0_76 = arith.constant 0 : index
    %49 = vector.load %arg10[%c71, %c0_76] : memref<224x2xf32, #tpu.memory_space<vmem>>, vector<1x2xf32>
    tpu.vector_store %arg10[%c71, %c0_76], %40 {strides = array<i32>} : memref<224x2xf32, #tpu.memory_space<vmem>>, vector<1x2xf32>,
    %c79 = arith.constant 79 : index
    %c0_77 = arith.constant 0 : index
    %50 = vector.load %arg10[%c79, %c0_77] : memref<224x2xf32, #tpu.memory_space<vmem>>, vector<1x2xf32>
    tpu.vector_store %arg10[%c79, %c0_77], %40 {strides = array<i32>} : memref<224x2xf32, #tpu.memory_space<vmem>>, vector<1x2xf32>,
    %c87 = arith.constant 87 : index
    %c0_78 = arith.constant 0 : index
    %51 = vector.load %arg10[%c87, %c0_78] : memref<224x2xf32, #tpu.memory_space<vmem>>, vector<1x2xf32>
    tpu.vector_store %arg10[%c87, %c0_78], %40 {strides = array<i32>} : memref<224x2xf32, #tpu.memory_space<vmem>>, vector<1x2xf32>,
    %c95 = arith.constant 95 : index
    %c0_79 = arith.constant 0 : index
    %52 = vector.load %arg10[%c95, %c0_79] : memref<224x2xf32, #tpu.memory_space<vmem>>, vector<1x2xf32>
    tpu.vector_store %arg10[%c95, %c0_79], %40 {strides = array<i32>} : memref<224x2xf32, #tpu.memory_space<vmem>>, vector<1x2xf32>,
    %c103 = arith.constant 103 : index
    %c0_80 = arith.constant 0 : index
    %53 = vector.load %arg10[%c103, %c0_80] : memref<224x2xf32, #tpu.memory_space<vmem>>, vector<1x2xf32>
    tpu.vector_store %arg10[%c103, %c0_80], %40 {strides = array<i32>} : memref<224x2xf32, #tpu.memory_space<vmem>>, vector<1x2xf32>,
    %c111 = arith.constant 111 : index
    %c0_81 = arith.constant 0 : index
    %54 = vector.load %arg10[%c111, %c0_81] : memref<224x2xf32, #tpu.memory_space<vmem>>, vector<1x2xf32>
    tpu.vector_store %arg10[%c111, %c0_81], %40 {strides = array<i32>} : memref<224x2xf32, #tpu.memory_space<vmem>>, vector<1x2xf32>,
    %c119 = arith.constant 119 : index
    %c0_82 = arith.constant 0 : index
    %55 = vector.load %arg10[%c119, %c0_82] : memref<224x2xf32, #tpu.memory_space<vmem>>, vector<1x2xf32>
    tpu.vector_store %arg10[%c119, %c0_82], %40 {strides = array<i32>} : memref<224x2xf32, #tpu.memory_space<vmem>>, vector<1x2xf32>,
    %c127 = arith.constant 127 : index
    %c0_83 = arith.constant 0 : index
    %56 = vector.load %arg10[%c127, %c0_83] : memref<224x2xf32, #tpu.memory_space<vmem>>, vector<1x2xf32>
    tpu.vector_store %arg10[%c127, %c0_83], %40 {strides = array<i32>} : memref<224x2xf32, #tpu.memory_space<vmem>>, vector<1x2xf32>,
    %c135 = arith.constant 135 : index
    %c0_84 = arith.constant 0 : index
    %57 = vector.load %arg10[%c135, %c0_84] : memref<224x2xf32, #tpu.memory_space<vmem>>, vector<1x2xf32>
    tpu.vector_store %arg10[%c135, %c0_84], %40 {strides = array<i32>} : memref<224x2xf32, #tpu.memory_space<vmem>>, vector<1x2xf32>,
    %c143 = arith.constant 143 : index
    %c0_85 = arith.constant 0 : index
    %58 = vector.load %arg10[%c143, %c0_85] : memref<224x2xf32, #tpu.memory_space<vmem>>, vector<1x2xf32>
    tpu.vector_store %arg10[%c143, %c0_85], %40 {strides = array<i32>} : memref<224x2xf32, #tpu.memory_space<vmem>>, vector<1x2xf32>,
    %c151 = arith.constant 151 : index
    %c0_86 = arith.constant 0 : index
    %59 = vector.load %arg10[%c151, %c0_86] : memref<224x2xf32, #tpu.memory_space<vmem>>, vector<1x2xf32>
    tpu.vector_store %arg10[%c151, %c0_86], %40 {strides = array<i32>} : memref<224x2xf32, #tpu.memory_space<vmem>>, vector<1x2xf32>,
    %c159 = arith.constant 159 : index
    %c0_87 = arith.constant 0 : index
    %60 = vector.load %arg10[%c159, %c0_87] : memref<224x2xf32, #tpu.memory_space<vmem>>, vector<1x2xf32>
    tpu.vector_store %arg10[%c159, %c0_87], %40 {strides = array<i32>} : memref<224x2xf32, #tpu.memory_space<vmem>>, vector<1x2xf32>,
    %c167 = arith.constant 167 : index
    %c0_88 = arith.constant 0 : index
    %61 = vector.load %arg10[%c167, %c0_88] : memref<224x2xf32, #tpu.memory_space<vmem>>, vector<1x2xf32>
    tpu.vector_store %arg10[%c167, %c0_88], %40 {strides = array<i32>} : memref<224x2xf32, #tpu.memory_space<vmem>>, vector<1x2xf32>,
    %c175 = arith.constant 175 : index
    %c0_89 = arith.constant 0 : index
    %62 = vector.load %arg10[%c175, %c0_89] : memref<224x2xf32, #tpu.memory_space<vmem>>, vector<1x2xf32>
    tpu.vector_store %arg10[%c175, %c0_89], %40 {strides = array<i32>} : memref<224x2xf32, #tpu.memory_space<vmem>>, vector<1x2xf32>,
    %c183 = arith.constant 183 : index
    %c0_90 = arith.constant 0 : index
    %63 = vector.load %arg10[%c183, %c0_90] : memref<224x2xf32, #tpu.memory_space<vmem>>, vector<1x2xf32>
    tpu.vector_store %arg10[%c183, %c0_90], %40 {strides = array<i32>} : memref<224x2xf32, #tpu.memory_space<vmem>>, vector<1x2xf32>,
    %c191 = arith.constant 191 : index
    %c0_91 = arith.constant 0 : index
    %64 = vector.load %arg10[%c191, %c0_91] : memref<224x2xf32, #tpu.memory_space<vmem>>, vector<1x2xf32>
    tpu.vector_store %arg10[%c191, %c0_91], %40 {strides = array<i32>} : memref<224x2xf32, #tpu.memory_space<vmem>>, vector<1x2xf32>,
    %c199 = arith.constant 199 : index
    %c0_92 = arith.constant 0 : index
    %65 = vector.load %arg10[%c199, %c0_92] : memref<224x2xf32, #tpu.memory_space<vmem>>, vector<1x2xf32>
    tpu.vector_store %arg10[%c199, %c0_92], %40 {strides = array<i32>} : memref<224x2xf32, #tpu.memory_space<vmem>>, vector<1x2xf32>,
    %c207 = arith.constant 207 : index
    %c0_93 = arith.constant 0 : index
    %66 = vector.load %arg10[%c207, %c0_93] : memref<224x2xf32, #tpu.memory_space<vmem>>, vector<1x2xf32>
    tpu.vector_store %arg10[%c207, %c0_93], %40 {strides = array<i32>} : memref<224x2xf32, #tpu.memory_space<vmem>>, vector<1x2xf32>,
    %c215 = arith.constant 215 : index
    %c0_94 = arith.constant 0 : index
    %67 = vector.load %arg10[%c215, %c0_94] : memref<224x2xf32, #tpu.memory_space<vmem>>, vector<1x2xf32>
    tpu.vector_store %arg10[%c215, %c0_94], %40 {strides = array<i32>} : memref<224x2xf32, #tpu.memory_space<vmem>>, vector<1x2xf32>,
    %c223 = arith.constant 223 : index
    %c0_95 = arith.constant 0 : index
    %68 = vector.load %arg10[%c223, %c0_95] : memref<224x2xf32, #tpu.memory_space<vmem>>, vector<1x2xf32>
    tpu.vector_store %arg10[%c223, %c0_95], %40 {strides = array<i32>} : memref<224x2xf32, #tpu.memory_space<vmem>>, vector<1x2xf32>,
    %c0_96 = arith.constant 0 : index
    %c0_97 = arith.constant 0 : index
    %c0_98 = arith.constant 0 : index
    %69 = vector.load %arg3[%c0_96, %c0_97, %c0_98] : memref<16x8x2xf32, #tpu.memory_space<vmem>>, vector<1x7x2xf32>
    %70 = vector.shape_cast %69 : vector<1x7x2xf32> to vector<7x2xf32>
    %c0_99 = arith.constant 0 : index
    %c1_100 = arith.constant 1 : index
    %c0_101 = arith.constant 0 : index
    %71 = vector.load %arg3[%c0_99, %c1_100, %c0_101] : memref<16x8x2xf32, #tpu.memory_space<vmem>>, vector<1x7x2xf32>
    %72 = vector.shape_cast %71 : vector<1x7x2xf32> to vector<7x2xf32>
    %c0_102 = arith.constant 0 : index
    %c0_103 = arith.constant 0 : index
    %c0_104 = arith.constant 0 : index
    %73 = vector.load %arg4[%c0_102, %c0_103, %c0_104] : memref<16x8x2xf32, #tpu.memory_space<vmem>>, vector<1x7x2xf32>
    %74 = vector.shape_cast %73 : vector<1x7x2xf32> to vector<7x2xf32>
    %c0_105 = arith.constant 0 : index
    %c1_106 = arith.constant 1 : index
    %c0_107 = arith.constant 0 : index
    %75 = vector.load %arg4[%c0_105, %c1_106, %c0_107] : memref<16x8x2xf32, #tpu.memory_space<vmem>>, vector<1x7x2xf32>
    %76 = vector.shape_cast %75 : vector<1x7x2xf32> to vector<7x2xf32>
    %c1_108 = arith.constant 1 : index
    %c0_109 = arith.constant 0 : index
    %c0_110 = arith.constant 0 : index
    %77 = vector.load %arg3[%c1_108, %c0_109, %c0_110] : memref<16x8x2xf32, #tpu.memory_space<vmem>>, vector<1x7x2xf32>
    %78 = vector.shape_cast %77 : vector<1x7x2xf32> to vector<7x2xf32>
    %c1_111 = arith.constant 1 : index
    %c1_112 = arith.constant 1 : index
    %c0_113 = arith.constant 0 : index
    %79 = vector.load %arg3[%c1_111, %c1_112, %c0_113] : memref<16x8x2xf32, #tpu.memory_space<vmem>>, vector<1x7x2xf32>
    %80 = vector.shape_cast %79 : vector<1x7x2xf32> to vector<7x2xf32>
    %c1_114 = arith.constant 1 : index
    %c0_115 = arith.constant 0 : index
    %c0_116 = arith.constant 0 : index
    %81 = vector.load %arg4[%c1_114, %c0_115, %c0_116] : memref<16x8x2xf32, #tpu.memory_space<vmem>>, vector<1x7x2xf32>
    %82 = vector.shape_cast %81 : vector<1x7x2xf32> to vector<7x2xf32>
    %c1_117 = arith.constant 1 : index
    %c1_118 = arith.constant 1 : index
    %c0_119 = arith.constant 0 : index
    %83 = vector.load %arg4[%c1_117, %c1_118, %c0_119] : memref<16x8x2xf32, #tpu.memory_space<vmem>>, vector<1x7x2xf32>
    %84 = vector.shape_cast %83 : vector<1x7x2xf32> to vector<7x2xf32>
    %c2_120 = arith.constant 2 : index
    %c0_121 = arith.constant 0 : index
    %c0_122 = arith.constant 0 : index
    %85 = vector.load %arg3[%c2_120, %c0_121, %c0_122] : memref<16x8x2xf32, #tpu.memory_space<vmem>>, vector<1x7x2xf32>
    %86 = vector.shape_cast %85 : vector<1x7x2xf32> to vector<7x2xf32>
    %c2_123 = arith.constant 2 : index
    %c1_124 = arith.constant 1 : index
    %c0_125 = arith.constant 0 : index
    %87 = vector.load %arg3[%c2_123, %c1_124, %c0_125] : memref<16x8x2xf32, #tpu.memory_space<vmem>>, vector<1x7x2xf32>
    %88 = vector.shape_cast %87 : vector<1x7x2xf32> to vector<7x2xf32>
    %c2_126 = arith.constant 2 : index
    %c0_127 = arith.constant 0 : index
    %c0_128 = arith.constant 0 : index
    %89 = vector.load %arg4[%c2_126, %c0_127, %c0_128] : memref<16x8x2xf32, #tpu.memory_space<vmem>>, vector<1x7x2xf32>
    %90 = vector.shape_cast %89 : vector<1x7x2xf32> to vector<7x2xf32>
    %c2_129 = arith.constant 2 : index
    %c1_130 = arith.constant 1 : index
    %c0_131 = arith.constant 0 : index
    %91 = vector.load %arg4[%c2_129, %c1_130, %c0_131] : memref<16x8x2xf32, #tpu.memory_space<vmem>>, vector<1x7x2xf32>
    %92 = vector.shape_cast %91 : vector<1x7x2xf32> to vector<7x2xf32>
    %c3_132 = arith.constant 3 : index
    %c0_133 = arith.constant 0 : index
    %c0_134 = arith.constant 0 : index
    %93 = vector.load %arg3[%c3_132, %c0_133, %c0_134] : memref<16x8x2xf32, #tpu.memory_space<vmem>>, vector<1x7x2xf32>
    %94 = vector.shape_cast %93 : vector<1x7x2xf32> to vector<7x2xf32>
    %c3_135 = arith.constant 3 : index
    %c1_136 = arith.constant 1 : index
    %c0_137 = arith.constant 0 : index
    %95 = vector.load %arg3[%c3_135, %c1_136, %c0_137] : memref<16x8x2xf32, #tpu.memory_space<vmem>>, vector<1x7x2xf32>
    %96 = vector.shape_cast %95 : vector<1x7x2xf32> to vector<7x2xf32>
    %c3_138 = arith.constant 3 : index
    %c0_139 = arith.constant 0 : index
    %c0_140 = arith.constant 0 : index
    %97 = vector.load %arg4[%c3_138, %c0_139, %c0_140] : memref<16x8x2xf32, #tpu.memory_space<vmem>>, vector<1x7x2xf32>
    %98 = vector.shape_cast %97 : vector<1x7x2xf32> to vector<7x2xf32>
    %c3_141 = arith.constant 3 : index
    %c1_142 = arith.constant 1 : index
    %c0_143 = arith.constant 0 : index
    %99 = vector.load %arg4[%c3_141, %c1_142, %c0_143] : memref<16x8x2xf32, #tpu.memory_space<vmem>>, vector<1x7x2xf32>
    %100 = vector.shape_cast %99 : vector<1x7x2xf32> to vector<7x2xf32>
    %101 = vector.broadcast %0 : f32 to vector<7x2xf32>
    %102 = arith.mulf %70, %101 : vector<7x2xf32>
    %103 = vector.broadcast %1 : f32 to vector<7x2xf32>
    %104 = arith.mulf %74, %103 : vector<7x2xf32>
    %105 = arith.addf %102, %104 : vector<7x2xf32>
    %106 = vector.broadcast %2 : f32 to vector<7x2xf32>
    %107 = arith.mulf %72, %106 : vector<7x2xf32>
    %108 = arith.addf %105, %107 : vector<7x2xf32>
    %109 = vector.broadcast %3 : f32 to vector<7x2xf32>
    %110 = arith.mulf %78, %109 : vector<7x2xf32>
    %111 = arith.addf %108, %110 : vector<7x2xf32>
    %112 = vector.broadcast %4 : f32 to vector<7x2xf32>
    %113 = arith.mulf %82, %112 : vector<7x2xf32>
    %114 = arith.addf %111, %113 : vector<7x2xf32>
    %115 = vector.broadcast %5 : f32 to vector<7x2xf32>
    %116 = arith.mulf %80, %115 : vector<7x2xf32>
    %117 = arith.addf %114, %116 : vector<7x2xf32>
    %118 = vector.broadcast %6 : f32 to vector<7x2xf32>
    %119 = arith.mulf %86, %118 : vector<7x2xf32>
    %120 = arith.addf %117, %119 : vector<7x2xf32>
    %121 = vector.broadcast %7 : f32 to vector<7x2xf32>
    %122 = arith.mulf %90, %121 : vector<7x2xf32>
    %123 = arith.addf %120, %122 : vector<7x2xf32>
    %124 = vector.broadcast %8 : f32 to vector<7x2xf32>
    %125 = arith.mulf %88, %124 : vector<7x2xf32>
    %126 = arith.addf %123, %125 : vector<7x2xf32>
    %127 = vector.broadcast %0 : f32 to vector<7x2xf32>
    %128 = arith.mulf %74, %127 : vector<7x2xf32>
    %129 = vector.broadcast %1 : f32 to vector<7x2xf32>
    %130 = arith.mulf %72, %129 : vector<7x2xf32>
    %131 = arith.addf %128, %130 : vector<7x2xf32>
    %132 = vector.broadcast %2 : f32 to vector<7x2xf32>
    %133 = arith.mulf %76, %132 : vector<7x2xf32>
    %134 = arith.addf %131, %133 : vector<7x2xf32>
    %135 = vector.broadcast %3 : f32 to vector<7x2xf32>
    %136 = arith.mulf %82, %135 : vector<7x2xf32>
    %137 = arith.addf %134, %136 : vector<7x2xf32>
    %138 = vector.broadcast %4 : f32 to vector<7x2xf32>
    %139 = arith.mulf %80, %138 : vector<7x2xf32>
    %140 = arith.addf %137, %139 : vector<7x2xf32>
    %141 = vector.broadcast %5 : f32 to vector<7x2xf32>
    %142 = arith.mulf %84, %141 : vector<7x2xf32>
    %143 = arith.addf %140, %142 : vector<7x2xf32>
    %144 = vector.broadcast %6 : f32 to vector<7x2xf32>
    %145 = arith.mulf %90, %144 : vector<7x2xf32>
    %146 = arith.addf %143, %145 : vector<7x2xf32>
    %147 = vector.broadcast %7 : f32 to vector<7x2xf32>
    %148 = arith.mulf %88, %147 : vector<7x2xf32>
    %149 = arith.addf %146, %148 : vector<7x2xf32>
    %150 = vector.broadcast %8 : f32 to vector<7x2xf32>
    %151 = arith.mulf %92, %150 : vector<7x2xf32>
    %152 = arith.addf %149, %151 : vector<7x2xf32>
    %153 = arith.maximumf %126, %152 : vector<7x2xf32>
    %154 = vector.broadcast %0 : f32 to vector<7x2xf32>
    %155 = arith.mulf %78, %154 : vector<7x2xf32>
    %156 = vector.broadcast %1 : f32 to vector<7x2xf32>
    %157 = arith.mulf %82, %156 : vector<7x2xf32>
    %158 = arith.addf %155, %157 : vector<7x2xf32>
    %159 = vector.broadcast %2 : f32 to vector<7x2xf32>
    %160 = arith.mulf %80, %159 : vector<7x2xf32>
    %161 = arith.addf %158, %160 : vector<7x2xf32>
    %162 = vector.broadcast %3 : f32 to vector<7x2xf32>
    %163 = arith.mulf %86, %162 : vector<7x2xf32>
    %164 = arith.addf %161, %163 : vector<7x2xf32>
    %165 = vector.broadcast %4 : f32 to vector<7x2xf32>
    %166 = arith.mulf %90, %165 : vector<7x2xf32>
    %167 = arith.addf %164, %166 : vector<7x2xf32>
    %168 = vector.broadcast %5 : f32 to vector<7x2xf32>
    %169 = arith.mulf %88, %168 : vector<7x2xf32>
    %170 = arith.addf %167, %169 : vector<7x2xf32>
    %171 = vector.broadcast %6 : f32 to vector<7x2xf32>
    %172 = arith.mulf %94, %171 : vector<7x2xf32>
    %173 = arith.addf %170, %172 : vector<7x2xf32>
    %174 = vector.broadcast %7 : f32 to vector<7x2xf32>
    %175 = arith.mulf %98, %174 : vector<7x2xf32>
    %176 = arith.addf %173, %175 : vector<7x2xf32>
    %177 = vector.broadcast %8 : f32 to vector<7x2xf32>
    %178 = arith.mulf %96, %177 : vector<7x2xf32>
    %179 = arith.addf %176, %178 : vector<7x2xf32>
    %180 = arith.maximumf %153, %179 : vector<7x2xf32>
    %181 = vector.broadcast %0 : f32 to vector<7x2xf32>
    %182 = arith.mulf %82, %181 : vector<7x2xf32>
    %183 = vector.broadcast %1 : f32 to vector<7x2xf32>
    %184 = arith.mulf %80, %183 : vector<7x2xf32>
    %185 = arith.addf %182, %184 : vector<7x2xf32>
    %186 = vector.broadcast %2 : f32 to vector<7x2xf32>
    %187 = arith.mulf %84, %186 : vector<7x2xf32>
    %188 = arith.addf %185, %187 : vector<7x2xf32>
    %189 = vector.broadcast %3 : f32 to vector<7x2xf32>
    %190 = arith.mulf %90, %189 : vector<7x2xf32>
    %191 = arith.addf %188, %190 : vector<7x2xf32>
    %192 = vector.broadcast %4 : f32 to vector<7x2xf32>
    %193 = arith.mulf %88, %192 : vector<7x2xf32>
    %194 = arith.addf %191, %193 : vector<7x2xf32>
    %195 = vector.broadcast %5 : f32 to vector<7x2xf32>
    %196 = arith.mulf %92, %195 : vector<7x2xf32>
    %197 = arith.addf %194, %196 : vector<7x2xf32>
    %198 = vector.broadcast %6 : f32 to vector<7x2xf32>
    %199 = arith.mulf %98, %198 : vector<7x2xf32>
    %200 = arith.addf %197, %199 : vector<7x2xf32>
    %201 = vector.broadcast %7 : f32 to vector<7x2xf32>
    %202 = arith.mulf %96, %201 : vector<7x2xf32>
    %203 = arith.addf %200, %202 : vector<7x2xf32>
    %204 = vector.broadcast %8 : f32 to vector<7x2xf32>
    %205 = arith.mulf %100, %204 : vector<7x2xf32>
    %206 = arith.addf %203, %205 : vector<7x2xf32>
    %207 = arith.maximumf %180, %206 : vector<7x2xf32>
    %208 = vector.broadcast %36 : f32 to vector<7x2xf32>
    %209 = arith.addf %207, %208 : vector<7x2xf32>
    %cst_144 = arith.constant 0.000000e+00 : f32
    %210 = vector.broadcast %cst_144 : f32 to vector<7x2xf32>
    %211 = arith.maximumf %209, %210 : vector<7x2xf32>
    %c0_145 = arith.constant 0 : index
    %c0_146 = arith.constant 0 : index
    %212 = vector.load %arg10[%c0_145, %c0_146] : memref<224x2xf32, #tpu.memory_space<vmem>>, vector<7x2xf32>
    tpu.vector_store %arg10[%c0_145, %c0_146], %211 {strides = array<i32>} : memref<224x2xf32, #tpu.memory_space<vmem>>, vector<7x2xf32>,
    %213 = vector.broadcast %9 : f32 to vector<7x2xf32>
    %214 = arith.mulf %70, %213 : vector<7x2xf32>
    %215 = vector.broadcast %10 : f32 to vector<7x2xf32>
    %216 = arith.mulf %74, %215 : vector<7x2xf32>
    %217 = arith.addf %214, %216 : vector<7x2xf32>
    %218 = vector.broadcast %11 : f32 to vector<7x2xf32>
    %219 = arith.mulf %72, %218 : vector<7x2xf32>
    %220 = arith.addf %217, %219 : vector<7x2xf32>
    %221 = vector.broadcast %12 : f32 to vector<7x2xf32>
    %222 = arith.mulf %78, %221 : vector<7x2xf32>
    %223 = arith.addf %220, %222 : vector<7x2xf32>
    %224 = vector.broadcast %13 : f32 to vector<7x2xf32>
    %225 = arith.mulf %82, %224 : vector<7x2xf32>
    %226 = arith.addf %223, %225 : vector<7x2xf32>
    %227 = vector.broadcast %14 : f32 to vector<7x2xf32>
    %228 = arith.mulf %80, %227 : vector<7x2xf32>
    %229 = arith.addf %226, %228 : vector<7x2xf32>
    %230 = vector.broadcast %15 : f32 to vector<7x2xf32>
    %231 = arith.mulf %86, %230 : vector<7x2xf32>
    %232 = arith.addf %229, %231 : vector<7x2xf32>
    %233 = vector.broadcast %16 : f32 to vector<7x2xf32>
    %234 = arith.mulf %90, %233 : vector<7x2xf32>
    %235 = arith.addf %232, %234 : vector<7x2xf32>
    %236 = vector.broadcast %17 : f32 to vector<7x2xf32>
    %237 = arith.mulf %88, %236 : vector<7x2xf32>
    %238 = arith.addf %235, %237 : vector<7x2xf32>
    %239 = vector.broadcast %9 : f32 to vector<7x2xf32>
    %240 = arith.mulf %74, %239 : vector<7x2xf32>
    %241 = vector.broadcast %10 : f32 to vector<7x2xf32>
    %242 = arith.mulf %72, %241 : vector<7x2xf32>
    %243 = arith.addf %240, %242 : vector<7x2xf32>
    %244 = vector.broadcast %11 : f32 to vector<7x2xf32>
    %245 = arith.mulf %76, %244 : vector<7x2xf32>
    %246 = arith.addf %243, %245 : vector<7x2xf32>
    %247 = vector.broadcast %12 : f32 to vector<7x2xf32>
    %248 = arith.mulf %82, %247 : vector<7x2xf32>
    %249 = arith.addf %246, %248 : vector<7x2xf32>
    %250 = vector.broadcast %13 : f32 to vector<7x2xf32>
    %251 = arith.mulf %80, %250 : vector<7x2xf32>
    %252 = arith.addf %249, %251 : vector<7x2xf32>
    %253 = vector.broadcast %14 : f32 to vector<7x2xf32>
    %254 = arith.mulf %84, %253 : vector<7x2xf32>
    %255 = arith.addf %252, %254 : vector<7x2xf32>
    %256 = vector.broadcast %15 : f32 to vector<7x2xf32>
    %257 = arith.mulf %90, %256 : vector<7x2xf32>
    %258 = arith.addf %255, %257 : vector<7x2xf32>
    %259 = vector.broadcast %16 : f32 to vector<7x2xf32>
    %260 = arith.mulf %88, %259 : vector<7x2xf32>
    %261 = arith.addf %258, %260 : vector<7x2xf32>
    %262 = vector.broadcast %17 : f32 to vector<7x2xf32>
    %263 = arith.mulf %92, %262 : vector<7x2xf32>
    %264 = arith.addf %261, %263 : vector<7x2xf32>
    %265 = arith.maximumf %238, %264 : vector<7x2xf32>
    %266 = vector.broadcast %9 : f32 to vector<7x2xf32>
    %267 = arith.mulf %78, %266 : vector<7x2xf32>
    %268 = vector.broadcast %10 : f32 to vector<7x2xf32>
    %269 = arith.mulf %82, %268 : vector<7x2xf32>
    %270 = arith.addf %267, %269 : vector<7x2xf32>
    %271 = vector.broadcast %11 : f32 to vector<7x2xf32>
    %272 = arith.mulf %80, %271 : vector<7x2xf32>
    %273 = arith.addf %270, %272 : vector<7x2xf32>
    %274 = vector.broadcast %12 : f32 to vector<7x2xf32>
    %275 = arith.mulf %86, %274 : vector<7x2xf32>
    %276 = arith.addf %273, %275 : vector<7x2xf32>
    %277 = vector.broadcast %13 : f32 to vector<7x2xf32>
    %278 = arith.mulf %90, %277 : vector<7x2xf32>
    %279 = arith.addf %276, %278 : vector<7x2xf32>
    %280 = vector.broadcast %14 : f32 to vector<7x2xf32>
    %281 = arith.mulf %88, %280 : vector<7x2xf32>
    %282 = arith.addf %279, %281 : vector<7x2xf32>
    %283 = vector.broadcast %15 : f32 to vector<7x2xf32>
    %284 = arith.mulf %94, %283 : vector<7x2xf32>
    %285 = arith.addf %282, %284 : vector<7x2xf32>
    %286 = vector.broadcast %16 : f32 to vector<7x2xf32>
    %287 = arith.mulf %98, %286 : vector<7x2xf32>
    %288 = arith.addf %285, %287 : vector<7x2xf32>
    %289 = vector.broadcast %17 : f32 to vector<7x2xf32>
    %290 = arith.mulf %96, %289 : vector<7x2xf32>
    %291 = arith.addf %288, %290 : vector<7x2xf32>
    %292 = arith.maximumf %265, %291 : vector<7x2xf32>
    %293 = vector.broadcast %9 : f32 to vector<7x2xf32>
    %294 = arith.mulf %82, %293 : vector<7x2xf32>
    %295 = vector.broadcast %10 : f32 to vector<7x2xf32>
    %296 = arith.mulf %80, %295 : vector<7x2xf32>
    %297 = arith.addf %294, %296 : vector<7x2xf32>
    %298 = vector.broadcast %11 : f32 to vector<7x2xf32>
    %299 = arith.mulf %84, %298 : vector<7x2xf32>
    %300 = arith.addf %297, %299 : vector<7x2xf32>
    %301 = vector.broadcast %12 : f32 to vector<7x2xf32>
    %302 = arith.mulf %90, %301 : vector<7x2xf32>
    %303 = arith.addf %300, %302 : vector<7x2xf32>
    %304 = vector.broadcast %13 : f32 to vector<7x2xf32>
    %305 = arith.mulf %88, %304 : vector<7x2xf32>
    %306 = arith.addf %303, %305 : vector<7x2xf32>
    %307 = vector.broadcast %14 : f32 to vector<7x2xf32>
    %308 = arith.mulf %92, %307 : vector<7x2xf32>
    %309 = arith.addf %306, %308 : vector<7x2xf32>
    %310 = vector.broadcast %15 : f32 to vector<7x2xf32>
    %311 = arith.mulf %98, %310 : vector<7x2xf32>
    %312 = arith.addf %309, %311 : vector<7x2xf32>
    %313 = vector.broadcast %16 : f32 to vector<7x2xf32>
    %314 = arith.mulf %96, %313 : vector<7x2xf32>
    %315 = arith.addf %312, %314 : vector<7x2xf32>
    %316 = vector.broadcast %17 : f32 to vector<7x2xf32>
    %317 = arith.mulf %100, %316 : vector<7x2xf32>
    %318 = arith.addf %315, %317 : vector<7x2xf32>
    %319 = arith.maximumf %292, %318 : vector<7x2xf32>
    %320 = vector.broadcast %37 : f32 to vector<7x2xf32>
    %321 = arith.addf %319, %320 : vector<7x2xf32>
    %cst_147 = arith.constant 0.000000e+00 : f32
    %322 = vector.broadcast %cst_147 : f32 to vector<7x2xf32>
    %323 = arith.maximumf %321, %322 : vector<7x2xf32>
    %c56 = arith.constant 56 : index
    %c0_148 = arith.constant 0 : index
    %324 = vector.load %arg10[%c56, %c0_148] : memref<224x2xf32, #tpu.memory_space<vmem>>, vector<7x2xf32>
    tpu.vector_store %arg10[%c56, %c0_148], %323 {strides = array<i32>} : memref<224x2xf32, #tpu.memory_space<vmem>>, vector<7x2xf32>,
    %325 = vector.broadcast %18 : f32 to vector<7x2xf32>
    %326 = arith.mulf %70, %325 : vector<7x2xf32>
    %327 = vector.broadcast %19 : f32 to vector<7x2xf32>
    %328 = arith.mulf %74, %327 : vector<7x2xf32>
    %329 = arith.addf %326, %328 : vector<7x2xf32>
    %330 = vector.broadcast %20 : f32 to vector<7x2xf32>
    %331 = arith.mulf %72, %330 : vector<7x2xf32>
    %332 = arith.addf %329, %331 : vector<7x2xf32>
    %333 = vector.broadcast %21 : f32 to vector<7x2xf32>
    %334 = arith.mulf %78, %333 : vector<7x2xf32>
    %335 = arith.addf %332, %334 : vector<7x2xf32>
    %336 = vector.broadcast %22 : f32 to vector<7x2xf32>
    %337 = arith.mulf %82, %336 : vector<7x2xf32>
    %338 = arith.addf %335, %337 : vector<7x2xf32>
    %339 = vector.broadcast %23 : f32 to vector<7x2xf32>
    %340 = arith.mulf %80, %339 : vector<7x2xf32>
    %341 = arith.addf %338, %340 : vector<7x2xf32>
    %342 = vector.broadcast %24 : f32 to vector<7x2xf32>
    %343 = arith.mulf %86, %342 : vector<7x2xf32>
    %344 = arith.addf %341, %343 : vector<7x2xf32>
    %345 = vector.broadcast %25 : f32 to vector<7x2xf32>
    %346 = arith.mulf %90, %345 : vector<7x2xf32>
    %347 = arith.addf %344, %346 : vector<7x2xf32>
    %348 = vector.broadcast %26 : f32 to vector<7x2xf32>
    %349 = arith.mulf %88, %348 : vector<7x2xf32>
    %350 = arith.addf %347, %349 : vector<7x2xf32>
    %351 = vector.broadcast %18 : f32 to vector<7x2xf32>
    %352 = arith.mulf %74, %351 : vector<7x2xf32>
    %353 = vector.broadcast %19 : f32 to vector<7x2xf32>
    %354 = arith.mulf %72, %353 : vector<7x2xf32>
    %355 = arith.addf %352, %354 : vector<7x2xf32>
    %356 = vector.broadcast %20 : f32 to vector<7x2xf32>
    %357 = arith.mulf %76, %356 : vector<7x2xf32>
    %358 = arith.addf %355, %357 : vector<7x2xf32>
    %359 = vector.broadcast %21 : f32 to vector<7x2xf32>
    %360 = arith.mulf %82, %359 : vector<7x2xf32>
    %361 = arith.addf %358, %360 : vector<7x2xf32>
    %362 = vector.broadcast %22 : f32 to vector<7x2xf32>
    %363 = arith.mulf %80, %362 : vector<7x2xf32>
    %364 = arith.addf %361, %363 : vector<7x2xf32>
    %365 = vector.broadcast %23 : f32 to vector<7x2xf32>
    %366 = arith.mulf %84, %365 : vector<7x2xf32>
    %367 = arith.addf %364, %366 : vector<7x2xf32>
    %368 = vector.broadcast %24 : f32 to vector<7x2xf32>
    %369 = arith.mulf %90, %368 : vector<7x2xf32>
    %370 = arith.addf %367, %369 : vector<7x2xf32>
    %371 = vector.broadcast %25 : f32 to vector<7x2xf32>
    %372 = arith.mulf %88, %371 : vector<7x2xf32>
    %373 = arith.addf %370, %372 : vector<7x2xf32>
    %374 = vector.broadcast %26 : f32 to vector<7x2xf32>
    %375 = arith.mulf %92, %374 : vector<7x2xf32>
    %376 = arith.addf %373, %375 : vector<7x2xf32>
    %377 = arith.maximumf %350, %376 : vector<7x2xf32>
    %378 = vector.broadcast %18 : f32 to vector<7x2xf32>
    %379 = arith.mulf %78, %378 : vector<7x2xf32>
    %380 = vector.broadcast %19 : f32 to vector<7x2xf32>
    %381 = arith.mulf %82, %380 : vector<7x2xf32>
    %382 = arith.addf %379, %381 : vector<7x2xf32>
    %383 = vector.broadcast %20 : f32 to vector<7x2xf32>
    %384 = arith.mulf %80, %383 : vector<7x2xf32>
    %385 = arith.addf %382, %384 : vector<7x2xf32>
    %386 = vector.broadcast %21 : f32 to vector<7x2xf32>
    %387 = arith.mulf %86, %386 : vector<7x2xf32>
    %388 = arith.addf %385, %387 : vector<7x2xf32>
    %389 = vector.broadcast %22 : f32 to vector<7x2xf32>
    %390 = arith.mulf %90, %389 : vector<7x2xf32>
    %391 = arith.addf %388, %390 : vector<7x2xf32>
    %392 = vector.broadcast %23 : f32 to vector<7x2xf32>
    %393 = arith.mulf %88, %392 : vector<7x2xf32>
    %394 = arith.addf %391, %393 : vector<7x2xf32>
    %395 = vector.broadcast %24 : f32 to vector<7x2xf32>
    %396 = arith.mulf %94, %395 : vector<7x2xf32>
    %397 = arith.addf %394, %396 : vector<7x2xf32>
    %398 = vector.broadcast %25 : f32 to vector<7x2xf32>
    %399 = arith.mulf %98, %398 : vector<7x2xf32>
    %400 = arith.addf %397, %399 : vector<7x2xf32>
    %401 = vector.broadcast %26 : f32 to vector<7x2xf32>
    %402 = arith.mulf %96, %401 : vector<7x2xf32>
    %403 = arith.addf %400, %402 : vector<7x2xf32>
    %404 = arith.maximumf %377, %403 : vector<7x2xf32>
    %405 = vector.broadcast %18 : f32 to vector<7x2xf32>
    %406 = arith.mulf %82, %405 : vector<7x2xf32>
    %407 = vector.broadcast %19 : f32 to vector<7x2xf32>
    %408 = arith.mulf %80, %407 : vector<7x2xf32>
    %409 = arith.addf %406, %408 : vector<7x2xf32>
    %410 = vector.broadcast %20 : f32 to vector<7x2xf32>
    %411 = arith.mulf %84, %410 : vector<7x2xf32>
    %412 = arith.addf %409, %411 : vector<7x2xf32>
    %413 = vector.broadcast %21 : f32 to vector<7x2xf32>
    %414 = arith.mulf %90, %413 : vector<7x2xf32>
    %415 = arith.addf %412, %414 : vector<7x2xf32>
    %416 = vector.broadcast %22 : f32 to vector<7x2xf32>
    %417 = arith.mulf %88, %416 : vector<7x2xf32>
    %418 = arith.addf %415, %417 : vector<7x2xf32>
    %419 = vector.broadcast %23 : f32 to vector<7x2xf32>
    %420 = arith.mulf %92, %419 : vector<7x2xf32>
    %421 = arith.addf %418, %420 : vector<7x2xf32>
    %422 = vector.broadcast %24 : f32 to vector<7x2xf32>
    %423 = arith.mulf %98, %422 : vector<7x2xf32>
    %424 = arith.addf %421, %423 : vector<7x2xf32>
    %425 = vector.broadcast %25 : f32 to vector<7x2xf32>
    %426 = arith.mulf %96, %425 : vector<7x2xf32>
    %427 = arith.addf %424, %426 : vector<7x2xf32>
    %428 = vector.broadcast %26 : f32 to vector<7x2xf32>
    %429 = arith.mulf %100, %428 : vector<7x2xf32>
    %430 = arith.addf %427, %429 : vector<7x2xf32>
    %431 = arith.maximumf %404, %430 : vector<7x2xf32>
    %432 = vector.broadcast %38 : f32 to vector<7x2xf32>
    %433 = arith.addf %431, %432 : vector<7x2xf32>
    %cst_149 = arith.constant 0.000000e+00 : f32
    %434 = vector.broadcast %cst_149 : f32 to vector<7x2xf32>
    %435 = arith.maximumf %433, %434 : vector<7x2xf32>
    %c112 = arith.constant 112 : index
    %c0_150 = arith.constant 0 : index
    %436 = vector.load %arg10[%c112, %c0_150] : memref<224x2xf32, #tpu.memory_space<vmem>>, vector<7x2xf32>
    tpu.vector_store %arg10[%c112, %c0_150], %435 {strides = array<i32>} : memref<224x2xf32, #tpu.memory_space<vmem>>, vector<7x2xf32>,
    %437 = vector.broadcast %27 : f32 to vector<7x2xf32>
    %438 = arith.mulf %70, %437 : vector<7x2xf32>
    %439 = vector.broadcast %28 : f32 to vector<7x2xf32>
    %440 = arith.mulf %74, %439 : vector<7x2xf32>
    %441 = arith.addf %438, %440 : vector<7x2xf32>
    %442 = vector.broadcast %29 : f32 to vector<7x2xf32>
    %443 = arith.mulf %72, %442 : vector<7x2xf32>
    %444 = arith.addf %441, %443 : vector<7x2xf32>
    %445 = vector.broadcast %30 : f32 to vector<7x2xf32>
    %446 = arith.mulf %78, %445 : vector<7x2xf32>
    %447 = arith.addf %444, %446 : vector<7x2xf32>
    %448 = vector.broadcast %31 : f32 to vector<7x2xf32>
    %449 = arith.mulf %82, %448 : vector<7x2xf32>
    %450 = arith.addf %447, %449 : vector<7x2xf32>
    %451 = vector.broadcast %32 : f32 to vector<7x2xf32>
    %452 = arith.mulf %80, %451 : vector<7x2xf32>
    %453 = arith.addf %450, %452 : vector<7x2xf32>
    %454 = vector.broadcast %33 : f32 to vector<7x2xf32>
    %455 = arith.mulf %86, %454 : vector<7x2xf32>
    %456 = arith.addf %453, %455 : vector<7x2xf32>
    %457 = vector.broadcast %34 : f32 to vector<7x2xf32>
    %458 = arith.mulf %90, %457 : vector<7x2xf32>
    %459 = arith.addf %456, %458 : vector<7x2xf32>
    %460 = vector.broadcast %35 : f32 to vector<7x2xf32>
    %461 = arith.mulf %88, %460 : vector<7x2xf32>
    %462 = arith.addf %459, %461 : vector<7x2xf32>
    %463 = vector.broadcast %27 : f32 to vector<7x2xf32>
    %464 = arith.mulf %74, %463 : vector<7x2xf32>
    %465 = vector.broadcast %28 : f32 to vector<7x2xf32>
    %466 = arith.mulf %72, %465 : vector<7x2xf32>
    %467 = arith.addf %464, %466 : vector<7x2xf32>
    %468 = vector.broadcast %29 : f32 to vector<7x2xf32>
    %469 = arith.mulf %76, %468 : vector<7x2xf32>
    %470 = arith.addf %467, %469 : vector<7x2xf32>
    %471 = vector.broadcast %30 : f32 to vector<7x2xf32>
    %472 = arith.mulf %82, %471 : vector<7x2xf32>
    %473 = arith.addf %470, %472 : vector<7x2xf32>
    %474 = vector.broadcast %31 : f32 to vector<7x2xf32>
    %475 = arith.mulf %80, %474 : vector<7x2xf32>
    %476 = arith.addf %473, %475 : vector<7x2xf32>
    %477 = vector.broadcast %32 : f32 to vector<7x2xf32>
    %478 = arith.mulf %84, %477 : vector<7x2xf32>
    %479 = arith.addf %476, %478 : vector<7x2xf32>
    %480 = vector.broadcast %33 : f32 to vector<7x2xf32>
    %481 = arith.mulf %90, %480 : vector<7x2xf32>
    %482 = arith.addf %479, %481 : vector<7x2xf32>
    %483 = vector.broadcast %34 : f32 to vector<7x2xf32>
    %484 = arith.mulf %88, %483 : vector<7x2xf32>
    %485 = arith.addf %482, %484 : vector<7x2xf32>
    %486 = vector.broadcast %35 : f32 to vector<7x2xf32>
    %487 = arith.mulf %92, %486 : vector<7x2xf32>
    %488 = arith.addf %485, %487 : vector<7x2xf32>
    %489 = arith.maximumf %462, %488 : vector<7x2xf32>
    %490 = vector.broadcast %27 : f32 to vector<7x2xf32>
    %491 = arith.mulf %78, %490 : vector<7x2xf32>
    %492 = vector.broadcast %28 : f32 to vector<7x2xf32>
    %493 = arith.mulf %82, %492 : vector<7x2xf32>
    %494 = arith.addf %491, %493 : vector<7x2xf32>
    %495 = vector.broadcast %29 : f32 to vector<7x2xf32>
    %496 = arith.mulf %80, %495 : vector<7x2xf32>
    %497 = arith.addf %494, %496 : vector<7x2xf32>
    %498 = vector.broadcast %30 : f32 to vector<7x2xf32>
    %499 = arith.mulf %86, %498 : vector<7x2xf32>
    %500 = arith.addf %497, %499 : vector<7x2xf32>
    %501 = vector.broadcast %31 : f32 to vector<7x2xf32>
    %502 = arith.mulf %90, %501 : vector<7x2xf32>
    %503 = arith.addf %500, %502 : vector<7x2xf32>
    %504 = vector.broadcast %32 : f32 to vector<7x2xf32>
    %505 = arith.mulf %88, %504 : vector<7x2xf32>
    %506 = arith.addf %503, %505 : vector<7x2xf32>
    %507 = vector.broadcast %33 : f32 to vector<7x2xf32>
    %508 = arith.mulf %94, %507 : vector<7x2xf32>
    %509 = arith.addf %506, %508 : vector<7x2xf32>
    %510 = vector.broadcast %34 : f32 to vector<7x2xf32>
    %511 = arith.mulf %98, %510 : vector<7x2xf32>
    %512 = arith.addf %509, %511 : vector<7x2xf32>
    %513 = vector.broadcast %35 : f32 to vector<7x2xf32>
    %514 = arith.mulf %96, %513 : vector<7x2xf32>
    %515 = arith.addf %512, %514 : vector<7x2xf32>
    %516 = arith.maximumf %489, %515 : vector<7x2xf32>
    %517 = vector.broadcast %27 : f32 to vector<7x2xf32>
    %518 = arith.mulf %82, %517 : vector<7x2xf32>
    %519 = vector.broadcast %28 : f32 to vector<7x2xf32>
    %520 = arith.mulf %80, %519 : vector<7x2xf32>
    %521 = arith.addf %518, %520 : vector<7x2xf32>
    %522 = vector.broadcast %29 : f32 to vector<7x2xf32>
    %523 = arith.mulf %84, %522 : vector<7x2xf32>
    %524 = arith.addf %521, %523 : vector<7x2xf32>
    %525 = vector.broadcast %30 : f32 to vector<7x2xf32>
    %526 = arith.mulf %90, %525 : vector<7x2xf32>
    %527 = arith.addf %524, %526 : vector<7x2xf32>
    %528 = vector.broadcast %31 : f32 to vector<7x2xf32>
    %529 = arith.mulf %88, %528 : vector<7x2xf32>
    %530 = arith.addf %527, %529 : vector<7x2xf32>
    %531 = vector.broadcast %32 : f32 to vector<7x2xf32>
    %532 = arith.mulf %92, %531 : vector<7x2xf32>
    %533 = arith.addf %530, %532 : vector<7x2xf32>
    %534 = vector.broadcast %33 : f32 to vector<7x2xf32>
    %535 = arith.mulf %98, %534 : vector<7x2xf32>
    %536 = arith.addf %533, %535 : vector<7x2xf32>
    %537 = vector.broadcast %34 : f32 to vector<7x2xf32>
    %538 = arith.mulf %96, %537 : vector<7x2xf32>
    %539 = arith.addf %536, %538 : vector<7x2xf32>
    %540 = vector.broadcast %35 : f32 to vector<7x2xf32>
    %541 = arith.mulf %100, %540 : vector<7x2xf32>
    %542 = arith.addf %539, %541 : vector<7x2xf32>
    %543 = arith.maximumf %516, %542 : vector<7x2xf32>
    %544 = vector.broadcast %39 : f32 to vector<7x2xf32>
    %545 = arith.addf %543, %544 : vector<7x2xf32>
    %cst_151 = arith.constant 0.000000e+00 : f32
    %546 = vector.broadcast %cst_151 : f32 to vector<7x2xf32>
    %547 = arith.maximumf %545, %546 : vector<7x2xf32>
    %c168 = arith.constant 168 : index
    %c0_152 = arith.constant 0 : index
    %548 = vector.load %arg10[%c168, %c0_152] : memref<224x2xf32, #tpu.memory_space<vmem>>, vector<7x2xf32>
    tpu.vector_store %arg10[%c168, %c0_152], %547 {strides = array<i32>} : memref<224x2xf32, #tpu.memory_space<vmem>>, vector<7x2xf32>,
    %c2_153 = arith.constant 2 : index
    %c0_154 = arith.constant 0 : index
    %c0_155 = arith.constant 0 : index
    %549 = vector.load %arg3[%c2_153, %c0_154, %c0_155] : memref<16x8x2xf32, #tpu.memory_space<vmem>>, vector<1x7x2xf32>
    %550 = vector.shape_cast %549 : vector<1x7x2xf32> to vector<7x2xf32>
    %c2_156 = arith.constant 2 : index
    %c1_157 = arith.constant 1 : index
    %c0_158 = arith.constant 0 : index
    %551 = vector.load %arg3[%c2_156, %c1_157, %c0_158] : memref<16x8x2xf32, #tpu.memory_space<vmem>>, vector<1x7x2xf32>
    %552 = vector.shape_cast %551 : vector<1x7x2xf32> to vector<7x2xf32>
    %c2_159 = arith.constant 2 : index
    %c0_160 = arith.constant 0 : index
    %c0_161 = arith.constant 0 : index
    %553 = vector.load %arg4[%c2_159, %c0_160, %c0_161] : memref<16x8x2xf32, #tpu.memory_space<vmem>>, vector<1x7x2xf32>
    %554 = vector.shape_cast %553 : vector<1x7x2xf32> to vector<7x2xf32>
    %c2_162 = arith.constant 2 : index
    %c1_163 = arith.constant 1 : index
    %c0_164 = arith.constant 0 : index
    %555 = vector.load %arg4[%c2_162, %c1_163, %c0_164] : memref<16x8x2xf32, #tpu.memory_space<vmem>>, vector<1x7x2xf32>
    %556 = vector.shape_cast %555 : vector<1x7x2xf32> to vector<7x2xf32>
    %c3_165 = arith.constant 3 : index
    %c0_166 = arith.constant 0 : index
    %c0_167 = arith.constant 0 : index
    %557 = vector.load %arg3[%c3_165, %c0_166, %c0_167] : memref<16x8x2xf32, #tpu.memory_space<vmem>>, vector<1x7x2xf32>
    %558 = vector.shape_cast %557 : vector<1x7x2xf32> to vector<7x2xf32>
    %c3_168 = arith.constant 3 : index
    %c1_169 = arith.constant 1 : index
    %c0_170 = arith.constant 0 : index
    %559 = vector.load %arg3[%c3_168, %c1_169, %c0_170] : memref<16x8x2xf32, #tpu.memory_space<vmem>>, vector<1x7x2xf32>
    %560 = vector.shape_cast %559 : vector<1x7x2xf32> to vector<7x2xf32>
    %c3_171 = arith.constant 3 : index
    %c0_172 = arith.constant 0 : index
    %c0_173 = arith.constant 0 : index
    %561 = vector.load %arg4[%c3_171, %c0_172, %c0_173] : memref<16x8x2xf32, #tpu.memory_space<vmem>>, vector<1x7x2xf32>
    %562 = vector.shape_cast %561 : vector<1x7x2xf32> to vector<7x2xf32>
    %c3_174 = arith.constant 3 : index
    %c1_175 = arith.constant 1 : index
    %c0_176 = arith.constant 0 : index
    %563 = vector.load %arg4[%c3_174, %c1_175, %c0_176] : memref<16x8x2xf32, #tpu.memory_space<vmem>>, vector<1x7x2xf32>
    %564 = vector.shape_cast %563 : vector<1x7x2xf32> to vector<7x2xf32>
    %c4_177 = arith.constant 4 : index
    %c0_178 = arith.constant 0 : index
    %c0_179 = arith.constant 0 : index
    %565 = vector.load %arg3[%c4_177, %c0_178, %c0_179] : memref<16x8x2xf32, #tpu.memory_space<vmem>>, vector<1x7x2xf32>
    %566 = vector.shape_cast %565 : vector<1x7x2xf32> to vector<7x2xf32>
    %c4_180 = arith.constant 4 : index
    %c1_181 = arith.constant 1 : index
    %c0_182 = arith.constant 0 : index
    %567 = vector.load %arg3[%c4_180, %c1_181, %c0_182] : memref<16x8x2xf32, #tpu.memory_space<vmem>>, vector<1x7x2xf32>
    %568 = vector.shape_cast %567 : vector<1x7x2xf32> to vector<7x2xf32>
    %c4_183 = arith.constant 4 : index
    %c0_184 = arith.constant 0 : index
    %c0_185 = arith.constant 0 : index
    %569 = vector.load %arg4[%c4_183, %c0_184, %c0_185] : memref<16x8x2xf32, #tpu.memory_space<vmem>>, vector<1x7x2xf32>
    %570 = vector.shape_cast %569 : vector<1x7x2xf32> to vector<7x2xf32>
    %c4_186 = arith.constant 4 : index
    %c1_187 = arith.constant 1 : index
    %c0_188 = arith.constant 0 : index
    %571 = vector.load %arg4[%c4_186, %c1_187, %c0_188] : memref<16x8x2xf32, #tpu.memory_space<vmem>>, vector<1x7x2xf32>
    %572 = vector.shape_cast %571 : vector<1x7x2xf32> to vector<7x2xf32>
    %c5_189 = arith.constant 5 : index
    %c0_190 = arith.constant 0 : index
    %c0_191 = arith.constant 0 : index
    %573 = vector.load %arg3[%c5_189, %c0_190, %c0_191] : memref<16x8x2xf32, #tpu.memory_space<vmem>>, vector<1x7x2xf32>
    %574 = vector.shape_cast %573 : vector<1x7x2xf32> to vector<7x2xf32>
    %c5_192 = arith.constant 5 : index
    %c1_193 = arith.constant 1 : index
    %c0_194 = arith.constant 0 : index
    %575 = vector.load %arg3[%c5_192, %c1_193, %c0_194] : memref<16x8x2xf32, #tpu.memory_space<vmem>>, vector<1x7x2xf32>
    %576 = vector.shape_cast %575 : vector<1x7x2xf32> to vector<7x2xf32>
    %c5_195 = arith.constant 5 : index
    %c0_196 = arith.constant 0 : index
    %c0_197 = arith.constant 0 : index
    %577 = vector.load %arg4[%c5_195, %c0_196, %c0_197] : memref<16x8x2xf32, #tpu.memory_space<vmem>>, vector<1x7x2xf32>
    %578 = vector.shape_cast %577 : vector<1x7x2xf32> to vector<7x2xf32>
    %c5_198 = arith.constant 5 : index
    %c1_199 = arith.constant 1 : index
    %c0_200 = arith.constant 0 : index
    %579 = vector.load %arg4[%c5_198, %c1_199, %c0_200] : memref<16x8x2xf32, #tpu.memory_space<vmem>>, vector<1x7x2xf32>
    %580 = vector.shape_cast %579 : vector<1x7x2xf32> to vector<7x2xf32>
    %581 = vector.broadcast %0 : f32 to vector<7x2xf32>
    %582 = arith.mulf %550, %581 : vector<7x2xf32>
    %583 = vector.broadcast %1 : f32 to vector<7x2xf32>
    %584 = arith.mulf %554, %583 : vector<7x2xf32>
    %585 = arith.addf %582, %584 : vector<7x2xf32>
    %586 = vector.broadcast %2 : f32 to vector<7x2xf32>
    %587 = arith.mulf %552, %586 : vector<7x2xf32>
    %588 = arith.addf %585, %587 : vector<7x2xf32>
    %589 = vector.broadcast %3 : f32 to vector<7x2xf32>
    %590 = arith.mulf %558, %589 : vector<7x2xf32>
    %591 = arith.addf %588, %590 : vector<7x2xf32>
    %592 = vector.broadcast %4 : f32 to vector<7x2xf32>
    %593 = arith.mulf %562, %592 : vector<7x2xf32>
    %594 = arith.addf %591, %593 : vector<7x2xf32>
    %595 = vector.broadcast %5 : f32 to vector<7x2xf32>
    %596 = arith.mulf %560, %595 : vector<7x2xf32>
    %597 = arith.addf %594, %596 : vector<7x2xf32>
    %598 = vector.broadcast %6 : f32 to vector<7x2xf32>
    %599 = arith.mulf %566, %598 : vector<7x2xf32>
    %600 = arith.addf %597, %599 : vector<7x2xf32>
    %601 = vector.broadcast %7 : f32 to vector<7x2xf32>
    %602 = arith.mulf %570, %601 : vector<7x2xf32>
    %603 = arith.addf %600, %602 : vector<7x2xf32>
    %604 = vector.broadcast %8 : f32 to vector<7x2xf32>
    %605 = arith.mulf %568, %604 : vector<7x2xf32>
    %606 = arith.addf %603, %605 : vector<7x2xf32>
    %607 = vector.broadcast %0 : f32 to vector<7x2xf32>
    %608 = arith.mulf %554, %607 : vector<7x2xf32>
    %609 = vector.broadcast %1 : f32 to vector<7x2xf32>
    %610 = arith.mulf %552, %609 : vector<7x2xf32>
    %611 = arith.addf %608, %610 : vector<7x2xf32>
    %612 = vector.broadcast %2 : f32 to vector<7x2xf32>
    %613 = arith.mulf %556, %612 : vector<7x2xf32>
    %614 = arith.addf %611, %613 : vector<7x2xf32>
    %615 = vector.broadcast %3 : f32 to vector<7x2xf32>
    %616 = arith.mulf %562, %615 : vector<7x2xf32>
    %617 = arith.addf %614, %616 : vector<7x2xf32>
    %618 = vector.broadcast %4 : f32 to vector<7x2xf32>
    %619 = arith.mulf %560, %618 : vector<7x2xf32>
    %620 = arith.addf %617, %619 : vector<7x2xf32>
    %621 = vector.broadcast %5 : f32 to vector<7x2xf32>
    %622 = arith.mulf %564, %621 : vector<7x2xf32>
    %623 = arith.addf %620, %622 : vector<7x2xf32>
    %624 = vector.broadcast %6 : f32 to vector<7x2xf32>
    %625 = arith.mulf %570, %624 : vector<7x2xf32>
    %626 = arith.addf %623, %625 : vector<7x2xf32>
    %627 = vector.broadcast %7 : f32 to vector<7x2xf32>
    %628 = arith.mulf %568, %627 : vector<7x2xf32>
    %629 = arith.addf %626, %628 : vector<7x2xf32>
    %630 = vector.broadcast %8 : f32 to vector<7x2xf32>
    %631 = arith.mulf %572, %630 : vector<7x2xf32>
    %632 = arith.addf %629, %631 : vector<7x2xf32>
    %633 = arith.maximumf %606, %632 : vector<7x2xf32>
    %634 = vector.broadcast %0 : f32 to vector<7x2xf32>
    %635 = arith.mulf %558, %634 : vector<7x2xf32>
    %636 = vector.broadcast %1 : f32 to vector<7x2xf32>
    %637 = arith.mulf %562, %636 : vector<7x2xf32>
    %638 = arith.addf %635, %637 : vector<7x2xf32>
    %639 = vector.broadcast %2 : f32 to vector<7x2xf32>
    %640 = arith.mulf %560, %639 : vector<7x2xf32>
    %641 = arith.addf %638, %640 : vector<7x2xf32>
    %642 = vector.broadcast %3 : f32 to vector<7x2xf32>
    %643 = arith.mulf %566, %642 : vector<7x2xf32>
    %644 = arith.addf %641, %643 : vector<7x2xf32>
    %645 = vector.broadcast %4 : f32 to vector<7x2xf32>
    %646 = arith.mulf %570, %645 : vector<7x2xf32>
    %647 = arith.addf %644, %646 : vector<7x2xf32>
    %648 = vector.broadcast %5 : f32 to vector<7x2xf32>
    %649 = arith.mulf %568, %648 : vector<7x2xf32>
    %650 = arith.addf %647, %649 : vector<7x2xf32>
    %651 = vector.broadcast %6 : f32 to vector<7x2xf32>
    %652 = arith.mulf %574, %651 : vector<7x2xf32>
    %653 = arith.addf %650, %652 : vector<7x2xf32>
    %654 = vector.broadcast %7 : f32 to vector<7x2xf32>
    %655 = arith.mulf %578, %654 : vector<7x2xf32>
    %656 = arith.addf %653, %655 : vector<7x2xf32>
    %657 = vector.broadcast %8 : f32 to vector<7x2xf32>
    %658 = arith.mulf %576, %657 : vector<7x2xf32>
    %659 = arith.addf %656, %658 : vector<7x2xf32>
    %660 = arith.maximumf %633, %659 : vector<7x2xf32>
    %661 = vector.broadcast %0 : f32 to vector<7x2xf32>
    %662 = arith.mulf %562, %661 : vector<7x2xf32>
    %663 = vector.broadcast %1 : f32 to vector<7x2xf32>
    %664 = arith.mulf %560, %663 : vector<7x2xf32>
    %665 = arith.addf %662, %664 : vector<7x2xf32>
    %666 = vector.broadcast %2 : f32 to vector<7x2xf32>
    %667 = arith.mulf %564, %666 : vector<7x2xf32>
    %668 = arith.addf %665, %667 : vector<7x2xf32>
    %669 = vector.broadcast %3 : f32 to vector<7x2xf32>
    %670 = arith.mulf %570, %669 : vector<7x2xf32>
    %671 = arith.addf %668, %670 : vector<7x2xf32>
    %672 = vector.broadcast %4 : f32 to vector<7x2xf32>
    %673 = arith.mulf %568, %672 : vector<7x2xf32>
    %674 = arith.addf %671, %673 : vector<7x2xf32>
    %675 = vector.broadcast %5 : f32 to vector<7x2xf32>
    %676 = arith.mulf %572, %675 : vector<7x2xf32>
    %677 = arith.addf %674, %676 : vector<7x2xf32>
    %678 = vector.broadcast %6 : f32 to vector<7x2xf32>
    %679 = arith.mulf %578, %678 : vector<7x2xf32>
    %680 = arith.addf %677, %679 : vector<7x2xf32>
    %681 = vector.broadcast %7 : f32 to vector<7x2xf32>
    %682 = arith.mulf %576, %681 : vector<7x2xf32>
    %683 = arith.addf %680, %682 : vector<7x2xf32>
    %684 = vector.broadcast %8 : f32 to vector<7x2xf32>
    %685 = arith.mulf %580, %684 : vector<7x2xf32>
    %686 = arith.addf %683, %685 : vector<7x2xf32>
    %687 = arith.maximumf %660, %686 : vector<7x2xf32>
    %688 = vector.broadcast %36 : f32 to vector<7x2xf32>
    %689 = arith.addf %687, %688 : vector<7x2xf32>
    %cst_201 = arith.constant 0.000000e+00 : f32
    %690 = vector.broadcast %cst_201 : f32 to vector<7x2xf32>
    %691 = arith.maximumf %689, %690 : vector<7x2xf32>
    %c8_202 = arith.constant 8 : index
    %c0_203 = arith.constant 0 : index
    %692 = vector.load %arg10[%c8_202, %c0_203] : memref<224x2xf32, #tpu.memory_space<vmem>>, vector<7x2xf32>
    tpu.vector_store %arg10[%c8_202, %c0_203], %691 {strides = array<i32>} : memref<224x2xf32, #tpu.memory_space<vmem>>, vector<7x2xf32>,
    %693 = vector.broadcast %9 : f32 to vector<7x2xf32>
    %694 = arith.mulf %550, %693 : vector<7x2xf32>
    %695 = vector.broadcast %10 : f32 to vector<7x2xf32>
    %696 = arith.mulf %554, %695 : vector<7x2xf32>
    %697 = arith.addf %694, %696 : vector<7x2xf32>
    %698 = vector.broadcast %11 : f32 to vector<7x2xf32>
    %699 = arith.mulf %552, %698 : vector<7x2xf32>
    %700 = arith.addf %697, %699 : vector<7x2xf32>
    %701 = vector.broadcast %12 : f32 to vector<7x2xf32>
    %702 = arith.mulf %558, %701 : vector<7x2xf32>
    %703 = arith.addf %700, %702 : vector<7x2xf32>
    %704 = vector.broadcast %13 : f32 to vector<7x2xf32>
    %705 = arith.mulf %562, %704 : vector<7x2xf32>
    %706 = arith.addf %703, %705 : vector<7x2xf32>
    %707 = vector.broadcast %14 : f32 to vector<7x2xf32>
    %708 = arith.mulf %560, %707 : vector<7x2xf32>
    %709 = arith.addf %706, %708 : vector<7x2xf32>
    %710 = vector.broadcast %15 : f32 to vector<7x2xf32>
    %711 = arith.mulf %566, %710 : vector<7x2xf32>
    %712 = arith.addf %709, %711 : vector<7x2xf32>
    %713 = vector.broadcast %16 : f32 to vector<7x2xf32>
    %714 = arith.mulf %570, %713 : vector<7x2xf32>
    %715 = arith.addf %712, %714 : vector<7x2xf32>
    %716 = vector.broadcast %17 : f32 to vector<7x2xf32>
    %717 = arith.mulf %568, %716 : vector<7x2xf32>
    %718 = arith.addf %715, %717 : vector<7x2xf32>
    %719 = vector.broadcast %9 : f32 to vector<7x2xf32>
    %720 = arith.mulf %554, %719 : vector<7x2xf32>
    %721 = vector.broadcast %10 : f32 to vector<7x2xf32>
    %722 = arith.mulf %552, %721 : vector<7x2xf32>
    %723 = arith.addf %720, %722 : vector<7x2xf32>
    %724 = vector.broadcast %11 : f32 to vector<7x2xf32>
    %725 = arith.mulf %556, %724 : vector<7x2xf32>
    %726 = arith.addf %723, %725 : vector<7x2xf32>
    %727 = vector.broadcast %12 : f32 to vector<7x2xf32>
    %728 = arith.mulf %562, %727 : vector<7x2xf32>
    %729 = arith.addf %726, %728 : vector<7x2xf32>
    %730 = vector.broadcast %13 : f32 to vector<7x2xf32>
    %731 = arith.mulf %560, %730 : vector<7x2xf32>
    %732 = arith.addf %729, %731 : vector<7x2xf32>
    %733 = vector.broadcast %14 : f32 to vector<7x2xf32>
    %734 = arith.mulf %564, %733 : vector<7x2xf32>
    %735 = arith.addf %732, %734 : vector<7x2xf32>
    %736 = vector.broadcast %15 : f32 to vector<7x2xf32>
    %737 = arith.mulf %570, %736 : vector<7x2xf32>
    %738 = arith.addf %735, %737 : vector<7x2xf32>
    %739 = vector.broadcast %16 : f32 to vector<7x2xf32>
    %740 = arith.mulf %568, %739 : vector<7x2xf32>
    %741 = arith.addf %738, %740 : vector<7x2xf32>
    %742 = vector.broadcast %17 : f32 to vector<7x2xf32>
    %743 = arith.mulf %572, %742 : vector<7x2xf32>
    %744 = arith.addf %741, %743 : vector<7x2xf32>
    %745 = arith.maximumf %718, %744 : vector<7x2xf32>
    %746 = vector.broadcast %9 : f32 to vector<7x2xf32>
    %747 = arith.mulf %558, %746 : vector<7x2xf32>
    %748 = vector.broadcast %10 : f32 to vector<7x2xf32>
    %749 = arith.mulf %562, %748 : vector<7x2xf32>
    %750 = arith.addf %747, %749 : vector<7x2xf32>
    %751 = vector.broadcast %11 : f32 to vector<7x2xf32>
    %752 = arith.mulf %560, %751 : vector<7x2xf32>
    %753 = arith.addf %750, %752 : vector<7x2xf32>
    %754 = vector.broadcast %12 : f32 to vector<7x2xf32>
    %755 = arith.mulf %566, %754 : vector<7x2xf32>
    %756 = arith.addf %753, %755 : vector<7x2xf32>
    %757 = vector.broadcast %13 : f32 to vector<7x2xf32>
    %758 = arith.mulf %570, %757 : vector<7x2xf32>
    %759 = arith.addf %756, %758 : vector<7x2xf32>
    %760 = vector.broadcast %14 : f32 to vector<7x2xf32>
    %761 = arith.mulf %568, %760 : vector<7x2xf32>
    %762 = arith.addf %759, %761 : vector<7x2xf32>
    %763 = vector.broadcast %15 : f32 to vector<7x2xf32>
    %764 = arith.mulf %574, %763 : vector<7x2xf32>
    %765 = arith.addf %762, %764 : vector<7x2xf32>
    %766 = vector.broadcast %16 : f32 to vector<7x2xf32>
    %767 = arith.mulf %578, %766 : vector<7x2xf32>
    %768 = arith.addf %765, %767 : vector<7x2xf32>
    %769 = vector.broadcast %17 : f32 to vector<7x2xf32>
    %770 = arith.mulf %576, %769 : vector<7x2xf32>
    %771 = arith.addf %768, %770 : vector<7x2xf32>
    %772 = arith.maximumf %745, %771 : vector<7x2xf32>
    %773 = vector.broadcast %9 : f32 to vector<7x2xf32>
    %774 = arith.mulf %562, %773 : vector<7x2xf32>
    %775 = vector.broadcast %10 : f32 to vector<7x2xf32>
    %776 = arith.mulf %560, %775 : vector<7x2xf32>
    %777 = arith.addf %774, %776 : vector<7x2xf32>
    %778 = vector.broadcast %11 : f32 to vector<7x2xf32>
    %779 = arith.mulf %564, %778 : vector<7x2xf32>
    %780 = arith.addf %777, %779 : vector<7x2xf32>
    %781 = vector.broadcast %12 : f32 to vector<7x2xf32>
    %782 = arith.mulf %570, %781 : vector<7x2xf32>
    %783 = arith.addf %780, %782 : vector<7x2xf32>
    %784 = vector.broadcast %13 : f32 to vector<7x2xf32>
    %785 = arith.mulf %568, %784 : vector<7x2xf32>
    %786 = arith.addf %783, %785 : vector<7x2xf32>
    %787 = vector.broadcast %14 : f32 to vector<7x2xf32>
    %788 = arith.mulf %572, %787 : vector<7x2xf32>
    %789 = arith.addf %786, %788 : vector<7x2xf32>
    %790 = vector.broadcast %15 : f32 to vector<7x2xf32>
    %791 = arith.mulf %578, %790 : vector<7x2xf32>
    %792 = arith.addf %789, %791 : vector<7x2xf32>
    %793 = vector.broadcast %16 : f32 to vector<7x2xf32>
    %794 = arith.mulf %576, %793 : vector<7x2xf32>
    %795 = arith.addf %792, %794 : vector<7x2xf32>
    %796 = vector.broadcast %17 : f32 to vector<7x2xf32>
    %797 = arith.mulf %580, %796 : vector<7x2xf32>
    %798 = arith.addf %795, %797 : vector<7x2xf32>
    %799 = arith.maximumf %772, %798 : vector<7x2xf32>
    %800 = vector.broadcast %37 : f32 to vector<7x2xf32>
    %801 = arith.addf %799, %800 : vector<7x2xf32>
    %cst_204 = arith.constant 0.000000e+00 : f32
    %802 = vector.broadcast %cst_204 : f32 to vector<7x2xf32>
    %803 = arith.maximumf %801, %802 : vector<7x2xf32>
    %c64 = arith.constant 64 : index
    %c0_205 = arith.constant 0 : index
    %804 = vector.load %arg10[%c64, %c0_205] : memref<224x2xf32, #tpu.memory_space<vmem>>, vector<7x2xf32>
    tpu.vector_store %arg10[%c64, %c0_205], %803 {strides = array<i32>} : memref<224x2xf32, #tpu.memory_space<vmem>>, vector<7x2xf32>,
    %805 = vector.broadcast %18 : f32 to vector<7x2xf32>
    %806 = arith.mulf %550, %805 : vector<7x2xf32>
    %807 = vector.broadcast %19 : f32 to vector<7x2xf32>
    %808 = arith.mulf %554, %807 : vector<7x2xf32>
    %809 = arith.addf %806, %808 : vector<7x2xf32>
    %810 = vector.broadcast %20 : f32 to vector<7x2xf32>
    %811 = arith.mulf %552, %810 : vector<7x2xf32>
    %812 = arith.addf %809, %811 : vector<7x2xf32>
    %813 = vector.broadcast %21 : f32 to vector<7x2xf32>
    %814 = arith.mulf %558, %813 : vector<7x2xf32>
    %815 = arith.addf %812, %814 : vector<7x2xf32>
    %816 = vector.broadcast %22 : f32 to vector<7x2xf32>
    %817 = arith.mulf %562, %816 : vector<7x2xf32>
    %818 = arith.addf %815, %817 : vector<7x2xf32>
    %819 = vector.broadcast %23 : f32 to vector<7x2xf32>
    %820 = arith.mulf %560, %819 : vector<7x2xf32>
    %821 = arith.addf %818, %820 : vector<7x2xf32>
    %822 = vector.broadcast %24 : f32 to vector<7x2xf32>
    %823 = arith.mulf %566, %822 : vector<7x2xf32>
    %824 = arith.addf %821, %823 : vector<7x2xf32>
    %825 = vector.broadcast %25 : f32 to vector<7x2xf32>
    %826 = arith.mulf %570, %825 : vector<7x2xf32>
    %827 = arith.addf %824, %826 : vector<7x2xf32>
    %828 = vector.broadcast %26 : f32 to vector<7x2xf32>
    %829 = arith.mulf %568, %828 : vector<7x2xf32>
    %830 = arith.addf %827, %829 : vector<7x2xf32>
    %831 = vector.broadcast %18 : f32 to vector<7x2xf32>
    %832 = arith.mulf %554, %831 : vector<7x2xf32>
    %833 = vector.broadcast %19 : f32 to vector<7x2xf32>
    %834 = arith.mulf %552, %833 : vector<7x2xf32>
    %835 = arith.addf %832, %834 : vector<7x2xf32>
    %836 = vector.broadcast %20 : f32 to vector<7x2xf32>
    %837 = arith.mulf %556, %836 : vector<7x2xf32>
    %838 = arith.addf %835, %837 : vector<7x2xf32>
    %839 = vector.broadcast %21 : f32 to vector<7x2xf32>
    %840 = arith.mulf %562, %839 : vector<7x2xf32>
    %841 = arith.addf %838, %840 : vector<7x2xf32>
    %842 = vector.broadcast %22 : f32 to vector<7x2xf32>
    %843 = arith.mulf %560, %842 : vector<7x2xf32>
    %844 = arith.addf %841, %843 : vector<7x2xf32>
    %845 = vector.broadcast %23 : f32 to vector<7x2xf32>
    %846 = arith.mulf %564, %845 : vector<7x2xf32>
    %847 = arith.addf %844, %846 : vector<7x2xf32>
    %848 = vector.broadcast %24 : f32 to vector<7x2xf32>
    %849 = arith.mulf %570, %848 : vector<7x2xf32>
    %850 = arith.addf %847, %849 : vector<7x2xf32>
    %851 = vector.broadcast %25 : f32 to vector<7x2xf32>
    %852 = arith.mulf %568, %851 : vector<7x2xf32>
    %853 = arith.addf %850, %852 : vector<7x2xf32>
    %854 = vector.broadcast %26 : f32 to vector<7x2xf32>
    %855 = arith.mulf %572, %854 : vector<7x2xf32>
    %856 = arith.addf %853, %855 : vector<7x2xf32>
    %857 = arith.maximumf %830, %856 : vector<7x2xf32>
    %858 = vector.broadcast %18 : f32 to vector<7x2xf32>
    %859 = arith.mulf %558, %858 : vector<7x2xf32>
    %860 = vector.broadcast %19 : f32 to vector<7x2xf32>
    %861 = arith.mulf %562, %860 : vector<7x2xf32>
    %862 = arith.addf %859, %861 : vector<7x2xf32>
    %863 = vector.broadcast %20 : f32 to vector<7x2xf32>
    %864 = arith.mulf %560, %863 : vector<7x2xf32>
    %865 = arith.addf %862, %864 : vector<7x2xf32>
    %866 = vector.broadcast %21 : f32 to vector<7x2xf32>
    %867 = arith.mulf %566, %866 : vector<7x2xf32>
    %868 = arith.addf %865, %867 : vector<7x2xf32>
    %869 = vector.broadcast %22 : f32 to vector<7x2xf32>
    %870 = arith.mulf %570, %869 : vector<7x2xf32>
    %871 = arith.addf %868, %870 : vector<7x2xf32>
    %872 = vector.broadcast %23 : f32 to vector<7x2xf32>
    %873 = arith.mulf %568, %872 : vector<7x2xf32>
    %874 = arith.addf %871, %873 : vector<7x2xf32>
    %875 = vector.broadcast %24 : f32 to vector<7x2xf32>
    %876 = arith.mulf %574, %875 : vector<7x2xf32>
    %877 = arith.addf %874, %876 : vector<7x2xf32>
    %878 = vector.broadcast %25 : f32 to vector<7x2xf32>
    %879 = arith.mulf %578, %878 : vector<7x2xf32>
    %880 = arith.addf %877, %879 : vector<7x2xf32>
    %881 = vector.broadcast %26 : f32 to vector<7x2xf32>
    %882 = arith.mulf %576, %881 : vector<7x2xf32>
    %883 = arith.addf %880, %882 : vector<7x2xf32>
    %884 = arith.maximumf %857, %883 : vector<7x2xf32>
    %885 = vector.broadcast %18 : f32 to vector<7x2xf32>
    %886 = arith.mulf %562, %885 : vector<7x2xf32>
    %887 = vector.broadcast %19 : f32 to vector<7x2xf32>
    %888 = arith.mulf %560, %887 : vector<7x2xf32>
    %889 = arith.addf %886, %888 : vector<7x2xf32>
    %890 = vector.broadcast %20 : f32 to vector<7x2xf32>
    %891 = arith.mulf %564, %890 : vector<7x2xf32>
    %892 = arith.addf %889, %891 : vector<7x2xf32>
    %893 = vector.broadcast %21 : f32 to vector<7x2xf32>
    %894 = arith.mulf %570, %893 : vector<7x2xf32>
    %895 = arith.addf %892, %894 : vector<7x2xf32>
    %896 = vector.broadcast %22 : f32 to vector<7x2xf32>
    %897 = arith.mulf %568, %896 : vector<7x2xf32>
    %898 = arith.addf %895, %897 : vector<7x2xf32>
    %899 = vector.broadcast %23 : f32 to vector<7x2xf32>
    %900 = arith.mulf %572, %899 : vector<7x2xf32>
    %901 = arith.addf %898, %900 : vector<7x2xf32>
    %902 = vector.broadcast %24 : f32 to vector<7x2xf32>
    %903 = arith.mulf %578, %902 : vector<7x2xf32>
    %904 = arith.addf %901, %903 : vector<7x2xf32>
    %905 = vector.broadcast %25 : f32 to vector<7x2xf32>
    %906 = arith.mulf %576, %905 : vector<7x2xf32>
    %907 = arith.addf %904, %906 : vector<7x2xf32>
    %908 = vector.broadcast %26 : f32 to vector<7x2xf32>
    %909 = arith.mulf %580, %908 : vector<7x2xf32>
    %910 = arith.addf %907, %909 : vector<7x2xf32>
    %911 = arith.maximumf %884, %910 : vector<7x2xf32>
    %912 = vector.broadcast %38 : f32 to vector<7x2xf32>
    %913 = arith.addf %911, %912 : vector<7x2xf32>
    %cst_206 = arith.constant 0.000000e+00 : f32
    %914 = vector.broadcast %cst_206 : f32 to vector<7x2xf32>
    %915 = arith.maximumf %913, %914 : vector<7x2xf32>
    %c120 = arith.constant 120 : index
    %c0_207 = arith.constant 0 : index
    %916 = vector.load %arg10[%c120, %c0_207] : memref<224x2xf32, #tpu.memory_space<vmem>>, vector<7x2xf32>
    tpu.vector_store %arg10[%c120, %c0_207], %915 {strides = array<i32>} : memref<224x2xf32, #tpu.memory_space<vmem>>, vector<7x2xf32>,
    %917 = vector.broadcast %27 : f32 to vector<7x2xf32>
    %918 = arith.mulf %550, %917 : vector<7x2xf32>
    %919 = vector.broadcast %28 : f32 to vector<7x2xf32>
    %920 = arith.mulf %554, %919 : vector<7x2xf32>
    %921 = arith.addf %918, %920 : vector<7x2xf32>
    %922 = vector.broadcast %29 : f32 to vector<7x2xf32>
    %923 = arith.mulf %552, %922 : vector<7x2xf32>
    %924 = arith.addf %921, %923 : vector<7x2xf32>
    %925 = vector.broadcast %30 : f32 to vector<7x2xf32>
    %926 = arith.mulf %558, %925 : vector<7x2xf32>
    %927 = arith.addf %924, %926 : vector<7x2xf32>
    %928 = vector.broadcast %31 : f32 to vector<7x2xf32>
    %929 = arith.mulf %562, %928 : vector<7x2xf32>
    %930 = arith.addf %927, %929 : vector<7x2xf32>
    %931 = vector.broadcast %32 : f32 to vector<7x2xf32>
    %932 = arith.mulf %560, %931 : vector<7x2xf32>
    %933 = arith.addf %930, %932 : vector<7x2xf32>
    %934 = vector.broadcast %33 : f32 to vector<7x2xf32>
    %935 = arith.mulf %566, %934 : vector<7x2xf32>
    %936 = arith.addf %933, %935 : vector<7x2xf32>
    %937 = vector.broadcast %34 : f32 to vector<7x2xf32>
    %938 = arith.mulf %570, %937 : vector<7x2xf32>
    %939 = arith.addf %936, %938 : vector<7x2xf32>
    %940 = vector.broadcast %35 : f32 to vector<7x2xf32>
    %941 = arith.mulf %568, %940 : vector<7x2xf32>
    %942 = arith.addf %939, %941 : vector<7x2xf32>
    %943 = vector.broadcast %27 : f32 to vector<7x2xf32>
    %944 = arith.mulf %554, %943 : vector<7x2xf32>
    %945 = vector.broadcast %28 : f32 to vector<7x2xf32>
    %946 = arith.mulf %552, %945 : vector<7x2xf32>
    %947 = arith.addf %944, %946 : vector<7x2xf32>
    %948 = vector.broadcast %29 : f32 to vector<7x2xf32>
    %949 = arith.mulf %556, %948 : vector<7x2xf32>
    %950 = arith.addf %947, %949 : vector<7x2xf32>
    %951 = vector.broadcast %30 : f32 to vector<7x2xf32>
    %952 = arith.mulf %562, %951 : vector<7x2xf32>
    %953 = arith.addf %950, %952 : vector<7x2xf32>
    %954 = vector.broadcast %31 : f32 to vector<7x2xf32>
    %955 = arith.mulf %560, %954 : vector<7x2xf32>
    %956 = arith.addf %953, %955 : vector<7x2xf32>
    %957 = vector.broadcast %32 : f32 to vector<7x2xf32>
    %958 = arith.mulf %564, %957 : vector<7x2xf32>
    %959 = arith.addf %956, %958 : vector<7x2xf32>
    %960 = vector.broadcast %33 : f32 to vector<7x2xf32>
    %961 = arith.mulf %570, %960 : vector<7x2xf32>
    %962 = arith.addf %959, %961 : vector<7x2xf32>
    %963 = vector.broadcast %34 : f32 to vector<7x2xf32>
    %964 = arith.mulf %568, %963 : vector<7x2xf32>
    %965 = arith.addf %962, %964 : vector<7x2xf32>
    %966 = vector.broadcast %35 : f32 to vector<7x2xf32>
    %967 = arith.mulf %572, %966 : vector<7x2xf32>
    %968 = arith.addf %965, %967 : vector<7x2xf32>
    %969 = arith.maximumf %942, %968 : vector<7x2xf32>
    %970 = vector.broadcast %27 : f32 to vector<7x2xf32>
    %971 = arith.mulf %558, %970 : vector<7x2xf32>
    %972 = vector.broadcast %28 : f32 to vector<7x2xf32>
    %973 = arith.mulf %562, %972 : vector<7x2xf32>
    %974 = arith.addf %971, %973 : vector<7x2xf32>
    %975 = vector.broadcast %29 : f32 to vector<7x2xf32>
    %976 = arith.mulf %560, %975 : vector<7x2xf32>
    %977 = arith.addf %974, %976 : vector<7x2xf32>
    %978 = vector.broadcast %30 : f32 to vector<7x2xf32>
    %979 = arith.mulf %566, %978 : vector<7x2xf32>
    %980 = arith.addf %977, %979 : vector<7x2xf32>
    %981 = vector.broadcast %31 : f32 to vector<7x2xf32>
    %982 = arith.mulf %570, %981 : vector<7x2xf32>
    %983 = arith.addf %980, %982 : vector<7x2xf32>
    %984 = vector.broadcast %32 : f32 to vector<7x2xf32>
    %985 = arith.mulf %568, %984 : vector<7x2xf32>
    %986 = arith.addf %983, %985 : vector<7x2xf32>
    %987 = vector.broadcast %33 : f32 to vector<7x2xf32>
    %988 = arith.mulf %574, %987 : vector<7x2xf32>
    %989 = arith.addf %986, %988 : vector<7x2xf32>
    %990 = vector.broadcast %34 : f32 to vector<7x2xf32>
    %991 = arith.mulf %578, %990 : vector<7x2xf32>
    %992 = arith.addf %989, %991 : vector<7x2xf32>
    %993 = vector.broadcast %35 : f32 to vector<7x2xf32>
    %994 = arith.mulf %576, %993 : vector<7x2xf32>
    %995 = arith.addf %992, %994 : vector<7x2xf32>
    %996 = arith.maximumf %969, %995 : vector<7x2xf32>
    %997 = vector.broadcast %27 : f32 to vector<7x2xf32>
    %998 = arith.mulf %562, %997 : vector<7x2xf32>
    %999 = vector.broadcast %28 : f32 to vector<7x2xf32>
    %1000 = arith.mulf %560, %999 : vector<7x2xf32>
    %1001 = arith.addf %998, %1000 : vector<7x2xf32>
    %1002 = vector.broadcast %29 : f32 to vector<7x2xf32>
    %1003 = arith.mulf %564, %1002 : vector<7x2xf32>
    %1004 = arith.addf %1001, %1003 : vector<7x2xf32>
    %1005 = vector.broadcast %30 : f32 to vector<7x2xf32>
    %1006 = arith.mulf %570, %1005 : vector<7x2xf32>
    %1007 = arith.addf %1004, %1006 : vector<7x2xf32>
    %1008 = vector.broadcast %31 : f32 to vector<7x2xf32>
    %1009 = arith.mulf %568, %1008 : vector<7x2xf32>
    %1010 = arith.addf %1007, %1009 : vector<7x2xf32>
    %1011 = vector.broadcast %32 : f32 to vector<7x2xf32>
    %1012 = arith.mulf %572, %1011 : vector<7x2xf32>
    %1013 = arith.addf %1010, %1012 : vector<7x2xf32>
    %1014 = vector.broadcast %33 : f32 to vector<7x2xf32>
    %1015 = arith.mulf %578, %1014 : vector<7x2xf32>
    %1016 = arith.addf %1013, %1015 : vector<7x2xf32>
    %1017 = vector.broadcast %34 : f32 to vector<7x2xf32>
    %1018 = arith.mulf %576, %1017 : vector<7x2xf32>
    %1019 = arith.addf %1016, %1018 : vector<7x2xf32>
    %1020 = vector.broadcast %35 : f32 to vector<7x2xf32>
    %1021 = arith.mulf %580, %1020 : vector<7x2xf32>
    %1022 = arith.addf %1019, %1021 : vector<7x2xf32>
    %1023 = arith.maximumf %996, %1022 : vector<7x2xf32>
    %1024 = vector.broadcast %39 : f32 to vector<7x2xf32>
    %1025 = arith.addf %1023, %1024 : vector<7x2xf32>
    %cst_208 = arith.constant 0.000000e+00 : f32
    %1026 = vector.broadcast %cst_208 : f32 to vector<7x2xf32>
    %1027 = arith.maximumf %1025, %1026 : vector<7x2xf32>
    %c176 = arith.constant 176 : index
    %c0_209 = arith.constant 0 : index
    %1028 = vector.load %arg10[%c176, %c0_209] : memref<224x2xf32, #tpu.memory_space<vmem>>, vector<7x2xf32>
    tpu.vector_store %arg10[%c176, %c0_209], %1027 {strides = array<i32>} : memref<224x2xf32, #tpu.memory_space<vmem>>, vector<7x2xf32>,
    %c4_210 = arith.constant 4 : index
    %c0_211 = arith.constant 0 : index
    %c0_212 = arith.constant 0 : index
    %1029 = vector.load %arg3[%c4_210, %c0_211, %c0_212] : memref<16x8x2xf32, #tpu.memory_space<vmem>>, vector<1x7x2xf32>
    %1030 = vector.shape_cast %1029 : vector<1x7x2xf32> to vector<7x2xf32>
    %c4_213 = arith.constant 4 : index
    %c1_214 = arith.constant 1 : index
    %c0_215 = arith.constant 0 : index
    %1031 = vector.load %arg3[%c4_213, %c1_214, %c0_215] : memref<16x8x2xf32, #tpu.memory_space<vmem>>, vector<1x7x2xf32>
    %1032 = vector.shape_cast %1031 : vector<1x7x2xf32> to vector<7x2xf32>
    %c4_216 = arith.constant 4 : index
    %c0_217 = arith.constant 0 : index
    %c0_218 = arith.constant 0 : index
    %1033 = vector.load %arg4[%c4_216, %c0_217, %c0_218] : memref<16x8x2xf32, #tpu.memory_space<vmem>>, vector<1x7x2xf32>
    %1034 = vector.shape_cast %1033 : vector<1x7x2xf32> to vector<7x2xf32>
    %c4_219 = arith.constant 4 : index
    %c1_220 = arith.constant 1 : index
    %c0_221 = arith.constant 0 : index
    %1035 = vector.load %arg4[%c4_219, %c1_220, %c0_221] : memref<16x8x2xf32, #tpu.memory_space<vmem>>, vector<1x7x2xf32>
    %1036 = vector.shape_cast %1035 : vector<1x7x2xf32> to vector<7x2xf32>
    %c5_222 = arith.constant 5 : index
    %c0_223 = arith.constant 0 : index
    %c0_224 = arith.constant 0 : index
    %1037 = vector.load %arg3[%c5_222, %c0_223, %c0_224] : memref<16x8x2xf32, #tpu.memory_space<vmem>>, vector<1x7x2xf32>
    %1038 = vector.shape_cast %1037 : vector<1x7x2xf32> to vector<7x2xf32>
    %c5_225 = arith.constant 5 : index
    %c1_226 = arith.constant 1 : index
    %c0_227 = arith.constant 0 : index
    %1039 = vector.load %arg3[%c5_225, %c1_226, %c0_227] : memref<16x8x2xf32, #tpu.memory_space<vmem>>, vector<1x7x2xf32>
    %1040 = vector.shape_cast %1039 : vector<1x7x2xf32> to vector<7x2xf32>
    %c5_228 = arith.constant 5 : index
    %c0_229 = arith.constant 0 : index
    %c0_230 = arith.constant 0 : index
    %1041 = vector.load %arg4[%c5_228, %c0_229, %c0_230] : memref<16x8x2xf32, #tpu.memory_space<vmem>>, vector<1x7x2xf32>
    %1042 = vector.shape_cast %1041 : vector<1x7x2xf32> to vector<7x2xf32>
    %c5_231 = arith.constant 5 : index
    %c1_232 = arith.constant 1 : index
    %c0_233 = arith.constant 0 : index
    %1043 = vector.load %arg4[%c5_231, %c1_232, %c0_233] : memref<16x8x2xf32, #tpu.memory_space<vmem>>, vector<1x7x2xf32>
    %1044 = vector.shape_cast %1043 : vector<1x7x2xf32> to vector<7x2xf32>
    %c6_234 = arith.constant 6 : index
    %c0_235 = arith.constant 0 : index
    %c0_236 = arith.constant 0 : index
    %1045 = vector.load %arg3[%c6_234, %c0_235, %c0_236] : memref<16x8x2xf32, #tpu.memory_space<vmem>>, vector<1x7x2xf32>
    %1046 = vector.shape_cast %1045 : vector<1x7x2xf32> to vector<7x2xf32>
    %c6_237 = arith.constant 6 : index
    %c1_238 = arith.constant 1 : index
    %c0_239 = arith.constant 0 : index
    %1047 = vector.load %arg3[%c6_237, %c1_238, %c0_239] : memref<16x8x2xf32, #tpu.memory_space<vmem>>, vector<1x7x2xf32>
    %1048 = vector.shape_cast %1047 : vector<1x7x2xf32> to vector<7x2xf32>
    %c6_240 = arith.constant 6 : index
    %c0_241 = arith.constant 0 : index
    %c0_242 = arith.constant 0 : index
    %1049 = vector.load %arg4[%c6_240, %c0_241, %c0_242] : memref<16x8x2xf32, #tpu.memory_space<vmem>>, vector<1x7x2xf32>
    %1050 = vector.shape_cast %1049 : vector<1x7x2xf32> to vector<7x2xf32>
    %c6_243 = arith.constant 6 : index
    %c1_244 = arith.constant 1 : index
    %c0_245 = arith.constant 0 : index
    %1051 = vector.load %arg4[%c6_243, %c1_244, %c0_245] : memref<16x8x2xf32, #tpu.memory_space<vmem>>, vector<1x7x2xf32>
    %1052 = vector.shape_cast %1051 : vector<1x7x2xf32> to vector<7x2xf32>
    %c7_246 = arith.constant 7 : index
    %c0_247 = arith.constant 0 : index
    %c0_248 = arith.constant 0 : index
    %1053 = vector.load %arg3[%c7_246, %c0_247, %c0_248] : memref<16x8x2xf32, #tpu.memory_space<vmem>>, vector<1x7x2xf32>
    %1054 = vector.shape_cast %1053 : vector<1x7x2xf32> to vector<7x2xf32>
    %c7_249 = arith.constant 7 : index
    %c1_250 = arith.constant 1 : index
    %c0_251 = arith.constant 0 : index
    %1055 = vector.load %arg3[%c7_249, %c1_250, %c0_251] : memref<16x8x2xf32, #tpu.memory_space<vmem>>, vector<1x7x2xf32>
    %1056 = vector.shape_cast %1055 : vector<1x7x2xf32> to vector<7x2xf32>
    %c7_252 = arith.constant 7 : index
    %c0_253 = arith.constant 0 : index
    %c0_254 = arith.constant 0 : index
    %1057 = vector.load %arg4[%c7_252, %c0_253, %c0_254] : memref<16x8x2xf32, #tpu.memory_space<vmem>>, vector<1x7x2xf32>
    %1058 = vector.shape_cast %1057 : vector<1x7x2xf32> to vector<7x2xf32>
    %c7_255 = arith.constant 7 : index
    %c1_256 = arith.constant 1 : index
    %c0_257 = arith.constant 0 : index
    %1059 = vector.load %arg4[%c7_255, %c1_256, %c0_257] : memref<16x8x2xf32, #tpu.memory_space<vmem>>, vector<1x7x2xf32>
    %1060 = vector.shape_cast %1059 : vector<1x7x2xf32> to vector<7x2xf32>
    %1061 = vector.broadcast %0 : f32 to vector<7x2xf32>
    %1062 = arith.mulf %1030, %1061 : vector<7x2xf32>
    %1063 = vector.broadcast %1 : f32 to vector<7x2xf32>
    %1064 = arith.mulf %1034, %1063 : vector<7x2xf32>
    %1065 = arith.addf %1062, %1064 : vector<7x2xf32>
    %1066 = vector.broadcast %2 : f32 to vector<7x2xf32>
    %1067 = arith.mulf %1032, %1066 : vector<7x2xf32>
    %1068 = arith.addf %1065, %1067 : vector<7x2xf32>
    %1069 = vector.broadcast %3 : f32 to vector<7x2xf32>
    %1070 = arith.mulf %1038, %1069 : vector<7x2xf32>
    %1071 = arith.addf %1068, %1070 : vector<7x2xf32>
    %1072 = vector.broadcast %4 : f32 to vector<7x2xf32>
    %1073 = arith.mulf %1042, %1072 : vector<7x2xf32>
    %1074 = arith.addf %1071, %1073 : vector<7x2xf32>
    %1075 = vector.broadcast %5 : f32 to vector<7x2xf32>
    %1076 = arith.mulf %1040, %1075 : vector<7x2xf32>
    %1077 = arith.addf %1074, %1076 : vector<7x2xf32>
    %1078 = vector.broadcast %6 : f32 to vector<7x2xf32>
    %1079 = arith.mulf %1046, %1078 : vector<7x2xf32>
    %1080 = arith.addf %1077, %1079 : vector<7x2xf32>
    %1081 = vector.broadcast %7 : f32 to vector<7x2xf32>
    %1082 = arith.mulf %1050, %1081 : vector<7x2xf32>
    %1083 = arith.addf %1080, %1082 : vector<7x2xf32>
    %1084 = vector.broadcast %8 : f32 to vector<7x2xf32>
    %1085 = arith.mulf %1048, %1084 : vector<7x2xf32>
    %1086 = arith.addf %1083, %1085 : vector<7x2xf32>
    %1087 = vector.broadcast %0 : f32 to vector<7x2xf32>
    %1088 = arith.mulf %1034, %1087 : vector<7x2xf32>
    %1089 = vector.broadcast %1 : f32 to vector<7x2xf32>
    %1090 = arith.mulf %1032, %1089 : vector<7x2xf32>
    %1091 = arith.addf %1088, %1090 : vector<7x2xf32>
    %1092 = vector.broadcast %2 : f32 to vector<7x2xf32>
    %1093 = arith.mulf %1036, %1092 : vector<7x2xf32>
    %1094 = arith.addf %1091, %1093 : vector<7x2xf32>
    %1095 = vector.broadcast %3 : f32 to vector<7x2xf32>
    %1096 = arith.mulf %1042, %1095 : vector<7x2xf32>
    %1097 = arith.addf %1094, %1096 : vector<7x2xf32>
    %1098 = vector.broadcast %4 : f32 to vector<7x2xf32>
    %1099 = arith.mulf %1040, %1098 : vector<7x2xf32>
    %1100 = arith.addf %1097, %1099 : vector<7x2xf32>
    %1101 = vector.broadcast %5 : f32 to vector<7x2xf32>
    %1102 = arith.mulf %1044, %1101 : vector<7x2xf32>
    %1103 = arith.addf %1100, %1102 : vector<7x2xf32>
    %1104 = vector.broadcast %6 : f32 to vector<7x2xf32>
    %1105 = arith.mulf %1050, %1104 : vector<7x2xf32>
    %1106 = arith.addf %1103, %1105 : vector<7x2xf32>
    %1107 = vector.broadcast %7 : f32 to vector<7x2xf32>
    %1108 = arith.mulf %1048, %1107 : vector<7x2xf32>
    %1109 = arith.addf %1106, %1108 : vector<7x2xf32>
    %1110 = vector.broadcast %8 : f32 to vector<7x2xf32>
    %1111 = arith.mulf %1052, %1110 : vector<7x2xf32>
    %1112 = arith.addf %1109, %1111 : vector<7x2xf32>
    %1113 = arith.maximumf %1086, %1112 : vector<7x2xf32>
    %1114 = vector.broadcast %0 : f32 to vector<7x2xf32>
    %1115 = arith.mulf %1038, %1114 : vector<7x2xf32>
    %1116 = vector.broadcast %1 : f32 to vector<7x2xf32>
    %1117 = arith.mulf %1042, %1116 : vector<7x2xf32>
    %1118 = arith.addf %1115, %1117 : vector<7x2xf32>
    %1119 = vector.broadcast %2 : f32 to vector<7x2xf32>
    %1120 = arith.mulf %1040, %1119 : vector<7x2xf32>
    %1121 = arith.addf %1118, %1120 : vector<7x2xf32>
    %1122 = vector.broadcast %3 : f32 to vector<7x2xf32>
    %1123 = arith.mulf %1046, %1122 : vector<7x2xf32>
    %1124 = arith.addf %1121, %1123 : vector<7x2xf32>
    %1125 = vector.broadcast %4 : f32 to vector<7x2xf32>
    %1126 = arith.mulf %1050, %1125 : vector<7x2xf32>
    %1127 = arith.addf %1124, %1126 : vector<7x2xf32>
    %1128 = vector.broadcast %5 : f32 to vector<7x2xf32>
    %1129 = arith.mulf %1048, %1128 : vector<7x2xf32>
    %1130 = arith.addf %1127, %1129 : vector<7x2xf32>
    %1131 = vector.broadcast %6 : f32 to vector<7x2xf32>
    %1132 = arith.mulf %1054, %1131 : vector<7x2xf32>
    %1133 = arith.addf %1130, %1132 : vector<7x2xf32>
    %1134 = vector.broadcast %7 : f32 to vector<7x2xf32>
    %1135 = arith.mulf %1058, %1134 : vector<7x2xf32>
    %1136 = arith.addf %1133, %1135 : vector<7x2xf32>
    %1137 = vector.broadcast %8 : f32 to vector<7x2xf32>
    %1138 = arith.mulf %1056, %1137 : vector<7x2xf32>
    %1139 = arith.addf %1136, %1138 : vector<7x2xf32>
    %1140 = arith.maximumf %1113, %1139 : vector<7x2xf32>
    %1141 = vector.broadcast %0 : f32 to vector<7x2xf32>
    %1142 = arith.mulf %1042, %1141 : vector<7x2xf32>
    %1143 = vector.broadcast %1 : f32 to vector<7x2xf32>
    %1144 = arith.mulf %1040, %1143 : vector<7x2xf32>
    %1145 = arith.addf %1142, %1144 : vector<7x2xf32>
    %1146 = vector.broadcast %2 : f32 to vector<7x2xf32>
    %1147 = arith.mulf %1044, %1146 : vector<7x2xf32>
    %1148 = arith.addf %1145, %1147 : vector<7x2xf32>
    %1149 = vector.broadcast %3 : f32 to vector<7x2xf32>
    %1150 = arith.mulf %1050, %1149 : vector<7x2xf32>
    %1151 = arith.addf %1148, %1150 : vector<7x2xf32>
    %1152 = vector.broadcast %4 : f32 to vector<7x2xf32>
    %1153 = arith.mulf %1048, %1152 : vector<7x2xf32>
    %1154 = arith.addf %1151, %1153 : vector<7x2xf32>
    %1155 = vector.broadcast %5 : f32 to vector<7x2xf32>
    %1156 = arith.mulf %1052, %1155 : vector<7x2xf32>
    %1157 = arith.addf %1154, %1156 : vector<7x2xf32>
    %1158 = vector.broadcast %6 : f32 to vector<7x2xf32>
    %1159 = arith.mulf %1058, %1158 : vector<7x2xf32>
    %1160 = arith.addf %1157, %1159 : vector<7x2xf32>
    %1161 = vector.broadcast %7 : f32 to vector<7x2xf32>
    %1162 = arith.mulf %1056, %1161 : vector<7x2xf32>
    %1163 = arith.addf %1160, %1162 : vector<7x2xf32>
    %1164 = vector.broadcast %8 : f32 to vector<7x2xf32>
    %1165 = arith.mulf %1060, %1164 : vector<7x2xf32>
    %1166 = arith.addf %1163, %1165 : vector<7x2xf32>
    %1167 = arith.maximumf %1140, %1166 : vector<7x2xf32>
    %1168 = vector.broadcast %36 : f32 to vector<7x2xf32>
    %1169 = arith.addf %1167, %1168 : vector<7x2xf32>
    %cst_258 = arith.constant 0.000000e+00 : f32
    %1170 = vector.broadcast %cst_258 : f32 to vector<7x2xf32>
    %1171 = arith.maximumf %1169, %1170 : vector<7x2xf32>
    %c16 = arith.constant 16 : index
    %c0_259 = arith.constant 0 : index
    %1172 = vector.load %arg10[%c16, %c0_259] : memref<224x2xf32, #tpu.memory_space<vmem>>, vector<7x2xf32>
    tpu.vector_store %arg10[%c16, %c0_259], %1171 {strides = array<i32>} : memref<224x2xf32, #tpu.memory_space<vmem>>, vector<7x2xf32>,
    %1173 = vector.broadcast %9 : f32 to vector<7x2xf32>
    %1174 = arith.mulf %1030, %1173 : vector<7x2xf32>
    %1175 = vector.broadcast %10 : f32 to vector<7x2xf32>
    %1176 = arith.mulf %1034, %1175 : vector<7x2xf32>
    %1177 = arith.addf %1174, %1176 : vector<7x2xf32>
    %1178 = vector.broadcast %11 : f32 to vector<7x2xf32>
    %1179 = arith.mulf %1032, %1178 : vector<7x2xf32>
    %1180 = arith.addf %1177, %1179 : vector<7x2xf32>
    %1181 = vector.broadcast %12 : f32 to vector<7x2xf32>
    %1182 = arith.mulf %1038, %1181 : vector<7x2xf32>
    %1183 = arith.addf %1180, %1182 : vector<7x2xf32>
    %1184 = vector.broadcast %13 : f32 to vector<7x2xf32>
    %1185 = arith.mulf %1042, %1184 : vector<7x2xf32>
    %1186 = arith.addf %1183, %1185 : vector<7x2xf32>
    %1187 = vector.broadcast %14 : f32 to vector<7x2xf32>
    %1188 = arith.mulf %1040, %1187 : vector<7x2xf32>
    %1189 = arith.addf %1186, %1188 : vector<7x2xf32>
    %1190 = vector.broadcast %15 : f32 to vector<7x2xf32>
    %1191 = arith.mulf %1046, %1190 : vector<7x2xf32>
    %1192 = arith.addf %1189, %1191 : vector<7x2xf32>
    %1193 = vector.broadcast %16 : f32 to vector<7x2xf32>
    %1194 = arith.mulf %1050, %1193 : vector<7x2xf32>
    %1195 = arith.addf %1192, %1194 : vector<7x2xf32>
    %1196 = vector.broadcast %17 : f32 to vector<7x2xf32>
    %1197 = arith.mulf %1048, %1196 : vector<7x2xf32>
    %1198 = arith.addf %1195, %1197 : vector<7x2xf32>
    %1199 = vector.broadcast %9 : f32 to vector<7x2xf32>
    %1200 = arith.mulf %1034, %1199 : vector<7x2xf32>
    %1201 = vector.broadcast %10 : f32 to vector<7x2xf32>
    %1202 = arith.mulf %1032, %1201 : vector<7x2xf32>
    %1203 = arith.addf %1200, %1202 : vector<7x2xf32>
    %1204 = vector.broadcast %11 : f32 to vector<7x2xf32>
    %1205 = arith.mulf %1036, %1204 : vector<7x2xf32>
    %1206 = arith.addf %1203, %1205 : vector<7x2xf32>
    %1207 = vector.broadcast %12 : f32 to vector<7x2xf32>
    %1208 = arith.mulf %1042, %1207 : vector<7x2xf32>
    %1209 = arith.addf %1206, %1208 : vector<7x2xf32>
    %1210 = vector.broadcast %13 : f32 to vector<7x2xf32>
    %1211 = arith.mulf %1040, %1210 : vector<7x2xf32>
    %1212 = arith.addf %1209, %1211 : vector<7x2xf32>
    %1213 = vector.broadcast %14 : f32 to vector<7x2xf32>
    %1214 = arith.mulf %1044, %1213 : vector<7x2xf32>
    %1215 = arith.addf %1212, %1214 : vector<7x2xf32>
    %1216 = vector.broadcast %15 : f32 to vector<7x2xf32>
    %1217 = arith.mulf %1050, %1216 : vector<7x2xf32>
    %1218 = arith.addf %1215, %1217 : vector<7x2xf32>
    %1219 = vector.broadcast %16 : f32 to vector<7x2xf32>
    %1220 = arith.mulf %1048, %1219 : vector<7x2xf32>
    %1221 = arith.addf %1218, %1220 : vector<7x2xf32>
    %1222 = vector.broadcast %17 : f32 to vector<7x2xf32>
    %1223 = arith.mulf %1052, %1222 : vector<7x2xf32>
    %1224 = arith.addf %1221, %1223 : vector<7x2xf32>
    %1225 = arith.maximumf %1198, %1224 : vector<7x2xf32>
    %1226 = vector.broadcast %9 : f32 to vector<7x2xf32>
    %1227 = arith.mulf %1038, %1226 : vector<7x2xf32>
    %1228 = vector.broadcast %10 : f32 to vector<7x2xf32>
    %1229 = arith.mulf %1042, %1228 : vector<7x2xf32>
    %1230 = arith.addf %1227, %1229 : vector<7x2xf32>
    %1231 = vector.broadcast %11 : f32 to vector<7x2xf32>
    %1232 = arith.mulf %1040, %1231 : vector<7x2xf32>
    %1233 = arith.addf %1230, %1232 : vector<7x2xf32>
    %1234 = vector.broadcast %12 : f32 to vector<7x2xf32>
    %1235 = arith.mulf %1046, %1234 : vector<7x2xf32>
    %1236 = arith.addf %1233, %1235 : vector<7x2xf32>
    %1237 = vector.broadcast %13 : f32 to vector<7x2xf32>
    %1238 = arith.mulf %1050, %1237 : vector<7x2xf32>
    %1239 = arith.addf %1236, %1238 : vector<7x2xf32>
    %1240 = vector.broadcast %14 : f32 to vector<7x2xf32>
    %1241 = arith.mulf %1048, %1240 : vector<7x2xf32>
    %1242 = arith.addf %1239, %1241 : vector<7x2xf32>
    %1243 = vector.broadcast %15 : f32 to vector<7x2xf32>
    %1244 = arith.mulf %1054, %1243 : vector<7x2xf32>
    %1245 = arith.addf %1242, %1244 : vector<7x2xf32>
    %1246 = vector.broadcast %16 : f32 to vector<7x2xf32>
    %1247 = arith.mulf %1058, %1246 : vector<7x2xf32>
    %1248 = arith.addf %1245, %1247 : vector<7x2xf32>
    %1249 = vector.broadcast %17 : f32 to vector<7x2xf32>
    %1250 = arith.mulf %1056, %1249 : vector<7x2xf32>
    %1251 = arith.addf %1248, %1250 : vector<7x2xf32>
    %1252 = arith.maximumf %1225, %1251 : vector<7x2xf32>
    %1253 = vector.broadcast %9 : f32 to vector<7x2xf32>
    %1254 = arith.mulf %1042, %1253 : vector<7x2xf32>
    %1255 = vector.broadcast %10 : f32 to vector<7x2xf32>
    %1256 = arith.mulf %1040, %1255 : vector<7x2xf32>
    %1257 = arith.addf %1254, %1256 : vector<7x2xf32>
    %1258 = vector.broadcast %11 : f32 to vector<7x2xf32>
    %1259 = arith.mulf %1044, %1258 : vector<7x2xf32>
    %1260 = arith.addf %1257, %1259 : vector<7x2xf32>
    %1261 = vector.broadcast %12 : f32 to vector<7x2xf32>
    %1262 = arith.mulf %1050, %1261 : vector<7x2xf32>
    %1263 = arith.addf %1260, %1262 : vector<7x2xf32>
    %1264 = vector.broadcast %13 : f32 to vector<7x2xf32>
    %1265 = arith.mulf %1048, %1264 : vector<7x2xf32>
    %1266 = arith.addf %1263, %1265 : vector<7x2xf32>
    %1267 = vector.broadcast %14 : f32 to vector<7x2xf32>
    %1268 = arith.mulf %1052, %1267 : vector<7x2xf32>
    %1269 = arith.addf %1266, %1268 : vector<7x2xf32>
    %1270 = vector.broadcast %15 : f32 to vector<7x2xf32>
    %1271 = arith.mulf %1058, %1270 : vector<7x2xf32>
    %1272 = arith.addf %1269, %1271 : vector<7x2xf32>
    %1273 = vector.broadcast %16 : f32 to vector<7x2xf32>
    %1274 = arith.mulf %1056, %1273 : vector<7x2xf32>
    %1275 = arith.addf %1272, %1274 : vector<7x2xf32>
    %1276 = vector.broadcast %17 : f32 to vector<7x2xf32>
    %1277 = arith.mulf %1060, %1276 : vector<7x2xf32>
    %1278 = arith.addf %1275, %1277 : vector<7x2xf32>
    %1279 = arith.maximumf %1252, %1278 : vector<7x2xf32>
    %1280 = vector.broadcast %37 : f32 to vector<7x2xf32>
    %1281 = arith.addf %1279, %1280 : vector<7x2xf32>
    %cst_260 = arith.constant 0.000000e+00 : f32
    %1282 = vector.broadcast %cst_260 : f32 to vector<7x2xf32>
    %1283 = arith.maximumf %1281, %1282 : vector<7x2xf32>
    %c72 = arith.constant 72 : index
    %c0_261 = arith.constant 0 : index
    %1284 = vector.load %arg10[%c72, %c0_261] : memref<224x2xf32, #tpu.memory_space<vmem>>, vector<7x2xf32>
    tpu.vector_store %arg10[%c72, %c0_261], %1283 {strides = array<i32>} : memref<224x2xf32, #tpu.memory_space<vmem>>, vector<7x2xf32>,
    %1285 = vector.broadcast %18 : f32 to vector<7x2xf32>
    %1286 = arith.mulf %1030, %1285 : vector<7x2xf32>
    %1287 = vector.broadcast %19 : f32 to vector<7x2xf32>
    %1288 = arith.mulf %1034, %1287 : vector<7x2xf32>
    %1289 = arith.addf %1286, %1288 : vector<7x2xf32>
    %1290 = vector.broadcast %20 : f32 to vector<7x2xf32>
    %1291 = arith.mulf %1032, %1290 : vector<7x2xf32>
    %1292 = arith.addf %1289, %1291 : vector<7x2xf32>
    %1293 = vector.broadcast %21 : f32 to vector<7x2xf32>
    %1294 = arith.mulf %1038, %1293 : vector<7x2xf32>
    %1295 = arith.addf %1292, %1294 : vector<7x2xf32>
    %1296 = vector.broadcast %22 : f32 to vector<7x2xf32>
    %1297 = arith.mulf %1042, %1296 : vector<7x2xf32>
    %1298 = arith.addf %1295, %1297 : vector<7x2xf32>
    %1299 = vector.broadcast %23 : f32 to vector<7x2xf32>
    %1300 = arith.mulf %1040, %1299 : vector<7x2xf32>
    %1301 = arith.addf %1298, %1300 : vector<7x2xf32>
    %1302 = vector.broadcast %24 : f32 to vector<7x2xf32>
    %1303 = arith.mulf %1046, %1302 : vector<7x2xf32>
    %1304 = arith.addf %1301, %1303 : vector<7x2xf32>
    %1305 = vector.broadcast %25 : f32 to vector<7x2xf32>
    %1306 = arith.mulf %1050, %1305 : vector<7x2xf32>
    %1307 = arith.addf %1304, %1306 : vector<7x2xf32>
    %1308 = vector.broadcast %26 : f32 to vector<7x2xf32>
    %1309 = arith.mulf %1048, %1308 : vector<7x2xf32>
    %1310 = arith.addf %1307, %1309 : vector<7x2xf32>
    %1311 = vector.broadcast %18 : f32 to vector<7x2xf32>
    %1312 = arith.mulf %1034, %1311 : vector<7x2xf32>
    %1313 = vector.broadcast %19 : f32 to vector<7x2xf32>
    %1314 = arith.mulf %1032, %1313 : vector<7x2xf32>
    %1315 = arith.addf %1312, %1314 : vector<7x2xf32>
    %1316 = vector.broadcast %20 : f32 to vector<7x2xf32>
    %1317 = arith.mulf %1036, %1316 : vector<7x2xf32>
    %1318 = arith.addf %1315, %1317 : vector<7x2xf32>
    %1319 = vector.broadcast %21 : f32 to vector<7x2xf32>
    %1320 = arith.mulf %1042, %1319 : vector<7x2xf32>
    %1321 = arith.addf %1318, %1320 : vector<7x2xf32>
    %1322 = vector.broadcast %22 : f32 to vector<7x2xf32>
    %1323 = arith.mulf %1040, %1322 : vector<7x2xf32>
    %1324 = arith.addf %1321, %1323 : vector<7x2xf32>
    %1325 = vector.broadcast %23 : f32 to vector<7x2xf32>
    %1326 = arith.mulf %1044, %1325 : vector<7x2xf32>
    %1327 = arith.addf %1324, %1326 : vector<7x2xf32>
    %1328 = vector.broadcast %24 : f32 to vector<7x2xf32>
    %1329 = arith.mulf %1050, %1328 : vector<7x2xf32>
    %1330 = arith.addf %1327, %1329 : vector<7x2xf32>
    %1331 = vector.broadcast %25 : f32 to vector<7x2xf32>
    %1332 = arith.mulf %1048, %1331 : vector<7x2xf32>
    %1333 = arith.addf %1330, %1332 : vector<7x2xf32>
    %1334 = vector.broadcast %26 : f32 to vector<7x2xf32>
    %1335 = arith.mulf %1052, %1334 : vector<7x2xf32>
    %1336 = arith.addf %1333, %1335 : vector<7x2xf32>
    %1337 = arith.maximumf %1310, %1336 : vector<7x2xf32>
    %1338 = vector.broadcast %18 : f32 to vector<7x2xf32>
    %1339 = arith.mulf %1038, %1338 : vector<7x2xf32>
    %1340 = vector.broadcast %19 : f32 to vector<7x2xf32>
    %1341 = arith.mulf %1042, %1340 : vector<7x2xf32>
    %1342 = arith.addf %1339, %1341 : vector<7x2xf32>
    %1343 = vector.broadcast %20 : f32 to vector<7x2xf32>
    %1344 = arith.mulf %1040, %1343 : vector<7x2xf32>
    %1345 = arith.addf %1342, %1344 : vector<7x2xf32>
    %1346 = vector.broadcast %21 : f32 to vector<7x2xf32>
    %1347 = arith.mulf %1046, %1346 : vector<7x2xf32>
    %1348 = arith.addf %1345, %1347 : vector<7x2xf32>
    %1349 = vector.broadcast %22 : f32 to vector<7x2xf32>
    %1350 = arith.mulf %1050, %1349 : vector<7x2xf32>
    %1351 = arith.addf %1348, %1350 : vector<7x2xf32>
    %1352 = vector.broadcast %23 : f32 to vector<7x2xf32>
    %1353 = arith.mulf %1048, %1352 : vector<7x2xf32>
    %1354 = arith.addf %1351, %1353 : vector<7x2xf32>
    %1355 = vector.broadcast %24 : f32 to vector<7x2xf32>
    %1356 = arith.mulf %1054, %1355 : vector<7x2xf32>
    %1357 = arith.addf %1354, %1356 : vector<7x2xf32>
    %1358 = vector.broadcast %25 : f32 to vector<7x2xf32>
    %1359 = arith.mulf %1058, %1358 : vector<7x2xf32>
    %1360 = arith.addf %1357, %1359 : vector<7x2xf32>
    %1361 = vector.broadcast %26 : f32 to vector<7x2xf32>
    %1362 = arith.mulf %1056, %1361 : vector<7x2xf32>
    %1363 = arith.addf %1360, %1362 : vector<7x2xf32>
    %1364 = arith.maximumf %1337, %1363 : vector<7x2xf32>
    %1365 = vector.broadcast %18 : f32 to vector<7x2xf32>
    %1366 = arith.mulf %1042, %1365 : vector<7x2xf32>
    %1367 = vector.broadcast %19 : f32 to vector<7x2xf32>
    %1368 = arith.mulf %1040, %1367 : vector<7x2xf32>
    %1369 = arith.addf %1366, %1368 : vector<7x2xf32>
    %1370 = vector.broadcast %20 : f32 to vector<7x2xf32>
    %1371 = arith.mulf %1044, %1370 : vector<7x2xf32>
    %1372 = arith.addf %1369, %1371 : vector<7x2xf32>
    %1373 = vector.broadcast %21 : f32 to vector<7x2xf32>
    %1374 = arith.mulf %1050, %1373 : vector<7x2xf32>
    %1375 = arith.addf %1372, %1374 : vector<7x2xf32>
    %1376 = vector.broadcast %22 : f32 to vector<7x2xf32>
    %1377 = arith.mulf %1048, %1376 : vector<7x2xf32>
    %1378 = arith.addf %1375, %1377 : vector<7x2xf32>
    %1379 = vector.broadcast %23 : f32 to vector<7x2xf32>
    %1380 = arith.mulf %1052, %1379 : vector<7x2xf32>
    %1381 = arith.addf %1378, %1380 : vector<7x2xf32>
    %1382 = vector.broadcast %24 : f32 to vector<7x2xf32>
    %1383 = arith.mulf %1058, %1382 : vector<7x2xf32>
    %1384 = arith.addf %1381, %1383 : vector<7x2xf32>
    %1385 = vector.broadcast %25 : f32 to vector<7x2xf32>
    %1386 = arith.mulf %1056, %1385 : vector<7x2xf32>
    %1387 = arith.addf %1384, %1386 : vector<7x2xf32>
    %1388 = vector.broadcast %26 : f32 to vector<7x2xf32>
    %1389 = arith.mulf %1060, %1388 : vector<7x2xf32>
    %1390 = arith.addf %1387, %1389 : vector<7x2xf32>
    %1391 = arith.maximumf %1364, %1390 : vector<7x2xf32>
    %1392 = vector.broadcast %38 : f32 to vector<7x2xf32>
    %1393 = arith.addf %1391, %1392 : vector<7x2xf32>
    %cst_262 = arith.constant 0.000000e+00 : f32
    %1394 = vector.broadcast %cst_262 : f32 to vector<7x2xf32>
    %1395 = arith.maximumf %1393, %1394 : vector<7x2xf32>
    %c128 = arith.constant 128 : index
    %c0_263 = arith.constant 0 : index
    %1396 = vector.load %arg10[%c128, %c0_263] : memref<224x2xf32, #tpu.memory_space<vmem>>, vector<7x2xf32>
    tpu.vector_store %arg10[%c128, %c0_263], %1395 {strides = array<i32>} : memref<224x2xf32, #tpu.memory_space<vmem>>, vector<7x2xf32>,
    %1397 = vector.broadcast %27 : f32 to vector<7x2xf32>
    %1398 = arith.mulf %1030, %1397 : vector<7x2xf32>
    %1399 = vector.broadcast %28 : f32 to vector<7x2xf32>
    %1400 = arith.mulf %1034, %1399 : vector<7x2xf32>
    %1401 = arith.addf %1398, %1400 : vector<7x2xf32>
    %1402 = vector.broadcast %29 : f32 to vector<7x2xf32>
    %1403 = arith.mulf %1032, %1402 : vector<7x2xf32>
    %1404 = arith.addf %1401, %1403 : vector<7x2xf32>
    %1405 = vector.broadcast %30 : f32 to vector<7x2xf32>
    %1406 = arith.mulf %1038, %1405 : vector<7x2xf32>
    %1407 = arith.addf %1404, %1406 : vector<7x2xf32>
    %1408 = vector.broadcast %31 : f32 to vector<7x2xf32>
    %1409 = arith.mulf %1042, %1408 : vector<7x2xf32>
    %1410 = arith.addf %1407, %1409 : vector<7x2xf32>
    %1411 = vector.broadcast %32 : f32 to vector<7x2xf32>
    %1412 = arith.mulf %1040, %1411 : vector<7x2xf32>
    %1413 = arith.addf %1410, %1412 : vector<7x2xf32>
    %1414 = vector.broadcast %33 : f32 to vector<7x2xf32>
    %1415 = arith.mulf %1046, %1414 : vector<7x2xf32>
    %1416 = arith.addf %1413, %1415 : vector<7x2xf32>
    %1417 = vector.broadcast %34 : f32 to vector<7x2xf32>
    %1418 = arith.mulf %1050, %1417 : vector<7x2xf32>
    %1419 = arith.addf %1416, %1418 : vector<7x2xf32>
    %1420 = vector.broadcast %35 : f32 to vector<7x2xf32>
    %1421 = arith.mulf %1048, %1420 : vector<7x2xf32>
    %1422 = arith.addf %1419, %1421 : vector<7x2xf32>
    %1423 = vector.broadcast %27 : f32 to vector<7x2xf32>
    %1424 = arith.mulf %1034, %1423 : vector<7x2xf32>
    %1425 = vector.broadcast %28 : f32 to vector<7x2xf32>
    %1426 = arith.mulf %1032, %1425 : vector<7x2xf32>
    %1427 = arith.addf %1424, %1426 : vector<7x2xf32>
    %1428 = vector.broadcast %29 : f32 to vector<7x2xf32>
    %1429 = arith.mulf %1036, %1428 : vector<7x2xf32>
    %1430 = arith.addf %1427, %1429 : vector<7x2xf32>
    %1431 = vector.broadcast %30 : f32 to vector<7x2xf32>
    %1432 = arith.mulf %1042, %1431 : vector<7x2xf32>
    %1433 = arith.addf %1430, %1432 : vector<7x2xf32>
    %1434 = vector.broadcast %31 : f32 to vector<7x2xf32>
    %1435 = arith.mulf %1040, %1434 : vector<7x2xf32>
    %1436 = arith.addf %1433, %1435 : vector<7x2xf32>
    %1437 = vector.broadcast %32 : f32 to vector<7x2xf32>
    %1438 = arith.mulf %1044, %1437 : vector<7x2xf32>
    %1439 = arith.addf %1436, %1438 : vector<7x2xf32>
    %1440 = vector.broadcast %33 : f32 to vector<7x2xf32>
    %1441 = arith.mulf %1050, %1440 : vector<7x2xf32>
    %1442 = arith.addf %1439, %1441 : vector<7x2xf32>
    %1443 = vector.broadcast %34 : f32 to vector<7x2xf32>
    %1444 = arith.mulf %1048, %1443 : vector<7x2xf32>
    %1445 = arith.addf %1442, %1444 : vector<7x2xf32>
    %1446 = vector.broadcast %35 : f32 to vector<7x2xf32>
    %1447 = arith.mulf %1052, %1446 : vector<7x2xf32>
    %1448 = arith.addf %1445, %1447 : vector<7x2xf32>
    %1449 = arith.maximumf %1422, %1448 : vector<7x2xf32>
    %1450 = vector.broadcast %27 : f32 to vector<7x2xf32>
    %1451 = arith.mulf %1038, %1450 : vector<7x2xf32>
    %1452 = vector.broadcast %28 : f32 to vector<7x2xf32>
    %1453 = arith.mulf %1042, %1452 : vector<7x2xf32>
    %1454 = arith.addf %1451, %1453 : vector<7x2xf32>
    %1455 = vector.broadcast %29 : f32 to vector<7x2xf32>
    %1456 = arith.mulf %1040, %1455 : vector<7x2xf32>
    %1457 = arith.addf %1454, %1456 : vector<7x2xf32>
    %1458 = vector.broadcast %30 : f32 to vector<7x2xf32>
    %1459 = arith.mulf %1046, %1458 : vector<7x2xf32>
    %1460 = arith.addf %1457, %1459 : vector<7x2xf32>
    %1461 = vector.broadcast %31 : f32 to vector<7x2xf32>
    %1462 = arith.mulf %1050, %1461 : vector<7x2xf32>
    %1463 = arith.addf %1460, %1462 : vector<7x2xf32>
    %1464 = vector.broadcast %32 : f32 to vector<7x2xf32>
    %1465 = arith.mulf %1048, %1464 : vector<7x2xf32>
    %1466 = arith.addf %1463, %1465 : vector<7x2xf32>
    %1467 = vector.broadcast %33 : f32 to vector<7x2xf32>
    %1468 = arith.mulf %1054, %1467 : vector<7x2xf32>
    %1469 = arith.addf %1466, %1468 : vector<7x2xf32>
    %1470 = vector.broadcast %34 : f32 to vector<7x2xf32>
    %1471 = arith.mulf %1058, %1470 : vector<7x2xf32>
    %1472 = arith.addf %1469, %1471 : vector<7x2xf32>
    %1473 = vector.broadcast %35 : f32 to vector<7x2xf32>
    %1474 = arith.mulf %1056, %1473 : vector<7x2xf32>
    %1475 = arith.addf %1472, %1474 : vector<7x2xf32>
    %1476 = arith.maximumf %1449, %1475 : vector<7x2xf32>
    %1477 = vector.broadcast %27 : f32 to vector<7x2xf32>
    %1478 = arith.mulf %1042, %1477 : vector<7x2xf32>
    %1479 = vector.broadcast %28 : f32 to vector<7x2xf32>
    %1480 = arith.mulf %1040, %1479 : vector<7x2xf32>
    %1481 = arith.addf %1478, %1480 : vector<7x2xf32>
    %1482 = vector.broadcast %29 : f32 to vector<7x2xf32>
    %1483 = arith.mulf %1044, %1482 : vector<7x2xf32>
    %1484 = arith.addf %1481, %1483 : vector<7x2xf32>
    %1485 = vector.broadcast %30 : f32 to vector<7x2xf32>
    %1486 = arith.mulf %1050, %1485 : vector<7x2xf32>
    %1487 = arith.addf %1484, %1486 : vector<7x2xf32>
    %1488 = vector.broadcast %31 : f32 to vector<7x2xf32>
    %1489 = arith.mulf %1048, %1488 : vector<7x2xf32>
    %1490 = arith.addf %1487, %1489 : vector<7x2xf32>
    %1491 = vector.broadcast %32 : f32 to vector<7x2xf32>
    %1492 = arith.mulf %1052, %1491 : vector<7x2xf32>
    %1493 = arith.addf %1490, %1492 : vector<7x2xf32>
    %1494 = vector.broadcast %33 : f32 to vector<7x2xf32>
    %1495 = arith.mulf %1058, %1494 : vector<7x2xf32>
    %1496 = arith.addf %1493, %1495 : vector<7x2xf32>
    %1497 = vector.broadcast %34 : f32 to vector<7x2xf32>
    %1498 = arith.mulf %1056, %1497 : vector<7x2xf32>
    %1499 = arith.addf %1496, %1498 : vector<7x2xf32>
    %1500 = vector.broadcast %35 : f32 to vector<7x2xf32>
    %1501 = arith.mulf %1060, %1500 : vector<7x2xf32>
    %1502 = arith.addf %1499, %1501 : vector<7x2xf32>
    %1503 = arith.maximumf %1476, %1502 : vector<7x2xf32>
    %1504 = vector.broadcast %39 : f32 to vector<7x2xf32>
    %1505 = arith.addf %1503, %1504 : vector<7x2xf32>
    %cst_264 = arith.constant 0.000000e+00 : f32
    %1506 = vector.broadcast %cst_264 : f32 to vector<7x2xf32>
    %1507 = arith.maximumf %1505, %1506 : vector<7x2xf32>
    %c184 = arith.constant 184 : index
    %c0_265 = arith.constant 0 : index
    %1508 = vector.load %arg10[%c184, %c0_265] : memref<224x2xf32, #tpu.memory_space<vmem>>, vector<7x2xf32>
    tpu.vector_store %arg10[%c184, %c0_265], %1507 {strides = array<i32>} : memref<224x2xf32, #tpu.memory_space<vmem>>, vector<7x2xf32>,
    %c6_266 = arith.constant 6 : index
    %c0_267 = arith.constant 0 : index
    %c0_268 = arith.constant 0 : index
    %1509 = vector.load %arg3[%c6_266, %c0_267, %c0_268] : memref<16x8x2xf32, #tpu.memory_space<vmem>>, vector<1x7x2xf32>
    %1510 = vector.shape_cast %1509 : vector<1x7x2xf32> to vector<7x2xf32>
    %c6_269 = arith.constant 6 : index
    %c1_270 = arith.constant 1 : index
    %c0_271 = arith.constant 0 : index
    %1511 = vector.load %arg3[%c6_269, %c1_270, %c0_271] : memref<16x8x2xf32, #tpu.memory_space<vmem>>, vector<1x7x2xf32>
    %1512 = vector.shape_cast %1511 : vector<1x7x2xf32> to vector<7x2xf32>
    %c6_272 = arith.constant 6 : index
    %c0_273 = arith.constant 0 : index
    %c0_274 = arith.constant 0 : index
    %1513 = vector.load %arg4[%c6_272, %c0_273, %c0_274] : memref<16x8x2xf32, #tpu.memory_space<vmem>>, vector<1x7x2xf32>
    %1514 = vector.shape_cast %1513 : vector<1x7x2xf32> to vector<7x2xf32>
    %c6_275 = arith.constant 6 : index
    %c1_276 = arith.constant 1 : index
    %c0_277 = arith.constant 0 : index
    %1515 = vector.load %arg4[%c6_275, %c1_276, %c0_277] : memref<16x8x2xf32, #tpu.memory_space<vmem>>, vector<1x7x2xf32>
    %1516 = vector.shape_cast %1515 : vector<1x7x2xf32> to vector<7x2xf32>
    %c7_278 = arith.constant 7 : index
    %c0_279 = arith.constant 0 : index
    %c0_280 = arith.constant 0 : index
    %1517 = vector.load %arg3[%c7_278, %c0_279, %c0_280] : memref<16x8x2xf32, #tpu.memory_space<vmem>>, vector<1x7x2xf32>
    %1518 = vector.shape_cast %1517 : vector<1x7x2xf32> to vector<7x2xf32>
    %c7_281 = arith.constant 7 : index
    %c1_282 = arith.constant 1 : index
    %c0_283 = arith.constant 0 : index
    %1519 = vector.load %arg3[%c7_281, %c1_282, %c0_283] : memref<16x8x2xf32, #tpu.memory_space<vmem>>, vector<1x7x2xf32>
    %1520 = vector.shape_cast %1519 : vector<1x7x2xf32> to vector<7x2xf32>
    %c7_284 = arith.constant 7 : index
    %c0_285 = arith.constant 0 : index
    %c0_286 = arith.constant 0 : index
    %1521 = vector.load %arg4[%c7_284, %c0_285, %c0_286] : memref<16x8x2xf32, #tpu.memory_space<vmem>>, vector<1x7x2xf32>
    %1522 = vector.shape_cast %1521 : vector<1x7x2xf32> to vector<7x2xf32>
    %c7_287 = arith.constant 7 : index
    %c1_288 = arith.constant 1 : index
    %c0_289 = arith.constant 0 : index
    %1523 = vector.load %arg4[%c7_287, %c1_288, %c0_289] : memref<16x8x2xf32, #tpu.memory_space<vmem>>, vector<1x7x2xf32>
    %1524 = vector.shape_cast %1523 : vector<1x7x2xf32> to vector<7x2xf32>
    %c8_290 = arith.constant 8 : index
    %c0_291 = arith.constant 0 : index
    %c0_292 = arith.constant 0 : index
    %1525 = vector.load %arg3[%c8_290, %c0_291, %c0_292] : memref<16x8x2xf32, #tpu.memory_space<vmem>>, vector<1x7x2xf32>
    %1526 = vector.shape_cast %1525 : vector<1x7x2xf32> to vector<7x2xf32>
    %c8_293 = arith.constant 8 : index
    %c1_294 = arith.constant 1 : index
    %c0_295 = arith.constant 0 : index
    %1527 = vector.load %arg3[%c8_293, %c1_294, %c0_295] : memref<16x8x2xf32, #tpu.memory_space<vmem>>, vector<1x7x2xf32>
    %1528 = vector.shape_cast %1527 : vector<1x7x2xf32> to vector<7x2xf32>
    %c8_296 = arith.constant 8 : index
    %c0_297 = arith.constant 0 : index
    %c0_298 = arith.constant 0 : index
    %1529 = vector.load %arg4[%c8_296, %c0_297, %c0_298] : memref<16x8x2xf32, #tpu.memory_space<vmem>>, vector<1x7x2xf32>
    %1530 = vector.shape_cast %1529 : vector<1x7x2xf32> to vector<7x2xf32>
    %c8_299 = arith.constant 8 : index
    %c1_300 = arith.constant 1 : index
    %c0_301 = arith.constant 0 : index
    %1531 = vector.load %arg4[%c8_299, %c1_300, %c0_301] : memref<16x8x2xf32, #tpu.memory_space<vmem>>, vector<1x7x2xf32>
    %1532 = vector.shape_cast %1531 : vector<1x7x2xf32> to vector<7x2xf32>
    %c9 = arith.constant 9 : index
    %c0_302 = arith.constant 0 : index
    %c0_303 = arith.constant 0 : index
    %1533 = vector.load %arg3[%c9, %c0_302, %c0_303] : memref<16x8x2xf32, #tpu.memory_space<vmem>>, vector<1x7x2xf32>
    %1534 = vector.shape_cast %1533 : vector<1x7x2xf32> to vector<7x2xf32>
    %c9_304 = arith.constant 9 : index
    %c1_305 = arith.constant 1 : index
    %c0_306 = arith.constant 0 : index
    %1535 = vector.load %arg3[%c9_304, %c1_305, %c0_306] : memref<16x8x2xf32, #tpu.memory_space<vmem>>, vector<1x7x2xf32>
    %1536 = vector.shape_cast %1535 : vector<1x7x2xf32> to vector<7x2xf32>
    %c9_307 = arith.constant 9 : index
    %c0_308 = arith.constant 0 : index
    %c0_309 = arith.constant 0 : index
    %1537 = vector.load %arg4[%c9_307, %c0_308, %c0_309] : memref<16x8x2xf32, #tpu.memory_space<vmem>>, vector<1x7x2xf32>
    %1538 = vector.shape_cast %1537 : vector<1x7x2xf32> to vector<7x2xf32>
    %c9_310 = arith.constant 9 : index
    %c1_311 = arith.constant 1 : index
    %c0_312 = arith.constant 0 : index
    %1539 = vector.load %arg4[%c9_310, %c1_311, %c0_312] : memref<16x8x2xf32, #tpu.memory_space<vmem>>, vector<1x7x2xf32>
    %1540 = vector.shape_cast %1539 : vector<1x7x2xf32> to vector<7x2xf32>
    %1541 = vector.broadcast %0 : f32 to vector<7x2xf32>
    %1542 = arith.mulf %1510, %1541 : vector<7x2xf32>
    %1543 = vector.broadcast %1 : f32 to vector<7x2xf32>
    %1544 = arith.mulf %1514, %1543 : vector<7x2xf32>
    %1545 = arith.addf %1542, %1544 : vector<7x2xf32>
    %1546 = vector.broadcast %2 : f32 to vector<7x2xf32>
    %1547 = arith.mulf %1512, %1546 : vector<7x2xf32>
    %1548 = arith.addf %1545, %1547 : vector<7x2xf32>
    %1549 = vector.broadcast %3 : f32 to vector<7x2xf32>
    %1550 = arith.mulf %1518, %1549 : vector<7x2xf32>
    %1551 = arith.addf %1548, %1550 : vector<7x2xf32>
    %1552 = vector.broadcast %4 : f32 to vector<7x2xf32>
    %1553 = arith.mulf %1522, %1552 : vector<7x2xf32>
    %1554 = arith.addf %1551, %1553 : vector<7x2xf32>
    %1555 = vector.broadcast %5 : f32 to vector<7x2xf32>
    %1556 = arith.mulf %1520, %1555 : vector<7x2xf32>
    %1557 = arith.addf %1554, %1556 : vector<7x2xf32>
    %1558 = vector.broadcast %6 : f32 to vector<7x2xf32>
    %1559 = arith.mulf %1526, %1558 : vector<7x2xf32>
    %1560 = arith.addf %1557, %1559 : vector<7x2xf32>
    %1561 = vector.broadcast %7 : f32 to vector<7x2xf32>
    %1562 = arith.mulf %1530, %1561 : vector<7x2xf32>
    %1563 = arith.addf %1560, %1562 : vector<7x2xf32>
    %1564 = vector.broadcast %8 : f32 to vector<7x2xf32>
    %1565 = arith.mulf %1528, %1564 : vector<7x2xf32>
    %1566 = arith.addf %1563, %1565 : vector<7x2xf32>
    %1567 = vector.broadcast %0 : f32 to vector<7x2xf32>
    %1568 = arith.mulf %1514, %1567 : vector<7x2xf32>
    %1569 = vector.broadcast %1 : f32 to vector<7x2xf32>
    %1570 = arith.mulf %1512, %1569 : vector<7x2xf32>
    %1571 = arith.addf %1568, %1570 : vector<7x2xf32>
    %1572 = vector.broadcast %2 : f32 to vector<7x2xf32>
    %1573 = arith.mulf %1516, %1572 : vector<7x2xf32>
    %1574 = arith.addf %1571, %1573 : vector<7x2xf32>
    %1575 = vector.broadcast %3 : f32 to vector<7x2xf32>
    %1576 = arith.mulf %1522, %1575 : vector<7x2xf32>
    %1577 = arith.addf %1574, %1576 : vector<7x2xf32>
    %1578 = vector.broadcast %4 : f32 to vector<7x2xf32>
    %1579 = arith.mulf %1520, %1578 : vector<7x2xf32>
    %1580 = arith.addf %1577, %1579 : vector<7x2xf32>
    %1581 = vector.broadcast %5 : f32 to vector<7x2xf32>
    %1582 = arith.mulf %1524, %1581 : vector<7x2xf32>
    %1583 = arith.addf %1580, %1582 : vector<7x2xf32>
    %1584 = vector.broadcast %6 : f32 to vector<7x2xf32>
    %1585 = arith.mulf %1530, %1584 : vector<7x2xf32>
    %1586 = arith.addf %1583, %1585 : vector<7x2xf32>
    %1587 = vector.broadcast %7 : f32 to vector<7x2xf32>
    %1588 = arith.mulf %1528, %1587 : vector<7x2xf32>
    %1589 = arith.addf %1586, %1588 : vector<7x2xf32>
    %1590 = vector.broadcast %8 : f32 to vector<7x2xf32>
    %1591 = arith.mulf %1532, %1590 : vector<7x2xf32>
    %1592 = arith.addf %1589, %1591 : vector<7x2xf32>
    %1593 = arith.maximumf %1566, %1592 : vector<7x2xf32>
    %1594 = vector.broadcast %0 : f32 to vector<7x2xf32>
    %1595 = arith.mulf %1518, %1594 : vector<7x2xf32>
    %1596 = vector.broadcast %1 : f32 to vector<7x2xf32>
    %1597 = arith.mulf %1522, %1596 : vector<7x2xf32>
    %1598 = arith.addf %1595, %1597 : vector<7x2xf32>
    %1599 = vector.broadcast %2 : f32 to vector<7x2xf32>
    %1600 = arith.mulf %1520, %1599 : vector<7x2xf32>
    %1601 = arith.addf %1598, %1600 : vector<7x2xf32>
    %1602 = vector.broadcast %3 : f32 to vector<7x2xf32>
    %1603 = arith.mulf %1526, %1602 : vector<7x2xf32>
    %1604 = arith.addf %1601, %1603 : vector<7x2xf32>
    %1605 = vector.broadcast %4 : f32 to vector<7x2xf32>
    %1606 = arith.mulf %1530, %1605 : vector<7x2xf32>
    %1607 = arith.addf %1604, %1606 : vector<7x2xf32>
    %1608 = vector.broadcast %5 : f32 to vector<7x2xf32>
    %1609 = arith.mulf %1528, %1608 : vector<7x2xf32>
    %1610 = arith.addf %1607, %1609 : vector<7x2xf32>
    %1611 = vector.broadcast %6 : f32 to vector<7x2xf32>
    %1612 = arith.mulf %1534, %1611 : vector<7x2xf32>
    %1613 = arith.addf %1610, %1612 : vector<7x2xf32>
    %1614 = vector.broadcast %7 : f32 to vector<7x2xf32>
    %1615 = arith.mulf %1538, %1614 : vector<7x2xf32>
    %1616 = arith.addf %1613, %1615 : vector<7x2xf32>
    %1617 = vector.broadcast %8 : f32 to vector<7x2xf32>
    %1618 = arith.mulf %1536, %1617 : vector<7x2xf32>
    %1619 = arith.addf %1616, %1618 : vector<7x2xf32>
    %1620 = arith.maximumf %1593, %1619 : vector<7x2xf32>
    %1621 = vector.broadcast %0 : f32 to vector<7x2xf32>
    %1622 = arith.mulf %1522, %1621 : vector<7x2xf32>
    %1623 = vector.broadcast %1 : f32 to vector<7x2xf32>
    %1624 = arith.mulf %1520, %1623 : vector<7x2xf32>
    %1625 = arith.addf %1622, %1624 : vector<7x2xf32>
    %1626 = vector.broadcast %2 : f32 to vector<7x2xf32>
    %1627 = arith.mulf %1524, %1626 : vector<7x2xf32>
    %1628 = arith.addf %1625, %1627 : vector<7x2xf32>
    %1629 = vector.broadcast %3 : f32 to vector<7x2xf32>
    %1630 = arith.mulf %1530, %1629 : vector<7x2xf32>
    %1631 = arith.addf %1628, %1630 : vector<7x2xf32>
    %1632 = vector.broadcast %4 : f32 to vector<7x2xf32>
    %1633 = arith.mulf %1528, %1632 : vector<7x2xf32>
    %1634 = arith.addf %1631, %1633 : vector<7x2xf32>
    %1635 = vector.broadcast %5 : f32 to vector<7x2xf32>
    %1636 = arith.mulf %1532, %1635 : vector<7x2xf32>
    %1637 = arith.addf %1634, %1636 : vector<7x2xf32>
    %1638 = vector.broadcast %6 : f32 to vector<7x2xf32>
    %1639 = arith.mulf %1538, %1638 : vector<7x2xf32>
    %1640 = arith.addf %1637, %1639 : vector<7x2xf32>
    %1641 = vector.broadcast %7 : f32 to vector<7x2xf32>
    %1642 = arith.mulf %1536, %1641 : vector<7x2xf32>
    %1643 = arith.addf %1640, %1642 : vector<7x2xf32>
    %1644 = vector.broadcast %8 : f32 to vector<7x2xf32>
    %1645 = arith.mulf %1540, %1644 : vector<7x2xf32>
    %1646 = arith.addf %1643, %1645 : vector<7x2xf32>
    %1647 = arith.maximumf %1620, %1646 : vector<7x2xf32>
    %1648 = vector.broadcast %36 : f32 to vector<7x2xf32>
    %1649 = arith.addf %1647, %1648 : vector<7x2xf32>
    %cst_313 = arith.constant 0.000000e+00 : f32
    %1650 = vector.broadcast %cst_313 : f32 to vector<7x2xf32>
    %1651 = arith.maximumf %1649, %1650 : vector<7x2xf32>
    %c24 = arith.constant 24 : index
    %c0_314 = arith.constant 0 : index
    %1652 = vector.load %arg10[%c24, %c0_314] : memref<224x2xf32, #tpu.memory_space<vmem>>, vector<7x2xf32>
    tpu.vector_store %arg10[%c24, %c0_314], %1651 {strides = array<i32>} : memref<224x2xf32, #tpu.memory_space<vmem>>, vector<7x2xf32>,
    %1653 = vector.broadcast %9 : f32 to vector<7x2xf32>
    %1654 = arith.mulf %1510, %1653 : vector<7x2xf32>
    %1655 = vector.broadcast %10 : f32 to vector<7x2xf32>
    %1656 = arith.mulf %1514, %1655 : vector<7x2xf32>
    %1657 = arith.addf %1654, %1656 : vector<7x2xf32>
    %1658 = vector.broadcast %11 : f32 to vector<7x2xf32>
    %1659 = arith.mulf %1512, %1658 : vector<7x2xf32>
    %1660 = arith.addf %1657, %1659 : vector<7x2xf32>
    %1661 = vector.broadcast %12 : f32 to vector<7x2xf32>
    %1662 = arith.mulf %1518, %1661 : vector<7x2xf32>
    %1663 = arith.addf %1660, %1662 : vector<7x2xf32>
    %1664 = vector.broadcast %13 : f32 to vector<7x2xf32>
    %1665 = arith.mulf %1522, %1664 : vector<7x2xf32>
    %1666 = arith.addf %1663, %1665 : vector<7x2xf32>
    %1667 = vector.broadcast %14 : f32 to vector<7x2xf32>
    %1668 = arith.mulf %1520, %1667 : vector<7x2xf32>
    %1669 = arith.addf %1666, %1668 : vector<7x2xf32>
    %1670 = vector.broadcast %15 : f32 to vector<7x2xf32>
    %1671 = arith.mulf %1526, %1670 : vector<7x2xf32>
    %1672 = arith.addf %1669, %1671 : vector<7x2xf32>
    %1673 = vector.broadcast %16 : f32 to vector<7x2xf32>
    %1674 = arith.mulf %1530, %1673 : vector<7x2xf32>
    %1675 = arith.addf %1672, %1674 : vector<7x2xf32>
    %1676 = vector.broadcast %17 : f32 to vector<7x2xf32>
    %1677 = arith.mulf %1528, %1676 : vector<7x2xf32>
    %1678 = arith.addf %1675, %1677 : vector<7x2xf32>
    %1679 = vector.broadcast %9 : f32 to vector<7x2xf32>
    %1680 = arith.mulf %1514, %1679 : vector<7x2xf32>
    %1681 = vector.broadcast %10 : f32 to vector<7x2xf32>
    %1682 = arith.mulf %1512, %1681 : vector<7x2xf32>
    %1683 = arith.addf %1680, %1682 : vector<7x2xf32>
    %1684 = vector.broadcast %11 : f32 to vector<7x2xf32>
    %1685 = arith.mulf %1516, %1684 : vector<7x2xf32>
    %1686 = arith.addf %1683, %1685 : vector<7x2xf32>
    %1687 = vector.broadcast %12 : f32 to vector<7x2xf32>
    %1688 = arith.mulf %1522, %1687 : vector<7x2xf32>
    %1689 = arith.addf %1686, %1688 : vector<7x2xf32>
    %1690 = vector.broadcast %13 : f32 to vector<7x2xf32>
    %1691 = arith.mulf %1520, %1690 : vector<7x2xf32>
    %1692 = arith.addf %1689, %1691 : vector<7x2xf32>
    %1693 = vector.broadcast %14 : f32 to vector<7x2xf32>
    %1694 = arith.mulf %1524, %1693 : vector<7x2xf32>
    %1695 = arith.addf %1692, %1694 : vector<7x2xf32>
    %1696 = vector.broadcast %15 : f32 to vector<7x2xf32>
    %1697 = arith.mulf %1530, %1696 : vector<7x2xf32>
    %1698 = arith.addf %1695, %1697 : vector<7x2xf32>
    %1699 = vector.broadcast %16 : f32 to vector<7x2xf32>
    %1700 = arith.mulf %1528, %1699 : vector<7x2xf32>
    %1701 = arith.addf %1698, %1700 : vector<7x2xf32>
    %1702 = vector.broadcast %17 : f32 to vector<7x2xf32>
    %1703 = arith.mulf %1532, %1702 : vector<7x2xf32>
    %1704 = arith.addf %1701, %1703 : vector<7x2xf32>
    %1705 = arith.maximumf %1678, %1704 : vector<7x2xf32>
    %1706 = vector.broadcast %9 : f32 to vector<7x2xf32>
    %1707 = arith.mulf %1518, %1706 : vector<7x2xf32>
    %1708 = vector.broadcast %10 : f32 to vector<7x2xf32>
    %1709 = arith.mulf %1522, %1708 : vector<7x2xf32>
    %1710 = arith.addf %1707, %1709 : vector<7x2xf32>
    %1711 = vector.broadcast %11 : f32 to vector<7x2xf32>
    %1712 = arith.mulf %1520, %1711 : vector<7x2xf32>
    %1713 = arith.addf %1710, %1712 : vector<7x2xf32>
    %1714 = vector.broadcast %12 : f32 to vector<7x2xf32>
    %1715 = arith.mulf %1526, %1714 : vector<7x2xf32>
    %1716 = arith.addf %1713, %1715 : vector<7x2xf32>
    %1717 = vector.broadcast %13 : f32 to vector<7x2xf32>
    %1718 = arith.mulf %1530, %1717 : vector<7x2xf32>
    %1719 = arith.addf %1716, %1718 : vector<7x2xf32>
    %1720 = vector.broadcast %14 : f32 to vector<7x2xf32>
    %1721 = arith.mulf %1528, %1720 : vector<7x2xf32>
    %1722 = arith.addf %1719, %1721 : vector<7x2xf32>
    %1723 = vector.broadcast %15 : f32 to vector<7x2xf32>
    %1724 = arith.mulf %1534, %1723 : vector<7x2xf32>
    %1725 = arith.addf %1722, %1724 : vector<7x2xf32>
    %1726 = vector.broadcast %16 : f32 to vector<7x2xf32>
    %1727 = arith.mulf %1538, %1726 : vector<7x2xf32>
    %1728 = arith.addf %1725, %1727 : vector<7x2xf32>
    %1729 = vector.broadcast %17 : f32 to vector<7x2xf32>
    %1730 = arith.mulf %1536, %1729 : vector<7x2xf32>
    %1731 = arith.addf %1728, %1730 : vector<7x2xf32>
    %1732 = arith.maximumf %1705, %1731 : vector<7x2xf32>
    %1733 = vector.broadcast %9 : f32 to vector<7x2xf32>
    %1734 = arith.mulf %1522, %1733 : vector<7x2xf32>
    %1735 = vector.broadcast %10 : f32 to vector<7x2xf32>
    %1736 = arith.mulf %1520, %1735 : vector<7x2xf32>
    %1737 = arith.addf %1734, %1736 : vector<7x2xf32>
    %1738 = vector.broadcast %11 : f32 to vector<7x2xf32>
    %1739 = arith.mulf %1524, %1738 : vector<7x2xf32>
    %1740 = arith.addf %1737, %1739 : vector<7x2xf32>
    %1741 = vector.broadcast %12 : f32 to vector<7x2xf32>
    %1742 = arith.mulf %1530, %1741 : vector<7x2xf32>
    %1743 = arith.addf %1740, %1742 : vector<7x2xf32>
    %1744 = vector.broadcast %13 : f32 to vector<7x2xf32>
    %1745 = arith.mulf %1528, %1744 : vector<7x2xf32>
    %1746 = arith.addf %1743, %1745 : vector<7x2xf32>
    %1747 = vector.broadcast %14 : f32 to vector<7x2xf32>
    %1748 = arith.mulf %1532, %1747 : vector<7x2xf32>
    %1749 = arith.addf %1746, %1748 : vector<7x2xf32>
    %1750 = vector.broadcast %15 : f32 to vector<7x2xf32>
    %1751 = arith.mulf %1538, %1750 : vector<7x2xf32>
    %1752 = arith.addf %1749, %1751 : vector<7x2xf32>
    %1753 = vector.broadcast %16 : f32 to vector<7x2xf32>
    %1754 = arith.mulf %1536, %1753 : vector<7x2xf32>
    %1755 = arith.addf %1752, %1754 : vector<7x2xf32>
    %1756 = vector.broadcast %17 : f32 to vector<7x2xf32>
    %1757 = arith.mulf %1540, %1756 : vector<7x2xf32>
    %1758 = arith.addf %1755, %1757 : vector<7x2xf32>
    %1759 = arith.maximumf %1732, %1758 : vector<7x2xf32>
    %1760 = vector.broadcast %37 : f32 to vector<7x2xf32>
    %1761 = arith.addf %1759, %1760 : vector<7x2xf32>
    %cst_315 = arith.constant 0.000000e+00 : f32
    %1762 = vector.broadcast %cst_315 : f32 to vector<7x2xf32>
    %1763 = arith.maximumf %1761, %1762 : vector<7x2xf32>
    %c80 = arith.constant 80 : index
    %c0_316 = arith.constant 0 : index
    %1764 = vector.load %arg10[%c80, %c0_316] : memref<224x2xf32, #tpu.memory_space<vmem>>, vector<7x2xf32>
    tpu.vector_store %arg10[%c80, %c0_316], %1763 {strides = array<i32>} : memref<224x2xf32, #tpu.memory_space<vmem>>, vector<7x2xf32>,
    %1765 = vector.broadcast %18 : f32 to vector<7x2xf32>
    %1766 = arith.mulf %1510, %1765 : vector<7x2xf32>
    %1767 = vector.broadcast %19 : f32 to vector<7x2xf32>
    %1768 = arith.mulf %1514, %1767 : vector<7x2xf32>
    %1769 = arith.addf %1766, %1768 : vector<7x2xf32>
    %1770 = vector.broadcast %20 : f32 to vector<7x2xf32>
    %1771 = arith.mulf %1512, %1770 : vector<7x2xf32>
    %1772 = arith.addf %1769, %1771 : vector<7x2xf32>
    %1773 = vector.broadcast %21 : f32 to vector<7x2xf32>
    %1774 = arith.mulf %1518, %1773 : vector<7x2xf32>
    %1775 = arith.addf %1772, %1774 : vector<7x2xf32>
    %1776 = vector.broadcast %22 : f32 to vector<7x2xf32>
    %1777 = arith.mulf %1522, %1776 : vector<7x2xf32>
    %1778 = arith.addf %1775, %1777 : vector<7x2xf32>
    %1779 = vector.broadcast %23 : f32 to vector<7x2xf32>
    %1780 = arith.mulf %1520, %1779 : vector<7x2xf32>
    %1781 = arith.addf %1778, %1780 : vector<7x2xf32>
    %1782 = vector.broadcast %24 : f32 to vector<7x2xf32>
    %1783 = arith.mulf %1526, %1782 : vector<7x2xf32>
    %1784 = arith.addf %1781, %1783 : vector<7x2xf32>
    %1785 = vector.broadcast %25 : f32 to vector<7x2xf32>
    %1786 = arith.mulf %1530, %1785 : vector<7x2xf32>
    %1787 = arith.addf %1784, %1786 : vector<7x2xf32>
    %1788 = vector.broadcast %26 : f32 to vector<7x2xf32>
    %1789 = arith.mulf %1528, %1788 : vector<7x2xf32>
    %1790 = arith.addf %1787, %1789 : vector<7x2xf32>
    %1791 = vector.broadcast %18 : f32 to vector<7x2xf32>
    %1792 = arith.mulf %1514, %1791 : vector<7x2xf32>
    %1793 = vector.broadcast %19 : f32 to vector<7x2xf32>
    %1794 = arith.mulf %1512, %1793 : vector<7x2xf32>
    %1795 = arith.addf %1792, %1794 : vector<7x2xf32>
    %1796 = vector.broadcast %20 : f32 to vector<7x2xf32>
    %1797 = arith.mulf %1516, %1796 : vector<7x2xf32>
    %1798 = arith.addf %1795, %1797 : vector<7x2xf32>
    %1799 = vector.broadcast %21 : f32 to vector<7x2xf32>
    %1800 = arith.mulf %1522, %1799 : vector<7x2xf32>
    %1801 = arith.addf %1798, %1800 : vector<7x2xf32>
    %1802 = vector.broadcast %22 : f32 to vector<7x2xf32>
    %1803 = arith.mulf %1520, %1802 : vector<7x2xf32>
    %1804 = arith.addf %1801, %1803 : vector<7x2xf32>
    %1805 = vector.broadcast %23 : f32 to vector<7x2xf32>
    %1806 = arith.mulf %1524, %1805 : vector<7x2xf32>
    %1807 = arith.addf %1804, %1806 : vector<7x2xf32>
    %1808 = vector.broadcast %24 : f32 to vector<7x2xf32>
    %1809 = arith.mulf %1530, %1808 : vector<7x2xf32>
    %1810 = arith.addf %1807, %1809 : vector<7x2xf32>
    %1811 = vector.broadcast %25 : f32 to vector<7x2xf32>
    %1812 = arith.mulf %1528, %1811 : vector<7x2xf32>
    %1813 = arith.addf %1810, %1812 : vector<7x2xf32>
    %1814 = vector.broadcast %26 : f32 to vector<7x2xf32>
    %1815 = arith.mulf %1532, %1814 : vector<7x2xf32>
    %1816 = arith.addf %1813, %1815 : vector<7x2xf32>
    %1817 = arith.maximumf %1790, %1816 : vector<7x2xf32>
    %1818 = vector.broadcast %18 : f32 to vector<7x2xf32>
    %1819 = arith.mulf %1518, %1818 : vector<7x2xf32>
    %1820 = vector.broadcast %19 : f32 to vector<7x2xf32>
    %1821 = arith.mulf %1522, %1820 : vector<7x2xf32>
    %1822 = arith.addf %1819, %1821 : vector<7x2xf32>
    %1823 = vector.broadcast %20 : f32 to vector<7x2xf32>
    %1824 = arith.mulf %1520, %1823 : vector<7x2xf32>
    %1825 = arith.addf %1822, %1824 : vector<7x2xf32>
    %1826 = vector.broadcast %21 : f32 to vector<7x2xf32>
    %1827 = arith.mulf %1526, %1826 : vector<7x2xf32>
    %1828 = arith.addf %1825, %1827 : vector<7x2xf32>
    %1829 = vector.broadcast %22 : f32 to vector<7x2xf32>
    %1830 = arith.mulf %1530, %1829 : vector<7x2xf32>
    %1831 = arith.addf %1828, %1830 : vector<7x2xf32>
    %1832 = vector.broadcast %23 : f32 to vector<7x2xf32>
    %1833 = arith.mulf %1528, %1832 : vector<7x2xf32>
    %1834 = arith.addf %1831, %1833 : vector<7x2xf32>
    %1835 = vector.broadcast %24 : f32 to vector<7x2xf32>
    %1836 = arith.mulf %1534, %1835 : vector<7x2xf32>
    %1837 = arith.addf %1834, %1836 : vector<7x2xf32>
    %1838 = vector.broadcast %25 : f32 to vector<7x2xf32>
    %1839 = arith.mulf %1538, %1838 : vector<7x2xf32>
    %1840 = arith.addf %1837, %1839 : vector<7x2xf32>
    %1841 = vector.broadcast %26 : f32 to vector<7x2xf32>
    %1842 = arith.mulf %1536, %1841 : vector<7x2xf32>
    %1843 = arith.addf %1840, %1842 : vector<7x2xf32>
    %1844 = arith.maximumf %1817, %1843 : vector<7x2xf32>
    %1845 = vector.broadcast %18 : f32 to vector<7x2xf32>
    %1846 = arith.mulf %1522, %1845 : vector<7x2xf32>
    %1847 = vector.broadcast %19 : f32 to vector<7x2xf32>
    %1848 = arith.mulf %1520, %1847 : vector<7x2xf32>
    %1849 = arith.addf %1846, %1848 : vector<7x2xf32>
    %1850 = vector.broadcast %20 : f32 to vector<7x2xf32>
    %1851 = arith.mulf %1524, %1850 : vector<7x2xf32>
    %1852 = arith.addf %1849, %1851 : vector<7x2xf32>
    %1853 = vector.broadcast %21 : f32 to vector<7x2xf32>
    %1854 = arith.mulf %1530, %1853 : vector<7x2xf32>
    %1855 = arith.addf %1852, %1854 : vector<7x2xf32>
    %1856 = vector.broadcast %22 : f32 to vector<7x2xf32>
    %1857 = arith.mulf %1528, %1856 : vector<7x2xf32>
    %1858 = arith.addf %1855, %1857 : vector<7x2xf32>
    %1859 = vector.broadcast %23 : f32 to vector<7x2xf32>
    %1860 = arith.mulf %1532, %1859 : vector<7x2xf32>
    %1861 = arith.addf %1858, %1860 : vector<7x2xf32>
    %1862 = vector.broadcast %24 : f32 to vector<7x2xf32>
    %1863 = arith.mulf %1538, %1862 : vector<7x2xf32>
    %1864 = arith.addf %1861, %1863 : vector<7x2xf32>
    %1865 = vector.broadcast %25 : f32 to vector<7x2xf32>
    %1866 = arith.mulf %1536, %1865 : vector<7x2xf32>
    %1867 = arith.addf %1864, %1866 : vector<7x2xf32>
    %1868 = vector.broadcast %26 : f32 to vector<7x2xf32>
    %1869 = arith.mulf %1540, %1868 : vector<7x2xf32>
    %1870 = arith.addf %1867, %1869 : vector<7x2xf32>
    %1871 = arith.maximumf %1844, %1870 : vector<7x2xf32>
    %1872 = vector.broadcast %38 : f32 to vector<7x2xf32>
    %1873 = arith.addf %1871, %1872 : vector<7x2xf32>
    %cst_317 = arith.constant 0.000000e+00 : f32
    %1874 = vector.broadcast %cst_317 : f32 to vector<7x2xf32>
    %1875 = arith.maximumf %1873, %1874 : vector<7x2xf32>
    %c136 = arith.constant 136 : index
    %c0_318 = arith.constant 0 : index
    %1876 = vector.load %arg10[%c136, %c0_318] : memref<224x2xf32, #tpu.memory_space<vmem>>, vector<7x2xf32>
    tpu.vector_store %arg10[%c136, %c0_318], %1875 {strides = array<i32>} : memref<224x2xf32, #tpu.memory_space<vmem>>, vector<7x2xf32>,
    %1877 = vector.broadcast %27 : f32 to vector<7x2xf32>
    %1878 = arith.mulf %1510, %1877 : vector<7x2xf32>
    %1879 = vector.broadcast %28 : f32 to vector<7x2xf32>
    %1880 = arith.mulf %1514, %1879 : vector<7x2xf32>
    %1881 = arith.addf %1878, %1880 : vector<7x2xf32>
    %1882 = vector.broadcast %29 : f32 to vector<7x2xf32>
    %1883 = arith.mulf %1512, %1882 : vector<7x2xf32>
    %1884 = arith.addf %1881, %1883 : vector<7x2xf32>
    %1885 = vector.broadcast %30 : f32 to vector<7x2xf32>
    %1886 = arith.mulf %1518, %1885 : vector<7x2xf32>
    %1887 = arith.addf %1884, %1886 : vector<7x2xf32>
    %1888 = vector.broadcast %31 : f32 to vector<7x2xf32>
    %1889 = arith.mulf %1522, %1888 : vector<7x2xf32>
    %1890 = arith.addf %1887, %1889 : vector<7x2xf32>
    %1891 = vector.broadcast %32 : f32 to vector<7x2xf32>
    %1892 = arith.mulf %1520, %1891 : vector<7x2xf32>
    %1893 = arith.addf %1890, %1892 : vector<7x2xf32>
    %1894 = vector.broadcast %33 : f32 to vector<7x2xf32>
    %1895 = arith.mulf %1526, %1894 : vector<7x2xf32>
    %1896 = arith.addf %1893, %1895 : vector<7x2xf32>
    %1897 = vector.broadcast %34 : f32 to vector<7x2xf32>
    %1898 = arith.mulf %1530, %1897 : vector<7x2xf32>
    %1899 = arith.addf %1896, %1898 : vector<7x2xf32>
    %1900 = vector.broadcast %35 : f32 to vector<7x2xf32>
    %1901 = arith.mulf %1528, %1900 : vector<7x2xf32>
    %1902 = arith.addf %1899, %1901 : vector<7x2xf32>
    %1903 = vector.broadcast %27 : f32 to vector<7x2xf32>
    %1904 = arith.mulf %1514, %1903 : vector<7x2xf32>
    %1905 = vector.broadcast %28 : f32 to vector<7x2xf32>
    %1906 = arith.mulf %1512, %1905 : vector<7x2xf32>
    %1907 = arith.addf %1904, %1906 : vector<7x2xf32>
    %1908 = vector.broadcast %29 : f32 to vector<7x2xf32>
    %1909 = arith.mulf %1516, %1908 : vector<7x2xf32>
    %1910 = arith.addf %1907, %1909 : vector<7x2xf32>
    %1911 = vector.broadcast %30 : f32 to vector<7x2xf32>
    %1912 = arith.mulf %1522, %1911 : vector<7x2xf32>
    %1913 = arith.addf %1910, %1912 : vector<7x2xf32>
    %1914 = vector.broadcast %31 : f32 to vector<7x2xf32>
    %1915 = arith.mulf %1520, %1914 : vector<7x2xf32>
    %1916 = arith.addf %1913, %1915 : vector<7x2xf32>
    %1917 = vector.broadcast %32 : f32 to vector<7x2xf32>
    %1918 = arith.mulf %1524, %1917 : vector<7x2xf32>
    %1919 = arith.addf %1916, %1918 : vector<7x2xf32>
    %1920 = vector.broadcast %33 : f32 to vector<7x2xf32>
    %1921 = arith.mulf %1530, %1920 : vector<7x2xf32>
    %1922 = arith.addf %1919, %1921 : vector<7x2xf32>
    %1923 = vector.broadcast %34 : f32 to vector<7x2xf32>
    %1924 = arith.mulf %1528, %1923 : vector<7x2xf32>
    %1925 = arith.addf %1922, %1924 : vector<7x2xf32>
    %1926 = vector.broadcast %35 : f32 to vector<7x2xf32>
    %1927 = arith.mulf %1532, %1926 : vector<7x2xf32>
    %1928 = arith.addf %1925, %1927 : vector<7x2xf32>
    %1929 = arith.maximumf %1902, %1928 : vector<7x2xf32>
    %1930 = vector.broadcast %27 : f32 to vector<7x2xf32>
    %1931 = arith.mulf %1518, %1930 : vector<7x2xf32>
    %1932 = vector.broadcast %28 : f32 to vector<7x2xf32>
    %1933 = arith.mulf %1522, %1932 : vector<7x2xf32>
    %1934 = arith.addf %1931, %1933 : vector<7x2xf32>
    %1935 = vector.broadcast %29 : f32 to vector<7x2xf32>
    %1936 = arith.mulf %1520, %1935 : vector<7x2xf32>
    %1937 = arith.addf %1934, %1936 : vector<7x2xf32>
    %1938 = vector.broadcast %30 : f32 to vector<7x2xf32>
    %1939 = arith.mulf %1526, %1938 : vector<7x2xf32>
    %1940 = arith.addf %1937, %1939 : vector<7x2xf32>
    %1941 = vector.broadcast %31 : f32 to vector<7x2xf32>
    %1942 = arith.mulf %1530, %1941 : vector<7x2xf32>
    %1943 = arith.addf %1940, %1942 : vector<7x2xf32>
    %1944 = vector.broadcast %32 : f32 to vector<7x2xf32>
    %1945 = arith.mulf %1528, %1944 : vector<7x2xf32>
    %1946 = arith.addf %1943, %1945 : vector<7x2xf32>
    %1947 = vector.broadcast %33 : f32 to vector<7x2xf32>
    %1948 = arith.mulf %1534, %1947 : vector<7x2xf32>
    %1949 = arith.addf %1946, %1948 : vector<7x2xf32>
    %1950 = vector.broadcast %34 : f32 to vector<7x2xf32>
    %1951 = arith.mulf %1538, %1950 : vector<7x2xf32>
    %1952 = arith.addf %1949, %1951 : vector<7x2xf32>
    %1953 = vector.broadcast %35 : f32 to vector<7x2xf32>
    %1954 = arith.mulf %1536, %1953 : vector<7x2xf32>
    %1955 = arith.addf %1952, %1954 : vector<7x2xf32>
    %1956 = arith.maximumf %1929, %1955 : vector<7x2xf32>
    %1957 = vector.broadcast %27 : f32 to vector<7x2xf32>
    %1958 = arith.mulf %1522, %1957 : vector<7x2xf32>
    %1959 = vector.broadcast %28 : f32 to vector<7x2xf32>
    %1960 = arith.mulf %1520, %1959 : vector<7x2xf32>
    %1961 = arith.addf %1958, %1960 : vector<7x2xf32>
    %1962 = vector.broadcast %29 : f32 to vector<7x2xf32>
    %1963 = arith.mulf %1524, %1962 : vector<7x2xf32>
    %1964 = arith.addf %1961, %1963 : vector<7x2xf32>
    %1965 = vector.broadcast %30 : f32 to vector<7x2xf32>
    %1966 = arith.mulf %1530, %1965 : vector<7x2xf32>
    %1967 = arith.addf %1964, %1966 : vector<7x2xf32>
    %1968 = vector.broadcast %31 : f32 to vector<7x2xf32>
    %1969 = arith.mulf %1528, %1968 : vector<7x2xf32>
    %1970 = arith.addf %1967, %1969 : vector<7x2xf32>
    %1971 = vector.broadcast %32 : f32 to vector<7x2xf32>
    %1972 = arith.mulf %1532, %1971 : vector<7x2xf32>
    %1973 = arith.addf %1970, %1972 : vector<7x2xf32>
    %1974 = vector.broadcast %33 : f32 to vector<7x2xf32>
    %1975 = arith.mulf %1538, %1974 : vector<7x2xf32>
    %1976 = arith.addf %1973, %1975 : vector<7x2xf32>
    %1977 = vector.broadcast %34 : f32 to vector<7x2xf32>
    %1978 = arith.mulf %1536, %1977 : vector<7x2xf32>
    %1979 = arith.addf %1976, %1978 : vector<7x2xf32>
    %1980 = vector.broadcast %35 : f32 to vector<7x2xf32>
    %1981 = arith.mulf %1540, %1980 : vector<7x2xf32>
    %1982 = arith.addf %1979, %1981 : vector<7x2xf32>
    %1983 = arith.maximumf %1956, %1982 : vector<7x2xf32>
    %1984 = vector.broadcast %39 : f32 to vector<7x2xf32>
    %1985 = arith.addf %1983, %1984 : vector<7x2xf32>
    %cst_319 = arith.constant 0.000000e+00 : f32
    %1986 = vector.broadcast %cst_319 : f32 to vector<7x2xf32>
    %1987 = arith.maximumf %1985, %1986 : vector<7x2xf32>
    %c192 = arith.constant 192 : index
    %c0_320 = arith.constant 0 : index
    %1988 = vector.load %arg10[%c192, %c0_320] : memref<224x2xf32, #tpu.memory_space<vmem>>, vector<7x2xf32>
    tpu.vector_store %arg10[%c192, %c0_320], %1987 {strides = array<i32>} : memref<224x2xf32, #tpu.memory_space<vmem>>, vector<7x2xf32>,
    %c8_321 = arith.constant 8 : index
    %c0_322 = arith.constant 0 : index
    %c0_323 = arith.constant 0 : index
    %1989 = vector.load %arg3[%c8_321, %c0_322, %c0_323] : memref<16x8x2xf32, #tpu.memory_space<vmem>>, vector<1x7x2xf32>
    %1990 = vector.shape_cast %1989 : vector<1x7x2xf32> to vector<7x2xf32>
    %c8_324 = arith.constant 8 : index
    %c1_325 = arith.constant 1 : index
    %c0_326 = arith.constant 0 : index
    %1991 = vector.load %arg3[%c8_324, %c1_325, %c0_326] : memref<16x8x2xf32, #tpu.memory_space<vmem>>, vector<1x7x2xf32>
    %1992 = vector.shape_cast %1991 : vector<1x7x2xf32> to vector<7x2xf32>
    %c8_327 = arith.constant 8 : index
    %c0_328 = arith.constant 0 : index
    %c0_329 = arith.constant 0 : index
    %1993 = vector.load %arg4[%c8_327, %c0_328, %c0_329] : memref<16x8x2xf32, #tpu.memory_space<vmem>>, vector<1x7x2xf32>
    %1994 = vector.shape_cast %1993 : vector<1x7x2xf32> to vector<7x2xf32>
    %c8_330 = arith.constant 8 : index
    %c1_331 = arith.constant 1 : index
    %c0_332 = arith.constant 0 : index
    %1995 = vector.load %arg4[%c8_330, %c1_331, %c0_332] : memref<16x8x2xf32, #tpu.memory_space<vmem>>, vector<1x7x2xf32>
    %1996 = vector.shape_cast %1995 : vector<1x7x2xf32> to vector<7x2xf32>
    %c9_333 = arith.constant 9 : index
    %c0_334 = arith.constant 0 : index
    %c0_335 = arith.constant 0 : index
    %1997 = vector.load %arg3[%c9_333, %c0_334, %c0_335] : memref<16x8x2xf32, #tpu.memory_space<vmem>>, vector<1x7x2xf32>
    %1998 = vector.shape_cast %1997 : vector<1x7x2xf32> to vector<7x2xf32>
    %c9_336 = arith.constant 9 : index
    %c1_337 = arith.constant 1 : index
    %c0_338 = arith.constant 0 : index
    %1999 = vector.load %arg3[%c9_336, %c1_337, %c0_338] : memref<16x8x2xf32, #tpu.memory_space<vmem>>, vector<1x7x2xf32>
    %2000 = vector.shape_cast %1999 : vector<1x7x2xf32> to vector<7x2xf32>
    %c9_339 = arith.constant 9 : index
    %c0_340 = arith.constant 0 : index
    %c0_341 = arith.constant 0 : index
    %2001 = vector.load %arg4[%c9_339, %c0_340, %c0_341] : memref<16x8x2xf32, #tpu.memory_space<vmem>>, vector<1x7x2xf32>
    %2002 = vector.shape_cast %2001 : vector<1x7x2xf32> to vector<7x2xf32>
    %c9_342 = arith.constant 9 : index
    %c1_343 = arith.constant 1 : index
    %c0_344 = arith.constant 0 : index
    %2003 = vector.load %arg4[%c9_342, %c1_343, %c0_344] : memref<16x8x2xf32, #tpu.memory_space<vmem>>, vector<1x7x2xf32>
    %2004 = vector.shape_cast %2003 : vector<1x7x2xf32> to vector<7x2xf32>
    %c10 = arith.constant 10 : index
    %c0_345 = arith.constant 0 : index
    %c0_346 = arith.constant 0 : index
    %2005 = vector.load %arg3[%c10, %c0_345, %c0_346] : memref<16x8x2xf32, #tpu.memory_space<vmem>>, vector<1x7x2xf32>
    %2006 = vector.shape_cast %2005 : vector<1x7x2xf32> to vector<7x2xf32>
    %c10_347 = arith.constant 10 : index
    %c1_348 = arith.constant 1 : index
    %c0_349 = arith.constant 0 : index
    %2007 = vector.load %arg3[%c10_347, %c1_348, %c0_349] : memref<16x8x2xf32, #tpu.memory_space<vmem>>, vector<1x7x2xf32>
    %2008 = vector.shape_cast %2007 : vector<1x7x2xf32> to vector<7x2xf32>
    %c10_350 = arith.constant 10 : index
    %c0_351 = arith.constant 0 : index
    %c0_352 = arith.constant 0 : index
    %2009 = vector.load %arg4[%c10_350, %c0_351, %c0_352] : memref<16x8x2xf32, #tpu.memory_space<vmem>>, vector<1x7x2xf32>
    %2010 = vector.shape_cast %2009 : vector<1x7x2xf32> to vector<7x2xf32>
    %c10_353 = arith.constant 10 : index
    %c1_354 = arith.constant 1 : index
    %c0_355 = arith.constant 0 : index
    %2011 = vector.load %arg4[%c10_353, %c1_354, %c0_355] : memref<16x8x2xf32, #tpu.memory_space<vmem>>, vector<1x7x2xf32>
    %2012 = vector.shape_cast %2011 : vector<1x7x2xf32> to vector<7x2xf32>
    %c11 = arith.constant 11 : index
    %c0_356 = arith.constant 0 : index
    %c0_357 = arith.constant 0 : index
    %2013 = vector.load %arg3[%c11, %c0_356, %c0_357] : memref<16x8x2xf32, #tpu.memory_space<vmem>>, vector<1x7x2xf32>
    %2014 = vector.shape_cast %2013 : vector<1x7x2xf32> to vector<7x2xf32>
    %c11_358 = arith.constant 11 : index
    %c1_359 = arith.constant 1 : index
    %c0_360 = arith.constant 0 : index
    %2015 = vector.load %arg3[%c11_358, %c1_359, %c0_360] : memref<16x8x2xf32, #tpu.memory_space<vmem>>, vector<1x7x2xf32>
    %2016 = vector.shape_cast %2015 : vector<1x7x2xf32> to vector<7x2xf32>
    %c11_361 = arith.constant 11 : index
    %c0_362 = arith.constant 0 : index
    %c0_363 = arith.constant 0 : index
    %2017 = vector.load %arg4[%c11_361, %c0_362, %c0_363] : memref<16x8x2xf32, #tpu.memory_space<vmem>>, vector<1x7x2xf32>
    %2018 = vector.shape_cast %2017 : vector<1x7x2xf32> to vector<7x2xf32>
    %c11_364 = arith.constant 11 : index
    %c1_365 = arith.constant 1 : index
    %c0_366 = arith.constant 0 : index
    %2019 = vector.load %arg4[%c11_364, %c1_365, %c0_366] : memref<16x8x2xf32, #tpu.memory_space<vmem>>, vector<1x7x2xf32>
    %2020 = vector.shape_cast %2019 : vector<1x7x2xf32> to vector<7x2xf32>
    %2021 = vector.broadcast %0 : f32 to vector<7x2xf32>
    %2022 = arith.mulf %1990, %2021 : vector<7x2xf32>
    %2023 = vector.broadcast %1 : f32 to vector<7x2xf32>
    %2024 = arith.mulf %1994, %2023 : vector<7x2xf32>
    %2025 = arith.addf %2022, %2024 : vector<7x2xf32>
    %2026 = vector.broadcast %2 : f32 to vector<7x2xf32>
    %2027 = arith.mulf %1992, %2026 : vector<7x2xf32>
    %2028 = arith.addf %2025, %2027 : vector<7x2xf32>
    %2029 = vector.broadcast %3 : f32 to vector<7x2xf32>
    %2030 = arith.mulf %1998, %2029 : vector<7x2xf32>
    %2031 = arith.addf %2028, %2030 : vector<7x2xf32>
    %2032 = vector.broadcast %4 : f32 to vector<7x2xf32>
    %2033 = arith.mulf %2002, %2032 : vector<7x2xf32>
    %2034 = arith.addf %2031, %2033 : vector<7x2xf32>
    %2035 = vector.broadcast %5 : f32 to vector<7x2xf32>
    %2036 = arith.mulf %2000, %2035 : vector<7x2xf32>
    %2037 = arith.addf %2034, %2036 : vector<7x2xf32>
    %2038 = vector.broadcast %6 : f32 to vector<7x2xf32>
    %2039 = arith.mulf %2006, %2038 : vector<7x2xf32>
    %2040 = arith.addf %2037, %2039 : vector<7x2xf32>
    %2041 = vector.broadcast %7 : f32 to vector<7x2xf32>
    %2042 = arith.mulf %2010, %2041 : vector<7x2xf32>
    %2043 = arith.addf %2040, %2042 : vector<7x2xf32>
    %2044 = vector.broadcast %8 : f32 to vector<7x2xf32>
    %2045 = arith.mulf %2008, %2044 : vector<7x2xf32>
    %2046 = arith.addf %2043, %2045 : vector<7x2xf32>
    %2047 = vector.broadcast %0 : f32 to vector<7x2xf32>
    %2048 = arith.mulf %1994, %2047 : vector<7x2xf32>
    %2049 = vector.broadcast %1 : f32 to vector<7x2xf32>
    %2050 = arith.mulf %1992, %2049 : vector<7x2xf32>
    %2051 = arith.addf %2048, %2050 : vector<7x2xf32>
    %2052 = vector.broadcast %2 : f32 to vector<7x2xf32>
    %2053 = arith.mulf %1996, %2052 : vector<7x2xf32>
    %2054 = arith.addf %2051, %2053 : vector<7x2xf32>
    %2055 = vector.broadcast %3 : f32 to vector<7x2xf32>
    %2056 = arith.mulf %2002, %2055 : vector<7x2xf32>
    %2057 = arith.addf %2054, %2056 : vector<7x2xf32>
    %2058 = vector.broadcast %4 : f32 to vector<7x2xf32>
    %2059 = arith.mulf %2000, %2058 : vector<7x2xf32>
    %2060 = arith.addf %2057, %2059 : vector<7x2xf32>
    %2061 = vector.broadcast %5 : f32 to vector<7x2xf32>
    %2062 = arith.mulf %2004, %2061 : vector<7x2xf32>
    %2063 = arith.addf %2060, %2062 : vector<7x2xf32>
    %2064 = vector.broadcast %6 : f32 to vector<7x2xf32>
    %2065 = arith.mulf %2010, %2064 : vector<7x2xf32>
    %2066 = arith.addf %2063, %2065 : vector<7x2xf32>
    %2067 = vector.broadcast %7 : f32 to vector<7x2xf32>
    %2068 = arith.mulf %2008, %2067 : vector<7x2xf32>
    %2069 = arith.addf %2066, %2068 : vector<7x2xf32>
    %2070 = vector.broadcast %8 : f32 to vector<7x2xf32>
    %2071 = arith.mulf %2012, %2070 : vector<7x2xf32>
    %2072 = arith.addf %2069, %2071 : vector<7x2xf32>
    %2073 = arith.maximumf %2046, %2072 : vector<7x2xf32>
    %2074 = vector.broadcast %0 : f32 to vector<7x2xf32>
    %2075 = arith.mulf %1998, %2074 : vector<7x2xf32>
    %2076 = vector.broadcast %1 : f32 to vector<7x2xf32>
    %2077 = arith.mulf %2002, %2076 : vector<7x2xf32>
    %2078 = arith.addf %2075, %2077 : vector<7x2xf32>
    %2079 = vector.broadcast %2 : f32 to vector<7x2xf32>
    %2080 = arith.mulf %2000, %2079 : vector<7x2xf32>
    %2081 = arith.addf %2078, %2080 : vector<7x2xf32>
    %2082 = vector.broadcast %3 : f32 to vector<7x2xf32>
    %2083 = arith.mulf %2006, %2082 : vector<7x2xf32>
    %2084 = arith.addf %2081, %2083 : vector<7x2xf32>
    %2085 = vector.broadcast %4 : f32 to vector<7x2xf32>
    %2086 = arith.mulf %2010, %2085 : vector<7x2xf32>
    %2087 = arith.addf %2084, %2086 : vector<7x2xf32>
    %2088 = vector.broadcast %5 : f32 to vector<7x2xf32>
    %2089 = arith.mulf %2008, %2088 : vector<7x2xf32>
    %2090 = arith.addf %2087, %2089 : vector<7x2xf32>
    %2091 = vector.broadcast %6 : f32 to vector<7x2xf32>
    %2092 = arith.mulf %2014, %2091 : vector<7x2xf32>
    %2093 = arith.addf %2090, %2092 : vector<7x2xf32>
    %2094 = vector.broadcast %7 : f32 to vector<7x2xf32>
    %2095 = arith.mulf %2018, %2094 : vector<7x2xf32>
    %2096 = arith.addf %2093, %2095 : vector<7x2xf32>
    %2097 = vector.broadcast %8 : f32 to vector<7x2xf32>
    %2098 = arith.mulf %2016, %2097 : vector<7x2xf32>
    %2099 = arith.addf %2096, %2098 : vector<7x2xf32>
    %2100 = arith.maximumf %2073, %2099 : vector<7x2xf32>
    %2101 = vector.broadcast %0 : f32 to vector<7x2xf32>
    %2102 = arith.mulf %2002, %2101 : vector<7x2xf32>
    %2103 = vector.broadcast %1 : f32 to vector<7x2xf32>
    %2104 = arith.mulf %2000, %2103 : vector<7x2xf32>
    %2105 = arith.addf %2102, %2104 : vector<7x2xf32>
    %2106 = vector.broadcast %2 : f32 to vector<7x2xf32>
    %2107 = arith.mulf %2004, %2106 : vector<7x2xf32>
    %2108 = arith.addf %2105, %2107 : vector<7x2xf32>
    %2109 = vector.broadcast %3 : f32 to vector<7x2xf32>
    %2110 = arith.mulf %2010, %2109 : vector<7x2xf32>
    %2111 = arith.addf %2108, %2110 : vector<7x2xf32>
    %2112 = vector.broadcast %4 : f32 to vector<7x2xf32>
    %2113 = arith.mulf %2008, %2112 : vector<7x2xf32>
    %2114 = arith.addf %2111, %2113 : vector<7x2xf32>
    %2115 = vector.broadcast %5 : f32 to vector<7x2xf32>
    %2116 = arith.mulf %2012, %2115 : vector<7x2xf32>
    %2117 = arith.addf %2114, %2116 : vector<7x2xf32>
    %2118 = vector.broadcast %6 : f32 to vector<7x2xf32>
    %2119 = arith.mulf %2018, %2118 : vector<7x2xf32>
    %2120 = arith.addf %2117, %2119 : vector<7x2xf32>
    %2121 = vector.broadcast %7 : f32 to vector<7x2xf32>
    %2122 = arith.mulf %2016, %2121 : vector<7x2xf32>
    %2123 = arith.addf %2120, %2122 : vector<7x2xf32>
    %2124 = vector.broadcast %8 : f32 to vector<7x2xf32>
    %2125 = arith.mulf %2020, %2124 : vector<7x2xf32>
    %2126 = arith.addf %2123, %2125 : vector<7x2xf32>
    %2127 = arith.maximumf %2100, %2126 : vector<7x2xf32>
    %2128 = vector.broadcast %36 : f32 to vector<7x2xf32>
    %2129 = arith.addf %2127, %2128 : vector<7x2xf32>
    %cst_367 = arith.constant 0.000000e+00 : f32
    %2130 = vector.broadcast %cst_367 : f32 to vector<7x2xf32>
    %2131 = arith.maximumf %2129, %2130 : vector<7x2xf32>
    %c32 = arith.constant 32 : index
    %c0_368 = arith.constant 0 : index
    %2132 = vector.load %arg10[%c32, %c0_368] : memref<224x2xf32, #tpu.memory_space<vmem>>, vector<7x2xf32>
    tpu.vector_store %arg10[%c32, %c0_368], %2131 {strides = array<i32>} : memref<224x2xf32, #tpu.memory_space<vmem>>, vector<7x2xf32>,
    %2133 = vector.broadcast %9 : f32 to vector<7x2xf32>
    %2134 = arith.mulf %1990, %2133 : vector<7x2xf32>
    %2135 = vector.broadcast %10 : f32 to vector<7x2xf32>
    %2136 = arith.mulf %1994, %2135 : vector<7x2xf32>
    %2137 = arith.addf %2134, %2136 : vector<7x2xf32>
    %2138 = vector.broadcast %11 : f32 to vector<7x2xf32>
    %2139 = arith.mulf %1992, %2138 : vector<7x2xf32>
    %2140 = arith.addf %2137, %2139 : vector<7x2xf32>
    %2141 = vector.broadcast %12 : f32 to vector<7x2xf32>
    %2142 = arith.mulf %1998, %2141 : vector<7x2xf32>
    %2143 = arith.addf %2140, %2142 : vector<7x2xf32>
    %2144 = vector.broadcast %13 : f32 to vector<7x2xf32>
    %2145 = arith.mulf %2002, %2144 : vector<7x2xf32>
    %2146 = arith.addf %2143, %2145 : vector<7x2xf32>
    %2147 = vector.broadcast %14 : f32 to vector<7x2xf32>
    %2148 = arith.mulf %2000, %2147 : vector<7x2xf32>
    %2149 = arith.addf %2146, %2148 : vector<7x2xf32>
    %2150 = vector.broadcast %15 : f32 to vector<7x2xf32>
    %2151 = arith.mulf %2006, %2150 : vector<7x2xf32>
    %2152 = arith.addf %2149, %2151 : vector<7x2xf32>
    %2153 = vector.broadcast %16 : f32 to vector<7x2xf32>
    %2154 = arith.mulf %2010, %2153 : vector<7x2xf32>
    %2155 = arith.addf %2152, %2154 : vector<7x2xf32>
    %2156 = vector.broadcast %17 : f32 to vector<7x2xf32>
    %2157 = arith.mulf %2008, %2156 : vector<7x2xf32>
    %2158 = arith.addf %2155, %2157 : vector<7x2xf32>
    %2159 = vector.broadcast %9 : f32 to vector<7x2xf32>
    %2160 = arith.mulf %1994, %2159 : vector<7x2xf32>
    %2161 = vector.broadcast %10 : f32 to vector<7x2xf32>
    %2162 = arith.mulf %1992, %2161 : vector<7x2xf32>
    %2163 = arith.addf %2160, %2162 : vector<7x2xf32>
    %2164 = vector.broadcast %11 : f32 to vector<7x2xf32>
    %2165 = arith.mulf %1996, %2164 : vector<7x2xf32>
    %2166 = arith.addf %2163, %2165 : vector<7x2xf32>
    %2167 = vector.broadcast %12 : f32 to vector<7x2xf32>
    %2168 = arith.mulf %2002, %2167 : vector<7x2xf32>
    %2169 = arith.addf %2166, %2168 : vector<7x2xf32>
    %2170 = vector.broadcast %13 : f32 to vector<7x2xf32>
    %2171 = arith.mulf %2000, %2170 : vector<7x2xf32>
    %2172 = arith.addf %2169, %2171 : vector<7x2xf32>
    %2173 = vector.broadcast %14 : f32 to vector<7x2xf32>
    %2174 = arith.mulf %2004, %2173 : vector<7x2xf32>
    %2175 = arith.addf %2172, %2174 : vector<7x2xf32>
    %2176 = vector.broadcast %15 : f32 to vector<7x2xf32>
    %2177 = arith.mulf %2010, %2176 : vector<7x2xf32>
    %2178 = arith.addf %2175, %2177 : vector<7x2xf32>
    %2179 = vector.broadcast %16 : f32 to vector<7x2xf32>
    %2180 = arith.mulf %2008, %2179 : vector<7x2xf32>
    %2181 = arith.addf %2178, %2180 : vector<7x2xf32>
    %2182 = vector.broadcast %17 : f32 to vector<7x2xf32>
    %2183 = arith.mulf %2012, %2182 : vector<7x2xf32>
    %2184 = arith.addf %2181, %2183 : vector<7x2xf32>
    %2185 = arith.maximumf %2158, %2184 : vector<7x2xf32>
    %2186 = vector.broadcast %9 : f32 to vector<7x2xf32>
    %2187 = arith.mulf %1998, %2186 : vector<7x2xf32>
    %2188 = vector.broadcast %10 : f32 to vector<7x2xf32>
    %2189 = arith.mulf %2002, %2188 : vector<7x2xf32>
    %2190 = arith.addf %2187, %2189 : vector<7x2xf32>
    %2191 = vector.broadcast %11 : f32 to vector<7x2xf32>
    %2192 = arith.mulf %2000, %2191 : vector<7x2xf32>
    %2193 = arith.addf %2190, %2192 : vector<7x2xf32>
    %2194 = vector.broadcast %12 : f32 to vector<7x2xf32>
    %2195 = arith.mulf %2006, %2194 : vector<7x2xf32>
    %2196 = arith.addf %2193, %2195 : vector<7x2xf32>
    %2197 = vector.broadcast %13 : f32 to vector<7x2xf32>
    %2198 = arith.mulf %2010, %2197 : vector<7x2xf32>
    %2199 = arith.addf %2196, %2198 : vector<7x2xf32>
    %2200 = vector.broadcast %14 : f32 to vector<7x2xf32>
    %2201 = arith.mulf %2008, %2200 : vector<7x2xf32>
    %2202 = arith.addf %2199, %2201 : vector<7x2xf32>
    %2203 = vector.broadcast %15 : f32 to vector<7x2xf32>
    %2204 = arith.mulf %2014, %2203 : vector<7x2xf32>
    %2205 = arith.addf %2202, %2204 : vector<7x2xf32>
    %2206 = vector.broadcast %16 : f32 to vector<7x2xf32>
    %2207 = arith.mulf %2018, %2206 : vector<7x2xf32>
    %2208 = arith.addf %2205, %2207 : vector<7x2xf32>
    %2209 = vector.broadcast %17 : f32 to vector<7x2xf32>
    %2210 = arith.mulf %2016, %2209 : vector<7x2xf32>
    %2211 = arith.addf %2208, %2210 : vector<7x2xf32>
    %2212 = arith.maximumf %2185, %2211 : vector<7x2xf32>
    %2213 = vector.broadcast %9 : f32 to vector<7x2xf32>
    %2214 = arith.mulf %2002, %2213 : vector<7x2xf32>
    %2215 = vector.broadcast %10 : f32 to vector<7x2xf32>
    %2216 = arith.mulf %2000, %2215 : vector<7x2xf32>
    %2217 = arith.addf %2214, %2216 : vector<7x2xf32>
    %2218 = vector.broadcast %11 : f32 to vector<7x2xf32>
    %2219 = arith.mulf %2004, %2218 : vector<7x2xf32>
    %2220 = arith.addf %2217, %2219 : vector<7x2xf32>
    %2221 = vector.broadcast %12 : f32 to vector<7x2xf32>
    %2222 = arith.mulf %2010, %2221 : vector<7x2xf32>
    %2223 = arith.addf %2220, %2222 : vector<7x2xf32>
    %2224 = vector.broadcast %13 : f32 to vector<7x2xf32>
    %2225 = arith.mulf %2008, %2224 : vector<7x2xf32>
    %2226 = arith.addf %2223, %2225 : vector<7x2xf32>
    %2227 = vector.broadcast %14 : f32 to vector<7x2xf32>
    %2228 = arith.mulf %2012, %2227 : vector<7x2xf32>
    %2229 = arith.addf %2226, %2228 : vector<7x2xf32>
    %2230 = vector.broadcast %15 : f32 to vector<7x2xf32>
    %2231 = arith.mulf %2018, %2230 : vector<7x2xf32>
    %2232 = arith.addf %2229, %2231 : vector<7x2xf32>
    %2233 = vector.broadcast %16 : f32 to vector<7x2xf32>
    %2234 = arith.mulf %2016, %2233 : vector<7x2xf32>
    %2235 = arith.addf %2232, %2234 : vector<7x2xf32>
    %2236 = vector.broadcast %17 : f32 to vector<7x2xf32>
    %2237 = arith.mulf %2020, %2236 : vector<7x2xf32>
    %2238 = arith.addf %2235, %2237 : vector<7x2xf32>
    %2239 = arith.maximumf %2212, %2238 : vector<7x2xf32>
    %2240 = vector.broadcast %37 : f32 to vector<7x2xf32>
    %2241 = arith.addf %2239, %2240 : vector<7x2xf32>
    %cst_369 = arith.constant 0.000000e+00 : f32
    %2242 = vector.broadcast %cst_369 : f32 to vector<7x2xf32>
    %2243 = arith.maximumf %2241, %2242 : vector<7x2xf32>
    %c88 = arith.constant 88 : index
    %c0_370 = arith.constant 0 : index
    %2244 = vector.load %arg10[%c88, %c0_370] : memref<224x2xf32, #tpu.memory_space<vmem>>, vector<7x2xf32>
    tpu.vector_store %arg10[%c88, %c0_370], %2243 {strides = array<i32>} : memref<224x2xf32, #tpu.memory_space<vmem>>, vector<7x2xf32>,
    %2245 = vector.broadcast %18 : f32 to vector<7x2xf32>
    %2246 = arith.mulf %1990, %2245 : vector<7x2xf32>
    %2247 = vector.broadcast %19 : f32 to vector<7x2xf32>
    %2248 = arith.mulf %1994, %2247 : vector<7x2xf32>
    %2249 = arith.addf %2246, %2248 : vector<7x2xf32>
    %2250 = vector.broadcast %20 : f32 to vector<7x2xf32>
    %2251 = arith.mulf %1992, %2250 : vector<7x2xf32>
    %2252 = arith.addf %2249, %2251 : vector<7x2xf32>
    %2253 = vector.broadcast %21 : f32 to vector<7x2xf32>
    %2254 = arith.mulf %1998, %2253 : vector<7x2xf32>
    %2255 = arith.addf %2252, %2254 : vector<7x2xf32>
    %2256 = vector.broadcast %22 : f32 to vector<7x2xf32>
    %2257 = arith.mulf %2002, %2256 : vector<7x2xf32>
    %2258 = arith.addf %2255, %2257 : vector<7x2xf32>
    %2259 = vector.broadcast %23 : f32 to vector<7x2xf32>
    %2260 = arith.mulf %2000, %2259 : vector<7x2xf32>
    %2261 = arith.addf %2258, %2260 : vector<7x2xf32>
    %2262 = vector.broadcast %24 : f32 to vector<7x2xf32>
    %2263 = arith.mulf %2006, %2262 : vector<7x2xf32>
    %2264 = arith.addf %2261, %2263 : vector<7x2xf32>
    %2265 = vector.broadcast %25 : f32 to vector<7x2xf32>
    %2266 = arith.mulf %2010, %2265 : vector<7x2xf32>
    %2267 = arith.addf %2264, %2266 : vector<7x2xf32>
    %2268 = vector.broadcast %26 : f32 to vector<7x2xf32>
    %2269 = arith.mulf %2008, %2268 : vector<7x2xf32>
    %2270 = arith.addf %2267, %2269 : vector<7x2xf32>
    %2271 = vector.broadcast %18 : f32 to vector<7x2xf32>
    %2272 = arith.mulf %1994, %2271 : vector<7x2xf32>
    %2273 = vector.broadcast %19 : f32 to vector<7x2xf32>
    %2274 = arith.mulf %1992, %2273 : vector<7x2xf32>
    %2275 = arith.addf %2272, %2274 : vector<7x2xf32>
    %2276 = vector.broadcast %20 : f32 to vector<7x2xf32>
    %2277 = arith.mulf %1996, %2276 : vector<7x2xf32>
    %2278 = arith.addf %2275, %2277 : vector<7x2xf32>
    %2279 = vector.broadcast %21 : f32 to vector<7x2xf32>
    %2280 = arith.mulf %2002, %2279 : vector<7x2xf32>
    %2281 = arith.addf %2278, %2280 : vector<7x2xf32>
    %2282 = vector.broadcast %22 : f32 to vector<7x2xf32>
    %2283 = arith.mulf %2000, %2282 : vector<7x2xf32>
    %2284 = arith.addf %2281, %2283 : vector<7x2xf32>
    %2285 = vector.broadcast %23 : f32 to vector<7x2xf32>
    %2286 = arith.mulf %2004, %2285 : vector<7x2xf32>
    %2287 = arith.addf %2284, %2286 : vector<7x2xf32>
    %2288 = vector.broadcast %24 : f32 to vector<7x2xf32>
    %2289 = arith.mulf %2010, %2288 : vector<7x2xf32>
    %2290 = arith.addf %2287, %2289 : vector<7x2xf32>
    %2291 = vector.broadcast %25 : f32 to vector<7x2xf32>
    %2292 = arith.mulf %2008, %2291 : vector<7x2xf32>
    %2293 = arith.addf %2290, %2292 : vector<7x2xf32>
    %2294 = vector.broadcast %26 : f32 to vector<7x2xf32>
    %2295 = arith.mulf %2012, %2294 : vector<7x2xf32>
    %2296 = arith.addf %2293, %2295 : vector<7x2xf32>
    %2297 = arith.maximumf %2270, %2296 : vector<7x2xf32>
    %2298 = vector.broadcast %18 : f32 to vector<7x2xf32>
    %2299 = arith.mulf %1998, %2298 : vector<7x2xf32>
    %2300 = vector.broadcast %19 : f32 to vector<7x2xf32>
    %2301 = arith.mulf %2002, %2300 : vector<7x2xf32>
    %2302 = arith.addf %2299, %2301 : vector<7x2xf32>
    %2303 = vector.broadcast %20 : f32 to vector<7x2xf32>
    %2304 = arith.mulf %2000, %2303 : vector<7x2xf32>
    %2305 = arith.addf %2302, %2304 : vector<7x2xf32>
    %2306 = vector.broadcast %21 : f32 to vector<7x2xf32>
    %2307 = arith.mulf %2006, %2306 : vector<7x2xf32>
    %2308 = arith.addf %2305, %2307 : vector<7x2xf32>
    %2309 = vector.broadcast %22 : f32 to vector<7x2xf32>
    %2310 = arith.mulf %2010, %2309 : vector<7x2xf32>
    %2311 = arith.addf %2308, %2310 : vector<7x2xf32>
    %2312 = vector.broadcast %23 : f32 to vector<7x2xf32>
    %2313 = arith.mulf %2008, %2312 : vector<7x2xf32>
    %2314 = arith.addf %2311, %2313 : vector<7x2xf32>
    %2315 = vector.broadcast %24 : f32 to vector<7x2xf32>
    %2316 = arith.mulf %2014, %2315 : vector<7x2xf32>
    %2317 = arith.addf %2314, %2316 : vector<7x2xf32>
    %2318 = vector.broadcast %25 : f32 to vector<7x2xf32>
    %2319 = arith.mulf %2018, %2318 : vector<7x2xf32>
    %2320 = arith.addf %2317, %2319 : vector<7x2xf32>
    %2321 = vector.broadcast %26 : f32 to vector<7x2xf32>
    %2322 = arith.mulf %2016, %2321 : vector<7x2xf32>
    %2323 = arith.addf %2320, %2322 : vector<7x2xf32>
    %2324 = arith.maximumf %2297, %2323 : vector<7x2xf32>
    %2325 = vector.broadcast %18 : f32 to vector<7x2xf32>
    %2326 = arith.mulf %2002, %2325 : vector<7x2xf32>
    %2327 = vector.broadcast %19 : f32 to vector<7x2xf32>
    %2328 = arith.mulf %2000, %2327 : vector<7x2xf32>
    %2329 = arith.addf %2326, %2328 : vector<7x2xf32>
    %2330 = vector.broadcast %20 : f32 to vector<7x2xf32>
    %2331 = arith.mulf %2004, %2330 : vector<7x2xf32>
    %2332 = arith.addf %2329, %2331 : vector<7x2xf32>
    %2333 = vector.broadcast %21 : f32 to vector<7x2xf32>
    %2334 = arith.mulf %2010, %2333 : vector<7x2xf32>
    %2335 = arith.addf %2332, %2334 : vector<7x2xf32>
    %2336 = vector.broadcast %22 : f32 to vector<7x2xf32>
    %2337 = arith.mulf %2008, %2336 : vector<7x2xf32>
    %2338 = arith.addf %2335, %2337 : vector<7x2xf32>
    %2339 = vector.broadcast %23 : f32 to vector<7x2xf32>
    %2340 = arith.mulf %2012, %2339 : vector<7x2xf32>
    %2341 = arith.addf %2338, %2340 : vector<7x2xf32>
    %2342 = vector.broadcast %24 : f32 to vector<7x2xf32>
    %2343 = arith.mulf %2018, %2342 : vector<7x2xf32>
    %2344 = arith.addf %2341, %2343 : vector<7x2xf32>
    %2345 = vector.broadcast %25 : f32 to vector<7x2xf32>
    %2346 = arith.mulf %2016, %2345 : vector<7x2xf32>
    %2347 = arith.addf %2344, %2346 : vector<7x2xf32>
    %2348 = vector.broadcast %26 : f32 to vector<7x2xf32>
    %2349 = arith.mulf %2020, %2348 : vector<7x2xf32>
    %2350 = arith.addf %2347, %2349 : vector<7x2xf32>
    %2351 = arith.maximumf %2324, %2350 : vector<7x2xf32>
    %2352 = vector.broadcast %38 : f32 to vector<7x2xf32>
    %2353 = arith.addf %2351, %2352 : vector<7x2xf32>
    %cst_371 = arith.constant 0.000000e+00 : f32
    %2354 = vector.broadcast %cst_371 : f32 to vector<7x2xf32>
    %2355 = arith.maximumf %2353, %2354 : vector<7x2xf32>
    %c144 = arith.constant 144 : index
    %c0_372 = arith.constant 0 : index
    %2356 = vector.load %arg10[%c144, %c0_372] : memref<224x2xf32, #tpu.memory_space<vmem>>, vector<7x2xf32>
    tpu.vector_store %arg10[%c144, %c0_372], %2355 {strides = array<i32>} : memref<224x2xf32, #tpu.memory_space<vmem>>, vector<7x2xf32>,
    %2357 = vector.broadcast %27 : f32 to vector<7x2xf32>
    %2358 = arith.mulf %1990, %2357 : vector<7x2xf32>
    %2359 = vector.broadcast %28 : f32 to vector<7x2xf32>
    %2360 = arith.mulf %1994, %2359 : vector<7x2xf32>
    %2361 = arith.addf %2358, %2360 : vector<7x2xf32>
    %2362 = vector.broadcast %29 : f32 to vector<7x2xf32>
    %2363 = arith.mulf %1992, %2362 : vector<7x2xf32>
    %2364 = arith.addf %2361, %2363 : vector<7x2xf32>
    %2365 = vector.broadcast %30 : f32 to vector<7x2xf32>
    %2366 = arith.mulf %1998, %2365 : vector<7x2xf32>
    %2367 = arith.addf %2364, %2366 : vector<7x2xf32>
    %2368 = vector.broadcast %31 : f32 to vector<7x2xf32>
    %2369 = arith.mulf %2002, %2368 : vector<7x2xf32>
    %2370 = arith.addf %2367, %2369 : vector<7x2xf32>
    %2371 = vector.broadcast %32 : f32 to vector<7x2xf32>
    %2372 = arith.mulf %2000, %2371 : vector<7x2xf32>
    %2373 = arith.addf %2370, %2372 : vector<7x2xf32>
    %2374 = vector.broadcast %33 : f32 to vector<7x2xf32>
    %2375 = arith.mulf %2006, %2374 : vector<7x2xf32>
    %2376 = arith.addf %2373, %2375 : vector<7x2xf32>
    %2377 = vector.broadcast %34 : f32 to vector<7x2xf32>
    %2378 = arith.mulf %2010, %2377 : vector<7x2xf32>
    %2379 = arith.addf %2376, %2378 : vector<7x2xf32>
    %2380 = vector.broadcast %35 : f32 to vector<7x2xf32>
    %2381 = arith.mulf %2008, %2380 : vector<7x2xf32>
    %2382 = arith.addf %2379, %2381 : vector<7x2xf32>
    %2383 = vector.broadcast %27 : f32 to vector<7x2xf32>
    %2384 = arith.mulf %1994, %2383 : vector<7x2xf32>
    %2385 = vector.broadcast %28 : f32 to vector<7x2xf32>
    %2386 = arith.mulf %1992, %2385 : vector<7x2xf32>
    %2387 = arith.addf %2384, %2386 : vector<7x2xf32>
    %2388 = vector.broadcast %29 : f32 to vector<7x2xf32>
    %2389 = arith.mulf %1996, %2388 : vector<7x2xf32>
    %2390 = arith.addf %2387, %2389 : vector<7x2xf32>
    %2391 = vector.broadcast %30 : f32 to vector<7x2xf32>
    %2392 = arith.mulf %2002, %2391 : vector<7x2xf32>
    %2393 = arith.addf %2390, %2392 : vector<7x2xf32>
    %2394 = vector.broadcast %31 : f32 to vector<7x2xf32>
    %2395 = arith.mulf %2000, %2394 : vector<7x2xf32>
    %2396 = arith.addf %2393, %2395 : vector<7x2xf32>
    %2397 = vector.broadcast %32 : f32 to vector<7x2xf32>
    %2398 = arith.mulf %2004, %2397 : vector<7x2xf32>
    %2399 = arith.addf %2396, %2398 : vector<7x2xf32>
    %2400 = vector.broadcast %33 : f32 to vector<7x2xf32>
    %2401 = arith.mulf %2010, %2400 : vector<7x2xf32>
    %2402 = arith.addf %2399, %2401 : vector<7x2xf32>
    %2403 = vector.broadcast %34 : f32 to vector<7x2xf32>
    %2404 = arith.mulf %2008, %2403 : vector<7x2xf32>
    %2405 = arith.addf %2402, %2404 : vector<7x2xf32>
    %2406 = vector.broadcast %35 : f32 to vector<7x2xf32>
    %2407 = arith.mulf %2012, %2406 : vector<7x2xf32>
    %2408 = arith.addf %2405, %2407 : vector<7x2xf32>
    %2409 = arith.maximumf %2382, %2408 : vector<7x2xf32>
    %2410 = vector.broadcast %27 : f32 to vector<7x2xf32>
    %2411 = arith.mulf %1998, %2410 : vector<7x2xf32>
    %2412 = vector.broadcast %28 : f32 to vector<7x2xf32>
    %2413 = arith.mulf %2002, %2412 : vector<7x2xf32>
    %2414 = arith.addf %2411, %2413 : vector<7x2xf32>
    %2415 = vector.broadcast %29 : f32 to vector<7x2xf32>
    %2416 = arith.mulf %2000, %2415 : vector<7x2xf32>
    %2417 = arith.addf %2414, %2416 : vector<7x2xf32>
    %2418 = vector.broadcast %30 : f32 to vector<7x2xf32>
    %2419 = arith.mulf %2006, %2418 : vector<7x2xf32>
    %2420 = arith.addf %2417, %2419 : vector<7x2xf32>
    %2421 = vector.broadcast %31 : f32 to vector<7x2xf32>
    %2422 = arith.mulf %2010, %2421 : vector<7x2xf32>
    %2423 = arith.addf %2420, %2422 : vector<7x2xf32>
    %2424 = vector.broadcast %32 : f32 to vector<7x2xf32>
    %2425 = arith.mulf %2008, %2424 : vector<7x2xf32>
    %2426 = arith.addf %2423, %2425 : vector<7x2xf32>
    %2427 = vector.broadcast %33 : f32 to vector<7x2xf32>
    %2428 = arith.mulf %2014, %2427 : vector<7x2xf32>
    %2429 = arith.addf %2426, %2428 : vector<7x2xf32>
    %2430 = vector.broadcast %34 : f32 to vector<7x2xf32>
    %2431 = arith.mulf %2018, %2430 : vector<7x2xf32>
    %2432 = arith.addf %2429, %2431 : vector<7x2xf32>
    %2433 = vector.broadcast %35 : f32 to vector<7x2xf32>
    %2434 = arith.mulf %2016, %2433 : vector<7x2xf32>
    %2435 = arith.addf %2432, %2434 : vector<7x2xf32>
    %2436 = arith.maximumf %2409, %2435 : vector<7x2xf32>
    %2437 = vector.broadcast %27 : f32 to vector<7x2xf32>
    %2438 = arith.mulf %2002, %2437 : vector<7x2xf32>
    %2439 = vector.broadcast %28 : f32 to vector<7x2xf32>
    %2440 = arith.mulf %2000, %2439 : vector<7x2xf32>
    %2441 = arith.addf %2438, %2440 : vector<7x2xf32>
    %2442 = vector.broadcast %29 : f32 to vector<7x2xf32>
    %2443 = arith.mulf %2004, %2442 : vector<7x2xf32>
    %2444 = arith.addf %2441, %2443 : vector<7x2xf32>
    %2445 = vector.broadcast %30 : f32 to vector<7x2xf32>
    %2446 = arith.mulf %2010, %2445 : vector<7x2xf32>
    %2447 = arith.addf %2444, %2446 : vector<7x2xf32>
    %2448 = vector.broadcast %31 : f32 to vector<7x2xf32>
    %2449 = arith.mulf %2008, %2448 : vector<7x2xf32>
    %2450 = arith.addf %2447, %2449 : vector<7x2xf32>
    %2451 = vector.broadcast %32 : f32 to vector<7x2xf32>
    %2452 = arith.mulf %2012, %2451 : vector<7x2xf32>
    %2453 = arith.addf %2450, %2452 : vector<7x2xf32>
    %2454 = vector.broadcast %33 : f32 to vector<7x2xf32>
    %2455 = arith.mulf %2018, %2454 : vector<7x2xf32>
    %2456 = arith.addf %2453, %2455 : vector<7x2xf32>
    %2457 = vector.broadcast %34 : f32 to vector<7x2xf32>
    %2458 = arith.mulf %2016, %2457 : vector<7x2xf32>
    %2459 = arith.addf %2456, %2458 : vector<7x2xf32>
    %2460 = vector.broadcast %35 : f32 to vector<7x2xf32>
    %2461 = arith.mulf %2020, %2460 : vector<7x2xf32>
    %2462 = arith.addf %2459, %2461 : vector<7x2xf32>
    %2463 = arith.maximumf %2436, %2462 : vector<7x2xf32>
    %2464 = vector.broadcast %39 : f32 to vector<7x2xf32>
    %2465 = arith.addf %2463, %2464 : vector<7x2xf32>
    %cst_373 = arith.constant 0.000000e+00 : f32
    %2466 = vector.broadcast %cst_373 : f32 to vector<7x2xf32>
    %2467 = arith.maximumf %2465, %2466 : vector<7x2xf32>
    %c200 = arith.constant 200 : index
    %c0_374 = arith.constant 0 : index
    %2468 = vector.load %arg10[%c200, %c0_374] : memref<224x2xf32, #tpu.memory_space<vmem>>, vector<7x2xf32>
    tpu.vector_store %arg10[%c200, %c0_374], %2467 {strides = array<i32>} : memref<224x2xf32, #tpu.memory_space<vmem>>, vector<7x2xf32>,
    %c10_375 = arith.constant 10 : index
    %c0_376 = arith.constant 0 : index
    %c0_377 = arith.constant 0 : index
    %2469 = vector.load %arg3[%c10_375, %c0_376, %c0_377] : memref<16x8x2xf32, #tpu.memory_space<vmem>>, vector<1x7x2xf32>
    %2470 = vector.shape_cast %2469 : vector<1x7x2xf32> to vector<7x2xf32>
    %c10_378 = arith.constant 10 : index
    %c1_379 = arith.constant 1 : index
    %c0_380 = arith.constant 0 : index
    %2471 = vector.load %arg3[%c10_378, %c1_379, %c0_380] : memref<16x8x2xf32, #tpu.memory_space<vmem>>, vector<1x7x2xf32>
    %2472 = vector.shape_cast %2471 : vector<1x7x2xf32> to vector<7x2xf32>
    %c10_381 = arith.constant 10 : index
    %c0_382 = arith.constant 0 : index
    %c0_383 = arith.constant 0 : index
    %2473 = vector.load %arg4[%c10_381, %c0_382, %c0_383] : memref<16x8x2xf32, #tpu.memory_space<vmem>>, vector<1x7x2xf32>
    %2474 = vector.shape_cast %2473 : vector<1x7x2xf32> to vector<7x2xf32>
    %c10_384 = arith.constant 10 : index
    %c1_385 = arith.constant 1 : index
    %c0_386 = arith.constant 0 : index
    %2475 = vector.load %arg4[%c10_384, %c1_385, %c0_386] : memref<16x8x2xf32, #tpu.memory_space<vmem>>, vector<1x7x2xf32>
    %2476 = vector.shape_cast %2475 : vector<1x7x2xf32> to vector<7x2xf32>
    %c11_387 = arith.constant 11 : index
    %c0_388 = arith.constant 0 : index
    %c0_389 = arith.constant 0 : index
    %2477 = vector.load %arg3[%c11_387, %c0_388, %c0_389] : memref<16x8x2xf32, #tpu.memory_space<vmem>>, vector<1x7x2xf32>
    %2478 = vector.shape_cast %2477 : vector<1x7x2xf32> to vector<7x2xf32>
    %c11_390 = arith.constant 11 : index
    %c1_391 = arith.constant 1 : index
    %c0_392 = arith.constant 0 : index
    %2479 = vector.load %arg3[%c11_390, %c1_391, %c0_392] : memref<16x8x2xf32, #tpu.memory_space<vmem>>, vector<1x7x2xf32>
    %2480 = vector.shape_cast %2479 : vector<1x7x2xf32> to vector<7x2xf32>
    %c11_393 = arith.constant 11 : index
    %c0_394 = arith.constant 0 : index
    %c0_395 = arith.constant 0 : index
    %2481 = vector.load %arg4[%c11_393, %c0_394, %c0_395] : memref<16x8x2xf32, #tpu.memory_space<vmem>>, vector<1x7x2xf32>
    %2482 = vector.shape_cast %2481 : vector<1x7x2xf32> to vector<7x2xf32>
    %c11_396 = arith.constant 11 : index
    %c1_397 = arith.constant 1 : index
    %c0_398 = arith.constant 0 : index
    %2483 = vector.load %arg4[%c11_396, %c1_397, %c0_398] : memref<16x8x2xf32, #tpu.memory_space<vmem>>, vector<1x7x2xf32>
    %2484 = vector.shape_cast %2483 : vector<1x7x2xf32> to vector<7x2xf32>
    %c12 = arith.constant 12 : index
    %c0_399 = arith.constant 0 : index
    %c0_400 = arith.constant 0 : index
    %2485 = vector.load %arg3[%c12, %c0_399, %c0_400] : memref<16x8x2xf32, #tpu.memory_space<vmem>>, vector<1x7x2xf32>
    %2486 = vector.shape_cast %2485 : vector<1x7x2xf32> to vector<7x2xf32>
    %c12_401 = arith.constant 12 : index
    %c1_402 = arith.constant 1 : index
    %c0_403 = arith.constant 0 : index
    %2487 = vector.load %arg3[%c12_401, %c1_402, %c0_403] : memref<16x8x2xf32, #tpu.memory_space<vmem>>, vector<1x7x2xf32>
    %2488 = vector.shape_cast %2487 : vector<1x7x2xf32> to vector<7x2xf32>
    %c12_404 = arith.constant 12 : index
    %c0_405 = arith.constant 0 : index
    %c0_406 = arith.constant 0 : index
    %2489 = vector.load %arg4[%c12_404, %c0_405, %c0_406] : memref<16x8x2xf32, #tpu.memory_space<vmem>>, vector<1x7x2xf32>
    %2490 = vector.shape_cast %2489 : vector<1x7x2xf32> to vector<7x2xf32>
    %c12_407 = arith.constant 12 : index
    %c1_408 = arith.constant 1 : index
    %c0_409 = arith.constant 0 : index
    %2491 = vector.load %arg4[%c12_407, %c1_408, %c0_409] : memref<16x8x2xf32, #tpu.memory_space<vmem>>, vector<1x7x2xf32>
    %2492 = vector.shape_cast %2491 : vector<1x7x2xf32> to vector<7x2xf32>
    %c13 = arith.constant 13 : index
    %c0_410 = arith.constant 0 : index
    %c0_411 = arith.constant 0 : index
    %2493 = vector.load %arg3[%c13, %c0_410, %c0_411] : memref<16x8x2xf32, #tpu.memory_space<vmem>>, vector<1x7x2xf32>
    %2494 = vector.shape_cast %2493 : vector<1x7x2xf32> to vector<7x2xf32>
    %c13_412 = arith.constant 13 : index
    %c1_413 = arith.constant 1 : index
    %c0_414 = arith.constant 0 : index
    %2495 = vector.load %arg3[%c13_412, %c1_413, %c0_414] : memref<16x8x2xf32, #tpu.memory_space<vmem>>, vector<1x7x2xf32>
    %2496 = vector.shape_cast %2495 : vector<1x7x2xf32> to vector<7x2xf32>
    %c13_415 = arith.constant 13 : index
    %c0_416 = arith.constant 0 : index
    %c0_417 = arith.constant 0 : index
    %2497 = vector.load %arg4[%c13_415, %c0_416, %c0_417] : memref<16x8x2xf32, #tpu.memory_space<vmem>>, vector<1x7x2xf32>
    %2498 = vector.shape_cast %2497 : vector<1x7x2xf32> to vector<7x2xf32>
    %c13_418 = arith.constant 13 : index
    %c1_419 = arith.constant 1 : index
    %c0_420 = arith.constant 0 : index
    %2499 = vector.load %arg4[%c13_418, %c1_419, %c0_420] : memref<16x8x2xf32, #tpu.memory_space<vmem>>, vector<1x7x2xf32>
    %2500 = vector.shape_cast %2499 : vector<1x7x2xf32> to vector<7x2xf32>
    %2501 = vector.broadcast %0 : f32 to vector<7x2xf32>
    %2502 = arith.mulf %2470, %2501 : vector<7x2xf32>
    %2503 = vector.broadcast %1 : f32 to vector<7x2xf32>
    %2504 = arith.mulf %2474, %2503 : vector<7x2xf32>
    %2505 = arith.addf %2502, %2504 : vector<7x2xf32>
    %2506 = vector.broadcast %2 : f32 to vector<7x2xf32>
    %2507 = arith.mulf %2472, %2506 : vector<7x2xf32>
    %2508 = arith.addf %2505, %2507 : vector<7x2xf32>
    %2509 = vector.broadcast %3 : f32 to vector<7x2xf32>
    %2510 = arith.mulf %2478, %2509 : vector<7x2xf32>
    %2511 = arith.addf %2508, %2510 : vector<7x2xf32>
    %2512 = vector.broadcast %4 : f32 to vector<7x2xf32>
    %2513 = arith.mulf %2482, %2512 : vector<7x2xf32>
    %2514 = arith.addf %2511, %2513 : vector<7x2xf32>
    %2515 = vector.broadcast %5 : f32 to vector<7x2xf32>
    %2516 = arith.mulf %2480, %2515 : vector<7x2xf32>
    %2517 = arith.addf %2514, %2516 : vector<7x2xf32>
    %2518 = vector.broadcast %6 : f32 to vector<7x2xf32>
    %2519 = arith.mulf %2486, %2518 : vector<7x2xf32>
    %2520 = arith.addf %2517, %2519 : vector<7x2xf32>
    %2521 = vector.broadcast %7 : f32 to vector<7x2xf32>
    %2522 = arith.mulf %2490, %2521 : vector<7x2xf32>
    %2523 = arith.addf %2520, %2522 : vector<7x2xf32>
    %2524 = vector.broadcast %8 : f32 to vector<7x2xf32>
    %2525 = arith.mulf %2488, %2524 : vector<7x2xf32>
    %2526 = arith.addf %2523, %2525 : vector<7x2xf32>
    %2527 = vector.broadcast %0 : f32 to vector<7x2xf32>
    %2528 = arith.mulf %2474, %2527 : vector<7x2xf32>
    %2529 = vector.broadcast %1 : f32 to vector<7x2xf32>
    %2530 = arith.mulf %2472, %2529 : vector<7x2xf32>
    %2531 = arith.addf %2528, %2530 : vector<7x2xf32>
    %2532 = vector.broadcast %2 : f32 to vector<7x2xf32>
    %2533 = arith.mulf %2476, %2532 : vector<7x2xf32>
    %2534 = arith.addf %2531, %2533 : vector<7x2xf32>
    %2535 = vector.broadcast %3 : f32 to vector<7x2xf32>
    %2536 = arith.mulf %2482, %2535 : vector<7x2xf32>
    %2537 = arith.addf %2534, %2536 : vector<7x2xf32>
    %2538 = vector.broadcast %4 : f32 to vector<7x2xf32>
    %2539 = arith.mulf %2480, %2538 : vector<7x2xf32>
    %2540 = arith.addf %2537, %2539 : vector<7x2xf32>
    %2541 = vector.broadcast %5 : f32 to vector<7x2xf32>
    %2542 = arith.mulf %2484, %2541 : vector<7x2xf32>
    %2543 = arith.addf %2540, %2542 : vector<7x2xf32>
    %2544 = vector.broadcast %6 : f32 to vector<7x2xf32>
    %2545 = arith.mulf %2490, %2544 : vector<7x2xf32>
    %2546 = arith.addf %2543, %2545 : vector<7x2xf32>
    %2547 = vector.broadcast %7 : f32 to vector<7x2xf32>
    %2548 = arith.mulf %2488, %2547 : vector<7x2xf32>
    %2549 = arith.addf %2546, %2548 : vector<7x2xf32>
    %2550 = vector.broadcast %8 : f32 to vector<7x2xf32>
    %2551 = arith.mulf %2492, %2550 : vector<7x2xf32>
    %2552 = arith.addf %2549, %2551 : vector<7x2xf32>
    %2553 = arith.maximumf %2526, %2552 : vector<7x2xf32>
    %2554 = vector.broadcast %0 : f32 to vector<7x2xf32>
    %2555 = arith.mulf %2478, %2554 : vector<7x2xf32>
    %2556 = vector.broadcast %1 : f32 to vector<7x2xf32>
    %2557 = arith.mulf %2482, %2556 : vector<7x2xf32>
    %2558 = arith.addf %2555, %2557 : vector<7x2xf32>
    %2559 = vector.broadcast %2 : f32 to vector<7x2xf32>
    %2560 = arith.mulf %2480, %2559 : vector<7x2xf32>
    %2561 = arith.addf %2558, %2560 : vector<7x2xf32>
    %2562 = vector.broadcast %3 : f32 to vector<7x2xf32>
    %2563 = arith.mulf %2486, %2562 : vector<7x2xf32>
    %2564 = arith.addf %2561, %2563 : vector<7x2xf32>
    %2565 = vector.broadcast %4 : f32 to vector<7x2xf32>
    %2566 = arith.mulf %2490, %2565 : vector<7x2xf32>
    %2567 = arith.addf %2564, %2566 : vector<7x2xf32>
    %2568 = vector.broadcast %5 : f32 to vector<7x2xf32>
    %2569 = arith.mulf %2488, %2568 : vector<7x2xf32>
    %2570 = arith.addf %2567, %2569 : vector<7x2xf32>
    %2571 = vector.broadcast %6 : f32 to vector<7x2xf32>
    %2572 = arith.mulf %2494, %2571 : vector<7x2xf32>
    %2573 = arith.addf %2570, %2572 : vector<7x2xf32>
    %2574 = vector.broadcast %7 : f32 to vector<7x2xf32>
    %2575 = arith.mulf %2498, %2574 : vector<7x2xf32>
    %2576 = arith.addf %2573, %2575 : vector<7x2xf32>
    %2577 = vector.broadcast %8 : f32 to vector<7x2xf32>
    %2578 = arith.mulf %2496, %2577 : vector<7x2xf32>
    %2579 = arith.addf %2576, %2578 : vector<7x2xf32>
    %2580 = arith.maximumf %2553, %2579 : vector<7x2xf32>
    %2581 = vector.broadcast %0 : f32 to vector<7x2xf32>
    %2582 = arith.mulf %2482, %2581 : vector<7x2xf32>
    %2583 = vector.broadcast %1 : f32 to vector<7x2xf32>
    %2584 = arith.mulf %2480, %2583 : vector<7x2xf32>
    %2585 = arith.addf %2582, %2584 : vector<7x2xf32>
    %2586 = vector.broadcast %2 : f32 to vector<7x2xf32>
    %2587 = arith.mulf %2484, %2586 : vector<7x2xf32>
    %2588 = arith.addf %2585, %2587 : vector<7x2xf32>
    %2589 = vector.broadcast %3 : f32 to vector<7x2xf32>
    %2590 = arith.mulf %2490, %2589 : vector<7x2xf32>
    %2591 = arith.addf %2588, %2590 : vector<7x2xf32>
    %2592 = vector.broadcast %4 : f32 to vector<7x2xf32>
    %2593 = arith.mulf %2488, %2592 : vector<7x2xf32>
    %2594 = arith.addf %2591, %2593 : vector<7x2xf32>
    %2595 = vector.broadcast %5 : f32 to vector<7x2xf32>
    %2596 = arith.mulf %2492, %2595 : vector<7x2xf32>
    %2597 = arith.addf %2594, %2596 : vector<7x2xf32>
    %2598 = vector.broadcast %6 : f32 to vector<7x2xf32>
    %2599 = arith.mulf %2498, %2598 : vector<7x2xf32>
    %2600 = arith.addf %2597, %2599 : vector<7x2xf32>
    %2601 = vector.broadcast %7 : f32 to vector<7x2xf32>
    %2602 = arith.mulf %2496, %2601 : vector<7x2xf32>
    %2603 = arith.addf %2600, %2602 : vector<7x2xf32>
    %2604 = vector.broadcast %8 : f32 to vector<7x2xf32>
    %2605 = arith.mulf %2500, %2604 : vector<7x2xf32>
    %2606 = arith.addf %2603, %2605 : vector<7x2xf32>
    %2607 = arith.maximumf %2580, %2606 : vector<7x2xf32>
    %2608 = vector.broadcast %36 : f32 to vector<7x2xf32>
    %2609 = arith.addf %2607, %2608 : vector<7x2xf32>
    %cst_421 = arith.constant 0.000000e+00 : f32
    %2610 = vector.broadcast %cst_421 : f32 to vector<7x2xf32>
    %2611 = arith.maximumf %2609, %2610 : vector<7x2xf32>
    %c40 = arith.constant 40 : index
    %c0_422 = arith.constant 0 : index
    %2612 = vector.load %arg10[%c40, %c0_422] : memref<224x2xf32, #tpu.memory_space<vmem>>, vector<7x2xf32>
    tpu.vector_store %arg10[%c40, %c0_422], %2611 {strides = array<i32>} : memref<224x2xf32, #tpu.memory_space<vmem>>, vector<7x2xf32>,
    %2613 = vector.broadcast %9 : f32 to vector<7x2xf32>
    %2614 = arith.mulf %2470, %2613 : vector<7x2xf32>
    %2615 = vector.broadcast %10 : f32 to vector<7x2xf32>
    %2616 = arith.mulf %2474, %2615 : vector<7x2xf32>
    %2617 = arith.addf %2614, %2616 : vector<7x2xf32>
    %2618 = vector.broadcast %11 : f32 to vector<7x2xf32>
    %2619 = arith.mulf %2472, %2618 : vector<7x2xf32>
    %2620 = arith.addf %2617, %2619 : vector<7x2xf32>
    %2621 = vector.broadcast %12 : f32 to vector<7x2xf32>
    %2622 = arith.mulf %2478, %2621 : vector<7x2xf32>
    %2623 = arith.addf %2620, %2622 : vector<7x2xf32>
    %2624 = vector.broadcast %13 : f32 to vector<7x2xf32>
    %2625 = arith.mulf %2482, %2624 : vector<7x2xf32>
    %2626 = arith.addf %2623, %2625 : vector<7x2xf32>
    %2627 = vector.broadcast %14 : f32 to vector<7x2xf32>
    %2628 = arith.mulf %2480, %2627 : vector<7x2xf32>
    %2629 = arith.addf %2626, %2628 : vector<7x2xf32>
    %2630 = vector.broadcast %15 : f32 to vector<7x2xf32>
    %2631 = arith.mulf %2486, %2630 : vector<7x2xf32>
    %2632 = arith.addf %2629, %2631 : vector<7x2xf32>
    %2633 = vector.broadcast %16 : f32 to vector<7x2xf32>
    %2634 = arith.mulf %2490, %2633 : vector<7x2xf32>
    %2635 = arith.addf %2632, %2634 : vector<7x2xf32>
    %2636 = vector.broadcast %17 : f32 to vector<7x2xf32>
    %2637 = arith.mulf %2488, %2636 : vector<7x2xf32>
    %2638 = arith.addf %2635, %2637 : vector<7x2xf32>
    %2639 = vector.broadcast %9 : f32 to vector<7x2xf32>
    %2640 = arith.mulf %2474, %2639 : vector<7x2xf32>
    %2641 = vector.broadcast %10 : f32 to vector<7x2xf32>
    %2642 = arith.mulf %2472, %2641 : vector<7x2xf32>
    %2643 = arith.addf %2640, %2642 : vector<7x2xf32>
    %2644 = vector.broadcast %11 : f32 to vector<7x2xf32>
    %2645 = arith.mulf %2476, %2644 : vector<7x2xf32>
    %2646 = arith.addf %2643, %2645 : vector<7x2xf32>
    %2647 = vector.broadcast %12 : f32 to vector<7x2xf32>
    %2648 = arith.mulf %2482, %2647 : vector<7x2xf32>
    %2649 = arith.addf %2646, %2648 : vector<7x2xf32>
    %2650 = vector.broadcast %13 : f32 to vector<7x2xf32>
    %2651 = arith.mulf %2480, %2650 : vector<7x2xf32>
    %2652 = arith.addf %2649, %2651 : vector<7x2xf32>
    %2653 = vector.broadcast %14 : f32 to vector<7x2xf32>
    %2654 = arith.mulf %2484, %2653 : vector<7x2xf32>
    %2655 = arith.addf %2652, %2654 : vector<7x2xf32>
    %2656 = vector.broadcast %15 : f32 to vector<7x2xf32>
    %2657 = arith.mulf %2490, %2656 : vector<7x2xf32>
    %2658 = arith.addf %2655, %2657 : vector<7x2xf32>
    %2659 = vector.broadcast %16 : f32 to vector<7x2xf32>
    %2660 = arith.mulf %2488, %2659 : vector<7x2xf32>
    %2661 = arith.addf %2658, %2660 : vector<7x2xf32>
    %2662 = vector.broadcast %17 : f32 to vector<7x2xf32>
    %2663 = arith.mulf %2492, %2662 : vector<7x2xf32>
    %2664 = arith.addf %2661, %2663 : vector<7x2xf32>
    %2665 = arith.maximumf %2638, %2664 : vector<7x2xf32>
    %2666 = vector.broadcast %9 : f32 to vector<7x2xf32>
    %2667 = arith.mulf %2478, %2666 : vector<7x2xf32>
    %2668 = vector.broadcast %10 : f32 to vector<7x2xf32>
    %2669 = arith.mulf %2482, %2668 : vector<7x2xf32>
    %2670 = arith.addf %2667, %2669 : vector<7x2xf32>
    %2671 = vector.broadcast %11 : f32 to vector<7x2xf32>
    %2672 = arith.mulf %2480, %2671 : vector<7x2xf32>
    %2673 = arith.addf %2670, %2672 : vector<7x2xf32>
    %2674 = vector.broadcast %12 : f32 to vector<7x2xf32>
    %2675 = arith.mulf %2486, %2674 : vector<7x2xf32>
    %2676 = arith.addf %2673, %2675 : vector<7x2xf32>
    %2677 = vector.broadcast %13 : f32 to vector<7x2xf32>
    %2678 = arith.mulf %2490, %2677 : vector<7x2xf32>
    %2679 = arith.addf %2676, %2678 : vector<7x2xf32>
    %2680 = vector.broadcast %14 : f32 to vector<7x2xf32>
    %2681 = arith.mulf %2488, %2680 : vector<7x2xf32>
    %2682 = arith.addf %2679, %2681 : vector<7x2xf32>
    %2683 = vector.broadcast %15 : f32 to vector<7x2xf32>
    %2684 = arith.mulf %2494, %2683 : vector<7x2xf32>
    %2685 = arith.addf %2682, %2684 : vector<7x2xf32>
    %2686 = vector.broadcast %16 : f32 to vector<7x2xf32>
    %2687 = arith.mulf %2498, %2686 : vector<7x2xf32>
    %2688 = arith.addf %2685, %2687 : vector<7x2xf32>
    %2689 = vector.broadcast %17 : f32 to vector<7x2xf32>
    %2690 = arith.mulf %2496, %2689 : vector<7x2xf32>
    %2691 = arith.addf %2688, %2690 : vector<7x2xf32>
    %2692 = arith.maximumf %2665, %2691 : vector<7x2xf32>
    %2693 = vector.broadcast %9 : f32 to vector<7x2xf32>
    %2694 = arith.mulf %2482, %2693 : vector<7x2xf32>
    %2695 = vector.broadcast %10 : f32 to vector<7x2xf32>
    %2696 = arith.mulf %2480, %2695 : vector<7x2xf32>
    %2697 = arith.addf %2694, %2696 : vector<7x2xf32>
    %2698 = vector.broadcast %11 : f32 to vector<7x2xf32>
    %2699 = arith.mulf %2484, %2698 : vector<7x2xf32>
    %2700 = arith.addf %2697, %2699 : vector<7x2xf32>
    %2701 = vector.broadcast %12 : f32 to vector<7x2xf32>
    %2702 = arith.mulf %2490, %2701 : vector<7x2xf32>
    %2703 = arith.addf %2700, %2702 : vector<7x2xf32>
    %2704 = vector.broadcast %13 : f32 to vector<7x2xf32>
    %2705 = arith.mulf %2488, %2704 : vector<7x2xf32>
    %2706 = arith.addf %2703, %2705 : vector<7x2xf32>
    %2707 = vector.broadcast %14 : f32 to vector<7x2xf32>
    %2708 = arith.mulf %2492, %2707 : vector<7x2xf32>
    %2709 = arith.addf %2706, %2708 : vector<7x2xf32>
    %2710 = vector.broadcast %15 : f32 to vector<7x2xf32>
    %2711 = arith.mulf %2498, %2710 : vector<7x2xf32>
    %2712 = arith.addf %2709, %2711 : vector<7x2xf32>
    %2713 = vector.broadcast %16 : f32 to vector<7x2xf32>
    %2714 = arith.mulf %2496, %2713 : vector<7x2xf32>
    %2715 = arith.addf %2712, %2714 : vector<7x2xf32>
    %2716 = vector.broadcast %17 : f32 to vector<7x2xf32>
    %2717 = arith.mulf %2500, %2716 : vector<7x2xf32>
    %2718 = arith.addf %2715, %2717 : vector<7x2xf32>
    %2719 = arith.maximumf %2692, %2718 : vector<7x2xf32>
    %2720 = vector.broadcast %37 : f32 to vector<7x2xf32>
    %2721 = arith.addf %2719, %2720 : vector<7x2xf32>
    %cst_423 = arith.constant 0.000000e+00 : f32
    %2722 = vector.broadcast %cst_423 : f32 to vector<7x2xf32>
    %2723 = arith.maximumf %2721, %2722 : vector<7x2xf32>
    %c96 = arith.constant 96 : index
    %c0_424 = arith.constant 0 : index
    %2724 = vector.load %arg10[%c96, %c0_424] : memref<224x2xf32, #tpu.memory_space<vmem>>, vector<7x2xf32>
    tpu.vector_store %arg10[%c96, %c0_424], %2723 {strides = array<i32>} : memref<224x2xf32, #tpu.memory_space<vmem>>, vector<7x2xf32>,
    %2725 = vector.broadcast %18 : f32 to vector<7x2xf32>
    %2726 = arith.mulf %2470, %2725 : vector<7x2xf32>
    %2727 = vector.broadcast %19 : f32 to vector<7x2xf32>
    %2728 = arith.mulf %2474, %2727 : vector<7x2xf32>
    %2729 = arith.addf %2726, %2728 : vector<7x2xf32>
    %2730 = vector.broadcast %20 : f32 to vector<7x2xf32>
    %2731 = arith.mulf %2472, %2730 : vector<7x2xf32>
    %2732 = arith.addf %2729, %2731 : vector<7x2xf32>
    %2733 = vector.broadcast %21 : f32 to vector<7x2xf32>
    %2734 = arith.mulf %2478, %2733 : vector<7x2xf32>
    %2735 = arith.addf %2732, %2734 : vector<7x2xf32>
    %2736 = vector.broadcast %22 : f32 to vector<7x2xf32>
    %2737 = arith.mulf %2482, %2736 : vector<7x2xf32>
    %2738 = arith.addf %2735, %2737 : vector<7x2xf32>
    %2739 = vector.broadcast %23 : f32 to vector<7x2xf32>
    %2740 = arith.mulf %2480, %2739 : vector<7x2xf32>
    %2741 = arith.addf %2738, %2740 : vector<7x2xf32>
    %2742 = vector.broadcast %24 : f32 to vector<7x2xf32>
    %2743 = arith.mulf %2486, %2742 : vector<7x2xf32>
    %2744 = arith.addf %2741, %2743 : vector<7x2xf32>
    %2745 = vector.broadcast %25 : f32 to vector<7x2xf32>
    %2746 = arith.mulf %2490, %2745 : vector<7x2xf32>
    %2747 = arith.addf %2744, %2746 : vector<7x2xf32>
    %2748 = vector.broadcast %26 : f32 to vector<7x2xf32>
    %2749 = arith.mulf %2488, %2748 : vector<7x2xf32>
    %2750 = arith.addf %2747, %2749 : vector<7x2xf32>
    %2751 = vector.broadcast %18 : f32 to vector<7x2xf32>
    %2752 = arith.mulf %2474, %2751 : vector<7x2xf32>
    %2753 = vector.broadcast %19 : f32 to vector<7x2xf32>
    %2754 = arith.mulf %2472, %2753 : vector<7x2xf32>
    %2755 = arith.addf %2752, %2754 : vector<7x2xf32>
    %2756 = vector.broadcast %20 : f32 to vector<7x2xf32>
    %2757 = arith.mulf %2476, %2756 : vector<7x2xf32>
    %2758 = arith.addf %2755, %2757 : vector<7x2xf32>
    %2759 = vector.broadcast %21 : f32 to vector<7x2xf32>
    %2760 = arith.mulf %2482, %2759 : vector<7x2xf32>
    %2761 = arith.addf %2758, %2760 : vector<7x2xf32>
    %2762 = vector.broadcast %22 : f32 to vector<7x2xf32>
    %2763 = arith.mulf %2480, %2762 : vector<7x2xf32>
    %2764 = arith.addf %2761, %2763 : vector<7x2xf32>
    %2765 = vector.broadcast %23 : f32 to vector<7x2xf32>
    %2766 = arith.mulf %2484, %2765 : vector<7x2xf32>
    %2767 = arith.addf %2764, %2766 : vector<7x2xf32>
    %2768 = vector.broadcast %24 : f32 to vector<7x2xf32>
    %2769 = arith.mulf %2490, %2768 : vector<7x2xf32>
    %2770 = arith.addf %2767, %2769 : vector<7x2xf32>
    %2771 = vector.broadcast %25 : f32 to vector<7x2xf32>
    %2772 = arith.mulf %2488, %2771 : vector<7x2xf32>
    %2773 = arith.addf %2770, %2772 : vector<7x2xf32>
    %2774 = vector.broadcast %26 : f32 to vector<7x2xf32>
    %2775 = arith.mulf %2492, %2774 : vector<7x2xf32>
    %2776 = arith.addf %2773, %2775 : vector<7x2xf32>
    %2777 = arith.maximumf %2750, %2776 : vector<7x2xf32>
    %2778 = vector.broadcast %18 : f32 to vector<7x2xf32>
    %2779 = arith.mulf %2478, %2778 : vector<7x2xf32>
    %2780 = vector.broadcast %19 : f32 to vector<7x2xf32>
    %2781 = arith.mulf %2482, %2780 : vector<7x2xf32>
    %2782 = arith.addf %2779, %2781 : vector<7x2xf32>
    %2783 = vector.broadcast %20 : f32 to vector<7x2xf32>
    %2784 = arith.mulf %2480, %2783 : vector<7x2xf32>
    %2785 = arith.addf %2782, %2784 : vector<7x2xf32>
    %2786 = vector.broadcast %21 : f32 to vector<7x2xf32>
    %2787 = arith.mulf %2486, %2786 : vector<7x2xf32>
    %2788 = arith.addf %2785, %2787 : vector<7x2xf32>
    %2789 = vector.broadcast %22 : f32 to vector<7x2xf32>
    %2790 = arith.mulf %2490, %2789 : vector<7x2xf32>
    %2791 = arith.addf %2788, %2790 : vector<7x2xf32>
    %2792 = vector.broadcast %23 : f32 to vector<7x2xf32>
    %2793 = arith.mulf %2488, %2792 : vector<7x2xf32>
    %2794 = arith.addf %2791, %2793 : vector<7x2xf32>
    %2795 = vector.broadcast %24 : f32 to vector<7x2xf32>
    %2796 = arith.mulf %2494, %2795 : vector<7x2xf32>
    %2797 = arith.addf %2794, %2796 : vector<7x2xf32>
    %2798 = vector.broadcast %25 : f32 to vector<7x2xf32>
    %2799 = arith.mulf %2498, %2798 : vector<7x2xf32>
    %2800 = arith.addf %2797, %2799 : vector<7x2xf32>
    %2801 = vector.broadcast %26 : f32 to vector<7x2xf32>
    %2802 = arith.mulf %2496, %2801 : vector<7x2xf32>
    %2803 = arith.addf %2800, %2802 : vector<7x2xf32>
    %2804 = arith.maximumf %2777, %2803 : vector<7x2xf32>
    %2805 = vector.broadcast %18 : f32 to vector<7x2xf32>
    %2806 = arith.mulf %2482, %2805 : vector<7x2xf32>
    %2807 = vector.broadcast %19 : f32 to vector<7x2xf32>
    %2808 = arith.mulf %2480, %2807 : vector<7x2xf32>
    %2809 = arith.addf %2806, %2808 : vector<7x2xf32>
    %2810 = vector.broadcast %20 : f32 to vector<7x2xf32>
    %2811 = arith.mulf %2484, %2810 : vector<7x2xf32>
    %2812 = arith.addf %2809, %2811 : vector<7x2xf32>
    %2813 = vector.broadcast %21 : f32 to vector<7x2xf32>
    %2814 = arith.mulf %2490, %2813 : vector<7x2xf32>
    %2815 = arith.addf %2812, %2814 : vector<7x2xf32>
    %2816 = vector.broadcast %22 : f32 to vector<7x2xf32>
    %2817 = arith.mulf %2488, %2816 : vector<7x2xf32>
    %2818 = arith.addf %2815, %2817 : vector<7x2xf32>
    %2819 = vector.broadcast %23 : f32 to vector<7x2xf32>
    %2820 = arith.mulf %2492, %2819 : vector<7x2xf32>
    %2821 = arith.addf %2818, %2820 : vector<7x2xf32>
    %2822 = vector.broadcast %24 : f32 to vector<7x2xf32>
    %2823 = arith.mulf %2498, %2822 : vector<7x2xf32>
    %2824 = arith.addf %2821, %2823 : vector<7x2xf32>
    %2825 = vector.broadcast %25 : f32 to vector<7x2xf32>
    %2826 = arith.mulf %2496, %2825 : vector<7x2xf32>
    %2827 = arith.addf %2824, %2826 : vector<7x2xf32>
    %2828 = vector.broadcast %26 : f32 to vector<7x2xf32>
    %2829 = arith.mulf %2500, %2828 : vector<7x2xf32>
    %2830 = arith.addf %2827, %2829 : vector<7x2xf32>
    %2831 = arith.maximumf %2804, %2830 : vector<7x2xf32>
    %2832 = vector.broadcast %38 : f32 to vector<7x2xf32>
    %2833 = arith.addf %2831, %2832 : vector<7x2xf32>
    %cst_425 = arith.constant 0.000000e+00 : f32
    %2834 = vector.broadcast %cst_425 : f32 to vector<7x2xf32>
    %2835 = arith.maximumf %2833, %2834 : vector<7x2xf32>
    %c152 = arith.constant 152 : index
    %c0_426 = arith.constant 0 : index
    %2836 = vector.load %arg10[%c152, %c0_426] : memref<224x2xf32, #tpu.memory_space<vmem>>, vector<7x2xf32>
    tpu.vector_store %arg10[%c152, %c0_426], %2835 {strides = array<i32>} : memref<224x2xf32, #tpu.memory_space<vmem>>, vector<7x2xf32>,
    %2837 = vector.broadcast %27 : f32 to vector<7x2xf32>
    %2838 = arith.mulf %2470, %2837 : vector<7x2xf32>
    %2839 = vector.broadcast %28 : f32 to vector<7x2xf32>
    %2840 = arith.mulf %2474, %2839 : vector<7x2xf32>
    %2841 = arith.addf %2838, %2840 : vector<7x2xf32>
    %2842 = vector.broadcast %29 : f32 to vector<7x2xf32>
    %2843 = arith.mulf %2472, %2842 : vector<7x2xf32>
    %2844 = arith.addf %2841, %2843 : vector<7x2xf32>
    %2845 = vector.broadcast %30 : f32 to vector<7x2xf32>
    %2846 = arith.mulf %2478, %2845 : vector<7x2xf32>
    %2847 = arith.addf %2844, %2846 : vector<7x2xf32>
    %2848 = vector.broadcast %31 : f32 to vector<7x2xf32>
    %2849 = arith.mulf %2482, %2848 : vector<7x2xf32>
    %2850 = arith.addf %2847, %2849 : vector<7x2xf32>
    %2851 = vector.broadcast %32 : f32 to vector<7x2xf32>
    %2852 = arith.mulf %2480, %2851 : vector<7x2xf32>
    %2853 = arith.addf %2850, %2852 : vector<7x2xf32>
    %2854 = vector.broadcast %33 : f32 to vector<7x2xf32>
    %2855 = arith.mulf %2486, %2854 : vector<7x2xf32>
    %2856 = arith.addf %2853, %2855 : vector<7x2xf32>
    %2857 = vector.broadcast %34 : f32 to vector<7x2xf32>
    %2858 = arith.mulf %2490, %2857 : vector<7x2xf32>
    %2859 = arith.addf %2856, %2858 : vector<7x2xf32>
    %2860 = vector.broadcast %35 : f32 to vector<7x2xf32>
    %2861 = arith.mulf %2488, %2860 : vector<7x2xf32>
    %2862 = arith.addf %2859, %2861 : vector<7x2xf32>
    %2863 = vector.broadcast %27 : f32 to vector<7x2xf32>
    %2864 = arith.mulf %2474, %2863 : vector<7x2xf32>
    %2865 = vector.broadcast %28 : f32 to vector<7x2xf32>
    %2866 = arith.mulf %2472, %2865 : vector<7x2xf32>
    %2867 = arith.addf %2864, %2866 : vector<7x2xf32>
    %2868 = vector.broadcast %29 : f32 to vector<7x2xf32>
    %2869 = arith.mulf %2476, %2868 : vector<7x2xf32>
    %2870 = arith.addf %2867, %2869 : vector<7x2xf32>
    %2871 = vector.broadcast %30 : f32 to vector<7x2xf32>
    %2872 = arith.mulf %2482, %2871 : vector<7x2xf32>
    %2873 = arith.addf %2870, %2872 : vector<7x2xf32>
    %2874 = vector.broadcast %31 : f32 to vector<7x2xf32>
    %2875 = arith.mulf %2480, %2874 : vector<7x2xf32>
    %2876 = arith.addf %2873, %2875 : vector<7x2xf32>
    %2877 = vector.broadcast %32 : f32 to vector<7x2xf32>
    %2878 = arith.mulf %2484, %2877 : vector<7x2xf32>
    %2879 = arith.addf %2876, %2878 : vector<7x2xf32>
    %2880 = vector.broadcast %33 : f32 to vector<7x2xf32>
    %2881 = arith.mulf %2490, %2880 : vector<7x2xf32>
    %2882 = arith.addf %2879, %2881 : vector<7x2xf32>
    %2883 = vector.broadcast %34 : f32 to vector<7x2xf32>
    %2884 = arith.mulf %2488, %2883 : vector<7x2xf32>
    %2885 = arith.addf %2882, %2884 : vector<7x2xf32>
    %2886 = vector.broadcast %35 : f32 to vector<7x2xf32>
    %2887 = arith.mulf %2492, %2886 : vector<7x2xf32>
    %2888 = arith.addf %2885, %2887 : vector<7x2xf32>
    %2889 = arith.maximumf %2862, %2888 : vector<7x2xf32>
    %2890 = vector.broadcast %27 : f32 to vector<7x2xf32>
    %2891 = arith.mulf %2478, %2890 : vector<7x2xf32>
    %2892 = vector.broadcast %28 : f32 to vector<7x2xf32>
    %2893 = arith.mulf %2482, %2892 : vector<7x2xf32>
    %2894 = arith.addf %2891, %2893 : vector<7x2xf32>
    %2895 = vector.broadcast %29 : f32 to vector<7x2xf32>
    %2896 = arith.mulf %2480, %2895 : vector<7x2xf32>
    %2897 = arith.addf %2894, %2896 : vector<7x2xf32>
    %2898 = vector.broadcast %30 : f32 to vector<7x2xf32>
    %2899 = arith.mulf %2486, %2898 : vector<7x2xf32>
    %2900 = arith.addf %2897, %2899 : vector<7x2xf32>
    %2901 = vector.broadcast %31 : f32 to vector<7x2xf32>
    %2902 = arith.mulf %2490, %2901 : vector<7x2xf32>
    %2903 = arith.addf %2900, %2902 : vector<7x2xf32>
    %2904 = vector.broadcast %32 : f32 to vector<7x2xf32>
    %2905 = arith.mulf %2488, %2904 : vector<7x2xf32>
    %2906 = arith.addf %2903, %2905 : vector<7x2xf32>
    %2907 = vector.broadcast %33 : f32 to vector<7x2xf32>
    %2908 = arith.mulf %2494, %2907 : vector<7x2xf32>
    %2909 = arith.addf %2906, %2908 : vector<7x2xf32>
    %2910 = vector.broadcast %34 : f32 to vector<7x2xf32>
    %2911 = arith.mulf %2498, %2910 : vector<7x2xf32>
    %2912 = arith.addf %2909, %2911 : vector<7x2xf32>
    %2913 = vector.broadcast %35 : f32 to vector<7x2xf32>
    %2914 = arith.mulf %2496, %2913 : vector<7x2xf32>
    %2915 = arith.addf %2912, %2914 : vector<7x2xf32>
    %2916 = arith.maximumf %2889, %2915 : vector<7x2xf32>
    %2917 = vector.broadcast %27 : f32 to vector<7x2xf32>
    %2918 = arith.mulf %2482, %2917 : vector<7x2xf32>
    %2919 = vector.broadcast %28 : f32 to vector<7x2xf32>
    %2920 = arith.mulf %2480, %2919 : vector<7x2xf32>
    %2921 = arith.addf %2918, %2920 : vector<7x2xf32>
    %2922 = vector.broadcast %29 : f32 to vector<7x2xf32>
    %2923 = arith.mulf %2484, %2922 : vector<7x2xf32>
    %2924 = arith.addf %2921, %2923 : vector<7x2xf32>
    %2925 = vector.broadcast %30 : f32 to vector<7x2xf32>
    %2926 = arith.mulf %2490, %2925 : vector<7x2xf32>
    %2927 = arith.addf %2924, %2926 : vector<7x2xf32>
    %2928 = vector.broadcast %31 : f32 to vector<7x2xf32>
    %2929 = arith.mulf %2488, %2928 : vector<7x2xf32>
    %2930 = arith.addf %2927, %2929 : vector<7x2xf32>
    %2931 = vector.broadcast %32 : f32 to vector<7x2xf32>
    %2932 = arith.mulf %2492, %2931 : vector<7x2xf32>
    %2933 = arith.addf %2930, %2932 : vector<7x2xf32>
    %2934 = vector.broadcast %33 : f32 to vector<7x2xf32>
    %2935 = arith.mulf %2498, %2934 : vector<7x2xf32>
    %2936 = arith.addf %2933, %2935 : vector<7x2xf32>
    %2937 = vector.broadcast %34 : f32 to vector<7x2xf32>
    %2938 = arith.mulf %2496, %2937 : vector<7x2xf32>
    %2939 = arith.addf %2936, %2938 : vector<7x2xf32>
    %2940 = vector.broadcast %35 : f32 to vector<7x2xf32>
    %2941 = arith.mulf %2500, %2940 : vector<7x2xf32>
    %2942 = arith.addf %2939, %2941 : vector<7x2xf32>
    %2943 = arith.maximumf %2916, %2942 : vector<7x2xf32>
    %2944 = vector.broadcast %39 : f32 to vector<7x2xf32>
    %2945 = arith.addf %2943, %2944 : vector<7x2xf32>
    %cst_427 = arith.constant 0.000000e+00 : f32
    %2946 = vector.broadcast %cst_427 : f32 to vector<7x2xf32>
    %2947 = arith.maximumf %2945, %2946 : vector<7x2xf32>
    %c208 = arith.constant 208 : index
    %c0_428 = arith.constant 0 : index
    %2948 = vector.load %arg10[%c208, %c0_428] : memref<224x2xf32, #tpu.memory_space<vmem>>, vector<7x2xf32>
    tpu.vector_store %arg10[%c208, %c0_428], %2947 {strides = array<i32>} : memref<224x2xf32, #tpu.memory_space<vmem>>, vector<7x2xf32>,
    %c12_429 = arith.constant 12 : index
    %c0_430 = arith.constant 0 : index
    %c0_431 = arith.constant 0 : index
    %2949 = vector.load %arg3[%c12_429, %c0_430, %c0_431] : memref<16x8x2xf32, #tpu.memory_space<vmem>>, vector<1x7x2xf32>
    %2950 = vector.shape_cast %2949 : vector<1x7x2xf32> to vector<7x2xf32>
    %c12_432 = arith.constant 12 : index
    %c1_433 = arith.constant 1 : index
    %c0_434 = arith.constant 0 : index
    %2951 = vector.load %arg3[%c12_432, %c1_433, %c0_434] : memref<16x8x2xf32, #tpu.memory_space<vmem>>, vector<1x7x2xf32>
    %2952 = vector.shape_cast %2951 : vector<1x7x2xf32> to vector<7x2xf32>
    %c12_435 = arith.constant 12 : index
    %c0_436 = arith.constant 0 : index
    %c0_437 = arith.constant 0 : index
    %2953 = vector.load %arg4[%c12_435, %c0_436, %c0_437] : memref<16x8x2xf32, #tpu.memory_space<vmem>>, vector<1x7x2xf32>
    %2954 = vector.shape_cast %2953 : vector<1x7x2xf32> to vector<7x2xf32>
    %c12_438 = arith.constant 12 : index
    %c1_439 = arith.constant 1 : index
    %c0_440 = arith.constant 0 : index
    %2955 = vector.load %arg4[%c12_438, %c1_439, %c0_440] : memref<16x8x2xf32, #tpu.memory_space<vmem>>, vector<1x7x2xf32>
    %2956 = vector.shape_cast %2955 : vector<1x7x2xf32> to vector<7x2xf32>
    %c13_441 = arith.constant 13 : index
    %c0_442 = arith.constant 0 : index
    %c0_443 = arith.constant 0 : index
    %2957 = vector.load %arg3[%c13_441, %c0_442, %c0_443] : memref<16x8x2xf32, #tpu.memory_space<vmem>>, vector<1x7x2xf32>
    %2958 = vector.shape_cast %2957 : vector<1x7x2xf32> to vector<7x2xf32>
    %c13_444 = arith.constant 13 : index
    %c1_445 = arith.constant 1 : index
    %c0_446 = arith.constant 0 : index
    %2959 = vector.load %arg3[%c13_444, %c1_445, %c0_446] : memref<16x8x2xf32, #tpu.memory_space<vmem>>, vector<1x7x2xf32>
    %2960 = vector.shape_cast %2959 : vector<1x7x2xf32> to vector<7x2xf32>
    %c13_447 = arith.constant 13 : index
    %c0_448 = arith.constant 0 : index
    %c0_449 = arith.constant 0 : index
    %2961 = vector.load %arg4[%c13_447, %c0_448, %c0_449] : memref<16x8x2xf32, #tpu.memory_space<vmem>>, vector<1x7x2xf32>
    %2962 = vector.shape_cast %2961 : vector<1x7x2xf32> to vector<7x2xf32>
    %c13_450 = arith.constant 13 : index
    %c1_451 = arith.constant 1 : index
    %c0_452 = arith.constant 0 : index
    %2963 = vector.load %arg4[%c13_450, %c1_451, %c0_452] : memref<16x8x2xf32, #tpu.memory_space<vmem>>, vector<1x7x2xf32>
    %2964 = vector.shape_cast %2963 : vector<1x7x2xf32> to vector<7x2xf32>
    %c14 = arith.constant 14 : index
    %c0_453 = arith.constant 0 : index
    %c0_454 = arith.constant 0 : index
    %2965 = vector.load %arg3[%c14, %c0_453, %c0_454] : memref<16x8x2xf32, #tpu.memory_space<vmem>>, vector<1x7x2xf32>
    %2966 = vector.shape_cast %2965 : vector<1x7x2xf32> to vector<7x2xf32>
    %c14_455 = arith.constant 14 : index
    %c1_456 = arith.constant 1 : index
    %c0_457 = arith.constant 0 : index
    %2967 = vector.load %arg3[%c14_455, %c1_456, %c0_457] : memref<16x8x2xf32, #tpu.memory_space<vmem>>, vector<1x7x2xf32>
    %2968 = vector.shape_cast %2967 : vector<1x7x2xf32> to vector<7x2xf32>
    %c14_458 = arith.constant 14 : index
    %c0_459 = arith.constant 0 : index
    %c0_460 = arith.constant 0 : index
    %2969 = vector.load %arg4[%c14_458, %c0_459, %c0_460] : memref<16x8x2xf32, #tpu.memory_space<vmem>>, vector<1x7x2xf32>
    %2970 = vector.shape_cast %2969 : vector<1x7x2xf32> to vector<7x2xf32>
    %c14_461 = arith.constant 14 : index
    %c1_462 = arith.constant 1 : index
    %c0_463 = arith.constant 0 : index
    %2971 = vector.load %arg4[%c14_461, %c1_462, %c0_463] : memref<16x8x2xf32, #tpu.memory_space<vmem>>, vector<1x7x2xf32>
    %2972 = vector.shape_cast %2971 : vector<1x7x2xf32> to vector<7x2xf32>
    %c15_464 = arith.constant 15 : index
    %c0_465 = arith.constant 0 : index
    %c0_466 = arith.constant 0 : index
    %2973 = vector.load %arg3[%c15_464, %c0_465, %c0_466] : memref<16x8x2xf32, #tpu.memory_space<vmem>>, vector<1x7x2xf32>
    %2974 = vector.shape_cast %2973 : vector<1x7x2xf32> to vector<7x2xf32>
    %c15_467 = arith.constant 15 : index
    %c1_468 = arith.constant 1 : index
    %c0_469 = arith.constant 0 : index
    %2975 = vector.load %arg3[%c15_467, %c1_468, %c0_469] : memref<16x8x2xf32, #tpu.memory_space<vmem>>, vector<1x7x2xf32>
    %2976 = vector.shape_cast %2975 : vector<1x7x2xf32> to vector<7x2xf32>
    %c15_470 = arith.constant 15 : index
    %c0_471 = arith.constant 0 : index
    %c0_472 = arith.constant 0 : index
    %2977 = vector.load %arg4[%c15_470, %c0_471, %c0_472] : memref<16x8x2xf32, #tpu.memory_space<vmem>>, vector<1x7x2xf32>
    %2978 = vector.shape_cast %2977 : vector<1x7x2xf32> to vector<7x2xf32>
    %c15_473 = arith.constant 15 : index
    %c1_474 = arith.constant 1 : index
    %c0_475 = arith.constant 0 : index
    %2979 = vector.load %arg4[%c15_473, %c1_474, %c0_475] : memref<16x8x2xf32, #tpu.memory_space<vmem>>, vector<1x7x2xf32>
    %2980 = vector.shape_cast %2979 : vector<1x7x2xf32> to vector<7x2xf32>
    %2981 = vector.broadcast %0 : f32 to vector<7x2xf32>
    %2982 = arith.mulf %2950, %2981 : vector<7x2xf32>
    %2983 = vector.broadcast %1 : f32 to vector<7x2xf32>
    %2984 = arith.mulf %2954, %2983 : vector<7x2xf32>
    %2985 = arith.addf %2982, %2984 : vector<7x2xf32>
    %2986 = vector.broadcast %2 : f32 to vector<7x2xf32>
    %2987 = arith.mulf %2952, %2986 : vector<7x2xf32>
    %2988 = arith.addf %2985, %2987 : vector<7x2xf32>
    %2989 = vector.broadcast %3 : f32 to vector<7x2xf32>
    %2990 = arith.mulf %2958, %2989 : vector<7x2xf32>
    %2991 = arith.addf %2988, %2990 : vector<7x2xf32>
    %2992 = vector.broadcast %4 : f32 to vector<7x2xf32>
    %2993 = arith.mulf %2962, %2992 : vector<7x2xf32>
    %2994 = arith.addf %2991, %2993 : vector<7x2xf32>
    %2995 = vector.broadcast %5 : f32 to vector<7x2xf32>
    %2996 = arith.mulf %2960, %2995 : vector<7x2xf32>
    %2997 = arith.addf %2994, %2996 : vector<7x2xf32>
    %2998 = vector.broadcast %6 : f32 to vector<7x2xf32>
    %2999 = arith.mulf %2966, %2998 : vector<7x2xf32>
    %3000 = arith.addf %2997, %2999 : vector<7x2xf32>
    %3001 = vector.broadcast %7 : f32 to vector<7x2xf32>
    %3002 = arith.mulf %2970, %3001 : vector<7x2xf32>
    %3003 = arith.addf %3000, %3002 : vector<7x2xf32>
    %3004 = vector.broadcast %8 : f32 to vector<7x2xf32>
    %3005 = arith.mulf %2968, %3004 : vector<7x2xf32>
    %3006 = arith.addf %3003, %3005 : vector<7x2xf32>
    %3007 = vector.broadcast %0 : f32 to vector<7x2xf32>
    %3008 = arith.mulf %2954, %3007 : vector<7x2xf32>
    %3009 = vector.broadcast %1 : f32 to vector<7x2xf32>
    %3010 = arith.mulf %2952, %3009 : vector<7x2xf32>
    %3011 = arith.addf %3008, %3010 : vector<7x2xf32>
    %3012 = vector.broadcast %2 : f32 to vector<7x2xf32>
    %3013 = arith.mulf %2956, %3012 : vector<7x2xf32>
    %3014 = arith.addf %3011, %3013 : vector<7x2xf32>
    %3015 = vector.broadcast %3 : f32 to vector<7x2xf32>
    %3016 = arith.mulf %2962, %3015 : vector<7x2xf32>
    %3017 = arith.addf %3014, %3016 : vector<7x2xf32>
    %3018 = vector.broadcast %4 : f32 to vector<7x2xf32>
    %3019 = arith.mulf %2960, %3018 : vector<7x2xf32>
    %3020 = arith.addf %3017, %3019 : vector<7x2xf32>
    %3021 = vector.broadcast %5 : f32 to vector<7x2xf32>
    %3022 = arith.mulf %2964, %3021 : vector<7x2xf32>
    %3023 = arith.addf %3020, %3022 : vector<7x2xf32>
    %3024 = vector.broadcast %6 : f32 to vector<7x2xf32>
    %3025 = arith.mulf %2970, %3024 : vector<7x2xf32>
    %3026 = arith.addf %3023, %3025 : vector<7x2xf32>
    %3027 = vector.broadcast %7 : f32 to vector<7x2xf32>
    %3028 = arith.mulf %2968, %3027 : vector<7x2xf32>
    %3029 = arith.addf %3026, %3028 : vector<7x2xf32>
    %3030 = vector.broadcast %8 : f32 to vector<7x2xf32>
    %3031 = arith.mulf %2972, %3030 : vector<7x2xf32>
    %3032 = arith.addf %3029, %3031 : vector<7x2xf32>
    %3033 = arith.maximumf %3006, %3032 : vector<7x2xf32>
    %3034 = vector.broadcast %0 : f32 to vector<7x2xf32>
    %3035 = arith.mulf %2958, %3034 : vector<7x2xf32>
    %3036 = vector.broadcast %1 : f32 to vector<7x2xf32>
    %3037 = arith.mulf %2962, %3036 : vector<7x2xf32>
    %3038 = arith.addf %3035, %3037 : vector<7x2xf32>
    %3039 = vector.broadcast %2 : f32 to vector<7x2xf32>
    %3040 = arith.mulf %2960, %3039 : vector<7x2xf32>
    %3041 = arith.addf %3038, %3040 : vector<7x2xf32>
    %3042 = vector.broadcast %3 : f32 to vector<7x2xf32>
    %3043 = arith.mulf %2966, %3042 : vector<7x2xf32>
    %3044 = arith.addf %3041, %3043 : vector<7x2xf32>
    %3045 = vector.broadcast %4 : f32 to vector<7x2xf32>
    %3046 = arith.mulf %2970, %3045 : vector<7x2xf32>
    %3047 = arith.addf %3044, %3046 : vector<7x2xf32>
    %3048 = vector.broadcast %5 : f32 to vector<7x2xf32>
    %3049 = arith.mulf %2968, %3048 : vector<7x2xf32>
    %3050 = arith.addf %3047, %3049 : vector<7x2xf32>
    %3051 = vector.broadcast %6 : f32 to vector<7x2xf32>
    %3052 = arith.mulf %2974, %3051 : vector<7x2xf32>
    %3053 = arith.addf %3050, %3052 : vector<7x2xf32>
    %3054 = vector.broadcast %7 : f32 to vector<7x2xf32>
    %3055 = arith.mulf %2978, %3054 : vector<7x2xf32>
    %3056 = arith.addf %3053, %3055 : vector<7x2xf32>
    %3057 = vector.broadcast %8 : f32 to vector<7x2xf32>
    %3058 = arith.mulf %2976, %3057 : vector<7x2xf32>
    %3059 = arith.addf %3056, %3058 : vector<7x2xf32>
    %3060 = arith.maximumf %3033, %3059 : vector<7x2xf32>
    %3061 = vector.broadcast %0 : f32 to vector<7x2xf32>
    %3062 = arith.mulf %2962, %3061 : vector<7x2xf32>
    %3063 = vector.broadcast %1 : f32 to vector<7x2xf32>
    %3064 = arith.mulf %2960, %3063 : vector<7x2xf32>
    %3065 = arith.addf %3062, %3064 : vector<7x2xf32>
    %3066 = vector.broadcast %2 : f32 to vector<7x2xf32>
    %3067 = arith.mulf %2964, %3066 : vector<7x2xf32>
    %3068 = arith.addf %3065, %3067 : vector<7x2xf32>
    %3069 = vector.broadcast %3 : f32 to vector<7x2xf32>
    %3070 = arith.mulf %2970, %3069 : vector<7x2xf32>
    %3071 = arith.addf %3068, %3070 : vector<7x2xf32>
    %3072 = vector.broadcast %4 : f32 to vector<7x2xf32>
    %3073 = arith.mulf %2968, %3072 : vector<7x2xf32>
    %3074 = arith.addf %3071, %3073 : vector<7x2xf32>
    %3075 = vector.broadcast %5 : f32 to vector<7x2xf32>
    %3076 = arith.mulf %2972, %3075 : vector<7x2xf32>
    %3077 = arith.addf %3074, %3076 : vector<7x2xf32>
    %3078 = vector.broadcast %6 : f32 to vector<7x2xf32>
    %3079 = arith.mulf %2978, %3078 : vector<7x2xf32>
    %3080 = arith.addf %3077, %3079 : vector<7x2xf32>
    %3081 = vector.broadcast %7 : f32 to vector<7x2xf32>
    %3082 = arith.mulf %2976, %3081 : vector<7x2xf32>
    %3083 = arith.addf %3080, %3082 : vector<7x2xf32>
    %3084 = vector.broadcast %8 : f32 to vector<7x2xf32>
    %3085 = arith.mulf %2980, %3084 : vector<7x2xf32>
    %3086 = arith.addf %3083, %3085 : vector<7x2xf32>
    %3087 = arith.maximumf %3060, %3086 : vector<7x2xf32>
    %3088 = vector.broadcast %36 : f32 to vector<7x2xf32>
    %3089 = arith.addf %3087, %3088 : vector<7x2xf32>
    %cst_476 = arith.constant 0.000000e+00 : f32
    %3090 = vector.broadcast %cst_476 : f32 to vector<7x2xf32>
    %3091 = arith.maximumf %3089, %3090 : vector<7x2xf32>
    %c48 = arith.constant 48 : index
    %c0_477 = arith.constant 0 : index
    %3092 = vector.load %arg10[%c48, %c0_477] : memref<224x2xf32, #tpu.memory_space<vmem>>, vector<7x2xf32>
    tpu.vector_store %arg10[%c48, %c0_477], %3091 {strides = array<i32>} : memref<224x2xf32, #tpu.memory_space<vmem>>, vector<7x2xf32>,
    %3093 = vector.broadcast %9 : f32 to vector<7x2xf32>
    %3094 = arith.mulf %2950, %3093 : vector<7x2xf32>
    %3095 = vector.broadcast %10 : f32 to vector<7x2xf32>
    %3096 = arith.mulf %2954, %3095 : vector<7x2xf32>
    %3097 = arith.addf %3094, %3096 : vector<7x2xf32>
    %3098 = vector.broadcast %11 : f32 to vector<7x2xf32>
    %3099 = arith.mulf %2952, %3098 : vector<7x2xf32>
    %3100 = arith.addf %3097, %3099 : vector<7x2xf32>
    %3101 = vector.broadcast %12 : f32 to vector<7x2xf32>
    %3102 = arith.mulf %2958, %3101 : vector<7x2xf32>
    %3103 = arith.addf %3100, %3102 : vector<7x2xf32>
    %3104 = vector.broadcast %13 : f32 to vector<7x2xf32>
    %3105 = arith.mulf %2962, %3104 : vector<7x2xf32>
    %3106 = arith.addf %3103, %3105 : vector<7x2xf32>
    %3107 = vector.broadcast %14 : f32 to vector<7x2xf32>
    %3108 = arith.mulf %2960, %3107 : vector<7x2xf32>
    %3109 = arith.addf %3106, %3108 : vector<7x2xf32>
    %3110 = vector.broadcast %15 : f32 to vector<7x2xf32>
    %3111 = arith.mulf %2966, %3110 : vector<7x2xf32>
    %3112 = arith.addf %3109, %3111 : vector<7x2xf32>
    %3113 = vector.broadcast %16 : f32 to vector<7x2xf32>
    %3114 = arith.mulf %2970, %3113 : vector<7x2xf32>
    %3115 = arith.addf %3112, %3114 : vector<7x2xf32>
    %3116 = vector.broadcast %17 : f32 to vector<7x2xf32>
    %3117 = arith.mulf %2968, %3116 : vector<7x2xf32>
    %3118 = arith.addf %3115, %3117 : vector<7x2xf32>
    %3119 = vector.broadcast %9 : f32 to vector<7x2xf32>
    %3120 = arith.mulf %2954, %3119 : vector<7x2xf32>
    %3121 = vector.broadcast %10 : f32 to vector<7x2xf32>
    %3122 = arith.mulf %2952, %3121 : vector<7x2xf32>
    %3123 = arith.addf %3120, %3122 : vector<7x2xf32>
    %3124 = vector.broadcast %11 : f32 to vector<7x2xf32>
    %3125 = arith.mulf %2956, %3124 : vector<7x2xf32>
    %3126 = arith.addf %3123, %3125 : vector<7x2xf32>
    %3127 = vector.broadcast %12 : f32 to vector<7x2xf32>
    %3128 = arith.mulf %2962, %3127 : vector<7x2xf32>
    %3129 = arith.addf %3126, %3128 : vector<7x2xf32>
    %3130 = vector.broadcast %13 : f32 to vector<7x2xf32>
    %3131 = arith.mulf %2960, %3130 : vector<7x2xf32>
    %3132 = arith.addf %3129, %3131 : vector<7x2xf32>
    %3133 = vector.broadcast %14 : f32 to vector<7x2xf32>
    %3134 = arith.mulf %2964, %3133 : vector<7x2xf32>
    %3135 = arith.addf %3132, %3134 : vector<7x2xf32>
    %3136 = vector.broadcast %15 : f32 to vector<7x2xf32>
    %3137 = arith.mulf %2970, %3136 : vector<7x2xf32>
    %3138 = arith.addf %3135, %3137 : vector<7x2xf32>
    %3139 = vector.broadcast %16 : f32 to vector<7x2xf32>
    %3140 = arith.mulf %2968, %3139 : vector<7x2xf32>
    %3141 = arith.addf %3138, %3140 : vector<7x2xf32>
    %3142 = vector.broadcast %17 : f32 to vector<7x2xf32>
    %3143 = arith.mulf %2972, %3142 : vector<7x2xf32>
    %3144 = arith.addf %3141, %3143 : vector<7x2xf32>
    %3145 = arith.maximumf %3118, %3144 : vector<7x2xf32>
    %3146 = vector.broadcast %9 : f32 to vector<7x2xf32>
    %3147 = arith.mulf %2958, %3146 : vector<7x2xf32>
    %3148 = vector.broadcast %10 : f32 to vector<7x2xf32>
    %3149 = arith.mulf %2962, %3148 : vector<7x2xf32>
    %3150 = arith.addf %3147, %3149 : vector<7x2xf32>
    %3151 = vector.broadcast %11 : f32 to vector<7x2xf32>
    %3152 = arith.mulf %2960, %3151 : vector<7x2xf32>
    %3153 = arith.addf %3150, %3152 : vector<7x2xf32>
    %3154 = vector.broadcast %12 : f32 to vector<7x2xf32>
    %3155 = arith.mulf %2966, %3154 : vector<7x2xf32>
    %3156 = arith.addf %3153, %3155 : vector<7x2xf32>
    %3157 = vector.broadcast %13 : f32 to vector<7x2xf32>
    %3158 = arith.mulf %2970, %3157 : vector<7x2xf32>
    %3159 = arith.addf %3156, %3158 : vector<7x2xf32>
    %3160 = vector.broadcast %14 : f32 to vector<7x2xf32>
    %3161 = arith.mulf %2968, %3160 : vector<7x2xf32>
    %3162 = arith.addf %3159, %3161 : vector<7x2xf32>
    %3163 = vector.broadcast %15 : f32 to vector<7x2xf32>
    %3164 = arith.mulf %2974, %3163 : vector<7x2xf32>
    %3165 = arith.addf %3162, %3164 : vector<7x2xf32>
    %3166 = vector.broadcast %16 : f32 to vector<7x2xf32>
    %3167 = arith.mulf %2978, %3166 : vector<7x2xf32>
    %3168 = arith.addf %3165, %3167 : vector<7x2xf32>
    %3169 = vector.broadcast %17 : f32 to vector<7x2xf32>
    %3170 = arith.mulf %2976, %3169 : vector<7x2xf32>
    %3171 = arith.addf %3168, %3170 : vector<7x2xf32>
    %3172 = arith.maximumf %3145, %3171 : vector<7x2xf32>
    %3173 = vector.broadcast %9 : f32 to vector<7x2xf32>
    %3174 = arith.mulf %2962, %3173 : vector<7x2xf32>
    %3175 = vector.broadcast %10 : f32 to vector<7x2xf32>
    %3176 = arith.mulf %2960, %3175 : vector<7x2xf32>
    %3177 = arith.addf %3174, %3176 : vector<7x2xf32>
    %3178 = vector.broadcast %11 : f32 to vector<7x2xf32>
    %3179 = arith.mulf %2964, %3178 : vector<7x2xf32>
    %3180 = arith.addf %3177, %3179 : vector<7x2xf32>
    %3181 = vector.broadcast %12 : f32 to vector<7x2xf32>
    %3182 = arith.mulf %2970, %3181 : vector<7x2xf32>
    %3183 = arith.addf %3180, %3182 : vector<7x2xf32>
    %3184 = vector.broadcast %13 : f32 to vector<7x2xf32>
    %3185 = arith.mulf %2968, %3184 : vector<7x2xf32>
    %3186 = arith.addf %3183, %3185 : vector<7x2xf32>
    %3187 = vector.broadcast %14 : f32 to vector<7x2xf32>
    %3188 = arith.mulf %2972, %3187 : vector<7x2xf32>
    %3189 = arith.addf %3186, %3188 : vector<7x2xf32>
    %3190 = vector.broadcast %15 : f32 to vector<7x2xf32>
    %3191 = arith.mulf %2978, %3190 : vector<7x2xf32>
    %3192 = arith.addf %3189, %3191 : vector<7x2xf32>
    %3193 = vector.broadcast %16 : f32 to vector<7x2xf32>
    %3194 = arith.mulf %2976, %3193 : vector<7x2xf32>
    %3195 = arith.addf %3192, %3194 : vector<7x2xf32>
    %3196 = vector.broadcast %17 : f32 to vector<7x2xf32>
    %3197 = arith.mulf %2980, %3196 : vector<7x2xf32>
    %3198 = arith.addf %3195, %3197 : vector<7x2xf32>
    %3199 = arith.maximumf %3172, %3198 : vector<7x2xf32>
    %3200 = vector.broadcast %37 : f32 to vector<7x2xf32>
    %3201 = arith.addf %3199, %3200 : vector<7x2xf32>
    %cst_478 = arith.constant 0.000000e+00 : f32
    %3202 = vector.broadcast %cst_478 : f32 to vector<7x2xf32>
    %3203 = arith.maximumf %3201, %3202 : vector<7x2xf32>
    %c104 = arith.constant 104 : index
    %c0_479 = arith.constant 0 : index
    %3204 = vector.load %arg10[%c104, %c0_479] : memref<224x2xf32, #tpu.memory_space<vmem>>, vector<7x2xf32>
    tpu.vector_store %arg10[%c104, %c0_479], %3203 {strides = array<i32>} : memref<224x2xf32, #tpu.memory_space<vmem>>, vector<7x2xf32>,
    %3205 = vector.broadcast %18 : f32 to vector<7x2xf32>
    %3206 = arith.mulf %2950, %3205 : vector<7x2xf32>
    %3207 = vector.broadcast %19 : f32 to vector<7x2xf32>
    %3208 = arith.mulf %2954, %3207 : vector<7x2xf32>
    %3209 = arith.addf %3206, %3208 : vector<7x2xf32>
    %3210 = vector.broadcast %20 : f32 to vector<7x2xf32>
    %3211 = arith.mulf %2952, %3210 : vector<7x2xf32>
    %3212 = arith.addf %3209, %3211 : vector<7x2xf32>
    %3213 = vector.broadcast %21 : f32 to vector<7x2xf32>
    %3214 = arith.mulf %2958, %3213 : vector<7x2xf32>
    %3215 = arith.addf %3212, %3214 : vector<7x2xf32>
    %3216 = vector.broadcast %22 : f32 to vector<7x2xf32>
    %3217 = arith.mulf %2962, %3216 : vector<7x2xf32>
    %3218 = arith.addf %3215, %3217 : vector<7x2xf32>
    %3219 = vector.broadcast %23 : f32 to vector<7x2xf32>
    %3220 = arith.mulf %2960, %3219 : vector<7x2xf32>
    %3221 = arith.addf %3218, %3220 : vector<7x2xf32>
    %3222 = vector.broadcast %24 : f32 to vector<7x2xf32>
    %3223 = arith.mulf %2966, %3222 : vector<7x2xf32>
    %3224 = arith.addf %3221, %3223 : vector<7x2xf32>
    %3225 = vector.broadcast %25 : f32 to vector<7x2xf32>
    %3226 = arith.mulf %2970, %3225 : vector<7x2xf32>
    %3227 = arith.addf %3224, %3226 : vector<7x2xf32>
    %3228 = vector.broadcast %26 : f32 to vector<7x2xf32>
    %3229 = arith.mulf %2968, %3228 : vector<7x2xf32>
    %3230 = arith.addf %3227, %3229 : vector<7x2xf32>
    %3231 = vector.broadcast %18 : f32 to vector<7x2xf32>
    %3232 = arith.mulf %2954, %3231 : vector<7x2xf32>
    %3233 = vector.broadcast %19 : f32 to vector<7x2xf32>
    %3234 = arith.mulf %2952, %3233 : vector<7x2xf32>
    %3235 = arith.addf %3232, %3234 : vector<7x2xf32>
    %3236 = vector.broadcast %20 : f32 to vector<7x2xf32>
    %3237 = arith.mulf %2956, %3236 : vector<7x2xf32>
    %3238 = arith.addf %3235, %3237 : vector<7x2xf32>
    %3239 = vector.broadcast %21 : f32 to vector<7x2xf32>
    %3240 = arith.mulf %2962, %3239 : vector<7x2xf32>
    %3241 = arith.addf %3238, %3240 : vector<7x2xf32>
    %3242 = vector.broadcast %22 : f32 to vector<7x2xf32>
    %3243 = arith.mulf %2960, %3242 : vector<7x2xf32>
    %3244 = arith.addf %3241, %3243 : vector<7x2xf32>
    %3245 = vector.broadcast %23 : f32 to vector<7x2xf32>
    %3246 = arith.mulf %2964, %3245 : vector<7x2xf32>
    %3247 = arith.addf %3244, %3246 : vector<7x2xf32>
    %3248 = vector.broadcast %24 : f32 to vector<7x2xf32>
    %3249 = arith.mulf %2970, %3248 : vector<7x2xf32>
    %3250 = arith.addf %3247, %3249 : vector<7x2xf32>
    %3251 = vector.broadcast %25 : f32 to vector<7x2xf32>
    %3252 = arith.mulf %2968, %3251 : vector<7x2xf32>
    %3253 = arith.addf %3250, %3252 : vector<7x2xf32>
    %3254 = vector.broadcast %26 : f32 to vector<7x2xf32>
    %3255 = arith.mulf %2972, %3254 : vector<7x2xf32>
    %3256 = arith.addf %3253, %3255 : vector<7x2xf32>
    %3257 = arith.maximumf %3230, %3256 : vector<7x2xf32>
    %3258 = vector.broadcast %18 : f32 to vector<7x2xf32>
    %3259 = arith.mulf %2958, %3258 : vector<7x2xf32>
    %3260 = vector.broadcast %19 : f32 to vector<7x2xf32>
    %3261 = arith.mulf %2962, %3260 : vector<7x2xf32>
    %3262 = arith.addf %3259, %3261 : vector<7x2xf32>
    %3263 = vector.broadcast %20 : f32 to vector<7x2xf32>
    %3264 = arith.mulf %2960, %3263 : vector<7x2xf32>
    %3265 = arith.addf %3262, %3264 : vector<7x2xf32>
    %3266 = vector.broadcast %21 : f32 to vector<7x2xf32>
    %3267 = arith.mulf %2966, %3266 : vector<7x2xf32>
    %3268 = arith.addf %3265, %3267 : vector<7x2xf32>
    %3269 = vector.broadcast %22 : f32 to vector<7x2xf32>
    %3270 = arith.mulf %2970, %3269 : vector<7x2xf32>
    %3271 = arith.addf %3268, %3270 : vector<7x2xf32>
    %3272 = vector.broadcast %23 : f32 to vector<7x2xf32>
    %3273 = arith.mulf %2968, %3272 : vector<7x2xf32>
    %3274 = arith.addf %3271, %3273 : vector<7x2xf32>
    %3275 = vector.broadcast %24 : f32 to vector<7x2xf32>
    %3276 = arith.mulf %2974, %3275 : vector<7x2xf32>
    %3277 = arith.addf %3274, %3276 : vector<7x2xf32>
    %3278 = vector.broadcast %25 : f32 to vector<7x2xf32>
    %3279 = arith.mulf %2978, %3278 : vector<7x2xf32>
    %3280 = arith.addf %3277, %3279 : vector<7x2xf32>
    %3281 = vector.broadcast %26 : f32 to vector<7x2xf32>
    %3282 = arith.mulf %2976, %3281 : vector<7x2xf32>
    %3283 = arith.addf %3280, %3282 : vector<7x2xf32>
    %3284 = arith.maximumf %3257, %3283 : vector<7x2xf32>
    %3285 = vector.broadcast %18 : f32 to vector<7x2xf32>
    %3286 = arith.mulf %2962, %3285 : vector<7x2xf32>
    %3287 = vector.broadcast %19 : f32 to vector<7x2xf32>
    %3288 = arith.mulf %2960, %3287 : vector<7x2xf32>
    %3289 = arith.addf %3286, %3288 : vector<7x2xf32>
    %3290 = vector.broadcast %20 : f32 to vector<7x2xf32>
    %3291 = arith.mulf %2964, %3290 : vector<7x2xf32>
    %3292 = arith.addf %3289, %3291 : vector<7x2xf32>
    %3293 = vector.broadcast %21 : f32 to vector<7x2xf32>
    %3294 = arith.mulf %2970, %3293 : vector<7x2xf32>
    %3295 = arith.addf %3292, %3294 : vector<7x2xf32>
    %3296 = vector.broadcast %22 : f32 to vector<7x2xf32>
    %3297 = arith.mulf %2968, %3296 : vector<7x2xf32>
    %3298 = arith.addf %3295, %3297 : vector<7x2xf32>
    %3299 = vector.broadcast %23 : f32 to vector<7x2xf32>
    %3300 = arith.mulf %2972, %3299 : vector<7x2xf32>
    %3301 = arith.addf %3298, %3300 : vector<7x2xf32>
    %3302 = vector.broadcast %24 : f32 to vector<7x2xf32>
    %3303 = arith.mulf %2978, %3302 : vector<7x2xf32>
    %3304 = arith.addf %3301, %3303 : vector<7x2xf32>
    %3305 = vector.broadcast %25 : f32 to vector<7x2xf32>
    %3306 = arith.mulf %2976, %3305 : vector<7x2xf32>
    %3307 = arith.addf %3304, %3306 : vector<7x2xf32>
    %3308 = vector.broadcast %26 : f32 to vector<7x2xf32>
    %3309 = arith.mulf %2980, %3308 : vector<7x2xf32>
    %3310 = arith.addf %3307, %3309 : vector<7x2xf32>
    %3311 = arith.maximumf %3284, %3310 : vector<7x2xf32>
    %3312 = vector.broadcast %38 : f32 to vector<7x2xf32>
    %3313 = arith.addf %3311, %3312 : vector<7x2xf32>
    %cst_480 = arith.constant 0.000000e+00 : f32
    %3314 = vector.broadcast %cst_480 : f32 to vector<7x2xf32>
    %3315 = arith.maximumf %3313, %3314 : vector<7x2xf32>
    %c160 = arith.constant 160 : index
    %c0_481 = arith.constant 0 : index
    %3316 = vector.load %arg10[%c160, %c0_481] : memref<224x2xf32, #tpu.memory_space<vmem>>, vector<7x2xf32>
    tpu.vector_store %arg10[%c160, %c0_481], %3315 {strides = array<i32>} : memref<224x2xf32, #tpu.memory_space<vmem>>, vector<7x2xf32>,
    %3317 = vector.broadcast %27 : f32 to vector<7x2xf32>
    %3318 = arith.mulf %2950, %3317 : vector<7x2xf32>
    %3319 = vector.broadcast %28 : f32 to vector<7x2xf32>
    %3320 = arith.mulf %2954, %3319 : vector<7x2xf32>
    %3321 = arith.addf %3318, %3320 : vector<7x2xf32>
    %3322 = vector.broadcast %29 : f32 to vector<7x2xf32>
    %3323 = arith.mulf %2952, %3322 : vector<7x2xf32>
    %3324 = arith.addf %3321, %3323 : vector<7x2xf32>
    %3325 = vector.broadcast %30 : f32 to vector<7x2xf32>
    %3326 = arith.mulf %2958, %3325 : vector<7x2xf32>
    %3327 = arith.addf %3324, %3326 : vector<7x2xf32>
    %3328 = vector.broadcast %31 : f32 to vector<7x2xf32>
    %3329 = arith.mulf %2962, %3328 : vector<7x2xf32>
    %3330 = arith.addf %3327, %3329 : vector<7x2xf32>
    %3331 = vector.broadcast %32 : f32 to vector<7x2xf32>
    %3332 = arith.mulf %2960, %3331 : vector<7x2xf32>
    %3333 = arith.addf %3330, %3332 : vector<7x2xf32>
    %3334 = vector.broadcast %33 : f32 to vector<7x2xf32>
    %3335 = arith.mulf %2966, %3334 : vector<7x2xf32>
    %3336 = arith.addf %3333, %3335 : vector<7x2xf32>
    %3337 = vector.broadcast %34 : f32 to vector<7x2xf32>
    %3338 = arith.mulf %2970, %3337 : vector<7x2xf32>
    %3339 = arith.addf %3336, %3338 : vector<7x2xf32>
    %3340 = vector.broadcast %35 : f32 to vector<7x2xf32>
    %3341 = arith.mulf %2968, %3340 : vector<7x2xf32>
    %3342 = arith.addf %3339, %3341 : vector<7x2xf32>
    %3343 = vector.broadcast %27 : f32 to vector<7x2xf32>
    %3344 = arith.mulf %2954, %3343 : vector<7x2xf32>
    %3345 = vector.broadcast %28 : f32 to vector<7x2xf32>
    %3346 = arith.mulf %2952, %3345 : vector<7x2xf32>
    %3347 = arith.addf %3344, %3346 : vector<7x2xf32>
    %3348 = vector.broadcast %29 : f32 to vector<7x2xf32>
    %3349 = arith.mulf %2956, %3348 : vector<7x2xf32>
    %3350 = arith.addf %3347, %3349 : vector<7x2xf32>
    %3351 = vector.broadcast %30 : f32 to vector<7x2xf32>
    %3352 = arith.mulf %2962, %3351 : vector<7x2xf32>
    %3353 = arith.addf %3350, %3352 : vector<7x2xf32>
    %3354 = vector.broadcast %31 : f32 to vector<7x2xf32>
    %3355 = arith.mulf %2960, %3354 : vector<7x2xf32>
    %3356 = arith.addf %3353, %3355 : vector<7x2xf32>
    %3357 = vector.broadcast %32 : f32 to vector<7x2xf32>
    %3358 = arith.mulf %2964, %3357 : vector<7x2xf32>
    %3359 = arith.addf %3356, %3358 : vector<7x2xf32>
    %3360 = vector.broadcast %33 : f32 to vector<7x2xf32>
    %3361 = arith.mulf %2970, %3360 : vector<7x2xf32>
    %3362 = arith.addf %3359, %3361 : vector<7x2xf32>
    %3363 = vector.broadcast %34 : f32 to vector<7x2xf32>
    %3364 = arith.mulf %2968, %3363 : vector<7x2xf32>
    %3365 = arith.addf %3362, %3364 : vector<7x2xf32>
    %3366 = vector.broadcast %35 : f32 to vector<7x2xf32>
    %3367 = arith.mulf %2972, %3366 : vector<7x2xf32>
    %3368 = arith.addf %3365, %3367 : vector<7x2xf32>
    %3369 = arith.maximumf %3342, %3368 : vector<7x2xf32>
    %3370 = vector.broadcast %27 : f32 to vector<7x2xf32>
    %3371 = arith.mulf %2958, %3370 : vector<7x2xf32>
    %3372 = vector.broadcast %28 : f32 to vector<7x2xf32>
    %3373 = arith.mulf %2962, %3372 : vector<7x2xf32>
    %3374 = arith.addf %3371, %3373 : vector<7x2xf32>
    %3375 = vector.broadcast %29 : f32 to vector<7x2xf32>
    %3376 = arith.mulf %2960, %3375 : vector<7x2xf32>
    %3377 = arith.addf %3374, %3376 : vector<7x2xf32>
    %3378 = vector.broadcast %30 : f32 to vector<7x2xf32>
    %3379 = arith.mulf %2966, %3378 : vector<7x2xf32>
    %3380 = arith.addf %3377, %3379 : vector<7x2xf32>
    %3381 = vector.broadcast %31 : f32 to vector<7x2xf32>
    %3382 = arith.mulf %2970, %3381 : vector<7x2xf32>
    %3383 = arith.addf %3380, %3382 : vector<7x2xf32>
    %3384 = vector.broadcast %32 : f32 to vector<7x2xf32>
    %3385 = arith.mulf %2968, %3384 : vector<7x2xf32>
    %3386 = arith.addf %3383, %3385 : vector<7x2xf32>
    %3387 = vector.broadcast %33 : f32 to vector<7x2xf32>
    %3388 = arith.mulf %2974, %3387 : vector<7x2xf32>
    %3389 = arith.addf %3386, %3388 : vector<7x2xf32>
    %3390 = vector.broadcast %34 : f32 to vector<7x2xf32>
    %3391 = arith.mulf %2978, %3390 : vector<7x2xf32>
    %3392 = arith.addf %3389, %3391 : vector<7x2xf32>
    %3393 = vector.broadcast %35 : f32 to vector<7x2xf32>
    %3394 = arith.mulf %2976, %3393 : vector<7x2xf32>
    %3395 = arith.addf %3392, %3394 : vector<7x2xf32>
    %3396 = arith.maximumf %3369, %3395 : vector<7x2xf32>
    %3397 = vector.broadcast %27 : f32 to vector<7x2xf32>
    %3398 = arith.mulf %2962, %3397 : vector<7x2xf32>
    %3399 = vector.broadcast %28 : f32 to vector<7x2xf32>
    %3400 = arith.mulf %2960, %3399 : vector<7x2xf32>
    %3401 = arith.addf %3398, %3400 : vector<7x2xf32>
    %3402 = vector.broadcast %29 : f32 to vector<7x2xf32>
    %3403 = arith.mulf %2964, %3402 : vector<7x2xf32>
    %3404 = arith.addf %3401, %3403 : vector<7x2xf32>
    %3405 = vector.broadcast %30 : f32 to vector<7x2xf32>
    %3406 = arith.mulf %2970, %3405 : vector<7x2xf32>
    %3407 = arith.addf %3404, %3406 : vector<7x2xf32>
    %3408 = vector.broadcast %31 : f32 to vector<7x2xf32>
    %3409 = arith.mulf %2968, %3408 : vector<7x2xf32>
    %3410 = arith.addf %3407, %3409 : vector<7x2xf32>
    %3411 = vector.broadcast %32 : f32 to vector<7x2xf32>
    %3412 = arith.mulf %2972, %3411 : vector<7x2xf32>
    %3413 = arith.addf %3410, %3412 : vector<7x2xf32>
    %3414 = vector.broadcast %33 : f32 to vector<7x2xf32>
    %3415 = arith.mulf %2978, %3414 : vector<7x2xf32>
    %3416 = arith.addf %3413, %3415 : vector<7x2xf32>
    %3417 = vector.broadcast %34 : f32 to vector<7x2xf32>
    %3418 = arith.mulf %2976, %3417 : vector<7x2xf32>
    %3419 = arith.addf %3416, %3418 : vector<7x2xf32>
    %3420 = vector.broadcast %35 : f32 to vector<7x2xf32>
    %3421 = arith.mulf %2980, %3420 : vector<7x2xf32>
    %3422 = arith.addf %3419, %3421 : vector<7x2xf32>
    %3423 = arith.maximumf %3396, %3422 : vector<7x2xf32>
    %3424 = vector.broadcast %39 : f32 to vector<7x2xf32>
    %3425 = arith.addf %3423, %3424 : vector<7x2xf32>
    %cst_482 = arith.constant 0.000000e+00 : f32
    %3426 = vector.broadcast %cst_482 : f32 to vector<7x2xf32>
    %3427 = arith.maximumf %3425, %3426 : vector<7x2xf32>
    %c216 = arith.constant 216 : index
    %c0_483 = arith.constant 0 : index
    %3428 = vector.load %arg10[%c216, %c0_483] : memref<224x2xf32, #tpu.memory_space<vmem>>, vector<7x2xf32>
    tpu.vector_store %arg10[%c216, %c0_483], %3427 {strides = array<i32>} : memref<224x2xf32, #tpu.memory_space<vmem>>, vector<7x2xf32>,
    %c0_484 = arith.constant 0 : index
    %c0_485 = arith.constant 0 : index
    %3429 = vector.load %arg5[%c0_484, %c0_485] : memref<32x224xf32, #tpu.memory_space<vmem>>, vector<32x224xf32>
    %c0_486 = arith.constant 0 : index
    %c0_487 = arith.constant 0 : index
    %3430 = vector.load %arg10[%c0_486, %c0_487] : memref<224x2xf32, #tpu.memory_space<vmem>>, vector<224x2xf32>
    %cst_488 = arith.constant dense<0.000000e+00> : vector<32x2xf32>
    %3431 = tpu.matmul %3429, %3430, %cst_488 {dimension_numbers = #tpu.dot_dimension_numbers<[1], [0], [0], [1], [0, 0, 1, 1], [], []>} : vector<32x224xf32>, vector<224x2xf32>, vector<32x2xf32> -> vector<32x2xf32>
    %c0_489 = arith.constant 0 : index
    %c0_490 = arith.constant 0 : index
    %3432 = vector.load %arg6[%c0_489, %c0_490] : memref<32x1xf32, #tpu.memory_space<vmem>>, vector<32x1xf32>
    %3433 = vector.broadcast %3432 : vector<32x1xf32> to vector<32x2xf32>
    %3434 = arith.addf %3431, %3433 : vector<32x2xf32>
    %cst_491 = arith.constant 0.000000e+00 : f32
    %3435 = vector.broadcast %cst_491 : f32 to vector<32x2xf32>
    %3436 = arith.maximumf %3434, %3435 : vector<32x2xf32>
    %c0_492 = arith.constant 0 : index
    %c0_493 = arith.constant 0 : index
    %3437 = vector.load %arg7[%c0_492, %c0_493] : memref<10x32xf32, #tpu.memory_space<vmem>>, vector<10x32xf32>
    %cst_494 = arith.constant dense<0.000000e+00> : vector<10x2xf32>
    %3438 = tpu.matmul %3437, %3436, %cst_494 {dimension_numbers = #tpu.dot_dimension_numbers<[1], [0], [0], [1], [0, 0, 1, 1], [], []>} : vector<10x32xf32>, vector<32x2xf32>, vector<10x2xf32> -> vector<10x2xf32>
    %c0_495 = arith.constant 0 : index
    %c0_496 = arith.constant 0 : index
    %3439 = vector.load %arg8[%c0_495, %c0_496] : memref<10x1xf32, #tpu.memory_space<vmem>>, vector<10x1xf32>
    %3440 = vector.broadcast %3439 : vector<10x1xf32> to vector<10x2xf32>
    %3441 = arith.addf %3438, %3440 : vector<10x2xf32>
    %3442 = arith.negf %3441 : vector<10x2xf32>
    %3443 = math.exp %3442 : vector<10x2xf32>
    %cst_497 = arith.constant 1.000000e+00 : f32
    %3444 = vector.broadcast %cst_497 : f32 to vector<10x2xf32>
    %3445 = arith.addf %3444, %3443 : vector<10x2xf32>
    %3446 = arith.divf %3444, %3445 : vector<10x2xf32>
    %c0_498 = arith.constant 0 : index
    %c0_499 = arith.constant 0 : index
    %3447 = vector.load %arg9[%c0_498, %c0_499] : memref<10x2xf32, #tpu.memory_space<vmem>>, vector<10x2xf32>
    tpu.vector_store %arg9[%c0_498, %c0_499], %3446 {strides = array<i32>} : memref<10x2xf32, #tpu.memory_space<vmem>>, vector<10x2xf32>,
    return
  }
  func.func @transform_0(%arg0: i32) -> (i32, i32) {
    %c0_i32 = arith.constant 0 : i32
    %c0_i32_0 = arith.constant 0 : i32
    %c0_i32_1 = arith.constant 0 : i32
    return %c0_i32, %c0_i32_0 : i32, i32
  }
  func.func @transform_1(%arg0: i32) -> i32 {
    %c0_i32 = arith.constant 0 : i32
    %c0_i32_0 = arith.constant 0 : i32
    return %c0_i32 : i32
  }
  func.func @transform_2(%arg0: i32) -> (i32, i32, i32) {
    %c0_i32 = arith.constant 0 : i32
    %c0_i32_0 = arith.constant 0 : i32
    %c0_i32_1 = arith.constant 0 : i32
    return %c0_i32, %c0_i32_0, %arg0 : i32, i32, i32
  }
  func.func @transform_3(%arg0: i32) -> (i32, i32, i32) {
    %c0_i32 = arith.constant 0 : i32
    %c0_i32_0 = arith.constant 0 : i32
    %c0_i32_1 = arith.constant 0 : i32
    return %c0_i32, %c0_i32_0, %arg0 : i32, i32, i32
  }
  func.func @transform_4(%arg0: i32) -> (i32, i32) {
    %c0_i32 = arith.constant 0 : i32
    %c0_i32_0 = arith.constant 0 : i32
    %c0_i32_1 = arith.constant 0 : i32
    return %c0_i32, %c0_i32_0 : i32, i32
  }
  func.func @transform_5(%arg0: i32) -> (i32, i32) {
    %c0_i32 = arith.constant 0 : i32
    %c0_i32_0 = arith.constant 0 : i32
    %c0_i32_1 = arith.constant 0 : i32
    return %c0_i32, %c0_i32_0 : i32, i32
  }
  func.func @transform_6(%arg0: i32) -> (i32, i32) {
    %c0_i32 = arith.constant 0 : i32
    %c0_i32_0 = arith.constant 0 : i32
    %c0_i32_1 = arith.constant 0 : i32
    return %c0_i32, %c0_i32_0 : i32, i32
  }
  func.func @transform_7(%arg0: i32) -> (i32, i32) {
    %c0_i32 = arith.constant 0 : i32
    %c0_i32_0 = arith.constant 0 : i32
    %c0_i32_1 = arith.constant 0 : i32
    return %c0_i32, %c0_i32_0 : i32, i32
  }
  func.func @transform_8(%arg0: i32) -> (i32, i32) {
    %c0_i32 = arith.constant 0 : i32
    %c0_i32_0 = arith.constant 0 : i32
    return %c0_i32, %arg0 : i32, i32
  }
}

</mosaic_0001>

<bundles_post_ra>
// kernel: forward.1
= control target key start
LH: loop header
LB: loop body
LE: loop exit
PB: predicated region body
PF: predicated region fallthrough
CT: control target
= control target key end

     0   :  { %13 = vsyncpa [#allocation4], 0  ;;  %s6408_s0 = inlined_call_operand.vmem [shape: f32[4,9], index: 0, kind: input, shape index: {}]   ;;  %s6409_s1 = inlined_call_operand.vmem [shape: f32[4], index: 1, kind: input, shape index: {}]   ;;  %s6410_s2 = inlined_call_operand.vmem [shape: f32[16,8,2], index: 2, kind: input, shape index: {}]   ;;  %s6411_s3 = inlined_call_operand.vmem [shape: f32[16,8,2], index: 3, kind: input, shape index: {}]   ;;  %s6412_s4 = inlined_call_operand.vmem [shape: f32[32,224], index: 4, kind: input, shape index: {}]   ;;  %s6413_s5 = inlined_call_operand.vmem [shape: f32[32,1], index: 5, kind: input, shape index: {}]   ;;  %s6414_s6 = inlined_call_operand.vmem [shape: f32[10,32], index: 6, kind: input, shape index: {}]   ;;  %s6415_s7 = inlined_call_operand.vmem [shape: f32[10,1], index: 7, kind: input, shape index: {}]   ;;  %s6416_s8 = inlined_call_operand.vmem [shape: f32[10,2], index: 8, kind: output, shape index: {}]  }
   0x1   :  { %s20_s29 = sshll.u32 %s6408_s0, 4  ;;  %s21_s29 = int_to_ptr.vmem [resolvable:$true] %s20_s29 }
   0x2   :  { %14 = vsyncpa [#allocation6], 0  ;;  %s29_s10 = sshll.u32 %s6409_s1, 4  ;;  %s2974_s11 = smov [#allocation3]   ;;  %s30_s10 = int_to_ptr.vmem [resolvable:$true] %s29_s10 }
   0x3   :  { %23 = dma.vmem_to_smem %s21_s29, 64, %s2974_s11, [#allocation4]  }
   0x4   :  { %s2975_s12 = smov [#allocation5]  }
   0x5   :  { %32 = dma.vmem_to_smem %s30_s10, 16, %s2975_s12, [#allocation6]  }
   0x6   :  { %2970 = dma.done.wait [#allocation4], 64  }
   0x7   :  { %2971 = vsyncadd [#allocation4], 4294967232 }
   0x8   :  { %2972 = dma.done.wait [#allocation6], 16  }
   0x9   :  { %2973 = vsyncadd [#allocation6], 4294967280 }
   0xa   :  { %53 = sfence }
   0xb   :  { %s2622_s13 = sld [smem:[#allocation3 + $0x100]]  ;;  %vm94_vm0 = vcmask 8192   ;;  %v2976_v0 = vmov 0.0   ;;  %v2655_v1 = vld [vmem:[%s6410_s2 + $0x10] sm:$0x7f]  ;;  %vm228_vm1 = vcmask 14336  }
   0xc   :  { %s2623_s14 = sld [smem:[#allocation3 + $0x101]]  ;;  %110 = vst.msk [vmem:[#allocation2 + $0x7f] sm:$0x1] %vm94_vm0, %v2976_v0  ;;  %v2657_v2 = vld [vmem:[%s6411_s3 + $0x10] sm:$0x7f]  ;;  %vm2438_vm2 = vcmask 785408  }
   0xd   :  { %s2624_s0 = sld [smem:[#allocation3 + $0x102]]  ;;  %v2656_v3 = vld [vmem:[%s6410_s2 + $0x11] sm:$0x7f]  ;;  %v2659_v6 = vld [vmem:[%s6410_s2 + $0x18] sm:$0x7f]  ;;  %vm2527_vm3 = vcmask 261120  }
   0xe   :  { %s2625_s15 = sld [smem:[#allocation3 + $0x103]]  ;;  %v2658_v5 = vld [vmem:[%s6411_s3 + $0x11] sm:$0x7f]  ;;  %v3061_v11 = vld [vmem:[%s6411_s3 + $0x18] sm:$0x7f]  ;;  %vm2595_vm7 = vcmask 15360  }
   0xf   :  { %s2626_s1 = sld [smem:[#allocation3 + $0x104]]  ;;  %95 = vst.msk [vmem:[#allocation2 + $0x7] sm:$0x1] %vm94_vm0, %v2976_v0  ;;  %v2660_v19 = vld [vmem:[%s6410_s2 + $0x19] sm:$0x7f]  ;;  %vm2597_vm12 = vcmask 9216  }
  0x10   :  { %s2627_s20 = sld [smem:[#allocation3 + $0x105]]  ;;  %96 = vst.msk [vmem:[#allocation2 + $0xf] sm:$0x1] %vm94_vm0, %v2976_v0  ;;  %v2662_v28 = vld [vmem:[%s6411_s3 + $0x19] sm:$0x7f] }
  0x11   :  { %s2628_s23 = sld [smem:[#allocation3 + $0x106]]  ;;  %v3040_v4 = vstv %s2622_s13  ;;  %97 = vst.msk [vmem:[#allocation2 + $0x17] sm:$0x1] %vm94_vm0, %v2976_v0  ;;  %v2663_v33 = vld [vmem:[%s6410_s2 + $0x20] sm:$0x7f] }
  0x12   :  { %6550 = vst [vmem:[#allocation9_spill] sm:$0xff] %v3040_v4  ;;  %s3048_s28 = sld [smem:[#allocation3 + $0x107]]  ;;  %v3050_v7 = vstv %s2623_s14  ;;  %v650_v8 = vmul.f32 %v2655_v1, %v3040_v4  ;;  %v667_v9 = vmul.f32 %v2657_v2, %v3040_v4  ;;  %v685_v17 = vmul.f32 %v2659_v6, %v3040_v4  ;;  %v2665_v37 = vld [vmem:[%s6411_s3 + $0x20] sm:$0x7f]  ;;  %v2667_v52 = vld [vmem:[%s6410_s2 + $0x28] sm:$0x7f] }
  0x13   :  { %6551 = vst [vmem:[#allocation10_spill] sm:$0xff] %v3050_v7  ;;  %s3054_s29 = sld [smem:[#allocation3 + $0x108]]  ;;  %v3056_v10 = vstv %s2624_s0  ;;  %v651_v12 = vmul.f32 %v2657_v2, %v3050_v7  ;;  %v668_v13 = vmul.f32 %v2656_v3, %v3050_v7  ;;  %v686_v26 = vmul.f32 %v3061_v11, %v3050_v7  ;;  %v2664_v43 = vld [vmem:[%s6410_s2 + $0x21] sm:$0x7f]  ;;  %v2669_v57 = vld [vmem:[%s6411_s3 + $0x28] sm:$0x7f] }
  0x14   :  { %6552 = vst [vmem:[#allocation11_spill] sm:$0xff] %v3056_v10  ;;  %v3065_v14 = vstv %s2625_s15  ;;  %v653_v15 = vmul.f32 %v2656_v3, %v3056_v10  ;;  %v670_v16 = vmul.f32 %v2658_v5, %v3056_v10  ;;  %s3098_s14 = sld [smem:[#allocation5 + $0x2]]  ;;  %v688_v35 = vmul.f32 %v2660_v19, %v3056_v10  ;;  %v2666_v48 = vld [vmem:[%s6411_s3 + $0x21] sm:$0x7f]  ;;  %v2668_v62 = vld [vmem:[%s6410_s2 + $0x29] sm:$0x7f] }
  0x15   :  { %6553 = vst [vmem:[#allocation12_spill] sm:$0xff] %v3065_v14  ;;  %v3072_v18 = vstv %s2626_s1  ;;  %v652_v20 = vadd.f32 %v651_v12, %v650_v8  ;;  %v655_v21 = vmul.f32 %v2659_v6, %v3065_v14  ;;  %v669_v22 = vadd.f32 %v668_v13, %v667_v9  ;;  %s3123_s17 = sld [smem:[#allocation3 + $0x180]] }
  0x16   :  { %6554 = vst [vmem:[#allocation13_spill] sm:$0xff] %v3072_v18  ;;  %v3080_v23 = vstv %s2627_s20  ;;  %v657_v24 = vmul.f32 %v3061_v11, %v3072_v18  ;;  %v672_v25 = vmul.f32 %v3061_v11, %v3065_v14  ;;  %v674_v31 = vmul.f32 %v2660_v19, %v3072_v18  ;;  %s3131_s20 = sld [smem:[#allocation3 + $0x181]] }
  0x17   :  { %6555 = vst [vmem:[#allocation14_spill] sm:$0xff] %v3080_v23  ;;  %v3090_v27 = vstv %s2628_s23  ;;  %v654_v29 = vadd.f32 %v653_v15, %v652_v20  ;;  %v671_v30 = vadd.f32 %v670_v16, %v669_v22  ;;  %v659_v34 = vmul.f32 %v2660_v19, %v3080_v23  ;;  %s3141_s23 = sld [smem:[#allocation3 + $0x182]]  ;;  %v2670_v16 = vld [vmem:[%s6411_s3 + $0x29] sm:$0x7f]  ;;  %v3198_v22 = vld [vmem:[%s6410_s2 + $0x60] sm:$0x7f] }
  0x18   :  { %6556 = vst [vmem:[#allocation15_spill] sm:$0xff] %v3090_v27  ;;  %v3101_v32 = vstv %s3048_s28  ;;  %v676_v40 = vmul.f32 %v2662_v28, %v3080_v23  ;;  %v661_v41 = vmul.f32 %v2663_v33, %v3090_v27  ;;  %v678_v42 = vmul.f32 %v2665_v37, %v3090_v27  ;;  %s3149_s26 = sld [smem:[#allocation3 + $0x183]] }
  0x19   :  { %98 = vst.msk [vmem:[#allocation2 + $0x1f] sm:$0x1] %vm94_vm0, %v2976_v0  ;;  %v3111_v36 = vstv %s3054_s29  ;;  %v656_v38 = vadd.f32 %v655_v21, %v654_v29  ;;  %v673_v39 = vadd.f32 %v672_v25, %v671_v30  ;;  %v687_v46 = vadd.f32 %v686_v26, %v685_v17  ;;  %s3161_s29 = sld [smem:[#allocation3 + $0x184]]  ;;  %v3210_v29 = vld [vmem:[%s6411_s3 + $0x60] sm:$0x7f] }
  0x1a   :  { %6557 = vst [vmem:[#allocation16_spill] sm:$0xff] %v3101_v32  ;;  %v690_v47 = vmul.f32 %v2663_v33, %v3065_v14  ;;  %v663_v49 = vmul.f32 %v2665_v37, %v3101_v32  ;;  %v665_v50 = vmul.f32 %v2664_v43, %v3111_v36  ;;  %v680_v51 = vmul.f32 %v2664_v43, %v3101_v32  ;;  %s3169_s10 = sld [smem:[#allocation3 + $0x185]] }
  0x1b   :  { %99 = vst.msk [vmem:[#allocation2 + $0x27] sm:$0x1] %vm94_vm0, %v2976_v0  ;;  %v658_v44 = vadd.f32 %v657_v24, %v656_v38  ;;  %v675_v45 = vadd.f32 %v674_v31, %v673_v39  ;;  %v689_v55 = vadd.f32 %v688_v35, %v687_v46  ;;  %v692_v56 = vmul.f32 %v2665_v37, %v3072_v18  ;;  %s3178_s11 = sld [smem:[#allocation3 + $0x186]] }
  0x1c   :  { %6558 = vst [vmem:[#allocation17_spill] sm:$0xff] %v3111_v36  ;;  %v682_v58 = vmul.f32 %v2666_v48, %v3111_v36  ;;  %v703_v59 = vmul.f32 %v3061_v11, %v3040_v4  ;;  %v704_v60 = vmul.f32 %v2660_v19, %v3050_v7  ;;  %v706_v61 = vmul.f32 %v2662_v28, %v3056_v10  ;;  %s3183_s12 = sld [smem:[#allocation3 + $0x187]] }
  0x1d   :  { %100 = vst.msk [vmem:[#allocation2 + $0x2f] sm:$0x1] %vm94_vm0, %v2976_v0  ;;  %v660_v53 = vadd.f32 %v659_v34, %v658_v44  ;;  %v677_v54 = vadd.f32 %v676_v40, %v675_v45  ;;  %v691_v2 = vadd.f32 %v690_v47, %v689_v55  ;;  %v694_v3 = vmul.f32 %v2664_v43, %v3080_v23  ;;  %s3202_s1 = sld [smem:[#allocation3 + $0x188]] }
  0x1e   :  { %101 = vst.msk [vmem:[#allocation2 + $0x37] sm:$0x1] %vm94_vm0, %v2976_v0  ;;  %v3172_v5 = vstv %s3098_s14  ;;  %v696_v6 = vmul.f32 %v2667_v52, %v3090_v27  ;;  %v705_v8 = vadd.f32 %v704_v60, %v703_v59  ;;  %v708_v9 = vmul.f32 %v2665_v37, %v3065_v14  ;;  %s3392_s24 = sld [smem:[#allocation5 + $0x3]] }
  0x1f   :  { %102 = vst.msk [vmem:[#allocation2 + $0x3f] sm:$0x1] %vm94_vm0, %v2976_v0  ;;  %v662_v63 = vadd.f32 %v661_v41, %v660_v53  ;;  %v679_v1 = vadd.f32 %v678_v42, %v677_v54  ;;  %v693_v13 = vadd.f32 %v692_v56, %v691_v2  ;;  %v698_v15 = vmul.f32 %v2669_v57, %v3101_v32  ;;  %v3234_v42 = vld [vmem:[%s6410_s2 + $0x61] sm:$0x7f]  ;;  %v3265_v53 = vld [vmem:[%s6411_s3 + $0x68] sm:$0x7f] }
  0x20   :  { %103 = vst.msk [vmem:[#allocation2 + $0x47] sm:$0x1] %vm94_vm0, %v2976_v0  ;;  %v700_v17 = vmul.f32 %v2668_v62, %v3111_v36  ;;  %v707_v19 = vadd.f32 %v706_v61, %v705_v8  ;;  %v710_v20 = vmul.f32 %v2664_v43, %v3072_v18  ;;  %v3193_v21 = vstv %s3123_s17  ;;  %v3283_v61 = vld [vmem:[%s6410_s2 + $0x69] sm:$0x7f]  ;;  %s3431_s0 = sld [smem:[#allocation3 + $0x80]] }
  0x21   :  { %104 = vst.msk [vmem:[#allocation2 + $0x4f] sm:$0x1] %vm94_vm0, %v2976_v0  ;;  %v664_v11 = vadd.f32 %v663_v49, %v662_v63  ;;  %v681_v12 = vadd.f32 %v680_v51, %v679_v1  ;;  %v695_v26 = vadd.f32 %v694_v3, %v693_v13  ;;  %v3205_v28 = vstv %s3131_s20  ;;  %v3253_v49 = vld [vmem:[%s6410_s2 + $0x68] sm:$0x7f]  ;;  %s3590_s30 = sld [smem:[#allocation3 + $0x81]] }
  0x22   :  { %105 = vst.msk [vmem:[#allocation2 + $0x57] sm:$0x1] %vm94_vm0, %v2976_v0  ;;  %v709_v30 = vadd.f32 %v708_v9, %v707_v19  ;;  %v712_v31 = vmul.f32 %v2666_v48, %v3080_v23  ;;  %v714_v33 = vmul.f32 %v2669_v57, %v3090_v27  ;;  %v3217_v34 = vstv %s3141_s23  ;;  %v3248_v48 = vld [vmem:[%s6411_s3 + $0x61] sm:$0x7f]  ;;  %s3598_s9 = sld [smem:[#allocation3 + $0x82]] }
  0x23   :  { %106 = vst.msk [vmem:[#allocation2 + $0x5f] sm:$0x1] %vm94_vm0, %v2976_v0  ;;  %v666_v24 = vadd.f32 %v665_v50, %v664_v11  ;;  %v683_v25 = vadd.f32 %v682_v58, %v681_v12  ;;  %v697_v35 = vadd.f32 %v696_v6, %v695_v26  ;;  %v716_v37 = vmul.f32 %v2668_v62, %v3101_v32  ;;  %v3288_v62 = vld [vmem:[%s6410_s2 + $0x70] sm:$0x7f]  ;;  %v3327_v26 = vld [vmem:[%s6411_s3 + $0x69] sm:$0x7f] }
  0x24   :  { %6559 = vst [vmem:[#allocation18_spill] sm:$0xff] %v3172_v5  ;;  %v718_v38 = vmul.f32 %v2670_v16, %v3111_v36  ;;  %v3224_v39 = vstv %s3149_s26  ;;  %v711_v40 = vadd.f32 %v710_v20, %v709_v30  ;;  %v3229_v41 = vstv %s3161_s29  ;;  %v3308_v12 = vld [vmem:[%s6411_s3 + $0x70] sm:$0x7f]  ;;  %s3634_s18 = sld [smem:[#allocation3 + $0x85]] }
  0x25   :  { %107 = vst.msk [vmem:[#allocation2 + $0x67] sm:$0x1] %vm94_vm0, %v2976_v0  ;;  %v2304_v43 = vmul.f32 %v3198_v22, %v3193_v21  ;;  %v2305_v44 = vmul.f32 %v3210_v29, %v3205_v28  ;;  %v684_v45 = vmax.f32 %v666_v24, %v683_v25  ;;  %v699_v46 = vadd.f32 %v698_v15, %v697_v35  ;;  %v3332_v30 = vld [vmem:[%s6410_s2 + $0x71] sm:$0x7f]  ;;  %s3641_s19 = sld [smem:[#allocation3 + $0x86]] }
  0x26   :  { %108 = vst.msk [vmem:[#allocation2 + $0x6f] sm:$0x1] %vm94_vm0, %v2976_v0  ;;  %v3243_v47 = vstv %s3169_s10  ;;  %v2307_v50 = vmul.f32 %v3234_v42, %v3217_v34  ;;  %v713_v51 = vadd.f32 %v712_v31, %v711_v40  ;;  %v3260_v52 = vstv %s3178_s11  ;;  %s3602_s10 = sld [smem:[#allocation3 + $0x83]] }
  0x27   :  { %109 = vst.msk [vmem:[#allocation2 + $0x77] sm:$0x1] %vm94_vm0, %v2976_v0  ;;  %v2306_v54 = vadd.f32 %v2305_v44, %v2304_v43  ;;  %v2309_v55 = vmul.f32 %v3253_v49, %v3224_v39  ;;  %v701_v56 = vadd.f32 %v700_v17, %v699_v46  ;;  %v3272_v57 = vstv %s3183_s12  ;;  %s3647_s20 = sld [smem:[#allocation3 + $0x87]] }
  0x28   :  { %111 = vst.msk [vmem:[#allocation2 + $0x87] sm:$0x1] %vm94_vm0, %v2976_v0  ;;  %v2311_v58 = vmul.f32 %v3265_v53, %v3229_v41  ;;  %v2321_v59 = vmul.f32 %v3210_v29, %v3193_v21  ;;  %v715_v60 = vadd.f32 %v714_v33, %v713_v51  ;;  %v2322_v1 = vmul.f32 %v3234_v42, %v3205_v28  ;;  %s3666_s23 = sld [smem:[#allocation3 + $0x88]] }
  0x29   :  { %112 = vst.msk [vmem:[#allocation2 + $0x8f] sm:$0x1] %vm94_vm0, %v2976_v0  ;;  %v2308_v63 = vadd.f32 %v2307_v50, %v2306_v54  ;;  %v2324_v2 = vmul.f32 %v3248_v48, %v3217_v34  ;;  %v702_v3 = vmax.f32 %v684_v45, %v701_v56  ;;  %v3297_v6 = vstv %s3202_s1  ;;  %s5239_s25 = sld [smem:[#allocation3 + $0x2]] }
  0x2a   :  { %113 = vst.msk [vmem:[#allocation2 + $0x97] sm:$0x1] %vm94_vm0, %v2976_v0  ;;  %v2313_v8 = vmul.f32 %v3283_v61, %v3243_v47  ;;  %v2315_v9 = vmul.f32 %v3288_v62, %v3260_v52  ;;  %v717_v11 = vadd.f32 %v716_v37, %v715_v60  ;;  %v2323_v15 = vadd.f32 %v2322_v1, %v2321_v59  ;;  %v3359_v59 = vld [vmem:[%s6411_s3 + $0x78] sm:$0x7f]  ;;  %s5245_s26 = sld [smem:[#allocation3 + $0x3]] }
  0x2b   :  { %114 = vst.msk [vmem:[#allocation2 + $0x9f] sm:$0x1] %vm94_vm0, %v2976_v0  ;;  %v2310_v13 = vadd.f32 %v2309_v55, %v2308_v63  ;;  %v2326_v16 = vmul.f32 %v3265_v53, %v3224_v39  ;;  %v2317_v17 = vmul.f32 %v3308_v12, %v3272_v57  ;;  %v2328_v19 = vmul.f32 %v3283_v61, %v3229_v41  ;;  %s5251_s27 = sld [smem:[#allocation3 + $0x4]] }
  0x2c   :  { %115 = vst.msk [vmem:[#allocation2 + $0xa7] sm:$0x1] %vm94_vm0, %v2976_v0  ;;  %v2339_v20 = vmul.f32 %v3253_v49, %v3193_v21  ;;  %v2340_v24 = vmul.f32 %v3265_v53, %v3205_v28  ;;  %v719_v25 = vadd.f32 %v718_v38, %v717_v11  ;;  %v2325_v33 = vadd.f32 %v2324_v2, %v2323_v15  ;;  %v3366_v2 = vld [vmem:[%s6411_s3 + $0x71] sm:$0x7f]  ;;  %s5257_s28 = sld [smem:[#allocation3 + $0x5]] }
  0x2d   :  { %116 = vst.msk [vmem:[#allocation2 + $0xaf] sm:$0x1] %vm94_vm0, %v2976_v0  ;;  %v2312_v31 = vadd.f32 %v2311_v58, %v2310_v13  ;;  %v2342_v35 = vmul.f32 %v3283_v61, %v3217_v34  ;;  %v2319_v37 = vmul.f32 %v3332_v30, %v3297_v6  ;;  %v2344_v40 = vmul.f32 %v3288_v62, %v3224_v39  ;;  %v3354_v58 = vld [vmem:[%s6410_s2 + $0x78] sm:$0x7f]  ;;  %s5262_s29 = sld [smem:[#allocation3 + $0x6]] }
  0x2e   :  { %117 = vst.msk [vmem:[#allocation2 + $0xb7] sm:$0x1] %vm94_vm0, %v2976_v0  ;;  %v2341_v38 = vadd.f32 %v2340_v24, %v2339_v20  ;;  %v720_v43 = vmax.f32 %v702_v3, %v719_v25  ;;  %v2327_v45 = vadd.f32 %v2326_v16, %v2325_v33  ;;  %v2332_v46 = vmul.f32 %v3308_v12, %v3260_v52  ;;  %v3371_v3 = vld [vmem:[%s6410_s2 + $0x79] sm:$0x7f]  ;;  %v123_v24 = vld [vmem:[%s6410_s2] sm:$0x7f] }
  0x2f   :  { %118 = vst.msk [vmem:[#allocation2 + $0xbf] sm:$0x1] %vm94_vm0, %v2976_v0  ;;  %v2314_v44 = vadd.f32 %v2313_v8, %v2312_v31  ;;  %v2334_v50 = vmul.f32 %v3332_v30, %v3272_v57  ;;  %v2346_v54 = vmul.f32 %v3308_v12, %v3229_v41  ;;  %v2357_v55 = vmul.f32 %v3265_v53, %v3193_v21  ;;  %v125_v25 = vld [vmem:[%s6411_s3] sm:$0x7f]  ;;  %s5278_s12 = sld [smem:[#allocation3 + $0x7]] }
  0x30   :  { %119 = vst.msk [vmem:[#allocation2 + $0xc7] sm:$0x1] %vm94_vm0, %v2976_v0  ;;  %v2343_v51 = vadd.f32 %v2342_v35, %v2341_v38  ;;  %v721_v56 = vadd.f32 %v720_v43, %v3172_v5  ;;  %v2329_v63 = vadd.f32 %v2328_v19, %v2327_v45  ;;  %v2358_v1 = vmul.f32 %v3283_v61, %v3205_v28  ;;  %s5285_s13 = sld [smem:[#allocation3 + $0x8]] }
  0x31   :  { %120 = vst.msk [vmem:[#allocation2 + $0xcf] sm:$0x1] %vm94_vm0, %v2976_v0  ;;  %v2316_v60 = vadd.f32 %v2315_v9, %v2314_v44  ;;  %v2348_v11 = vmul.f32 %v3332_v30, %v3243_v47  ;;  %v2360_v9 = vmul.f32 %v3327_v26, %v3217_v34  ;;  %v2362_v13 = vmul.f32 %v3308_v12, %v3224_v39  ;;  %v124_v44 = vld [vmem:[%s6410_s2 + $0x1] sm:$0x7f]  ;;  %s5297_s15 = sld [smem:[#allocation5]] }
  0x32   :  { %121 = vst.msk [vmem:[#allocation2 + $0xd7] sm:$0x1] %vm94_vm0, %v2976_v0  ;;  %v2345_v8 = vadd.f32 %v2344_v40, %v2343_v51  ;;  %v722_v15 = vmax.f32 %v721_v56, 0.0  ;;  %v2359_v20 = vadd.f32 %v2358_v1, %v2357_v55  ;;  %v2336_v31 = vmul.f32 %v3366_v2, %v3297_v6  ;;  %v2643_v1 = vld [vmem:[%s6410_s2 + $0x8] sm:$0x7f] }
  0x33   :  { %122 = vst.msk [vmem:[#allocation2 + $0xdf] sm:$0x1] %vm94_vm0, %v2976_v0  ;;  %v2330_v0 = vmul.f32 %v3327_v26, %v3243_v47  ;;  %v2318_v16 = vadd.f32 %v2317_v17, %v2316_v60  ;;  %v2350_v35 = vmul.f32 %v3354_v58, %v3260_v52  ;;  %v2352_v17 = vmul.f32 %v3359_v59, %v3272_v57 }
  0x34   :  { %6560 = vst [vmem:[#allocation19_spill] sm:$0xff] %v3354_v58  ;;  %v2347_v33 = vadd.f32 %v2346_v54, %v2345_v8  ;;  %v2354_v38 = vmul.f32 %v3371_v3, %v3297_v6  ;;  %v2361_v40 = vadd.f32 %v2360_v9, %v2359_v20  ;;  %v2364_v43 = vmul.f32 %v3332_v30, %v3229_v41  ;;  %v126_v9 = vld [vmem:[%s6411_s3 + $0x1] sm:$0x7f] }
  0x35   :  { %6561 = vst [vmem:[#allocation20_spill] sm:$0xff] %v3359_v59  ;;  %v2331_v19 = vadd.f32 %v2330_v0, %v2329_v63  ;;  %v315_v51 = vmul.f32 %v3040_v4, %v123_v24  ;;  %v317_v54 = vmul.f32 %v3050_v7, %v125_v25  ;;  %v320_v55 = vmul.f32 %v3056_v10, %v124_v44  ;;  %v3424_v24 = vld [vmem:[%s6411_s3 + $0x79] sm:$0x7f] }
  0x36   :  { %6562 = vst [vmem:[#allocation21_spill] sm:$0xff] %v3371_v3  ;;  %v2349_v45 = vadd.f32 %v2348_v11, %v2347_v33  ;;  %v2320_v56 = vadd.f32 %v2319_v37, %v2318_v16  ;;  %v2363_v60 = vadd.f32 %v2362_v13, %v2361_v40  ;;  %v2366_v63 = vmul.f32 %v3366_v2, %v3243_v47  ;;  %v2645_v37 = vld [vmem:[%s6411_s3 + $0x8] sm:$0x7f] }
  0x37   :  { %723 = vst.msk [vmem:[#allocation2 + $0x78] sm:$0x7f] %vm228_vm1, %v722_v15  ;;  %v2333_v0 = vadd.f32 %v2332_v46, %v2331_v19  ;;  %v2368_v11 = vmul.f32 %v3359_v59, %v3260_v52  ;;  %v323_v13 = vmul.f32 %v2643_v1, %v3065_v14  ;;  %v2370_v19 = vmul.f32 %v3371_v3, %v3272_v57 }
  0x38   :  { %v2351_v8 = vadd.f32 %v2350_v35, %v2349_v45  ;;  %v2365_v16 = vadd.f32 %v2364_v43, %v2363_v60  ;;  %v326_v20 = vmul.f32 %v2645_v37, %v3072_v18  ;;  %6563 = vst [vmem:[#allocation22_spill] sm:$0xff] %v3424_v24  ;;  %v2644_v35 = vld [vmem:[%s6410_s2 + $0x9] sm:$0x7f]  ;;  %v341_v40 = vmul.f32 %v3050_v7, %v124_v44  ;;  %v2647_v60 = vld [vmem:[%s6410_s2 + $0x10] sm:$0x7f] }
  0x39   :  { %v2335_v46 = vadd.f32 %v2334_v50, %v2333_v0  ;;  %v318_v50 = vadd.f32 %v317_v54, %v315_v51  ;;  %v329_v51 = vmul.f32 %v2644_v35, %v3080_v23  ;;  %v343_v54 = vmul.f32 %v3056_v10, %v126_v9 }
  0x3a   :  { %v2353_v33 = vadd.f32 %v2352_v17, %v2351_v8  ;;  %v2367_v45 = vadd.f32 %v2366_v63, %v2365_v16  ;;  %v3440_v44 = vstv %s3392_s24  ;;  %v2372_v63 = vmul.f32 %v3424_v24, %v3297_v6  ;;  %s3673_s24 = sld [smem:[#allocation5 + $0x1]] }
  0x3b   :  { %v2337_v15 = vadd.f32 %v2336_v31, %v2335_v46  ;;  %v321_v0 = vadd.f32 %v320_v55, %v318_v50  ;;  %v340_v31 = vmul.f32 %v3040_v4, %v125_v25  ;;  %v345_v25 = vmul.f32 %v2645_v37, %v3065_v14 }
  0x3c   :  { %v2355_v17 = vadd.f32 %v2354_v38, %v2353_v33  ;;  %v2649_v38 = vld [vmem:[%s6411_s3 + $0x10] sm:$0x7f]  ;;  %v332_v9 = vmul.f32 %v2647_v60, %v3090_v27  ;;  %v347_v16 = vmul.f32 %v2644_v35, %v3072_v18  ;;  %v3464_v3 = vstv %s3431_s0  ;;  %s3620_s0 = sld [smem:[#allocation3 + $0x84]] }
  0x3d   :  { %v2338_v43 = vmax.f32 %v2320_v56, %v2337_v15  ;;  %v324_v55 = vadd.f32 %v323_v13, %v321_v0  ;;  %v342_v8 = vadd.f32 %v341_v40, %v340_v31  ;;  %v2369_v56 = vadd.f32 %v2368_v11, %v2367_v45  ;;  %v2646_v11 = vld [vmem:[%s6411_s3 + $0x9] sm:$0x7f] }
  0x3e   :  { %v2401_v46 = vld [vmem:[#allocation2 + $0x78] sm:$0xff]  ;;  %v335_v13 = vmul.f32 %v2649_v38, %v3101_v32  ;;  %v358_v31 = vmul.f32 %v2643_v1, %v3040_v4  ;;  %v359_v40 = vmul.f32 %v2645_v37, %v3050_v7  ;;  %v351_v24 = vmul.f32 %v2649_v38, %v3090_v27 }
  0x3f   :  { %2451 = vmatpush.msra.mxu0 %v2401_v46  ;;  %2759 = vmatpush.msra.mxu3 %v2401_v46  ;;  %v327_v50 = vadd.f32 %v326_v20, %v324_v55  ;;  %v344_v15 = vadd.f32 %v343_v54, %v342_v8  ;;  %v2356_v33 = vmax.f32 %v2338_v43, %v2355_v17  ;;  %v2648_v20 = vld [vmem:[%s6410_s2 + $0x11] sm:$0x7f] }
  0x40   :  { %v2371_v0 = vadd.f32 %v2370_v19, %v2369_v56  ;;  %v349_v54 = vmul.f32 %v2646_v11, %v3080_v23  ;;  %v361_v43 = vmul.f32 %v2644_v35, %v3056_v10  ;;  %v338_v17 = vmul.f32 %v2648_v20, %v3111_v36 }
  0x41   :  { %v330_v45 = vadd.f32 %v329_v51, %v327_v50  ;;  %v346_v46 = vadd.f32 %v345_v25, %v344_v15  ;;  %v360_v55 = vadd.f32 %v359_v40, %v358_v31  ;;  %v363_v8 = vmul.f32 %v2647_v60, %v3065_v14  ;;  %v2651_v60 = vld [vmem:[%s6410_s2 + $0x18] sm:$0x7f] }
  0x42   :  { %v2373_v19 = vadd.f32 %v2372_v63, %v2371_v0  ;;  %v365_v51 = vmul.f32 %v2649_v38, %v3072_v18  ;;  %v376_v25 = vmul.f32 %v2645_v37, %v3040_v4  ;;  %v2650_v63 = vld [vmem:[%s6411_s3 + $0x11] sm:$0x7f]  ;;  %v353_v15 = vmul.f32 %v2648_v20, %v3101_v32 }
  0x43   :  { %v333_v56 = vadd.f32 %v332_v9, %v330_v45  ;;  %v348_v1 = vadd.f32 %v347_v16, %v346_v46  ;;  %v362_v58 = vadd.f32 %v361_v43, %v360_v55  ;;  %v2653_v9 = vld [vmem:[%s6411_s3 + $0x18] sm:$0x7f]  ;;  %v377_v16 = vmul.f32 %v2644_v35, %v3050_v7  ;;  %v3486_v45 = vld [vmem:[%s6410_s2 + $0x50] sm:$0x7f] }
  0x44   :  { %v2374_v59 = vmax.f32 %v2356_v33, %v2373_v19  ;;  %v379_v33 = vmul.f32 %v2646_v11, %v3056_v10  ;;  %v355_v0 = vmul.f32 %v2650_v63, %v3111_v36  ;;  %v367_v40 = vmul.f32 %v2648_v20, %v3080_v23  ;;  %v2652_v46 = vld [vmem:[%s6410_s2 + $0x19] sm:$0x7f] }
  0x45   :  { %v350_v50 = vadd.f32 %v349_v54, %v348_v1  ;;  %v364_v31 = vadd.f32 %v363_v8, %v362_v58  ;;  %v336_v54 = vadd.f32 %v335_v13, %v333_v56  ;;  %v378_v43 = vadd.f32 %v377_v16, %v376_v25  ;;  %v3495_v58 = vld [vmem:[%s6411_s3 + $0x50] sm:$0x7f] }
  0x46   :  { %v2375_v37 = vadd.f32 %v2374_v59, %v3440_v44  ;;  %v381_v11 = vmul.f32 %v2649_v38, %v3065_v14  ;;  %v369_v55 = vmul.f32 %v2651_v60, %v3090_v27  ;;  %v371_v8 = vmul.f32 %v2653_v9, %v3101_v32  ;;  %v3517_v16 = vld [vmem:[%s6411_s3 + $0x51] sm:$0x7f] }
  0x47   :  { %v352_v35 = vadd.f32 %v351_v24, %v350_v50  ;;  %v366_v19 = vadd.f32 %v365_v51, %v364_v31  ;;  %v380_v10 = vadd.f32 %v379_v33, %v378_v43  ;;  %v383_v7 = vmul.f32 %v2648_v20, %v3072_v18  ;;  %v3503_v24 = vld [vmem:[%s6410_s2 + $0x51] sm:$0x7f]  ;;  %v3522_v33 = vld [vmem:[%s6410_s2 + $0x58] sm:$0x7f] }
  0x48   :  { %v2376_v59 = vmax.f32 %v2375_v37, 0.0  ;;  %v1988_v38 = vmul.f32 %v3486_v45, %v3193_v21  ;;  %v373_v56 = vmul.f32 %v2652_v46, %v3111_v36  ;;  %v1989_v51 = vmul.f32 %v3495_v58, %v3205_v28  ;;  %v2654_v37 = vld [vmem:[%s6411_s3 + $0x19] sm:$0x7f] }
  0x49   :  { %v354_v1 = vadd.f32 %v353_v15, %v352_v35  ;;  %v368_v13 = vadd.f32 %v367_v40, %v366_v19  ;;  %v1991_v25 = vmul.f32 %v3503_v24, %v3217_v34  ;;  %v339_v20 = vadd.f32 %v338_v17, %v336_v54 }
  0x4a   :  { %2377 = vst.msk [vmem:[#allocation2 + $0xd8] sm:$0x7f] %vm228_vm1, %v2376_v59  ;;  %v382_v50 = vadd.f32 %v381_v11, %v380_v10  ;;  %v385_v15 = vmul.f32 %v2650_v63, %v3080_v23  ;;  %v387_v17 = vmul.f32 %v2653_v9, %v3090_v27  ;;  %v3531_v10 = vld [vmem:[%s6411_s3 + $0x58] sm:$0x7f]  ;;  %v1990_v63 = vadd.f32 %v1989_v51, %v1988_v38  ;;  %v3560_v51 = vld [vmem:[%s6411_s3 + $0x60] sm:$0x7f] }
  0x4b   :  { %v356_v60 = vadd.f32 %v355_v0, %v354_v1  ;;  %v370_v31 = vadd.f32 %v369_v55, %v368_v13  ;;  %v1993_v0 = vmul.f32 %v3522_v33, %v3224_v39  ;;  %v389_v54 = vmul.f32 %v2652_v46, %v3101_v32  ;;  %v3543_v9 = vld [vmem:[%s6410_s2 + $0x59] sm:$0x7f]  ;;  %v3555_v13 = vld [vmem:[%s6410_s2 + $0x60] sm:$0x7f] }
  0x4c   :  { %v384_v40 = vadd.f32 %v383_v7, %v382_v50  ;;  %v1995_v35 = vmul.f32 %v3531_v10, %v3229_v41  ;;  %v2005_v43 = vmul.f32 %v3495_v58, %v3193_v21  ;;  %v1992_v59 = vadd.f32 %v1991_v25, %v1990_v63  ;;  %v3573_v63 = vld [vmem:[%s6411_s3 + $0x59] sm:$0x7f] }
  0x4d   :  { %v372_v11 = vadd.f32 %v371_v8, %v370_v31  ;;  %v2006_v19 = vmul.f32 %v3503_v24, %v3205_v28  ;;  %v2008_v7 = vmul.f32 %v3517_v16, %v3217_v34  ;;  %v357_v46 = vmax.f32 %v339_v20, %v356_v60 }
  0x4e   :  { %v386_v55 = vadd.f32 %v385_v15, %v384_v40  ;;  %v391_v1 = vmul.f32 %v2654_v37, %v3111_v36  ;;  %v1997_v38 = vmul.f32 %v3543_v9, %v3243_v47  ;;  %v1994_v25 = vadd.f32 %v1993_v0, %v1992_v59 }
  0x4f   :  { %v374_v8 = vadd.f32 %v373_v56, %v372_v11  ;;  %v2007_v50 = vadd.f32 %v2006_v19, %v2005_v43  ;;  %v2010_v20 = vmul.f32 %v3531_v10, %v3224_v39  ;;  %v1999_v56 = vmul.f32 %v3555_v13, %v3260_v52 }
  0x50   :  { %v388_v15 = vadd.f32 %v387_v17, %v386_v55  ;;  %v2001_v37 = vmul.f32 %v3560_v51, %v3272_v57  ;;  %v2023_v31 = vmul.f32 %v3522_v33, %v3193_v21  ;;  %v1996_v0 = vadd.f32 %v1995_v35, %v1994_v25  ;;  %v3586_v35 = vld [vmem:[%s6410_s2 + $0x61] sm:$0x7f] }
  0x51   :  { %v2413_v60 = vld [vmem:[#allocation2 + $0xd8] sm:$0xff]  ;;  %v2009_v40 = vadd.f32 %v2008_v7, %v2007_v50  ;;  %v2012_v17 = vmul.f32 %v3543_v9, %v3229_v41  ;;  %v2024_v43 = vmul.f32 %v3531_v10, %v3205_v28  ;;  %v375_v11 = vmax.f32 %v357_v46, %v374_v8 }
  0x52   :  { %2484 = vmatpush.msra.mxu1 %v2413_v60  ;;  %v390_v59 = vadd.f32 %v389_v54, %v388_v15  ;;  %v2014_v19 = vmul.f32 %v3573_v63, %v3243_v47  ;;  %v2026_v55 = vmul.f32 %v3543_v9, %v3217_v34  ;;  %2775 = vmatpush.msra.mxu2 %v2413_v60  ;;  %v3690_v18 = vstv %s3634_s18 }
  0x53   :  { %v1998_v7 = vadd.f32 %v1997_v38, %v1996_v0  ;;  %v2011_v25 = vadd.f32 %v2010_v20, %v2009_v40  ;;  %v2025_v50 = vadd.f32 %v2024_v43, %v2023_v31  ;;  %v2028_v36 = vmul.f32 %v3555_v13, %v3224_v39  ;;  %v3607_v0 = vld [vmem:[%s6410_s2 + $0x68] sm:$0x7f] }
  0x54   :  { %v392_v54 = vadd.f32 %v391_v1, %v390_v59  ;;  %v2003_v46 = vmul.f32 %v3586_v35, %v3297_v6  ;;  %v2016_v8 = vmul.f32 %v3560_v51, %v3260_v52  ;;  %v2030_v60 = vmul.f32 %v3560_v51, %v3229_v41  ;;  %6564 = vst [vmem:[#allocation23_spill] sm:$0xff] %v3607_v0  ;;  %v3612_v40 = vld [vmem:[%s6411_s3 + $0x68] sm:$0x7f] }
  0x55   :  { %v2000_v38 = vadd.f32 %v1999_v56, %v1998_v7  ;;  %v2013_v20 = vadd.f32 %v2012_v17, %v2011_v25  ;;  %v2027_v15 = vadd.f32 %v2026_v55, %v2025_v50  ;;  %v2041_v31 = vmul.f32 %v3531_v10, %v3193_v21  ;;  %6565 = vst [vmem:[#allocation24_spill] sm:$0xff] %v3612_v40  ;;  %v3630_v59 = vld [vmem:[%s6410_s2 + $0x69] sm:$0x7f] }
  0x56   :  { %v393_v1 = vmax.f32 %v375_v11, %v392_v54  ;;  %v2018_v56 = vmul.f32 %v3586_v35, %v3272_v57  ;;  %v2042_v17 = vmul.f32 %v3543_v9, %v3205_v28  ;;  %v2044_v43 = vmul.f32 %v3573_v63, %v3217_v34  ;;  %v3625_v11 = vld [vmem:[%s6411_s3 + $0x61] sm:$0x7f]  ;;  %6566 = vst [vmem:[#allocation25_spill] sm:$0xff] %v3630_v59 }
  0x57   :  { %v2002_v55 = vadd.f32 %v2001_v37, %v2000_v38  ;;  %v2015_v7 = vadd.f32 %v2014_v19, %v2013_v20  ;;  %v2029_v25 = vadd.f32 %v2028_v36, %v2027_v15  ;;  %v2032_v50 = vmul.f32 %v3586_v35, %v3243_v47 }
  0x58   :  { %v395_v54 = vadd.f32 %v3172_v5, %v393_v1  ;;  %v2020_v32 = vmul.f32 %v3625_v11, %v3297_v6  ;;  %v2043_v27 = vadd.f32 %v2042_v17, %v2041_v31  ;;  %v2046_v23 = vmul.f32 %v3560_v51, %v3224_v39 }
  0x59   :  { %v2017_v37 = vadd.f32 %v2016_v8, %v2015_v7  ;;  %v2031_v19 = vadd.f32 %v2030_v60, %v2029_v25  ;;  %v2034_v36 = vmul.f32 %v3607_v0, %v3260_v52  ;;  %v2036_v38 = vmul.f32 %v3612_v40, %v3272_v57  ;;  %v3660_v25 = vld [vmem:[%s6411_s3 + $0x69] sm:$0x7f] }
  0x5a   :  { %v396_v20 = vmax.f32 %v395_v54, 0.0  ;;  %v2038_v15 = vmul.f32 %v3630_v59, %v3297_v6  ;;  %v2045_v31 = vadd.f32 %v2044_v43, %v2043_v27  ;;  %v2048_v1 = vmul.f32 %v3586_v35, %v3229_v41  ;;  %6567 = vst [vmem:[#allocation26_spill] sm:$0xff] %v3660_v25 }
  0x5b   :  { %v2004_v8 = vadd.f32 %v2003_v46, %v2002_v55  ;;  %v2019_v60 = vadd.f32 %v2018_v56, %v2017_v37  ;;  %v2033_v17 = vadd.f32 %v2032_v50, %v2031_v19  ;;  %v3654_v7 = vstv %s3590_s30 }
  0x5c   :  { %397 = vst.msk [vmem:[#allocation2 + $0x70] sm:$0x7f] %vm228_vm1, %v396_v20  ;;  %v2047_v54 = vadd.f32 %v2046_v23, %v2045_v31  ;;  %v2050_v27 = vmul.f32 %v3625_v11, %v3243_v47  ;;  %v2052_v43 = vmul.f32 %v3612_v40, %v3260_v52  ;;  %v3669_v46 = vstv %s3598_s9 }
  0x5d   :  { %v2021_v56 = vadd.f32 %v2020_v32, %v2019_v60  ;;  %v2035_v55 = vadd.f32 %v2034_v36, %v2033_v17  ;;  %v2054_v50 = vmul.f32 %v3630_v59, %v3272_v57  ;;  %v3676_v23 = vstv %s3602_s10 }
  0x5e   :  { %v2049_v37 = vadd.f32 %v2048_v1, %v2047_v54  ;;  %v3679_v19 = vstv %s3620_s0  ;;  %v2156_v20 = vmul.f32 %v3198_v22, %v3464_v3  ;;  %v2157_v31 = vmul.f32 %v3210_v29, %v3654_v7 }
  0x5f   :  { %v2022_v32 = vmax.f32 %v2004_v8, %v2021_v56  ;;  %v2037_v36 = vadd.f32 %v2036_v38, %v2035_v55  ;;  %v2056_v60 = vmul.f32 %v3660_v25, %v3297_v6  ;;  %v2159_v17 = vmul.f32 %v3234_v42, %v3669_v46 }
  0x60   :  { %v2051_v5 = vadd.f32 %v2050_v27, %v2049_v37  ;;  %v2158_v1 = vadd.f32 %v2157_v31, %v2156_v20  ;;  %v2161_v54 = vmul.f32 %v3253_v49, %v3676_v23  ;;  %v3695_v22 = vstv %s3641_s19  ;;  %s5213_s19 = sld [smem:[#allocation3]] }
  0x61   :  { %v2039_v14 = vadd.f32 %v2038_v15, %v2037_v36  ;;  %v3698_v4 = vstv %s3647_s20  ;;  %v2163_v38 = vmul.f32 %v3265_v53, %v3679_v19  ;;  %v2173_v27 = vmul.f32 %v3210_v29, %v3464_v3 }
  0x62   :  { %v2053_v8 = vadd.f32 %v2052_v43, %v2051_v5  ;;  %v2160_v56 = vadd.f32 %v2159_v17, %v2158_v1  ;;  %v2174_v55 = vmul.f32 %v3234_v42, %v3654_v7  ;;  %v2165_v15 = vmul.f32 %v3283_v61, %v3690_v18 }
  0x63   :  { %v2400_v37 = vld [vmem:[#allocation2 + $0x70] sm:$0xff]  ;;  %v2040_v20 = vmax.f32 %v2022_v32, %v2039_v14  ;;  %v2176_v31 = vmul.f32 %v3248_v48, %v3669_v46  ;;  %v2178_v36 = vmul.f32 %v3265_v53, %v3676_v23  ;;  %v3713_v43 = vstv %s3666_s23 }
  0x64   :  { %2452 = vmatpush.msra.mxu0 %v2400_v37  ;;  %2760 = vmatpush.msra.mxu3 %v2400_v37  ;;  %v2055_v5 = vadd.f32 %v2054_v50, %v2053_v8  ;;  %v2162_v29 = vadd.f32 %v2161_v54, %v2160_v56  ;;  %v2175_v17 = vadd.f32 %v2174_v55, %v2173_v27  ;;  %v3716_v1 = vstv %s3673_s24  ;;  %s5233_s24 = sld [smem:[#allocation3 + $0x1]] }
  0x65   :  { %v2167_v14 = vmul.f32 %v3288_v62, %v3695_v22  ;;  %v2169_v42 = vmul.f32 %v3308_v12, %v3698_v4  ;;  %v2180_v48 = vmul.f32 %v3283_v61, %v3679_v19  ;;  %v2191_v50 = vmul.f32 %v3253_v49, %v3464_v3 }
  0x66   :  { %v2057_v32 = vadd.f32 %v2056_v60, %v2055_v5  ;;  %v2164_v25 = vadd.f32 %v2163_v38, %v2162_v29  ;;  %v2177_v59 = vadd.f32 %v2176_v31, %v2175_v17  ;;  %v2171_v54 = vmul.f32 %v3332_v30, %v3713_v43 }
  0x67   :  { %v2182_v8 = vmul.f32 %v3327_v26, %v3690_v18  ;;  %v2192_v56 = vmul.f32 %v3265_v53, %v3654_v7  ;;  %v2194_v27 = vmul.f32 %v3283_v61, %v3669_v46  ;;  %v2184_v38 = vmul.f32 %v3308_v12, %v3695_v22 }
  0x68   :  { %v2058_v55 = vmax.f32 %v2040_v20, %v2057_v32  ;;  %v2166_v37 = vadd.f32 %v2165_v15, %v2164_v25  ;;  %v2179_v60 = vadd.f32 %v2178_v36, %v2177_v59  ;;  %v2186_v49 = vmul.f32 %v3332_v30, %v3698_v4 }
  0x69   :  { %v2188_v31 = vmul.f32 %v3366_v2, %v3713_v43  ;;  %v2193_v5 = vadd.f32 %v2192_v56, %v2191_v50  ;;  %v2196_v29 = vmul.f32 %v3288_v62, %v3676_v23  ;;  %v2209_v59 = vmul.f32 %v3265_v53, %v3464_v3  ;;  %v3756_v53 = vld [vmem:[%s6410_s2 + $0x40] sm:$0x7f]  ;;  %v6568_v56 = vld [vmem:[#allocation19_spill] sm:$0xff] }
  0x6a   :  { %v2059_v17 = vadd.f32 %v2058_v55, %v3440_v44  ;;  %v2168_v40 = vadd.f32 %v2167_v14, %v2166_v37  ;;  %v2181_v0 = vadd.f32 %v2180_v48, %v2179_v60  ;;  %v2198_v20 = vmul.f32 %v3308_v12, %v3679_v19  ;;  %v3761_v48 = vld [vmem:[%s6411_s3 + $0x40] sm:$0x7f] }
  0x6b   :  { %v2195_v25 = vadd.f32 %v2194_v27, %v2193_v5  ;;  %v2210_v15 = vmul.f32 %v3283_v61, %v3654_v7  ;;  %v2212_v36 = vmul.f32 %v3327_v26, %v3669_v46  ;;  %v2200_v14 = vmul.f32 %v3332_v30, %v3690_v18  ;;  %v6570_v55 = vld [vmem:[#allocation21_spill] sm:$0xff] }
  0x6c   :  { %v2060_v32 = vmax.f32 %v2059_v17, 0.0  ;;  %v2170_v50 = vadd.f32 %v2169_v42, %v2168_v40  ;;  %v2183_v62 = vadd.f32 %v2182_v8, %v2181_v0  ;;  %v2202_v26 = vmul.f32 %v6568_v56, %v3695_v22  ;;  %v6569_v42 = vld [vmem:[#allocation20_spill] sm:$0xff]  ;;  %v3777_v17 = vld [vmem:[%s6410_s2 + $0x41] sm:$0x7f] }
  0x6d   :  { %v2197_v61 = vadd.f32 %v2196_v29, %v2195_v25  ;;  %v2211_v27 = vadd.f32 %v2210_v15, %v2209_v59  ;;  %v2214_v0 = vmul.f32 %v3308_v12, %v3676_v23  ;;  %v2204_v8 = vmul.f32 %v6569_v42, %v3698_v4  ;;  %6571 = vst [vmem:[#allocation19_spill] sm:$0xff] %v3777_v17 }
  0x6e   :  { %2061 = vst.msk [vmem:[#allocation2 + $0xd0] sm:$0x7f] %vm228_vm1, %v2060_v32  ;;  %v2185_v40 = vadd.f32 %v2184_v38, %v2183_v62  ;;  %v2206_v37 = vmul.f32 %v6570_v55, %v3713_v43  ;;  %v2216_v60 = vmul.f32 %v3332_v30, %v3679_v19  ;;  %v1672_v12 = vmul.f32 %v3756_v53, %v3193_v21  ;;  %v3788_v30 = vld [vmem:[%s6410_s2 + $0x48] sm:$0x7f]  ;;  %v3795_v62 = vld [vmem:[%s6411_s3 + $0x41] sm:$0x7f] }
  0x6f   :  { %v2199_v5 = vadd.f32 %v2198_v20, %v2197_v61  ;;  %v2213_v29 = vadd.f32 %v2212_v36, %v2211_v27  ;;  %v1673_v38 = vmul.f32 %v3761_v48, %v3205_v28  ;;  %v2172_v59 = vadd.f32 %v2171_v54, %v2170_v50  ;;  %6572 = vst [vmem:[#allocation20_spill] sm:$0xff] %v3788_v30  ;;  %v3800_v54 = vld [vmem:[%s6411_s3 + $0x48] sm:$0x7f] }
  0x70   :  { %v2187_v25 = vadd.f32 %v2186_v49, %v2185_v40  ;;  %v2218_v15 = vmul.f32 %v3366_v2, %v3690_v18  ;;  %v1675_v20 = vmul.f32 %v3777_v17, %v3217_v34  ;;  %6573 = vst [vmem:[#allocation21_spill] sm:$0xff] %v3795_v62  ;;  %v1677_v49 = vmul.f32 %v3788_v30, %v3224_v39  ;;  %v3813_v40 = vld [vmem:[%s6410_s2 + $0x49] sm:$0x7f] }
  0x71   :  { %v2201_v36 = vadd.f32 %v2200_v14, %v2199_v5  ;;  %v2215_v32 = vadd.f32 %v2214_v0, %v2213_v29  ;;  %v1674_v2 = vadd.f32 %v1673_v38, %v1672_v12  ;;  %v2220_v61 = vmul.f32 %v6569_v42, %v3695_v22  ;;  %6574 = vst [vmem:[#allocation27_spill] sm:$0xff] %v3813_v40  ;;  %v6575_v29 = vld [vmem:[#allocation22_spill] sm:$0xff] }
  0x72   :  { %v2189_v50 = vadd.f32 %v2188_v31, %v2187_v25  ;;  %v2222_v14 = vmul.f32 %v6570_v55, %v3698_v4  ;;  %v1679_v56 = vmul.f32 %v3800_v54, %v3229_v41  ;;  %v1689_v31 = vmul.f32 %v3761_v48, %v3193_v21 }
  0x73   :  { %v2203_v27 = vadd.f32 %v2202_v26, %v2201_v36  ;;  %v2217_v0 = vadd.f32 %v2216_v60, %v2215_v32  ;;  %v1676_v5 = vadd.f32 %v1675_v20, %v1674_v2  ;;  %v2224_v42 = vmul.f32 %v6575_v29, %v3713_v43  ;;  %v3828_v20 = vld [vmem:[%s6410_s2 + $0x50] sm:$0x7f] }
  0x74   :  { %v1681_v55 = vmul.f32 %v3813_v40, %v3243_v47  ;;  %v1690_v12 = vmul.f32 %v3777_v17, %v3205_v28  ;;  %v1692_v26 = vmul.f32 %v3795_v62, %v3217_v34  ;;  %v2190_v38 = vmax.f32 %v2172_v59, %v2189_v50  ;;  %6576 = vst [vmem:[#allocation22_spill] sm:$0xff] %v3828_v20  ;;  %v3833_v32 = vld [vmem:[%s6411_s3 + $0x50] sm:$0x7f] }
  0x75   :  { %v2412_v60 = vld [vmem:[#allocation2 + $0xd0] sm:$0xff]  ;;  %v2205_v25 = vadd.f32 %v2204_v8, %v2203_v27  ;;  %v2219_v36 = vadd.f32 %v2218_v15, %v2217_v0  ;;  %6577 = vst [vmem:[#allocation28_spill] sm:$0xff] %v3833_v32  ;;  %v1678_v2 = vadd.f32 %v1677_v49, %v1676_v5  ;;  %v1683_v29 = vmul.f32 %v3828_v20, %v3260_v52 }
  0x76   :  { %2485 = vmatpush.msra.mxu1 %v2412_v60  ;;  %v1685_v59 = vmul.f32 %v3833_v32, %v3272_v57  ;;  %v1691_v8 = vadd.f32 %v1690_v12, %v1689_v31  ;;  %v1694_v15 = vmul.f32 %v3800_v54, %v3224_v39  ;;  %v1696_v62 = vmul.f32 %v3813_v40, %v3229_v41  ;;  %v3846_v49 = vld [vmem:[%s6410_s2 + $0x51] sm:$0x7f]  ;;  %v3857_v12 = vld [vmem:[%s6411_s3 + $0x49] sm:$0x7f] }
  0x77   :  { %v2207_v50 = vadd.f32 %v2206_v37, %v2205_v25  ;;  %v2221_v27 = vadd.f32 %v2220_v61, %v2219_v36  ;;  %v1680_v0 = vadd.f32 %v1679_v56, %v1678_v2  ;;  %2776 = vmatpush.msra.mxu2 %v2412_v60  ;;  %v1707_v17 = vmul.f32 %v3788_v30, %v3193_v21 }
  0x78   :  { %v1693_v5 = vadd.f32 %v1692_v26, %v1691_v8  ;;  %v1708_v31 = vmul.f32 %v3800_v54, %v3205_v28  ;;  %v1710_v37 = vmul.f32 %v3813_v40, %v3217_v34  ;;  %6578 = vst [vmem:[#allocation29_spill] sm:$0xff] %v3857_v12  ;;  %v1687_v26 = vmul.f32 %v3846_v49, %v3297_v6 }
  0x79   :  { %v2208_v61 = vmax.f32 %v2190_v38, %v2207_v50  ;;  %v2223_v56 = vadd.f32 %v2222_v14, %v2221_v27  ;;  %v1682_v60 = vadd.f32 %v1681_v55, %v1680_v0  ;;  %v1698_v36 = vmul.f32 %v3857_v12, %v3243_v47  ;;  %v3872_v55 = vld [vmem:[%s6410_s2 + $0x58] sm:$0x7f]  ;;  %v3881_v0 = vld [vmem:[%s6411_s3 + $0x51] sm:$0x7f] }
  0x7a   :  { %v1695_v25 = vadd.f32 %v1694_v15, %v1693_v5  ;;  %v1709_v2 = vadd.f32 %v1708_v31, %v1707_v17  ;;  %v1712_v8 = vmul.f32 %v3828_v20, %v3224_v39  ;;  %v1700_v14 = vmul.f32 %v3833_v32, %v3260_v52  ;;  %6579 = vst [vmem:[#allocation30_spill] sm:$0xff] %v3872_v55  ;;  %v3886_v5 = vld [vmem:[%s6411_s3 + $0x58] sm:$0x7f] }
  0x7b   :  { %v2225_v30 = vadd.f32 %v2224_v42, %v2223_v56  ;;  %v1684_v38 = vadd.f32 %v1683_v29, %v1682_v60  ;;  %v1702_v50 = vmul.f32 %v3846_v49, %v3272_v57  ;;  %v1714_v17 = vmul.f32 %v3833_v32, %v3229_v41 }
  0x7c   :  { %v1697_v15 = vadd.f32 %v1696_v62, %v1695_v25  ;;  %v1711_v27 = vadd.f32 %v1710_v37, %v1709_v2  ;;  %v1725_v42 = vmul.f32 %v3800_v54, %v3193_v21  ;;  %v1726_v62 = vmul.f32 %v3813_v40, %v3205_v28 }
  0x7d   :  { %v2226_v29 = vmax.f32 %v2208_v61, %v2225_v30  ;;  %v1686_v31 = vadd.f32 %v1685_v59, %v1684_v38  ;;  %v1728_v37 = vmul.f32 %v3857_v12, %v3217_v34  ;;  %v1704_v30 = vmul.f32 %v3881_v0, %v3297_v6 }
  0x7e   :  { %v1699_v56 = vadd.f32 %v1698_v36, %v1697_v15  ;;  %v1713_v61 = vadd.f32 %v1712_v8, %v1711_v27  ;;  %v1716_v60 = vmul.f32 %v3846_v49, %v3243_v47  ;;  %v1718_v2 = vmul.f32 %v3872_v55, %v3260_v52  ;;  %v3904_v36 = vld [vmem:[%s6410_s2 + $0x59] sm:$0x7f] }
  0x7f   :  { %v2227_v25 = vadd.f32 %v2226_v29, %v3716_v1  ;;  %v1727_v59 = vadd.f32 %v1726_v62, %v1725_v42  ;;  %v1730_v38 = vmul.f32 %v3833_v32, %v3224_v39  ;;  %v1720_v8 = vmul.f32 %v3886_v5, %v3272_v57 }
  0x80   :  { %v1701_v15 = vadd.f32 %v1700_v14, %v1699_v56  ;;  %v1715_v12 = vadd.f32 %v1714_v17, %v1713_v61  ;;  %v1732_v27 = vmul.f32 %v3846_v49, %v3229_v41  ;;  %v1688_v20 = vadd.f32 %v1687_v26, %v1686_v31 }
  0x81   :  { %v2228_v29 = vmax.f32 %v2227_v25, 0.0  ;;  %v1729_v55 = vadd.f32 %v1728_v37, %v1727_v59  ;;  %v1840_v42 = vmul.f32 %v3486_v45, %v3464_v3  ;;  %v1841_v40 = vmul.f32 %v3495_v58, %v3654_v7 }
  0x82   :  { %v1703_v62 = vadd.f32 %v1702_v50, %v1701_v15  ;;  %v1717_v32 = vadd.f32 %v1716_v60, %v1715_v12  ;;  %v1843_v14 = vmul.f32 %v3503_v24, %v3669_v46  ;;  %v1722_v17 = vmul.f32 %v3904_v36, %v3297_v6  ;;  %v3926_v12 = vld [vmem:[%s6411_s3 + $0x59] sm:$0x7f] }
  0x83   :  { %2229 = vst.msk [vmem:[#allocation2 + $0x68] sm:$0x7f] %vm228_vm1, %v2228_v29  ;;  %v1731_v56 = vadd.f32 %v1730_v38, %v1729_v55  ;;  %v1734_v26 = vmul.f32 %v3881_v0, %v3243_v47  ;;  %v1736_v45 = vmul.f32 %v3886_v5, %v3260_v52  ;;  %v1842_v37 = vadd.f32 %v1841_v40, %v1840_v42 }
  0x84   :  { %v1705_v50 = vadd.f32 %v1704_v30, %v1703_v62  ;;  %v1719_v31 = vadd.f32 %v1718_v2, %v1717_v32  ;;  %v1845_v61 = vmul.f32 %v3522_v33, %v3676_v23  ;;  %v1738_v55 = vmul.f32 %v3904_v36, %v3272_v57 }
  0x85   :  { %v1733_v60 = vadd.f32 %v1732_v27, %v1731_v56  ;;  %v1847_v25 = vmul.f32 %v3531_v10, %v3679_v19  ;;  %v1857_v59 = vmul.f32 %v3495_v58, %v3464_v3  ;;  %v1844_v29 = vadd.f32 %v1843_v14, %v1842_v37 }
  0x86   :  { %v1706_v38 = vmax.f32 %v1688_v20, %v1705_v50  ;;  %v1721_v15 = vadd.f32 %v1720_v8, %v1719_v31  ;;  %v1858_v32 = vmul.f32 %v3503_v24, %v3654_v7  ;;  %v1740_v30 = vmul.f32 %v3926_v12, %v3297_v6 }
  0x87   :  { %v1735_v40 = vadd.f32 %v1734_v26, %v1733_v60  ;;  %v1849_v2 = vmul.f32 %v3543_v9, %v3690_v18  ;;  %v1860_v27 = vmul.f32 %v3517_v16, %v3669_v46  ;;  %v1846_v62 = vadd.f32 %v1845_v61, %v1844_v29 }
  0x88   :  { %v1723_v42 = vadd.f32 %v1722_v17, %v1721_v15  ;;  %v1859_v56 = vadd.f32 %v1858_v32, %v1857_v59  ;;  %v1862_v58 = vmul.f32 %v3531_v10, %v3676_v23  ;;  %v1851_v24 = vmul.f32 %v3555_v13, %v3695_v22 }
  0x89   :  { %v1737_v20 = vadd.f32 %v1736_v45, %v1735_v40  ;;  %v1853_v8 = vmul.f32 %v3560_v51, %v3698_v4  ;;  %v1864_v14 = vmul.f32 %v3543_v9, %v3679_v19  ;;  %v1848_v31 = vadd.f32 %v1847_v25, %v1846_v62 }
  0x8a   :  { %v2399_v26 = vld [vmem:[#allocation2 + $0x68] sm:$0xff]  ;;  %v1724_v50 = vmax.f32 %v1706_v38, %v1723_v42  ;;  %v1861_v16 = vadd.f32 %v1860_v27, %v1859_v56  ;;  %v1875_v17 = vmul.f32 %v3522_v33, %v3464_v3  ;;  %v1876_v45 = vmul.f32 %v3531_v10, %v3654_v7 }
  0x8b   :  { %2453 = vmatpush.msra.mxu0 %v2399_v26  ;;  %2761 = vmatpush.msra.mxu3 %v2399_v26  ;;  %v1739_v37 = vadd.f32 %v1738_v55, %v1737_v20  ;;  %v1878_v61 = vmul.f32 %v3543_v9, %v3669_v46  ;;  %v1850_v60 = vadd.f32 %v1849_v2, %v1848_v31 }
  0x8c   :  { %v1855_v59 = vmul.f32 %v3586_v35, %v3713_v43  ;;  %v1863_v15 = vadd.f32 %v1862_v58, %v1861_v16  ;;  %v1866_v25 = vmul.f32 %v3573_v63, %v3690_v18  ;;  %v1868_v33 = vmul.f32 %v3560_v51, %v3695_v22  ;;  %v6580_v16 = vld [vmem:[#allocation23_spill] sm:$0xff] }
  0x8d   :  { %v1741_v38 = vadd.f32 %v1740_v30, %v1739_v37  ;;  %v1877_v29 = vadd.f32 %v1876_v45, %v1875_v17  ;;  %v1880_v55 = vmul.f32 %v3555_v13, %v3676_v23  ;;  %v1852_v32 = vadd.f32 %v1851_v24, %v1850_v60  ;;  %v6581_v37 = vld [vmem:[#allocation24_spill] sm:$0xff] }
  0x8e   :  { %v1865_v40 = vadd.f32 %v1864_v14, %v1863_v15  ;;  %v1870_v2 = vmul.f32 %v3586_v35, %v3698_v4  ;;  %v1882_v27 = vmul.f32 %v3560_v51, %v3679_v19  ;;  %v1893_v30 = vmul.f32 %v3531_v10, %v3464_v3  ;;  %v3984_v10 = vld [vmem:[%s6410_s2 + $0x30] sm:$0x7f] }
  0x8f   :  { %v1742_v42 = vmax.f32 %v1724_v50, %v1741_v38  ;;  %v1879_v62 = vadd.f32 %v1878_v61, %v1877_v29  ;;  %v1894_v56 = vmul.f32 %v3543_v9, %v3654_v7  ;;  %v1854_v58 = vadd.f32 %v1853_v8, %v1852_v32  ;;  %v3989_v9 = vld [vmem:[%s6411_s3 + $0x30] sm:$0x7f] }
  0x90   :  { %v1867_v20 = vadd.f32 %v1866_v25, %v1865_v40  ;;  %v1884_v13 = vmul.f32 %v3586_v35, %v3690_v18  ;;  %v1896_v24 = vmul.f32 %v3573_v63, %v3669_v46  ;;  %v1898_v50 = vmul.f32 %v3560_v51, %v3676_v23 }
  0x91   :  { %v1743_v14 = vadd.f32 %v1742_v42, %v3440_v44  ;;  %v1881_v26 = vadd.f32 %v1880_v55, %v1879_v62  ;;  %v1895_v31 = vadd.f32 %v1894_v56, %v1893_v30  ;;  %v1872_v63 = vmul.f32 %v3625_v11, %v3713_v43  ;;  %v6584_v42 = vld [vmem:[#allocation25_spill] sm:$0xff]  ;;  %v4023_v30 = vld [vmem:[%s6411_s3 + $0x31] sm:$0x7f] }
  0x92   :  { %v1869_v8 = vadd.f32 %v1868_v33, %v1867_v20  ;;  %v1886_v17 = vmul.f32 %v6580_v16, %v3695_v22  ;;  %v1888_v51 = vmul.f32 %v6581_v37, %v3698_v4  ;;  %v1900_v15 = vmul.f32 %v3586_v35, %v3679_v19  ;;  %v4002_v33 = vld [vmem:[%s6410_s2 + $0x31] sm:$0x7f]  ;;  %6585 = vst [vmem:[#allocation25_spill] sm:$0xff] %v4023_v30 }
  0x93   :  { %v1744_v45 = vmax.f32 %v1743_v14, 0.0  ;;  %v1883_v61 = vadd.f32 %v1882_v27, %v1881_v26  ;;  %v1897_v60 = vadd.f32 %v1896_v24, %v1895_v31  ;;  %v1856_v25 = vadd.f32 %v1855_v59, %v1854_v58  ;;  %6582 = vst [vmem:[#allocation23_spill] sm:$0xff] %v4002_v33  ;;  %v4014_v59 = vld [vmem:[%s6410_s2 + $0x38] sm:$0x7f] }
  0x94   :  { %v1871_v38 = vadd.f32 %v1870_v2, %v1869_v8  ;;  %v1356_v29 = vmul.f32 %v3984_v10, %v3193_v21  ;;  %v1357_v55 = vmul.f32 %v3989_v9, %v3205_v28  ;;  %v1902_v35 = vmul.f32 %v3625_v11, %v3690_v18  ;;  %6583 = vst [vmem:[#allocation24_spill] sm:$0xff] %v4014_v59  ;;  %v4034_v14 = vld [vmem:[%s6411_s3 + $0x38] sm:$0x7f] }
  0x95   :  { %1745 = vst.msk [vmem:[#allocation2 + $0xc8] sm:$0x7f] %vm228_vm1, %v1744_v45  ;;  %v1885_v32 = vadd.f32 %v1884_v13, %v1883_v61  ;;  %v1899_v40 = vadd.f32 %v1898_v50, %v1897_v60  ;;  %v1359_v2 = vmul.f32 %v4002_v33, %v3217_v34  ;;  %v1890_v62 = vmul.f32 %v6584_v42, %v3713_v43  ;;  %v6589_v60 = vld [vmem:[#allocation26_spill] sm:$0xff] }
  0x96   :  { %v1873_v27 = vadd.f32 %v1872_v63, %v1871_v38  ;;  %v1358_v56 = vadd.f32 %v1357_v55, %v1356_v29  ;;  %v1361_v11 = vmul.f32 %v4014_v59, %v3224_v39  ;;  %v1904_v13 = vmul.f32 %v6581_v37, %v3695_v22  ;;  %6586 = vst [vmem:[#allocation31_spill] sm:$0xff] %v4034_v14  ;;  %v4048_v37 = vld [vmem:[%s6410_s2 + $0x40] sm:$0x7f] }
  0x97   :  { %v1887_v58 = vadd.f32 %v1886_v17, %v1885_v32  ;;  %v1901_v20 = vadd.f32 %v1900_v15, %v1899_v40  ;;  %v1906_v24 = vmul.f32 %v6584_v42, %v3698_v4  ;;  %v1363_v50 = vmul.f32 %v4034_v14, %v3229_v41  ;;  %v4043_v17 = vld [vmem:[%s6410_s2 + $0x39] sm:$0x7f]  ;;  %6588 = vst [vmem:[#allocation33_spill] sm:$0xff] %v4048_v37  ;;  %v4063_v32 = vld [vmem:[%s6411_s3 + $0x40] sm:$0x7f] }
  0x98   :  { %v1874_v26 = vmax.f32 %v1856_v25, %v1873_v27  ;;  %v1360_v31 = vadd.f32 %v1359_v2, %v1358_v56  ;;  %v1373_v8 = vmul.f32 %v3989_v9, %v3193_v21  ;;  %6587 = vst [vmem:[#allocation32_spill] sm:$0xff] %v4043_v17  ;;  %v1374_v45 = vmul.f32 %v4002_v33, %v3205_v28 }
  0x99   :  { %v1889_v63 = vadd.f32 %v1888_v51, %v1887_v58  ;;  %v1903_v16 = vadd.f32 %v1902_v35, %v1901_v20  ;;  %v1376_v61 = vmul.f32 %v4023_v30, %v3217_v34  ;;  %v1908_v51 = vmul.f32 %v6589_v60, %v3713_v43  ;;  %v4076_v20 = vld [vmem:[%s6411_s3 + $0x39] sm:$0x7f] }
  0x9a   :  { %v1362_v15 = vadd.f32 %v1361_v11, %v1360_v31  ;;  %v1365_v25 = vmul.f32 %v4043_v17, %v3243_v47  ;;  %v1367_v38 = vmul.f32 %v4048_v37, %v3260_v52  ;;  %v1375_v40 = vadd.f32 %v1374_v45, %v1373_v8  ;;  %6590 = vst [vmem:[#allocation26_spill] sm:$0xff] %v4076_v20 }
  0x9b   :  { %v1891_v29 = vadd.f32 %v1890_v62, %v1889_v63  ;;  %v1905_v55 = vadd.f32 %v1904_v13, %v1903_v16  ;;  %v1378_v35 = vmul.f32 %v4034_v14, %v3224_v39  ;;  %v1369_v42 = vmul.f32 %v4063_v32, %v3272_v57  ;;  %v4081_v13 = vld [vmem:[%s6410_s2 + $0x41] sm:$0x7f] }
  0x9c   :  { %v2411_v2 = vld [vmem:[#allocation2 + $0xc8] sm:$0xff]  ;;  %v1364_v27 = vadd.f32 %v1363_v50, %v1362_v15  ;;  %v1380_v56 = vmul.f32 %v4043_v17, %v3229_v41  ;;  %v1391_v62 = vmul.f32 %v4014_v59, %v3193_v21  ;;  %v1377_v31 = vadd.f32 %v1376_v61, %v1375_v40 }
  0x9d   :  { %2486 = vmatpush.msra.mxu1 %v2411_v2  ;;  %v1892_v11 = vmax.f32 %v1874_v26, %v1891_v29  ;;  %v1907_v58 = vadd.f32 %v1906_v24, %v1905_v55  ;;  %v1392_v50 = vmul.f32 %v4034_v14, %v3205_v28  ;;  %v1371_v63 = vmul.f32 %v4081_v13, %v3297_v6 }
  0x9e   :  { %v1366_v8 = vadd.f32 %v1365_v25, %v1364_v27  ;;  %v1382_v24 = vmul.f32 %v4076_v20, %v3243_v47  ;;  %v1394_v26 = vmul.f32 %v4043_v17, %v3217_v34  ;;  %2777 = vmatpush.msra.mxu2 %v2411_v2  ;;  %v1379_v45 = vadd.f32 %v1378_v35, %v1377_v31  ;;  %v4107_v35 = vld [vmem:[%s6410_s2 + $0x48] sm:$0x7f] }
  0x9f   :  { %v1909_v16 = vadd.f32 %v1908_v51, %v1907_v58  ;;  %v1393_v60 = vadd.f32 %v1392_v50, %v1391_v62  ;;  %v1396_v61 = vmul.f32 %v4048_v37, %v3224_v39  ;;  %v1384_v25 = vmul.f32 %v4063_v32, %v3260_v52  ;;  %v4102_v51 = vld [vmem:[%s6411_s3 + $0x41] sm:$0x7f] }
  0xa0   :  { %v1368_v15 = vadd.f32 %v1367_v38, %v1366_v8  ;;  %v1386_v29 = vmul.f32 %v4081_v13, %v3272_v57  ;;  %v1398_v55 = vmul.f32 %v4063_v32, %v3229_v41  ;;  %v4112_v38 = vld [vmem:[%s6411_s3 + $0x48] sm:$0x7f]  ;;  %v1381_v2 = vadd.f32 %v1380_v56, %v1379_v45 }
  0xa1   :  { %v1910_v40 = vmax.f32 %v1892_v11, %v1909_v16  ;;  %v1395_v27 = vadd.f32 %v1394_v26, %v1393_v60  ;;  %v1409_v62 = vmul.f32 %v4034_v14, %v3193_v21  ;;  %v4119_v11 = vld [vmem:[%s6410_s2 + $0x49] sm:$0x7f]  ;;  %v1388_v58 = vmul.f32 %v4102_v51, %v3297_v6 }
  0xa2   :  { %v1400_v31 = vmul.f32 %v4081_v13, %v3243_v47  ;;  %v1410_v50 = vmul.f32 %v4043_v17, %v3205_v28  ;;  %v1412_v56 = vmul.f32 %v4076_v20, %v3217_v34  ;;  %v1370_v26 = vadd.f32 %v1369_v42, %v1368_v15 }
  0xa3   :  { %v1911_v8 = vadd.f32 %v1910_v40, %v3716_v1  ;;  %v1383_v16 = vadd.f32 %v1382_v24, %v1381_v2  ;;  %v1397_v45 = vadd.f32 %v1396_v61, %v1395_v27  ;;  %v1402_v60 = vmul.f32 %v4107_v35, %v3260_v52 }
  0xa4   :  { %v1404_v37 = vmul.f32 %v4112_v38, %v3272_v57  ;;  %v1411_v30 = vadd.f32 %v1410_v50, %v1409_v62  ;;  %v1414_v14 = vmul.f32 %v4063_v32, %v3224_v39  ;;  %v1406_v20 = vmul.f32 %v4119_v11, %v3297_v6 }
  0xa5   :  { %v1912_v59 = vmax.f32 %v1911_v8, 0.0  ;;  %v1385_v17 = vadd.f32 %v1384_v25, %v1383_v16  ;;  %v1399_v33 = vadd.f32 %v1398_v55, %v1397_v45  ;;  %v1416_v42 = vmul.f32 %v4081_v13, %v3229_v41  ;;  %v6591_v25 = vld [vmem:[#allocation19_spill] sm:$0xff] }
  0xa6   :  { %v1413_v40 = vadd.f32 %v1412_v56, %v1411_v30  ;;  %v1524_v24 = vmul.f32 %v3756_v53, %v3464_v3  ;;  %v1525_v61 = vmul.f32 %v3761_v48, %v3654_v7  ;;  %v1372_v15 = vadd.f32 %v1371_v63, %v1370_v26  ;;  %v6592_v56 = vld [vmem:[#allocation20_spill] sm:$0xff]  ;;  %v4154_v53 = vld [vmem:[%s6411_s3 + $0x49] sm:$0x7f] }
  0xa7   :  { %1913 = vst.msk [vmem:[#allocation2 + $0x60] sm:$0x7f] %vm228_vm1, %v1912_v59  ;;  %v1387_v2 = vadd.f32 %v1386_v29, %v1385_v17  ;;  %v1401_v27 = vadd.f32 %v1400_v31, %v1399_v33  ;;  %v1527_v55 = vmul.f32 %v6591_v25, %v3669_v46  ;;  %v1418_v30 = vmul.f32 %v4102_v51, %v3243_v47 }
  0xa8   :  { %v1415_v62 = vadd.f32 %v1414_v14, %v1413_v40  ;;  %v1526_v50 = vadd.f32 %v1525_v61, %v1524_v24  ;;  %v1529_v8 = vmul.f32 %v6592_v56, %v3676_v23  ;;  %v1420_v33 = vmul.f32 %v4112_v38, %v3260_v52 }
  0xa9   :  { %v1389_v59 = vadd.f32 %v1388_v58, %v1387_v2  ;;  %v1403_v63 = vadd.f32 %v1402_v60, %v1401_v27  ;;  %v1422_v14 = vmul.f32 %v4119_v11, %v3272_v57  ;;  %v1531_v31 = vmul.f32 %v3800_v54, %v3679_v19  ;;  %v6593_v60 = vld [vmem:[#allocation21_spill] sm:$0xff]  ;;  %v6594_v2 = vld [vmem:[#allocation27_spill] sm:$0xff] }
  0xaa   :  { %v1417_v17 = vadd.f32 %v1416_v42, %v1415_v62  ;;  %v1528_v29 = vadd.f32 %v1527_v55, %v1526_v50  ;;  %v1541_v26 = vmul.f32 %v3761_v48, %v3464_v3  ;;  %v1542_v58 = vmul.f32 %v6591_v25, %v3654_v7  ;;  %v6595_v62 = vld [vmem:[#allocation22_spill] sm:$0xff] }
  0xab   :  { %v1390_v16 = vmax.f32 %v1372_v15, %v1389_v59  ;;  %v1405_v45 = vadd.f32 %v1404_v37, %v1403_v63  ;;  %v1544_v40 = vmul.f32 %v6593_v60, %v3669_v46  ;;  %v1424_v61 = vmul.f32 %v4154_v53, %v3297_v6 }
  0xac   :  { %v1419_v24 = vadd.f32 %v1418_v30, %v1417_v17  ;;  %v1530_v42 = vadd.f32 %v1529_v8, %v1528_v29  ;;  %v1533_v27 = vmul.f32 %v6594_v2, %v3690_v18  ;;  %v1535_v48 = vmul.f32 %v6595_v62, %v3695_v22  ;;  %v6596_v30 = vld [vmem:[#allocation28_spill] sm:$0xff] }
  0xad   :  { %v1407_v55 = vadd.f32 %v1406_v20, %v1405_v45  ;;  %v1543_v15 = vadd.f32 %v1542_v58, %v1541_v26  ;;  %v1546_v37 = vmul.f32 %v3800_v54, %v3676_v23  ;;  %v1537_v63 = vmul.f32 %v6596_v30, %v3698_v4 }
  0xae   :  { %v2398_v25 = vld [vmem:[#allocation2 + $0x60] sm:$0xff]  ;;  %v1421_v50 = vadd.f32 %v1420_v33, %v1419_v24  ;;  %v1532_v59 = vadd.f32 %v1531_v31, %v1530_v42  ;;  %v1548_v8 = vmul.f32 %v6594_v2, %v3679_v19  ;;  %v1559_v29 = vmul.f32 %v6592_v56, %v3464_v3 }
  0xaf   :  { %2454 = vmatpush.msra.mxu0 %v2398_v25  ;;  %2762 = vmatpush.msra.mxu3 %v2398_v25  ;;  %v1408_v17 = vmax.f32 %v1390_v16, %v1407_v55  ;;  %v1545_v20 = vadd.f32 %v1544_v40, %v1543_v15  ;;  %v1560_v58 = vmul.f32 %v3800_v54, %v3654_v7  ;;  %v6597_v24 = vld [vmem:[#allocation29_spill] sm:$0xff] }
  0xb0   :  { %v1423_v26 = vadd.f32 %v1422_v14, %v1421_v50  ;;  %v1534_v45 = vadd.f32 %v1533_v27, %v1532_v59  ;;  %v1562_v33 = vmul.f32 %v6594_v2, %v3669_v46  ;;  %v1539_v31 = vmul.f32 %v3846_v49, %v3713_v43 }
  0xb1   :  { %v1547_v60 = vadd.f32 %v1546_v37, %v1545_v20  ;;  %v1550_v42 = vmul.f32 %v6597_v24, %v3690_v18  ;;  %v1552_v16 = vmul.f32 %v6596_v30, %v3695_v22  ;;  %v1561_v14 = vadd.f32 %v1560_v58, %v1559_v29  ;;  %v4214_v58 = vld [vmem:[%s6410_s2 + $0x20] sm:$0x7f] }
  0xb2   :  { %v1425_v40 = vadd.f32 %v1424_v61, %v1423_v26  ;;  %v1536_v56 = vadd.f32 %v1535_v48, %v1534_v45  ;;  %v1564_v27 = vmul.f32 %v6595_v62, %v3676_v23  ;;  %v1554_v15 = vmul.f32 %v3846_v49, %v3698_v4 }
  0xb3   :  { %v1549_v55 = vadd.f32 %v1548_v8, %v1547_v60  ;;  %v1556_v25 = vmul.f32 %v3881_v0, %v3713_v43  ;;  %v1577_v37 = vmul.f32 %v3800_v54, %v3464_v3  ;;  %v1563_v59 = vadd.f32 %v1562_v33, %v1561_v14  ;;  %v6598_v33 = vld [vmem:[#allocation30_spill] sm:$0xff] }
  0xb4   :  { %v1426_v50 = vmax.f32 %v1408_v17, %v1425_v40  ;;  %v1566_v61 = vmul.f32 %v6596_v30, %v3679_v19  ;;  %v1578_v48 = vmul.f32 %v6594_v2, %v3654_v7  ;;  %v1538_v20 = vadd.f32 %v1537_v63, %v1536_v56  ;;  %v4219_v2 = vld [vmem:[%s6411_s3 + $0x20] sm:$0x7f] }
  0xb5   :  { %v1551_v62 = vadd.f32 %v1550_v42, %v1549_v55  ;;  %v1568_v8 = vmul.f32 %v3846_v49, %v3690_v18  ;;  %v1580_v29 = vmul.f32 %v6597_v24, %v3669_v46  ;;  %v1565_v45 = vadd.f32 %v1564_v27, %v1563_v59  ;;  %v4232_v27 = vld [vmem:[%s6410_s2 + $0x21] sm:$0x7f] }
  0xb6   :  { %v1427_v26 = vadd.f32 %v1426_v50, %v3440_v44  ;;  %v1579_v54 = vadd.f32 %v1578_v48, %v1577_v37  ;;  %v1582_v17 = vmul.f32 %v6596_v30, %v3676_v23  ;;  %v1570_v60 = vmul.f32 %v6598_v33, %v3695_v22 }
  0xb7   :  { %v1553_v63 = vadd.f32 %v1552_v16, %v1551_v62  ;;  %v1572_v24 = vmul.f32 %v3886_v5, %v3698_v4  ;;  %v1574_v30 = vmul.f32 %v3904_v36, %v3713_v43  ;;  %v1567_v40 = vadd.f32 %v1566_v61, %v1565_v45 }
  0xb8   :  { %v1428_v42 = vmax.f32 %v1427_v26, 0.0  ;;  %v1581_v56 = vadd.f32 %v1580_v29, %v1579_v54  ;;  %v1584_v14 = vmul.f32 %v3846_v49, %v3679_v19  ;;  %v1040_v55 = vmul.f32 %v4214_v58, %v3193_v21  ;;  %v4253_v26 = vld [vmem:[%s6411_s3 + $0x21] sm:$0x7f] }
  0xb9   :  { %v1555_v16 = vadd.f32 %v1554_v15, %v1553_v63  ;;  %v1041_v37 = vmul.f32 %v4219_v2, %v3205_v28  ;;  %v1043_v50 = vmul.f32 %v4232_v27, %v3217_v34  ;;  %v1540_v59 = vadd.f32 %v1539_v31, %v1538_v20  ;;  %v4246_v15 = vld [vmem:[%s6410_s2 + $0x28] sm:$0x7f] }
  0xba   :  { %1429 = vst.msk [vmem:[#allocation2 + $0xc0] sm:$0x7f] %vm228_vm1, %v1428_v42  ;;  %v1569_v61 = vadd.f32 %v1568_v8, %v1567_v40  ;;  %v1583_v49 = vadd.f32 %v1582_v17, %v1581_v56  ;;  %v1586_v48 = vmul.f32 %v3881_v0, %v3690_v18  ;;  %v1588_v29 = vmul.f32 %v3886_v5, %v3695_v22  ;;  %v4264_v5 = vld [vmem:[%s6411_s3 + $0x28] sm:$0x7f]  ;;  %v4282_v56 = vld [vmem:[%s6410_s2 + $0x30] sm:$0x7f] }
  0xbb   :  { %v1557_v62 = vadd.f32 %v1556_v25, %v1555_v16  ;;  %v1042_v31 = vadd.f32 %v1041_v37, %v1040_v55  ;;  %v1045_v20 = vmul.f32 %v4246_v15, %v3224_v39  ;;  %v1590_v45 = vmul.f32 %v3904_v36, %v3698_v4  ;;  %6599 = vst [vmem:[#allocation19_spill] sm:$0xff] %v4282_v56 }
  0xbc   :  { %v1571_v8 = vadd.f32 %v1570_v60, %v1569_v61  ;;  %v1585_v0 = vadd.f32 %v1584_v14, %v1583_v49  ;;  %v1592_v25 = vmul.f32 %v3926_v12, %v3713_v43  ;;  %v1047_v17 = vmul.f32 %v4264_v5, %v3229_v41  ;;  %v4275_v12 = vld [vmem:[%s6410_s2 + $0x29] sm:$0x7f]  ;;  %v4287_v14 = vld [vmem:[%s6411_s3 + $0x30] sm:$0x7f] }
  0xbd   :  { %v1044_v54 = vadd.f32 %v1043_v50, %v1042_v31  ;;  %v1057_v63 = vmul.f32 %v4219_v2, %v3193_v21  ;;  %v1058_v33 = vmul.f32 %v4232_v27, %v3205_v28  ;;  %v1558_v60 = vmax.f32 %v1540_v59, %v1557_v62  ;;  %6600 = vst [vmem:[#allocation20_spill] sm:$0xff] %v4287_v14 }
  0xbe   :  { %v1573_v36 = vadd.f32 %v1572_v24, %v1571_v8  ;;  %v1587_v42 = vadd.f32 %v1586_v48, %v1585_v0  ;;  %v1060_v40 = vmul.f32 %v4253_v26, %v3217_v34  ;;  %v1049_v16 = vmul.f32 %v4275_v12, %v3243_v47 }
  0xbf   :  { %v1046_v24 = vadd.f32 %v1045_v20, %v1044_v54  ;;  %v1059_v55 = vadd.f32 %v1058_v33, %v1057_v63  ;;  %v1062_v37 = vmul.f32 %v4264_v5, %v3224_v39  ;;  %v1051_v61 = vmul.f32 %v4282_v56, %v3260_v52 }
  0xc0   :  { %v1575_v50 = vadd.f32 %v1574_v30, %v1573_v36  ;;  %v1589_v59 = vadd.f32 %v1588_v29, %v1587_v42  ;;  %v1053_v49 = vmul.f32 %v4287_v14, %v3272_v57  ;;  %v1064_v20 = vmul.f32 %v4275_v12, %v3229_v41  ;;  %v4304_v30 = vld [vmem:[%s6411_s3 + $0x29] sm:$0x7f]  ;;  %v4309_v29 = vld [vmem:[%s6410_s2 + $0x31] sm:$0x7f] }
  0xc1   :  { %v2410_v48 = vld [vmem:[#allocation2 + $0xc0] sm:$0xff]  ;;  %v1048_v62 = vadd.f32 %v1047_v17, %v1046_v24  ;;  %v1061_v31 = vadd.f32 %v1060_v40, %v1059_v55  ;;  %v1075_v8 = vmul.f32 %v4246_v15, %v3193_v21  ;;  %6601 = vst [vmem:[#allocation21_spill] sm:$0xff] %v4304_v30  ;;  %v1076_v17 = vmul.f32 %v4264_v5, %v3205_v28 }
  0xc2   :  { %2487 = vmatpush.msra.mxu1 %v2410_v48  ;;  %v1576_v0 = vmax.f32 %v1558_v60, %v1575_v50  ;;  %v1591_v54 = vadd.f32 %v1590_v45, %v1589_v59  ;;  %v1078_v63 = vmul.f32 %v4275_v12, %v3217_v34  ;;  %v1055_v45 = vmul.f32 %v4309_v29, %v3297_v6 }
  0xc3   :  { %v1050_v33 = vadd.f32 %v1049_v16, %v1048_v62  ;;  %v1063_v60 = vadd.f32 %v1062_v37, %v1061_v31  ;;  %v1066_v36 = vmul.f32 %v4304_v30, %v3243_v47  ;;  %2778 = vmatpush.msra.mxu2 %v2410_v48  ;;  %v1068_v40 = vmul.f32 %v4287_v14, %v3260_v52  ;;  %v4335_v48 = vld [vmem:[%s6411_s3 + $0x38] sm:$0x7f] }
  0xc4   :  { %v1593_v42 = vadd.f32 %v1592_v25, %v1591_v54  ;;  %v1077_v24 = vadd.f32 %v1076_v17, %v1075_v8  ;;  %v1080_v55 = vmul.f32 %v4282_v56, %v3224_v39  ;;  %v1070_v16 = vmul.f32 %v4309_v29, %v3272_v57  ;;  %v4330_v25 = vld [vmem:[%s6410_s2 + $0x38] sm:$0x7f]  ;;  %6603 = vst [vmem:[#allocation22_spill] sm:$0xff] %v4335_v48 }
  0xc5   :  { %v1052_v50 = vadd.f32 %v1051_v61, %v1050_v33  ;;  %v1065_v59 = vadd.f32 %v1064_v20, %v1063_v60  ;;  %v1082_v37 = vmul.f32 %v4287_v14, %v3229_v41  ;;  %6602 = vst [vmem:[#allocation27_spill] sm:$0xff] %v4330_v25  ;;  %v1093_v61 = vmul.f32 %v4264_v5, %v3193_v21 }
  0xc6   :  { %v1594_v62 = vmax.f32 %v1576_v0, %v1593_v42  ;;  %v1079_v31 = vadd.f32 %v1078_v63, %v1077_v24  ;;  %v1094_v20 = vmul.f32 %v4275_v12, %v3205_v28  ;;  %v1084_v0 = vmul.f32 %v4309_v29, %v3243_v47  ;;  %v4349_v63 = vld [vmem:[%s6411_s3 + $0x31] sm:$0x7f] }
  0xc7   :  { %v1054_v8 = vadd.f32 %v1053_v49, %v1052_v50  ;;  %v1067_v54 = vadd.f32 %v1066_v36, %v1065_v59  ;;  %v1096_v17 = vmul.f32 %v4304_v30, %v3217_v34  ;;  %6604 = vst [vmem:[#allocation28_spill] sm:$0xff] %v4349_v63  ;;  %v1098_v24 = vmul.f32 %v4287_v14, %v3224_v39  ;;  %v4362_v30 = vld [vmem:[%s6410_s2 + $0x39] sm:$0x7f] }
  0xc8   :  { %v1595_v33 = vadd.f32 %v1594_v62, %v3716_v1  ;;  %v1081_v60 = vadd.f32 %v1080_v55, %v1079_v31  ;;  %v1095_v42 = vadd.f32 %v1094_v20, %v1093_v61  ;;  %v1072_v36 = vmul.f32 %v4349_v63, %v3297_v6  ;;  %6605 = vst [vmem:[#allocation29_spill] sm:$0xff] %v4362_v30 }
  0xc9   :  { %v1069_v49 = vadd.f32 %v1068_v40, %v1067_v54  ;;  %v1086_v50 = vmul.f32 %v4330_v25, %v3260_v52  ;;  %v1088_v59 = vmul.f32 %v4335_v48, %v3272_v57  ;;  %v1100_v40 = vmul.f32 %v4309_v29, %v3229_v41 }
  0xca   :  { %v1596_v62 = vmax.f32 %v1595_v33, 0.0  ;;  %v1083_v55 = vadd.f32 %v1082_v37, %v1081_v60  ;;  %v1097_v31 = vadd.f32 %v1096_v17, %v1095_v42  ;;  %v1056_v61 = vadd.f32 %v1055_v45, %v1054_v8  ;;  %v6606_v37 = vld [vmem:[#allocation23_spill] sm:$0xff]  ;;  %v4382_v42 = vld [vmem:[%s6411_s3 + $0x39] sm:$0x7f] }
  0xcb   :  { %v1071_v20 = vadd.f32 %v1070_v16, %v1069_v49  ;;  %v1208_v54 = vmul.f32 %v3984_v10, %v3464_v3  ;;  %v1209_v25 = vmul.f32 %v3989_v9, %v3654_v7  ;;  %v1102_v56 = vmul.f32 %v4349_v63, %v3243_v47  ;;  %v6607_v10 = vld [vmem:[#allocation24_spill] sm:$0xff]  ;;  %6608 = vst [vmem:[#allocation30_spill] sm:$0xff] %v4382_v42 }
  0xcc   :  { %1597 = vst.msk [vmem:[#allocation2 + $0x58] sm:$0x7f] %vm228_vm1, %v1596_v62  ;;  %v1085_v33 = vadd.f32 %v1084_v0, %v1083_v55  ;;  %v1099_v14 = vadd.f32 %v1098_v24, %v1097_v31  ;;  %v1211_v17 = vmul.f32 %v6606_v37, %v3669_v46  ;;  %v1090_v45 = vmul.f32 %v4362_v30, %v3297_v6 }
  0xcd   :  { %v1073_v60 = vadd.f32 %v1072_v36, %v1071_v20  ;;  %v1210_v16 = vadd.f32 %v1209_v25, %v1208_v54  ;;  %v1213_v8 = vmul.f32 %v6607_v10, %v3676_v23  ;;  %v1104_v49 = vmul.f32 %v4335_v48, %v3260_v52  ;;  %v6609_v25 = vld [vmem:[#allocation31_spill] sm:$0xff] }
  0xce   :  { %v1087_v0 = vadd.f32 %v1086_v50, %v1085_v33  ;;  %v1101_v24 = vadd.f32 %v1100_v40, %v1099_v14  ;;  %v1106_v36 = vmul.f32 %v4362_v30, %v3272_v57  ;;  %v1215_v31 = vmul.f32 %v6609_v25, %v3679_v19  ;;  %v6610_v14 = vld [vmem:[#allocation25_spill] sm:$0xff] }
  0xcf   :  { %v1074_v62 = vmax.f32 %v1056_v61, %v1073_v60  ;;  %v1212_v55 = vadd.f32 %v1211_v17, %v1210_v16  ;;  %v1225_v20 = vmul.f32 %v3989_v9, %v3464_v3  ;;  %v1226_v50 = vmul.f32 %v6606_v37, %v3654_v7  ;;  %v6611_v61 = vld [vmem:[#allocation32_spill] sm:$0xff]  ;;  %v6612_v60 = vld [vmem:[#allocation33_spill] sm:$0xff] }
  0xd0   :  { %v1089_v54 = vadd.f32 %v1088_v59, %v1087_v0  ;;  %v1103_v63 = vadd.f32 %v1102_v56, %v1101_v24  ;;  %v1228_v40 = vmul.f32 %v6610_v14, %v3669_v46  ;;  %v1108_v33 = vmul.f32 %v4382_v42, %v3297_v6  ;;  %v6613_v42 = vld [vmem:[#allocation26_spill] sm:$0xff] }
  0xd1   :  { %v1214_v30 = vadd.f32 %v1213_v8, %v1212_v55  ;;  %v1217_v17 = vmul.f32 %v6611_v61, %v3690_v18  ;;  %v1219_v16 = vmul.f32 %v6612_v60, %v3695_v22  ;;  %v1227_v59 = vadd.f32 %v1226_v50, %v1225_v20 }
  0xd2   :  { %v1091_v48 = vadd.f32 %v1090_v45, %v1089_v54  ;;  %v1105_v9 = vadd.f32 %v1104_v49, %v1103_v63  ;;  %v1230_v56 = vmul.f32 %v6609_v25, %v3676_v23  ;;  %v1221_v24 = vmul.f32 %v4063_v32, %v3698_v4 }
  0xd3   :  { %v2397_v37 = vld [vmem:[#allocation2 + $0x58] sm:$0xff]  ;;  %v1216_v0 = vadd.f32 %v1215_v31, %v1214_v30  ;;  %v1232_v8 = vmul.f32 %v6611_v61, %v3679_v19  ;;  %v1243_v55 = vmul.f32 %v6607_v10, %v3464_v3  ;;  %v1229_v63 = vadd.f32 %v1228_v40, %v1227_v59 }
  0xd4   :  { %2455 = vmatpush.msra.mxu0 %v2397_v37  ;;  %2763 = vmatpush.msra.mxu3 %v2397_v37  ;;  %v1092_v14 = vmax.f32 %v1074_v62, %v1091_v48  ;;  %v1107_v45 = vadd.f32 %v1106_v36, %v1105_v9  ;;  %v1223_v20 = vmul.f32 %v4081_v13, %v3713_v43 }
  0xd5   :  { %v1218_v49 = vadd.f32 %v1217_v17, %v1216_v0  ;;  %v1244_v30 = vmul.f32 %v6609_v25, %v3654_v7  ;;  %v1246_v31 = vmul.f32 %v6611_v61, %v3669_v46  ;;  %v1231_v50 = vadd.f32 %v1230_v56, %v1229_v63 }
  0xd6   :  { %v1109_v54 = vadd.f32 %v1108_v33, %v1107_v45  ;;  %v1234_v10 = vmul.f32 %v6613_v42, %v3690_v18  ;;  %v1236_v48 = vmul.f32 %v4063_v32, %v3695_v22  ;;  %v1238_v62 = vmul.f32 %v4081_v13, %v3698_v4 }
  0xd7   :  { %v1220_v36 = vadd.f32 %v1219_v16, %v1218_v49  ;;  %v1245_v40 = vadd.f32 %v1244_v30, %v1243_v55  ;;  %v1248_v17 = vmul.f32 %v6612_v60, %v3676_v23  ;;  %v1233_v59 = vadd.f32 %v1232_v8, %v1231_v50 }
  0xd8   :  { %v1110_v9 = vmax.f32 %v1092_v14, %v1109_v54  ;;  %v1240_v33 = vmul.f32 %v4102_v51, %v3713_v43  ;;  %v1261_v56 = vmul.f32 %v6609_v25, %v3464_v3  ;;  %v1250_v0 = vmul.f32 %v4063_v32, %v3679_v19 }
  0xd9   :  { %v1247_v37 = vadd.f32 %v1246_v31, %v1245_v40  ;;  %v1262_v16 = vmul.f32 %v6611_v61, %v3654_v7  ;;  %v1264_v55 = vmul.f32 %v6613_v42, %v3669_v46  ;;  %v1222_v14 = vadd.f32 %v1221_v24, %v1220_v36  ;;  %v4458_v40 = vld [vmem:[%s6411_s3 + $0x10] sm:$0x7f] }
  0xda   :  { %v1111_v60 = vadd.f32 %v1110_v9, %v3440_v44  ;;  %v1235_v8 = vadd.f32 %v1234_v10, %v1233_v59  ;;  %v1252_v45 = vmul.f32 %v4081_v13, %v3690_v18  ;;  %v1254_v25 = vmul.f32 %v4107_v35, %v3695_v22  ;;  %v4450_v35 = vld [vmem:[%s6410_s2 + $0x10] sm:$0x7f] }
  0xdb   :  { %v1249_v63 = vadd.f32 %v1248_v17, %v1247_v37  ;;  %v1263_v49 = vadd.f32 %v1262_v16, %v1261_v56  ;;  %v1266_v30 = vmul.f32 %v4063_v32, %v3676_v23  ;;  %v1256_v42 = vmul.f32 %v4112_v38, %v3698_v4  ;;  %v4465_v17 = vld [vmem:[%s6410_s2 + $0x11] sm:$0x7f] }
  0xdc   :  { %v1112_v31 = vmax.f32 %v1111_v60, 0.0  ;;  %v1237_v61 = vadd.f32 %v1236_v48, %v1235_v8  ;;  %v1258_v24 = vmul.f32 %v4119_v11, %v3713_v43  ;;  %v1268_v10 = vmul.f32 %v4081_v13, %v3679_v19 }
  0xdd   :  { %v1251_v54 = vadd.f32 %v1250_v0, %v1249_v63  ;;  %v1265_v50 = vadd.f32 %v1264_v55, %v1263_v49  ;;  %v724_v32 = vmul.f32 %v4450_v35, %v3193_v21  ;;  %v1224_v48 = vadd.f32 %v1223_v20, %v1222_v14  ;;  %v4478_v55 = vld [vmem:[%s6410_s2 + $0x18] sm:$0x7f] }
  0xde   :  { %1113 = vst.msk [vmem:[#allocation2 + $0xb8] sm:$0x7f] %vm228_vm1, %v1112_v31  ;;  %v1239_v36 = vadd.f32 %v1238_v62, %v1237_v61  ;;  %v725_v13 = vmul.f32 %v4458_v40, %v3205_v28  ;;  %v727_v9 = vmul.f32 %v4465_v17, %v3217_v34  ;;  %v1270_v20 = vmul.f32 %v4102_v51, %v3690_v18  ;;  %v4505_v61 = vld [vmem:[%s6410_s2 + $0x19] sm:$0x7f] }
  0xdf   :  { %v1253_v59 = vadd.f32 %v1252_v45, %v1251_v54  ;;  %v1267_v56 = vadd.f32 %v1266_v30, %v1265_v50  ;;  %v1272_v62 = vmul.f32 %v4112_v38, %v3695_v22  ;;  %v1274_v0 = vmul.f32 %v4119_v11, %v3698_v4  ;;  %v4489_v11 = vld [vmem:[%s6411_s3 + $0x18] sm:$0x7f] }
  0xe0   :  { %v1241_v37 = vadd.f32 %v1240_v33, %v1239_v36  ;;  %v726_v16 = vadd.f32 %v725_v13, %v724_v32  ;;  %v729_v60 = vmul.f32 %v4478_v55, %v3224_v39  ;;  %v1276_v51 = vmul.f32 %v4154_v53, %v3713_v43 }
  0xe1   :  { %v1255_v14 = vadd.f32 %v1254_v25, %v1253_v59  ;;  %v1269_v8 = vadd.f32 %v1268_v10, %v1267_v56  ;;  %v741_v38 = vmul.f32 %v4458_v40, %v3193_v21  ;;  %v731_v45 = vmul.f32 %v4489_v11, %v3229_v41  ;;  %v4498_v25 = vld [vmem:[%s6411_s3 + $0x11] sm:$0x7f]  ;;  %v4512_v10 = vld [vmem:[%s6410_s2 + $0x20] sm:$0x7f] }
  0xe2   :  { %v728_v33 = vadd.f32 %v727_v9, %v726_v16  ;;  %v742_v63 = vmul.f32 %v4465_v17, %v3205_v28  ;;  %v744_v53 = vmul.f32 %v4498_v25, %v3217_v34  ;;  %v1242_v49 = vmax.f32 %v1224_v48, %v1241_v37  ;;  %v4521_v59 = vld [vmem:[%s6411_s3 + $0x20] sm:$0x7f] }
  0xe3   :  { %v1257_v30 = vadd.f32 %v1256_v42, %v1255_v14  ;;  %v1271_v31 = vadd.f32 %v1270_v20, %v1269_v8  ;;  %v733_v54 = vmul.f32 %v4505_v61, %v3243_v47  ;;  %v735_v32 = vmul.f32 %v4512_v10, %v3260_v52  ;;  %v4534_v8 = vld [vmem:[%s6411_s3 + $0x19] sm:$0x7f] }
  0xe4   :  { %v730_v50 = vadd.f32 %v729_v60, %v728_v33  ;;  %v743_v48 = vadd.f32 %v742_v63, %v741_v38  ;;  %v746_v42 = vmul.f32 %v4489_v11, %v3224_v39  ;;  %v737_v56 = vmul.f32 %v4521_v59, %v3272_v57  ;;  %6614 = vst [vmem:[#allocation23_spill] sm:$0xff] %v4534_v8 }
  0xe5   :  { %v2409_v36 = vld [vmem:[#allocation2 + $0xb8] sm:$0xff]  ;;  %v1259_v13 = vadd.f32 %v1258_v24, %v1257_v30  ;;  %v1273_v9 = vadd.f32 %v1272_v62, %v1271_v31  ;;  %v748_v20 = vmul.f32 %v4505_v61, %v3229_v41  ;;  %v759_v60 = vmul.f32 %v4478_v55, %v3193_v21 }
  0xe6   :  { %2488 = vmatpush.msra.mxu1 %v2409_v36  ;;  %v732_v37 = vadd.f32 %v731_v45, %v730_v50  ;;  %v745_v16 = vadd.f32 %v744_v53, %v743_v48  ;;  %v760_v24 = vmul.f32 %v4489_v11, %v3205_v28  ;;  %v750_v38 = vmul.f32 %v4534_v8, %v3243_v47 }
  0xe7   :  { %v1260_v62 = vmax.f32 %v1242_v49, %v1259_v13  ;;  %v1275_v14 = vadd.f32 %v1274_v0, %v1273_v9  ;;  %v762_v33 = vmul.f32 %v4505_v61, %v3217_v34  ;;  %2779 = vmatpush.msra.mxu2 %v2409_v36  ;;  %v764_v30 = vmul.f32 %v4512_v10, %v3224_v39  ;;  %v4545_v0 = vld [vmem:[%s6410_s2 + $0x21] sm:$0x7f] }
  0xe8   :  { %v734_v45 = vadd.f32 %v733_v54, %v732_v37  ;;  %v747_v63 = vadd.f32 %v746_v42, %v745_v16  ;;  %v761_v53 = vadd.f32 %v760_v24, %v759_v60  ;;  %v739_v31 = vmul.f32 %v4545_v0, %v3297_v6 }
  0xe9   :  { %v1277_v49 = vadd.f32 %v1276_v51, %v1275_v14  ;;  %v752_v50 = vmul.f32 %v4521_v59, %v3260_v52  ;;  %v754_v54 = vmul.f32 %v4545_v0, %v3272_v57  ;;  %v766_v51 = vmul.f32 %v4521_v59, %v3229_v41 }
  0xea   :  { %v736_v48 = vadd.f32 %v735_v32, %v734_v45  ;;  %v749_v42 = vadd.f32 %v748_v20, %v747_v63  ;;  %v763_v36 = vadd.f32 %v762_v33, %v761_v53  ;;  %v777_v9 = vmul.f32 %v4489_v11, %v3193_v21  ;;  %v4576_v53 = vld [vmem:[%s6410_s2 + $0x28] sm:$0x7f] }
  0xeb   :  { %v1278_v13 = vmax.f32 %v1260_v62, %v1277_v49  ;;  %v778_v37 = vmul.f32 %v4505_v61, %v3205_v28  ;;  %v780_v16 = vmul.f32 %v4534_v8, %v3217_v34  ;;  %v768_v32 = vmul.f32 %v4545_v0, %v3243_v47  ;;  %v4567_v62 = vld [vmem:[%s6411_s3 + $0x21] sm:$0x7f]  ;;  %6616 = vst [vmem:[#allocation31_spill] sm:$0xff] %v4576_v53  ;;  %v4583_v49 = vld [vmem:[%s6411_s3 + $0x28] sm:$0x7f] }
  0xec   :  { %v738_v60 = vadd.f32 %v737_v56, %v736_v48  ;;  %v751_v24 = vadd.f32 %v750_v38, %v749_v42  ;;  %v765_v14 = vadd.f32 %v764_v30, %v763_v36  ;;  %6615 = vst [vmem:[#allocation24_spill] sm:$0xff] %v4567_v62  ;;  %v756_v33 = vmul.f32 %v4567_v62, %v3297_v6 }
  0xed   :  { %v1279_v20 = vadd.f32 %v1278_v13, %v3716_v1  ;;  %v779_v45 = vadd.f32 %v778_v37, %v777_v9  ;;  %v782_v63 = vmul.f32 %v4521_v59, %v3224_v39  ;;  %v770_v30 = vmul.f32 %v4576_v53, %v3260_v52  ;;  %6617 = vst [vmem:[#allocation25_spill] sm:$0xff] %v4583_v49 }
  0xee   :  { %v753_v56 = vadd.f32 %v752_v50, %v751_v24  ;;  %v767_v38 = vadd.f32 %v766_v51, %v765_v14  ;;  %v772_v48 = vmul.f32 %v4583_v49, %v3272_v57  ;;  %v740_v36 = vadd.f32 %v739_v31, %v738_v60  ;;  %v4597_v14 = vld [vmem:[%s6410_s2 + $0x29] sm:$0x7f] }
  0xef   :  { %v1280_v42 = vmax.f32 %v1279_v20, 0.0  ;;  %v781_v50 = vadd.f32 %v780_v16, %v779_v45  ;;  %v784_v51 = vmul.f32 %v4545_v0, %v3229_v41  ;;  %v892_v37 = vmul.f32 %v4214_v58, %v3464_v3  ;;  %6618 = vst [vmem:[#allocation32_spill] sm:$0xff] %v4597_v14 }
  0xf0   :  { %v755_v13 = vadd.f32 %v754_v54, %v753_v56  ;;  %v769_v9 = vadd.f32 %v768_v32, %v767_v38  ;;  %v893_v24 = vmul.f32 %v4219_v2, %v3654_v7  ;;  %v774_v31 = vmul.f32 %v4597_v14, %v3297_v6 }
  0xf1   :  { %1281 = vst.msk [vmem:[#allocation2 + $0x50] sm:$0x7f] %vm228_vm1, %v1280_v42  ;;  %v783_v16 = vadd.f32 %v782_v63, %v781_v50  ;;  %v786_v54 = vmul.f32 %v4567_v62, %v3243_v47  ;;  %v895_v58 = vmul.f32 %v4232_v27, %v3669_v46  ;;  %v897_v45 = vmul.f32 %v4246_v15, %v3676_v23 }
  0xf2   :  { %v757_v60 = vadd.f32 %v756_v33, %v755_v13  ;;  %v771_v32 = vadd.f32 %v770_v30, %v769_v9  ;;  %v894_v20 = vadd.f32 %v893_v24, %v892_v37  ;;  %v788_v38 = vmul.f32 %v4583_v49, %v3260_v52  ;;  %v6620_v24 = vld [vmem:[#allocation19_spill] sm:$0xff] }
  0xf3   :  { %v785_v56 = vadd.f32 %v784_v51, %v783_v16  ;;  %v790_v42 = vmul.f32 %v4597_v14, %v3272_v57  ;;  %v899_v63 = vmul.f32 %v4264_v5, %v3679_v19  ;;  %v909_v33 = vmul.f32 %v4219_v2, %v3464_v3  ;;  %v4618_v51 = vld [vmem:[%s6411_s3 + $0x29] sm:$0x7f] }
  0xf4   :  { %v758_v50 = vmax.f32 %v740_v36, %v757_v60  ;;  %v773_v53 = vadd.f32 %v772_v48, %v771_v32  ;;  %v896_v62 = vadd.f32 %v895_v58, %v894_v20  ;;  %6619 = vst [vmem:[#allocation33_spill] sm:$0xff] %v4618_v51  ;;  %v792_v13 = vmul.f32 %v4618_v51, %v3297_v6  ;;  %v6621_v58 = vld [vmem:[#allocation20_spill] sm:$0xff] }
  0xf5   :  { %v787_v30 = vadd.f32 %v786_v54, %v785_v56  ;;  %v910_v9 = vmul.f32 %v4232_v27, %v3654_v7  ;;  %v912_v36 = vmul.f32 %v4253_v26, %v3669_v46  ;;  %v901_v2 = vmul.f32 %v4275_v12, %v3690_v18 }
  0xf6   :  { %v775_v48 = vadd.f32 %v774_v31, %v773_v53  ;;  %v898_v37 = vadd.f32 %v897_v45, %v896_v62  ;;  %v903_v16 = vmul.f32 %v6620_v24, %v3695_v22  ;;  %v905_v60 = vmul.f32 %v6621_v58, %v3698_v4 }
  0xf7   :  { %v789_v54 = vadd.f32 %v788_v38, %v787_v30  ;;  %v911_v32 = vadd.f32 %v910_v9, %v909_v33  ;;  %v914_v20 = vmul.f32 %v4264_v5, %v3676_v23  ;;  %v916_v26 = vmul.f32 %v4275_v12, %v3679_v19 }
  0xf8   :  { %v2396_v27 = vld [vmem:[#allocation2 + $0x50] sm:$0xff]  ;;  %v776_v56 = vmax.f32 %v758_v50, %v775_v48  ;;  %v900_v51 = vadd.f32 %v899_v63, %v898_v37  ;;  %v927_v62 = vmul.f32 %v4246_v15, %v3464_v3  ;;  %v928_v45 = vmul.f32 %v4264_v5, %v3654_v7  ;;  %v6622_v50 = vld [vmem:[#allocation21_spill] sm:$0xff] }
  0xf9   :  { %2456 = vmatpush.msra.mxu0 %v2396_v27  ;;  %2764 = vmatpush.msra.mxu3 %v2396_v27  ;;  %v791_v53 = vadd.f32 %v790_v42, %v789_v54  ;;  %v913_v31 = vadd.f32 %v912_v36, %v911_v32  ;;  %v907_v33 = vmul.f32 %v4309_v29, %v3713_v43 }
  0xfa   :  { %v902_v38 = vadd.f32 %v901_v2, %v900_v51  ;;  %v918_v63 = vmul.f32 %v6622_v50, %v3690_v18  ;;  %v930_v30 = vmul.f32 %v4275_v12, %v3669_v46  ;;  %v929_v15 = vadd.f32 %v928_v45, %v927_v62 }
  0xfb   :  { %v793_v9 = vadd.f32 %v792_v13, %v791_v53  ;;  %v915_v48 = vadd.f32 %v914_v20, %v913_v31  ;;  %v932_v42 = vmul.f32 %v6620_v24, %v3676_v23  ;;  %v920_v37 = vmul.f32 %v6621_v58, %v3695_v22  ;;  %v6623_v20 = vld [vmem:[#allocation28_spill] sm:$0xff] }
  0xfc   :  { %v904_v36 = vadd.f32 %v903_v16, %v902_v38  ;;  %v922_v51 = vmul.f32 %v4309_v29, %v3698_v4  ;;  %v934_v2 = vmul.f32 %v6621_v58, %v3679_v19  ;;  %v931_v27 = vadd.f32 %v930_v30, %v929_v15  ;;  %v6624_v38 = vld [vmem:[#allocation27_spill] sm:$0xff]  ;;  %v6625_v30 = vld [vmem:[#allocation22_spill] sm:$0xff] }
  0xfd   :  { %v794_v54 = vmax.f32 %v776_v56, %v793_v9  ;;  %v917_v32 = vadd.f32 %v916_v26, %v915_v48  ;;  %v945_v13 = vmul.f32 %v4264_v5, %v3464_v3  ;;  %v924_v62 = vmul.f32 %v6623_v20, %v3713_v43 }
  0xfe   :  { %v936_v24 = vmul.f32 %v4309_v29, %v3690_v18  ;;  %v946_v16 = vmul.f32 %v4275_v12, %v3654_v7  ;;  %v948_v53 = vmul.f32 %v6622_v50, %v3669_v46  ;;  %v906_v56 = vadd.f32 %v905_v60, %v904_v36  ;;  %v6626_v50 = vld [vmem:[#allocation29_spill] sm:$0xff] }
  0xff   :  { %v795_v31 = vadd.f32 %v794_v54, %v3440_v44  ;;  %v919_v26 = vadd.f32 %v918_v63, %v917_v32  ;;  %v933_v45 = vadd.f32 %v932_v42, %v931_v27  ;;  %v938_v5 = vmul.f32 %v6624_v38, %v3695_v22  ;;  %v4678_v63 = vld [vmem:[%s6410_s2] sm:$0x7f] }
 0x100   :  { %v940_v9 = vmul.f32 %v6625_v30, %v3698_v4  ;;  %v947_v48 = vadd.f32 %v946_v16, %v945_v13  ;;  %v950_v15 = vmul.f32 %v6621_v58, %v3676_v23  ;;  %v942_v8 = vmul.f32 %v6626_v50, %v3713_v43  ;;  %v4685_v58 = vld [vmem:[%s6411_s3] sm:$0x7f] }
 0x101   :  { %v796_v14 = vmax.f32 %v795_v31, 0.0  ;;  %v921_v12 = vadd.f32 %v920_v37, %v919_v26  ;;  %v935_v49 = vadd.f32 %v934_v2, %v933_v45  ;;  %v952_v60 = vmul.f32 %v4309_v29, %v3679_v19  ;;  %v4693_v32 = vld [vmem:[%s6410_s2 + $0x1] sm:$0x7f] }
 0x102   :  { %v949_v54 = vadd.f32 %v948_v53, %v947_v48  ;;  %v399_v42 = vmul.f32 %v4678_v63, %v3193_v21  ;;  %v401_v36 = vmul.f32 %v4685_v58, %v3205_v28  ;;  %v908_v37 = vadd.f32 %v907_v33, %v906_v56 }
 0x103   :  { %797 = vst.msk [vmem:[#allocation2 + $0xb0] sm:$0x7f] %vm228_vm1, %v796_v14  ;;  %v923_v29 = vadd.f32 %v922_v51, %v921_v12  ;;  %v937_v2 = vadd.f32 %v936_v24, %v935_v49  ;;  %v404_v27 = vmul.f32 %v4693_v32, %v3217_v34  ;;  %v954_v16 = vmul.f32 %v6623_v20, %v3690_v18  ;;  %v4702_v14 = vld [vmem:[%s6410_s2 + $0x8] sm:$0x7f] }
 0x104   :  { %v951_v13 = vadd.f32 %v950_v15, %v949_v54  ;;  %v402_v53 = vadd.f32 %v401_v36, %v399_v42  ;;  %v407_v49 = vmul.f32 %v4702_v14, %v3224_v39  ;;  %v956_v24 = vmul.f32 %v6625_v30, %v3695_v22  ;;  %v4713_v20 = vld [vmem:[%s6411_s3 + $0x8] sm:$0x7f]  ;;  %v4726_v15 = vld [vmem:[%s6411_s3 + $0x1] sm:$0x7f] }
 0x105   :  { %v925_v33 = vadd.f32 %v924_v62, %v923_v29  ;;  %v939_v51 = vadd.f32 %v938_v5, %v937_v2  ;;  %v958_v31 = vmul.f32 %v6626_v50, %v3698_v4  ;;  %v410_v45 = vmul.f32 %v4713_v20, %v3229_v41  ;;  %v6627_v5 = vld [vmem:[#allocation30_spill] sm:$0xff]  ;;  %6628 = vst [vmem:[#allocation26_spill] sm:$0xff] %v4726_v15  ;;  %v4740_v29 = vld [vmem:[%s6410_s2 + $0x10] sm:$0x7f] }
 0x106   :  { %v953_v56 = vadd.f32 %v952_v60, %v951_v13  ;;  %v405_v26 = vadd.f32 %v404_v27, %v402_v53  ;;  %v424_v62 = vmul.f32 %v4685_v58, %v3193_v21  ;;  %v960_v30 = vmul.f32 %v6627_v5, %v3713_v43 }
 0x107   :  { %v941_v38 = vadd.f32 %v940_v9, %v939_v51  ;;  %v425_v48 = vmul.f32 %v4693_v32, %v3205_v28  ;;  %v427_v12 = vmul.f32 %v4726_v15, %v3217_v34  ;;  %v926_v50 = vmax.f32 %v908_v37, %v925_v33  ;;  %v4733_v9 = vld [vmem:[%s6410_s2 + $0x9] sm:$0x7f]  ;;  %v4756_v33 = vld [vmem:[%s6410_s2 + $0x11] sm:$0x7f] }
 0x108   :  { %v955_v54 = vadd.f32 %v954_v16, %v953_v56  ;;  %v408_v60 = vadd.f32 %v407_v49, %v405_v26  ;;  %v413_v42 = vmul.f32 %v4733_v9, %v3243_v47  ;;  %v416_v2 = vmul.f32 %v4740_v29, %v3260_v52  ;;  %v4749_v49 = vld [vmem:[%s6411_s3 + $0x10] sm:$0x7f] }
 0x109   :  { %v943_v36 = vadd.f32 %v942_v8, %v941_v38  ;;  %v426_v37 = vadd.f32 %v425_v48, %v424_v62  ;;  %v429_v27 = vmul.f32 %v4713_v20, %v3224_v39  ;;  %v419_v8 = vmul.f32 %v4749_v49, %v3272_v57 }
 0x10a   :  { %v2408_v13 = vld [vmem:[#allocation2 + $0xb0] sm:$0xff]  ;;  %v957_v16 = vadd.f32 %v956_v24, %v955_v54  ;;  %v411_v53 = vadd.f32 %v410_v45, %v408_v60  ;;  %v422_v51 = vmul.f32 %v4756_v33, %v3297_v6  ;;  %v431_v24 = vmul.f32 %v4733_v9, %v3229_v41 }
 0x10b   :  { %2489 = vmatpush.msra.mxu1 %v2408_v13  ;;  %v428_v56 = vadd.f32 %v427_v12, %v426_v37  ;;  %v442_v26 = vmul.f32 %v4702_v14, %v3193_v21  ;;  %v443_v45 = vmul.f32 %v4713_v20, %v3205_v28  ;;  %v944_v62 = vmax.f32 %v926_v50, %v943_v36  ;;  %v4771_v12 = vld [vmem:[%s6411_s3 + $0x9] sm:$0x7f] }
 0x10c   :  { %v959_v38 = vadd.f32 %v958_v31, %v957_v16  ;;  %v414_v5 = vadd.f32 %v413_v42, %v411_v53  ;;  %v445_v48 = vmul.f32 %v4733_v9, %v3217_v34  ;;  %2780 = vmatpush.msra.mxu2 %v2408_v13  ;;  %v433_v60 = vmul.f32 %v4771_v12, %v3243_v47 }
 0x10d   :  { %v430_v54 = vadd.f32 %v429_v27, %v428_v56  ;;  %v444_v37 = vadd.f32 %v443_v45, %v442_v26  ;;  %v447_v15 = vmul.f32 %v4740_v29, %v3224_v39  ;;  %v435_v42 = vmul.f32 %v4749_v49, %v3260_v52 }
 0x10e   :  { %v961_v50 = vadd.f32 %v960_v30, %v959_v38  ;;  %v417_v31 = vadd.f32 %v416_v2, %v414_v5  ;;  %v437_v36 = vmul.f32 %v4756_v33, %v3272_v57  ;;  %v449_v16 = vmul.f32 %v4749_v49, %v3229_v41 }
 0x10f   :  { %v432_v27 = vadd.f32 %v431_v24, %v430_v54  ;;  %v446_v13 = vadd.f32 %v445_v48, %v444_v37  ;;  %v460_v53 = vmul.f32 %v4713_v20, %v3193_v21  ;;  %v461_v30 = vmul.f32 %v4733_v9, %v3205_v28  ;;  %v4792_v24 = vld [vmem:[%s6411_s3 + $0x11] sm:$0x7f]  ;;  %v4802_v28 = vld [vmem:[%s6410_s2 + $0x18] sm:$0x7f] }
 0x110   :  { %v962_v56 = vmax.f32 %v944_v62, %v961_v50  ;;  %v420_v26 = vadd.f32 %v419_v8, %v417_v31  ;;  %v463_v2 = vmul.f32 %v4771_v12, %v3217_v34  ;;  %v439_v38 = vmul.f32 %v4792_v24, %v3297_v6 }
 0x111   :  { %v434_v45 = vadd.f32 %v433_v60, %v432_v27  ;;  %v448_v5 = vadd.f32 %v447_v15, %v446_v13  ;;  %v451_v21 = vmul.f32 %v4756_v33, %v3243_v47  ;;  %v453_v34 = vmul.f32 %v4802_v28, %v3260_v52  ;;  %v4811_v15 = vld [vmem:[%s6411_s3 + $0x18] sm:$0x7f] }
 0x112   :  { %v963_v8 = vadd.f32 %v962_v56, %v3716_v1  ;;  %v462_v62 = vadd.f32 %v461_v30, %v460_v53  ;;  %v465_v48 = vmul.f32 %v4749_v49, %v3224_v39  ;;  %v455_v37 = vmul.f32 %v4811_v15, %v3272_v57 }
 0x113   :  { %v436_v54 = vadd.f32 %v435_v42, %v434_v45  ;;  %v450_v60 = vadd.f32 %v449_v16, %v448_v5  ;;  %v467_v50 = vmul.f32 %v4756_v33, %v3229_v41  ;;  %v423_v27 = vadd.f32 %v422_v51, %v420_v26  ;;  %v4827_v41 = vld [vmem:[%s6410_s2 + $0x19] sm:$0x7f] }
 0x114   :  { %v964_v31 = vmax.f32 %v963_v8, 0.0  ;;  %v464_v13 = vadd.f32 %v463_v2, %v462_v62  ;;  %v576_v53 = vmul.f32 %v4450_v35, %v3464_v3  ;;  %v577_v16 = vmul.f32 %v4458_v40, %v3654_v7  ;;  %6629 = vst [vmem:[#allocation19_spill] sm:$0xff] %v4827_v41 }
 0x115   :  { %v438_v39 = vadd.f32 %v437_v36, %v436_v54  ;;  %v452_v42 = vadd.f32 %v451_v21, %v450_v60  ;;  %v579_v56 = vmul.f32 %v4465_v17, %v3669_v46  ;;  %v457_v51 = vmul.f32 %v4827_v41, %v3297_v6 }
 0x116   :  { %965 = vst.msk [vmem:[#allocation2 + $0x48] sm:$0x7f] %vm228_vm1, %v964_v31  ;;  %v466_v26 = vadd.f32 %v465_v48, %v464_v13  ;;  %v469_v35 = vmul.f32 %v4792_v24, %v3243_v47  ;;  %v471_v36 = vmul.f32 %v4811_v15, %v3260_v52  ;;  %v578_v45 = vadd.f32 %v577_v16, %v576_v53 }
 0x117   :  { %v440_v30 = vadd.f32 %v439_v38, %v438_v39  ;;  %v454_v2 = vadd.f32 %v453_v34, %v452_v42  ;;  %v581_v5 = vmul.f32 %v4478_v55, %v3676_v23  ;;  %v473_v8 = vmul.f32 %v4827_v41, %v3272_v57  ;;  %v4848_v34 = vld [vmem:[%s6411_s3 + $0x19] sm:$0x7f] }
 0x118   :  { %v468_v21 = vadd.f32 %v467_v50, %v466_v26  ;;  %v583_v62 = vmul.f32 %v4489_v11, %v3679_v19  ;;  %v593_v48 = vmul.f32 %v4458_v40, %v3464_v3  ;;  %v580_v60 = vadd.f32 %v579_v56, %v578_v45  ;;  %6630 = vst [vmem:[#allocation20_spill] sm:$0xff] %v4848_v34 }
 0x119   :  { %v441_v47 = vmax.f32 %v423_v27, %v440_v30  ;;  %v456_v54 = vadd.f32 %v455_v37, %v454_v2  ;;  %v594_v52 = vmul.f32 %v4465_v17, %v3654_v7  ;;  %v475_v57 = vmul.f32 %v4848_v34, %v3297_v6 }
 0x11a   :  { %v470_v38 = vadd.f32 %v469_v35, %v468_v21  ;;  %v585_v50 = vmul.f32 %v4505_v61, %v3690_v18  ;;  %v596_v40 = vmul.f32 %v4498_v25, %v3669_v46  ;;  %v582_v31 = vadd.f32 %v581_v5, %v580_v60  ;;  %v6631_v5 = vld [vmem:[#allocation23_spill] sm:$0xff] }
 0x11b   :  { %v458_v37 = vadd.f32 %v457_v51, %v456_v54  ;;  %v595_v27 = vadd.f32 %v594_v52, %v593_v48  ;;  %v598_v17 = vmul.f32 %v4489_v11, %v3676_v23  ;;  %v587_v53 = vmul.f32 %v4512_v10, %v3695_v22 }
 0x11c   :  { %v472_v13 = vadd.f32 %v471_v36, %v470_v38  ;;  %v589_v39 = vmul.f32 %v4521_v59, %v3698_v4  ;;  %v600_v6 = vmul.f32 %v4505_v61, %v3679_v19  ;;  %v584_v56 = vadd.f32 %v583_v62, %v582_v31 }
 0x11d   :  { %v2395_v42 = vld [vmem:[#allocation2 + $0x48] sm:$0xff]  ;;  %v459_v16 = vmax.f32 %v441_v47, %v458_v37  ;;  %v597_v25 = vadd.f32 %v596_v40, %v595_v27  ;;  %v611_v51 = vmul.f32 %v4478_v55, %v3464_v3  ;;  %v612_v35 = vmul.f32 %v4489_v11, %v3654_v7 }
 0x11e   :  { %2457 = vmatpush.msra.mxu0 %v2395_v42  ;;  %2765 = vmatpush.msra.mxu3 %v2395_v42  ;;  %v474_v26 = vadd.f32 %v473_v8, %v472_v13  ;;  %v614_v36 = vmul.f32 %v4505_v61, %v3669_v46  ;;  %v586_v30 = vadd.f32 %v585_v50, %v584_v56  ;;  %v6634_v56 = vld [vmem:[#allocation25_spill] sm:$0xff] }
 0x11f   :  { %v591_v2 = vmul.f32 %v4545_v0, %v3713_v43  ;;  %v599_v45 = vadd.f32 %v598_v17, %v597_v25  ;;  %v602_v21 = vmul.f32 %v6631_v5, %v3690_v18  ;;  %v604_v55 = vmul.f32 %v4521_v59, %v3695_v22 }
 0x120   :  { %v476_v62 = vadd.f32 %v475_v57, %v474_v26  ;;  %v613_v48 = vadd.f32 %v612_v35, %v611_v51  ;;  %v616_v8 = vmul.f32 %v4512_v10, %v3676_v23  ;;  %v588_v47 = vadd.f32 %v587_v53, %v586_v30 }
 0x121   :  { %v601_v54 = vadd.f32 %v600_v6, %v599_v45  ;;  %v606_v60 = vmul.f32 %v4545_v0, %v3698_v4  ;;  %v618_v52 = vmul.f32 %v4521_v59, %v3679_v19  ;;  %v629_v57 = vmul.f32 %v4489_v11, %v3464_v3  ;;  %v6632_v11 = vld [vmem:[#allocation24_spill] sm:$0xff]  ;;  %v6636_v45 = vld [vmem:[#allocation9_spill] sm:$0xff] }
 0x122   :  { %v477_v38 = vmax.f32 %v459_v16, %v476_v62  ;;  %v615_v50 = vadd.f32 %v614_v36, %v613_v48  ;;  %v630_v40 = vmul.f32 %v4505_v61, %v3654_v7  ;;  %v590_v37 = vadd.f32 %v589_v39, %v588_v47  ;;  %v6633_v61 = vld [vmem:[#allocation31_spill] sm:$0xff]  ;;  %v6638_v62 = vld [vmem:[#allocation10_spill] sm:$0xff] }
 0x123   :  { %v603_v31 = vadd.f32 %v602_v21, %v601_v54  ;;  %v620_v10 = vmul.f32 %v4545_v0, %v3690_v18  ;;  %v632_v27 = vmul.f32 %v6631_v5, %v3669_v46  ;;  %v634_v6 = vmul.f32 %v4521_v59, %v3676_v23  ;;  %v4904_v59 = vld [vmem:[%s6410_s2 + $0x60] sm:$0x7f]  ;;  %v6640_v47 = vld [vmem:[#allocation11_spill] sm:$0xff] }
 0x124   :  { %v479_v17 = vadd.f32 %v3440_v44, %v477_v38  ;;  %v617_v13 = vadd.f32 %v616_v8, %v615_v50  ;;  %v631_v53 = vadd.f32 %v630_v40, %v629_v57  ;;  %v608_v16 = vmul.f32 %v6632_v11, %v3713_v43  ;;  %6635 = vst [vmem:[#allocation21_spill] sm:$0xff] %v4904_v59  ;;  %v4911_v21 = vld [vmem:[%s6411_s3 + $0x60] sm:$0x7f]  ;;  %v4930_v57 = vld [vmem:[%s6410_s2 + $0x68] sm:$0x7f]  ;;  %v6643_v40 = vld [vmem:[#allocation12_spill] sm:$0xff] }
 0x125   :  { %v605_v42 = vadd.f32 %v604_v55, %v603_v31  ;;  %v622_v39 = vmul.f32 %v6633_v61, %v3695_v22  ;;  %v624_v25 = vmul.f32 %v6634_v56, %v3698_v4  ;;  %v636_v44 = vmul.f32 %v4545_v0, %v3679_v19  ;;  %6637 = vst [vmem:[#allocation28_spill] sm:$0xff] %v4911_v21  ;;  %v4921_v8 = vld [vmem:[%s6410_s2 + $0x61] sm:$0x7f] }
 0x126   :  { %v480_v51 = vmax.f32 %v479_v17, 0.0  ;;  %v619_v26 = vadd.f32 %v618_v52, %v617_v13  ;;  %v633_v35 = vadd.f32 %v632_v27, %v631_v53  ;;  %v592_v36 = vadd.f32 %v591_v2, %v590_v37  ;;  %6639 = vst [vmem:[#allocation27_spill] sm:$0xff] %v4921_v8  ;;  %v6641_v52 = vld [vmem:[#allocation32_spill] sm:$0xff] }
 0x127   :  { %v607_v30 = vadd.f32 %v606_v60, %v605_v42  ;;  %v2230_v5 = vmul.f32 %v4904_v59, %v6636_v45  ;;  %v2231_v55 = vmul.f32 %v4911_v21, %v6638_v62  ;;  %v638_v48 = vmul.f32 %v6632_v11, %v3690_v18  ;;  %6642 = vst [vmem:[#allocation22_spill] sm:$0xff] %v4930_v57  ;;  %v6644_v42 = vld [vmem:[#allocation13_spill] sm:$0xff] }
 0x128   :  { %481 = vst.msk [vmem:[#allocation2 + $0xa8] sm:$0x7f] %vm228_vm1, %v480_v51  ;;  %v621_v0 = vadd.f32 %v620_v10, %v619_v26  ;;  %v635_v2 = vadd.f32 %v634_v6, %v633_v35  ;;  %v2233_v54 = vmul.f32 %v4921_v8, %v6640_v47  ;;  %v626_v38 = vmul.f32 %v6641_v52, %v3713_v43  ;;  %v4941_v6 = vld [vmem:[%s6411_s3 + $0x68] sm:$0x7f]  ;;  %v4952_v51 = vld [vmem:[%s6411_s3 + $0x61] sm:$0x7f] }
 0x129   :  { %v609_v60 = vadd.f32 %v608_v16, %v607_v30  ;;  %v2232_v50 = vadd.f32 %v2231_v55, %v2230_v5  ;;  %v2235_v37 = vmul.f32 %v4930_v57, %v6643_v40  ;;  %v640_v27 = vmul.f32 %v6634_v56, %v3695_v22  ;;  %6645 = vst [vmem:[#allocation29_spill] sm:$0xff] %v4952_v51  ;;  %v6646_v35 = vld [vmem:[#allocation33_spill] sm:$0xff]  ;;  %v6647_v30 = vld [vmem:[#allocation14_spill] sm:$0xff]  ;;  %v4968_v55 = vld [vmem:[%s6410_s2 + $0x70] sm:$0x7f] }
 0x12a   :  { %v623_v31 = vadd.f32 %v622_v39, %v621_v0  ;;  %v637_v10 = vadd.f32 %v636_v44, %v635_v2  ;;  %v642_v17 = vmul.f32 %v6641_v52, %v3698_v4  ;;  %v2237_v11 = vmul.f32 %v4941_v6, %v6644_v42  ;;  %v6648_v0 = vld [vmem:[#allocation15_spill] sm:$0xff] }
 0x12b   :  { %v610_v13 = vmax.f32 %v592_v36, %v609_v60  ;;  %v2234_v53 = vadd.f32 %v2233_v54, %v2232_v50  ;;  %v2247_v16 = vmul.f32 %v4911_v21, %v6636_v45  ;;  %v2248_v56 = vmul.f32 %v4921_v8, %v6638_v62 }
 0x12c   :  { %v625_v61 = vadd.f32 %v624_v25, %v623_v31  ;;  %v639_v39 = vadd.f32 %v638_v48, %v637_v10  ;;  %v2250_v26 = vmul.f32 %v4952_v51, %v6640_v47  ;;  %v644_v44 = vmul.f32 %v6646_v35, %v3713_v43  ;;  %v4961_v25 = vld [vmem:[%s6410_s2 + $0x69] sm:$0x7f]  ;;  %v4977_v31 = vld [vmem:[%s6411_s3 + $0x70] sm:$0x7f]  ;;  %v6650_v10 = vld [vmem:[#allocation16_spill] sm:$0xff] }
 0x12d   :  { %v2236_v36 = vadd.f32 %v2235_v37, %v2234_v53  ;;  %v2239_v5 = vmul.f32 %v4961_v25, %v6647_v30  ;;  %v2241_v2 = vmul.f32 %v4968_v55, %v6648_v0  ;;  %v2249_v60 = vadd.f32 %v2248_v56, %v2247_v16  ;;  %6649 = vst [vmem:[#allocation30_spill] sm:$0xff] %v4977_v31  ;;  %v4990_v56 = vld [vmem:[%s6410_s2 + $0x71] sm:$0x7f] }
 0x12e   :  { %v627_v48 = vadd.f32 %v626_v38, %v625_v61  ;;  %v641_v54 = vadd.f32 %v640_v27, %v639_v39  ;;  %v2252_v52 = vmul.f32 %v4941_v6, %v6643_v40  ;;  %v2243_v53 = vmul.f32 %v4977_v31, %v6650_v10  ;;  %6651 = vst [vmem:[#allocation23_spill] sm:$0xff] %v4990_v56 }
 0x12f   :  { %v2407_v50 = vld [vmem:[#allocation2 + $0xa8] sm:$0xff]  ;;  %v2238_v37 = vadd.f32 %v2237_v11, %v2236_v36  ;;  %v2254_v35 = vmul.f32 %v4961_v25, %v6644_v42  ;;  %v2265_v38 = vmul.f32 %v4930_v57, %v6636_v45  ;;  %v2251_v61 = vadd.f32 %v2250_v26, %v2249_v60  ;;  %v6652_v36 = vld [vmem:[#allocation17_spill] sm:$0xff] }
 0x130   :  { %2490 = vmatpush.msra.mxu1 %v2407_v50  ;;  %v628_v27 = vmax.f32 %v610_v13, %v627_v48  ;;  %v643_v16 = vadd.f32 %v642_v17, %v641_v54  ;;  %v2266_v11 = vmul.f32 %v4941_v6, %v6638_v62  ;;  %v2245_v51 = vmul.f32 %v4990_v56, %v6652_v36  ;;  %v4997_v57 = vld [vmem:[%s6411_s3 + $0x69] sm:$0x7f] }
 0x131   :  { %v2240_v39 = vadd.f32 %v2239_v5, %v2238_v37  ;;  %6653 = vst [vmem:[#allocation24_spill] sm:$0xff] %v4997_v57  ;;  %v2256_v17 = vmul.f32 %v4997_v57, %v6647_v30  ;;  %v2268_v13 = vmul.f32 %v4961_v25, %v6640_v47  ;;  %2781 = vmatpush.msra.mxu2 %v2407_v50 }
 0x132   :  { %v645_v26 = vadd.f32 %v644_v44, %v643_v16  ;;  %v2253_v5 = vadd.f32 %v2252_v52, %v2251_v61  ;;  %v2267_v48 = vadd.f32 %v2266_v11, %v2265_v38  ;;  %v2270_v54 = vmul.f32 %v4968_v55, %v6643_v40  ;;  %v5016_v52 = vld [vmem:[%s6411_s3 + $0x71] sm:$0x7f] }
 0x133   :  { %v2242_v60 = vadd.f32 %v2241_v2, %v2240_v39  ;;  %v2258_v37 = vmul.f32 %v4977_v31, %v6648_v0  ;;  %v2260_v8 = vmul.f32 %v4990_v56, %v6650_v10  ;;  %v2272_v21 = vmul.f32 %v4977_v31, %v6644_v42  ;;  %v5030_v39 = vld [vmem:[%s6410_s2 + $0x78] sm:$0x7f] }
 0x134   :  { %v646_v59 = vmax.f32 %v628_v27, %v645_v26  ;;  %v2255_v34 = vadd.f32 %v2254_v35, %v2253_v5  ;;  %v2269_v41 = vadd.f32 %v2268_v13, %v2267_v48  ;;  %v2283_v44 = vmul.f32 %v4941_v6, %v6636_v45  ;;  %6654 = vst [vmem:[#allocation31_spill] sm:$0xff] %v5030_v39  ;;  %v5037_v26 = vld [vmem:[%s6411_s3 + $0x78] sm:$0x7f] }
 0x135   :  { %v2262_v2 = vmul.f32 %v5016_v52, %v6652_v36  ;;  %v2274_v50 = vmul.f32 %v4990_v56, %v6647_v30  ;;  %v2284_v38 = vmul.f32 %v4961_v25, %v6638_v62  ;;  %v2286_v35 = vmul.f32 %v4997_v57, %v6640_v47  ;;  %v5046_v48 = vld [vmem:[%s6410_s2 + $0x79] sm:$0x7f] }
 0x136   :  { %v647_v27 = vadd.f32 %v646_v59, %v3716_v1  ;;  %v2244_v16 = vadd.f32 %v2243_v53, %v2242_v60  ;;  %v2257_v61 = vadd.f32 %v2256_v17, %v2255_v34  ;;  %v2271_v11 = vadd.f32 %v2270_v54, %v2269_v41 }
 0x137   :  { %v2276_v13 = vmul.f32 %v5030_v39, %v6648_v0  ;;  %v2278_v5 = vmul.f32 %v5037_v26, %v6650_v10  ;;  %v2285_v59 = vadd.f32 %v2284_v38, %v2283_v44  ;;  %v2288_v41 = vmul.f32 %v4977_v31, %v6643_v40 }
 0x138   :  { %v648_v34 = vmax.f32 %v647_v27, 0.0  ;;  %v2259_v53 = vadd.f32 %v2258_v37, %v2257_v61  ;;  %v2273_v17 = vadd.f32 %v2272_v21, %v2271_v11  ;;  %v2280_v54 = vmul.f32 %v5046_v48, %v6652_v36 }
 0x139   :  { %v2287_v60 = vadd.f32 %v2286_v35, %v2285_v59  ;;  %v2290_v39 = vmul.f32 %v4990_v56, %v6644_v42  ;;  %v231_v44 = vmul.f32 %v4678_v63, %v3464_v3  ;;  %v233_v38 = vmul.f32 %v4685_v58, %v3654_v7 }
 0x13a   :  { %649 = vst.msk [vmem:[#allocation2 + $0x40] sm:$0x7f] %vm228_vm1, %v648_v34  ;;  %v2246_v21 = vadd.f32 %v2245_v51, %v2244_v16  ;;  %v2261_v37 = vadd.f32 %v2260_v8, %v2259_v53  ;;  %v2275_v27 = vadd.f32 %v2274_v50, %v2273_v17  ;;  %v236_v61 = vmul.f32 %v4693_v32, %v3669_v46 }
 0x13b   :  { %v2289_v11 = vadd.f32 %v2288_v41, %v2287_v60  ;;  %v2292_v35 = vmul.f32 %v5016_v52, %v6647_v30  ;;  %v234_v59 = vadd.f32 %v233_v38, %v231_v44  ;;  %v239_v57 = vmul.f32 %v4702_v14, %v3676_v23 }
 0x13c   :  { %v2263_v63 = vadd.f32 %v2262_v2, %v2261_v37  ;;  %v2277_v56 = vadd.f32 %v2276_v13, %v2275_v27  ;;  %v2294_v31 = vmul.f32 %v5037_v26, %v6648_v0  ;;  %v2296_v8 = vmul.f32 %v5046_v48, %v6650_v10  ;;  %v6655_v13 = vld [vmem:[#allocation26_spill] sm:$0xff] }
 0x13d   :  { %v2291_v51 = vadd.f32 %v2290_v39, %v2289_v11  ;;  %v237_v50 = vadd.f32 %v236_v61, %v234_v59  ;;  %v242_v16 = vmul.f32 %v4713_v20, %v3679_v19  ;;  %v256_v41 = vmul.f32 %v4685_v58, %v3464_v3  ;;  %v5078_v39 = vld [vmem:[%s6411_s3 + $0x79] sm:$0x7f] }
 0x13e   :  { %v2264_v34 = vmax.f32 %v2246_v21, %v2263_v63  ;;  %v2279_v53 = vadd.f32 %v2278_v5, %v2277_v56  ;;  %v257_v2 = vmul.f32 %v4693_v32, %v3654_v7  ;;  %v259_v17 = vmul.f32 %v6655_v13, %v3669_v46 }
 0x13f   :  { %v2293_v60 = vadd.f32 %v2292_v35, %v2291_v51  ;;  %v2298_v44 = vmul.f32 %v5078_v39, %v6652_v36  ;;  %v240_v38 = vadd.f32 %v239_v57, %v237_v50  ;;  %v245_v58 = vmul.f32 %v4733_v9, %v3690_v18 }
 0x140   :  { %v2281_v56 = vadd.f32 %v2280_v54, %v2279_v53  ;;  %v248_v32 = vmul.f32 %v4740_v29, %v3695_v22  ;;  %v258_v5 = vadd.f32 %v257_v2, %v256_v41  ;;  %v261_v21 = vmul.f32 %v4713_v20, %v3676_v23 }
 0x141   :  { %v2394_v37 = vld [vmem:[#allocation2 + $0x40] sm:$0xff]  ;;  %v2295_v27 = vadd.f32 %v2294_v31, %v2293_v60  ;;  %v243_v61 = vadd.f32 %v242_v16, %v240_v38  ;;  %v251_v11 = vmul.f32 %v4749_v49, %v3698_v4  ;;  %v263_v57 = vmul.f32 %v4733_v9, %v3679_v19 }
 0x142   :  { %2458 = vmatpush.msra.mxu0 %v2394_v37  ;;  %2766 = vmatpush.msra.mxu3 %v2394_v37  ;;  %v2282_v35 = vmax.f32 %v2264_v34, %v2281_v56  ;;  %v260_v54 = vadd.f32 %v259_v17, %v258_v5  ;;  %v274_v59 = vmul.f32 %v4702_v14, %v3464_v3 }
 0x143   :  { %v2297_v63 = vadd.f32 %v2296_v8, %v2295_v27  ;;  %v246_v51 = vadd.f32 %v245_v58, %v243_v61  ;;  %v275_v50 = vmul.f32 %v4713_v20, %v3654_v7  ;;  %v277_v31 = vmul.f32 %v4733_v9, %v3669_v46  ;;  %v6656_v61 = vld [vmem:[#allocation18_spill] sm:$0xff] }
 0x144   :  { %v254_v16 = vmul.f32 %v4756_v33, %v3713_v43  ;;  %v262_v41 = vadd.f32 %v261_v21, %v260_v54  ;;  %v265_v53 = vmul.f32 %v4771_v12, %v3690_v18  ;;  %v267_v34 = vmul.f32 %v4749_v49, %v3695_v22 }
 0x145   :  { %v2299_v2 = vadd.f32 %v2298_v44, %v2297_v63  ;;  %v249_v14 = vadd.f32 %v248_v32, %v246_v51  ;;  %v276_v8 = vadd.f32 %v275_v50, %v274_v59  ;;  %v279_v13 = vmul.f32 %v4740_v29, %v3676_v23 }
 0x146   :  { %v264_v17 = vadd.f32 %v263_v57, %v262_v41  ;;  %v269_v60 = vmul.f32 %v4756_v33, %v3698_v4  ;;  %v271_v38 = vmul.f32 %v4792_v24, %v3713_v43  ;;  %v292_v58 = vmul.f32 %v4713_v20, %v3464_v3 }
 0x147   :  { %v2300_v56 = vmax.f32 %v2282_v35, %v2299_v2  ;;  %v278_v5 = vadd.f32 %v277_v31, %v276_v8  ;;  %v281_v44 = vmul.f32 %v4749_v49, %v3679_v19  ;;  %v293_v32 = vmul.f32 %v4733_v9, %v3654_v7  ;;  %v6657_v9 = vld [vmem:[#allocation19_spill] sm:$0xff] }
 0x148   :  { %v252_v21 = vadd.f32 %v251_v11, %v249_v14  ;;  %v266_v29 = vadd.f32 %v265_v53, %v264_v17  ;;  %v283_v37 = vmul.f32 %v4756_v33, %v3690_v18  ;;  %v295_v27 = vmul.f32 %v4771_v12, %v3669_v46  ;;  %v5160_v17 = vld [vmem:[%s6410_s2 + $0x58] sm:$0x7f] }
 0x149   :  { %v2301_v57 = vadd.f32 %v2300_v56, %v6656_v61  ;;  %v280_v54 = vadd.f32 %v279_v13, %v278_v5  ;;  %v294_v3 = vadd.f32 %v293_v32, %v292_v58  ;;  %v297_v20 = vmul.f32 %v4749_v49, %v3676_v23  ;;  %v5134_v23 = vld [vmem:[%s6410_s2 + $0x50] sm:$0x7f] }
 0x14a   :  { %v268_v35 = vadd.f32 %v267_v34, %v266_v29  ;;  %v285_v59 = vmul.f32 %v4802_v28, %v3695_v22  ;;  %v287_v7 = vmul.f32 %v4811_v15, %v3698_v4  ;;  %v289_v11 = vmul.f32 %v6657_v9, %v3713_v43  ;;  %v5141_v28 = vld [vmem:[%s6411_s3 + $0x50] sm:$0x7f] }
 0x14b   :  { %v2302_v63 = vmax.f32 %v2301_v57, 0.0  ;;  %v282_v51 = vadd.f32 %v281_v44, %v280_v54  ;;  %v296_v46 = vadd.f32 %v295_v27, %v294_v3  ;;  %v299_v12 = vmul.f32 %v4756_v33, %v3679_v19  ;;  %v5148_v19 = vld [vmem:[%s6410_s2 + $0x51] sm:$0x7f]  ;;  %v5189_v27 = vld [vmem:[%s6410_s2 + $0x59] sm:$0x7f] }
 0x14c   :  { %v270_v50 = vadd.f32 %v269_v60, %v268_v35  ;;  %v1914_v49 = vmul.f32 %v5134_v23, %v6636_v45  ;;  %v1915_v31 = vmul.f32 %v5141_v28, %v6638_v62  ;;  %v1917_v33 = vmul.f32 %v5148_v19, %v6640_v47 }
 0x14d   :  { %2303 = vst.msk [vmem:[#allocation2 + $0xa0] sm:$0x7f] %vm228_vm1, %v2302_v63  ;;  %v255_v41 = vadd.f32 %v254_v16, %v252_v21  ;;  %v284_v53 = vadd.f32 %v283_v37, %v282_v51  ;;  %v298_v34 = vadd.f32 %v297_v20, %v296_v46  ;;  %v301_v2 = vmul.f32 %v4792_v24, %v3690_v18  ;;  %v6658_v18 = vld [vmem:[#allocation20_spill] sm:$0xff] }
 0x14e   :  { %v272_v14 = vadd.f32 %v271_v38, %v270_v50  ;;  %v303_v8 = vmul.f32 %v4811_v15, %v3695_v22  ;;  %v1916_v13 = vadd.f32 %v1915_v31, %v1914_v49  ;;  %v1919_v60 = vmul.f32 %v5160_v17, %v6643_v40  ;;  %v5171_v22 = vld [vmem:[%s6411_s3 + $0x58] sm:$0x7f] }
 0x14f   :  { %v286_v58 = vadd.f32 %v285_v59, %v284_v53  ;;  %v300_v16 = vadd.f32 %v299_v12, %v298_v34  ;;  %v305_v56 = vmul.f32 %v6657_v9, %v3698_v4  ;;  %v307_v24 = vmul.f32 %v6658_v18, %v3713_v43  ;;  %v5182_v43 = vld [vmem:[%s6411_s3 + $0x51] sm:$0x7f]  ;;  %v5198_v59 = vld [vmem:[%s6410_s2 + $0x60] sm:$0x7f] }
 0x150   :  { %v1918_v38 = vadd.f32 %v1917_v33, %v1916_v13  ;;  %v1921_v15 = vmul.f32 %v5171_v22, %v6644_v42  ;;  %v1931_v5 = vmul.f32 %v5141_v28, %v6636_v45  ;;  %v1932_v44 = vmul.f32 %v5148_v19, %v6638_v62  ;;  %v5205_v9 = vld [vmem:[%s6411_s3 + $0x60] sm:$0x7f] }
 0x151   :  { %v273_v32 = vmax.f32 %v255_v41, %v272_v14  ;;  %v288_v4 = vadd.f32 %v287_v7, %v286_v58  ;;  %v302_v21 = vadd.f32 %v301_v2, %v300_v16  ;;  %v1934_v29 = vmul.f32 %v5182_v43, %v6640_v47  ;;  %v5222_v34 = vld [vmem:[%s6410_s2 + $0x61] sm:$0x7f] }
 0x152   :  { %v1920_v37 = vadd.f32 %v1919_v60, %v1918_v38  ;;  %v1923_v57 = vmul.f32 %v5189_v27, %v6647_v30  ;;  %v1933_v54 = vadd.f32 %v1932_v44, %v1931_v5  ;;  %v1936_v3 = vmul.f32 %v5171_v22, %v6643_v40  ;;  %6659 = vst [vmem:[#allocation25_spill] sm:$0xff] %v5222_v34 }
 0x153   :  { %v290_v20 = vadd.f32 %v289_v11, %v288_v4  ;;  %v304_v35 = vadd.f32 %v303_v8, %v302_v21  ;;  %v1925_v7 = vmul.f32 %v5198_v59, %v6648_v0  ;;  %v1927_v63 = vmul.f32 %v5205_v9, %v6650_v10  ;;  %v5229_v8 = vld [vmem:[%s6411_s3 + $0x59] sm:$0x7f] }
 0x154   :  { %v2406_v51 = vld [vmem:[#allocation2 + $0xa0] sm:$0xff]  ;;  %v1922_v46 = vadd.f32 %v1921_v15, %v1920_v37  ;;  %v1935_v11 = vadd.f32 %v1934_v29, %v1933_v54  ;;  %v1938_v12 = vmul.f32 %v5189_v27, %v6644_v42  ;;  %v1949_v50 = vmul.f32 %v5160_v17, %v6636_v45  ;;  %6660 = vst [vmem:[#allocation9_spill] sm:$0xff] %v5229_v8 }
 0x155   :  { %2491 = vmatpush.msra.mxu1 %v2406_v51  ;;  %v291_v49 = vmax.f32 %v273_v32, %v290_v20  ;;  %v306_v31 = vadd.f32 %v305_v56, %v304_v35  ;;  %v1950_v33 = vmul.f32 %v5171_v22, %v6638_v62  ;;  %v1952_v41 = vmul.f32 %v5189_v27, %v6640_v47 }
 0x156   :  { %v1924_v53 = vadd.f32 %v1923_v57, %v1922_v46  ;;  %v1929_v2 = vmul.f32 %v5222_v34, %v6652_v36  ;;  %v1937_v14 = vadd.f32 %v1936_v3, %v1935_v11  ;;  %v1940_v13 = vmul.f32 %v5229_v8, %v6647_v30  ;;  %2782 = vmatpush.msra.mxu2 %v2406_v51 }
 0x157   :  { %v308_v60 = vadd.f32 %v307_v24, %v306_v31  ;;  %v1942_v58 = vmul.f32 %v5205_v9, %v6648_v0  ;;  %v1951_v16 = vadd.f32 %v1950_v33, %v1949_v50  ;;  %v1954_v56 = vmul.f32 %v5198_v59, %v6643_v40 }
 0x158   :  { %v1926_v18 = vadd.f32 %v1925_v7, %v1924_v53  ;;  %v1939_v38 = vadd.f32 %v1938_v12, %v1937_v14  ;;  %v1944_v15 = vmul.f32 %v5222_v34, %v6650_v10  ;;  %v1956_v5 = vmul.f32 %v5205_v9, %v6644_v42  ;;  %v5290_v53 = vld [vmem:[%s6411_s3 + $0x68] sm:$0x7f] }
 0x159   :  { %v309_v24 = vmax.f32 %v291_v49, %v308_v60  ;;  %v1953_v44 = vadd.f32 %v1952_v41, %v1951_v16  ;;  %v1967_v32 = vmul.f32 %v5171_v22, %v6636_v45  ;;  %v1968_v4 = vmul.f32 %v5189_v27, %v6638_v62  ;;  %6663 = vst [vmem:[#allocation32_spill] sm:$0xff] %v5290_v53 }
 0x15a   :  { %v1928_v21 = vadd.f32 %v1927_v63, %v1926_v18  ;;  %v1941_v29 = vadd.f32 %v1940_v13, %v1939_v38  ;;  %v1958_v37 = vmul.f32 %v5222_v34, %v6647_v30  ;;  %v1970_v57 = vmul.f32 %v5229_v8, %v6640_v47  ;;  %v5267_v63 = vld [vmem:[%s6411_s3 + $0x61] sm:$0x7f]  ;;  %v5308_v18 = vld [vmem:[%s6410_s2 + $0x69] sm:$0x7f] }
 0x15b   :  { %v311_v54 = vadd.f32 %v3716_v1, %v309_v24  ;;  %v1955_v3 = vadd.f32 %v1954_v56, %v1953_v44  ;;  %v1969_v20 = vadd.f32 %v1968_v4, %v1967_v32  ;;  %v1972_v35 = vmul.f32 %v5205_v9, %v6643_v40  ;;  %6661 = vst [vmem:[#allocation10_spill] sm:$0xff] %v5267_v63  ;;  %v5274_v1 = vld [vmem:[%s6410_s2 + $0x68] sm:$0x7f] }
 0x15c   :  { %v1943_v7 = vadd.f32 %v1942_v58, %v1941_v29  ;;  %v1946_v51 = vmul.f32 %v5267_v63, %v6652_v36  ;;  %6662 = vst [vmem:[#allocation11_spill] sm:$0xff] %v5274_v1  ;;  %v1960_v46 = vmul.f32 %v5274_v1, %v6648_v0  ;;  %v5281_v11 = vstv %s5213_s19  ;;  %v5319_v32 = vld [vmem:[%s6411_s3 + $0x69] sm:$0x7f] }
 0x15d   :  { %v312_v12 = vmax.f32 %v311_v54, 0.0  ;;  %v1957_v50 = vadd.f32 %v1956_v5, %v1955_v3  ;;  %v1971_v49 = vadd.f32 %v1970_v57, %v1969_v20  ;;  %v1974_v31 = vmul.f32 %v5222_v34, %v6644_v42  ;;  %6664 = vst [vmem:[#allocation12_spill] sm:$0xff] %v5308_v18  ;;  %v6667_v54 = vld [vmem:[#allocation28_spill] sm:$0xff]  ;;  %v6668_v20 = vld [vmem:[#allocation27_spill] sm:$0xff] }
 0x15e   :  { %v1930_v33 = vadd.f32 %v1929_v2, %v1928_v21  ;;  %v1945_v41 = vadd.f32 %v1944_v15, %v1943_v7  ;;  %v1962_v14 = vmul.f32 %v5290_v53, %v6650_v10  ;;  %v1976_v13 = vmul.f32 %v5267_v63, %v6647_v30  ;;  %6665 = vst [vmem:[#allocation13_spill] sm:$0xff] %v5319_v32 }
 0x15f   :  { %313 = vst.msk [vmem:[#allocation2 + $0x38] sm:$0x7f] %vm228_vm1, %v312_v12  ;;  %v1959_v60 = vadd.f32 %v1958_v37, %v1957_v50  ;;  %v1973_v58 = vadd.f32 %v1972_v35, %v1971_v49  ;;  %v5300_v2 = vstv %s5233_s24  ;;  %v5303_v16 = vstv %s5239_s25  ;;  %v6666_v37 = vld [vmem:[#allocation21_spill] sm:$0xff] }
 0x160   :  { %v1947_v56 = vadd.f32 %v1946_v51, %v1945_v41  ;;  %v1964_v38 = vmul.f32 %v5308_v18, %v6652_v36  ;;  %v1978_v15 = vmul.f32 %v5290_v53, %v6648_v0  ;;  %v1980_v5 = vmul.f32 %v5308_v18, %v6650_v10  ;;  %v6669_v41 = vld [vmem:[#allocation22_spill] sm:$0xff] }
 0x161   :  { %v1961_v24 = vadd.f32 %v1960_v46, %v1959_v60  ;;  %v1975_v44 = vadd.f32 %v1974_v31, %v1973_v58  ;;  %v1982_v4 = vmul.f32 %v5319_v32, %v6652_v36  ;;  %v5324_v21 = vstv %s5245_s26 }
 0x162   :  { %v5327_v29 = vstv %s5251_s27  ;;  %v2082_v57 = vmul.f32 %v6666_v37, %v5281_v11  ;;  %v2083_v3 = vmul.f32 %v6667_v54, %v5300_v2  ;;  %v2085_v35 = vmul.f32 %v6668_v20, %v5303_v16 }
 0x163   :  { %v1948_v7 = vmax.f32 %v1930_v33, %v1947_v56  ;;  %v1963_v51 = vadd.f32 %v1962_v14, %v1961_v24  ;;  %v1977_v46 = vadd.f32 %v1976_v13, %v1975_v44  ;;  %v5336_v12 = vstv %s5257_s28  ;;  %v6670_v44 = vld [vmem:[#allocation29_spill] sm:$0xff] }
 0x164   :  { %v5339_v50 = vstv %s5262_s29  ;;  %v5342_v49 = vstv %s5278_s12  ;;  %v2084_v31 = vadd.f32 %v2083_v3, %v2082_v57  ;;  %v2087_v60 = vmul.f32 %v6669_v41, %v5324_v21 }
 0x165   :  { %v1965_v58 = vadd.f32 %v1964_v38, %v1963_v51  ;;  %v1979_v37 = vadd.f32 %v1978_v15, %v1977_v46  ;;  %v5347_v32 = vstv %s5285_s13  ;;  %v2099_v33 = vmul.f32 %v6667_v54, %v5281_v11 }
 0x166   :  { %v2393_v14 = vld [vmem:[#allocation2 + $0x38] sm:$0xff]  ;;  %v2086_v13 = vadd.f32 %v2085_v35, %v2084_v31  ;;  %v2089_v56 = vmul.f32 %v4941_v6, %v5327_v29  ;;  %v2100_v24 = vmul.f32 %v6668_v20, %v5300_v2  ;;  %v2102_v57 = vmul.f32 %v6670_v44, %v5303_v16  ;;  %v6671_v44 = vld [vmem:[#allocation30_spill] sm:$0xff] }
 0x167   :  { %2459 = vmatpush.msra.mxu0 %v2393_v14  ;;  %2767 = vmatpush.msra.mxu3 %v2393_v14  ;;  %v1966_v38 = vmax.f32 %v1948_v7, %v1965_v58  ;;  %v1981_v15 = vadd.f32 %v1980_v5, %v1979_v37  ;;  %v5358_v3 = vstv %s5297_s15  ;;  %v2091_v54 = vmul.f32 %v4961_v25, %v5336_v12 }
 0x168   :  { %v2088_v51 = vadd.f32 %v2087_v60, %v2086_v13  ;;  %v2093_v35 = vmul.f32 %v4968_v55, %v5339_v50  ;;  %v2101_v46 = vadd.f32 %v2100_v24, %v2099_v33  ;;  %v2104_v20 = vmul.f32 %v4941_v6, %v5324_v21  ;;  %v6673_v24 = vld [vmem:[#allocation24_spill] sm:$0xff] }
 0x169   :  { %v1983_v31 = vadd.f32 %v1982_v4, %v1981_v15  ;;  %v2095_v18 = vmul.f32 %v6671_v44, %v5342_v49  ;;  %v2106_v5 = vmul.f32 %v4961_v25, %v5327_v29  ;;  %v2117_v7 = vmul.f32 %v6669_v41, %v5281_v11  ;;  %v6672_v4 = vld [vmem:[#allocation23_spill] sm:$0xff] }
 0x16a   :  { %v2090_v58 = vadd.f32 %v2089_v56, %v2088_v51  ;;  %v2103_v37 = vadd.f32 %v2102_v57, %v2101_v46  ;;  %v2118_v60 = vmul.f32 %v4941_v6, %v5300_v2  ;;  %v2120_v33 = vmul.f32 %v4961_v25, %v5303_v16 }
 0x16b   :  { %v1984_v14 = vmax.f32 %v1966_v38, %v1983_v31  ;;  %v2097_v13 = vmul.f32 %v6672_v4, %v5347_v32  ;;  %v2108_v15 = vmul.f32 %v6673_v24, %v5336_v12  ;;  %v2110_v53 = vmul.f32 %v6671_v44, %v5339_v50 }
 0x16c   :  { %v2092_v1 = vadd.f32 %v2091_v54, %v2090_v58  ;;  %v2105_v41 = vadd.f32 %v2104_v20, %v2103_v37  ;;  %v2119_v56 = vadd.f32 %v2118_v60, %v2117_v7  ;;  %v2122_v57 = vmul.f32 %v4968_v55, %v5324_v21 }
 0x16d   :  { %v1985_v51 = vadd.f32 %v1984_v14, %v6656_v61  ;;  %v2112_v38 = vmul.f32 %v6672_v4, %v5342_v49  ;;  %v2124_v46 = vmul.f32 %v6671_v44, %v5327_v29  ;;  %v2135_v31 = vmul.f32 %v4941_v6, %v5281_v11 }
 0x16e   :  { %v2094_v63 = vadd.f32 %v2093_v35, %v2092_v1  ;;  %v2107_v8 = vadd.f32 %v2106_v5, %v2105_v41  ;;  %v2121_v34 = vadd.f32 %v2120_v33, %v2119_v56  ;;  %v2136_v54 = vmul.f32 %v4961_v25, %v5300_v2  ;;  %v6674_v25 = vld [vmem:[#allocation31_spill] sm:$0xff] }
 0x16f   :  { %v1986_v20 = vmax.f32 %v1985_v51, 0.0  ;;  %v2126_v55 = vmul.f32 %v6672_v4, %v5336_v12  ;;  %v2138_v7 = vmul.f32 %v6673_v24, %v5303_v16  ;;  %v2140_v58 = vmul.f32 %v6671_v44, %v5324_v21 }
 0x170   :  { %v2096_v37 = vadd.f32 %v2095_v18, %v2094_v63  ;;  %v2109_v60 = vadd.f32 %v2108_v15, %v2107_v8  ;;  %v2123_v14 = vadd.f32 %v2122_v57, %v2121_v34  ;;  %v2137_v6 = vadd.f32 %v2136_v54, %v2135_v31  ;;  %v5415_v18 = vld [vmem:[%s6410_s2 + $0x40] sm:$0x7f] }
 0x171   :  { %1987 = vst.msk [vmem:[#allocation2 + $0x98] sm:$0x7f] %vm228_vm1, %v1986_v20  ;;  %v2114_v1 = vmul.f32 %v5016_v52, %v5347_v32  ;;  %v2128_v35 = vmul.f32 %v6674_v25, %v5339_v50  ;;  %v2130_v5 = vmul.f32 %v5037_v26, %v5342_v49  ;;  %v2132_v33 = vmul.f32 %v5046_v48, %v5347_v32 }
 0x172   :  { %v2111_v24 = vadd.f32 %v2110_v53, %v2109_v60  ;;  %v2125_v44 = vadd.f32 %v2124_v46, %v2123_v14  ;;  %v2139_v63 = vadd.f32 %v2138_v7, %v2137_v6  ;;  %v2142_v34 = vmul.f32 %v6672_v4, %v5327_v29  ;;  %v5422_v53 = vld [vmem:[%s6411_s3 + $0x40] sm:$0x7f]  ;;  %v5440_v7 = vld [vmem:[%s6410_s2 + $0x48] sm:$0x7f] }
 0x173   :  { %v2144_v8 = vmul.f32 %v5016_v52, %v5336_v12  ;;  %v1598_v15 = vmul.f32 %v5415_v18, %v6636_v45  ;;  %v1599_v41 = vmul.f32 %v5422_v53, %v6638_v62  ;;  %v5429_v52 = vld [vmem:[%s6410_s2 + $0x41] sm:$0x7f]  ;;  %v2098_v56 = vadd.f32 %v2097_v13, %v2096_v37 }
 0x174   :  { %v1601_v4 = vmul.f32 %v5429_v52, %v6640_v47  ;;  %v2113_v57 = vadd.f32 %v2112_v38, %v2111_v24  ;;  %v2127_v51 = vadd.f32 %v2126_v55, %v2125_v44  ;;  %v2141_v46 = vadd.f32 %v2140_v58, %v2139_v63  ;;  %v5447_v55 = vld [vmem:[%s6411_s3 + $0x48] sm:$0x7f]  ;;  %v5458_v6 = vld [vmem:[%s6411_s3 + $0x41] sm:$0x7f] }
 0x175   :  { %v2146_v31 = vmul.f32 %v5037_v26, %v5339_v50  ;;  %v2148_v54 = vmul.f32 %v5046_v48, %v5342_v49  ;;  %v1600_v20 = vadd.f32 %v1599_v41, %v1598_v15  ;;  %v1603_v60 = vmul.f32 %v5440_v7, %v6643_v40  ;;  %v5467_v15 = vld [vmem:[%s6410_s2 + $0x49] sm:$0x7f] }
 0x176   :  { %v2115_v14 = vadd.f32 %v2114_v1, %v2113_v57  ;;  %v2129_v13 = vadd.f32 %v2128_v35, %v2127_v51  ;;  %v2143_v38 = vadd.f32 %v2142_v34, %v2141_v46  ;;  %v1605_v26 = vmul.f32 %v5447_v55, %v6644_v42  ;;  %v5483_v51 = vld [vmem:[%s6411_s3 + $0x50] sm:$0x7f] }
 0x177   :  { %v1602_v48 = vadd.f32 %v1601_v4, %v1600_v20  ;;  %v1615_v58 = vmul.f32 %v5422_v53, %v6636_v45  ;;  %v1616_v37 = vmul.f32 %v5429_v52, %v6638_v62  ;;  %v1618_v1 = vmul.f32 %v5458_v6, %v6640_v47  ;;  %6675 = vst [vmem:[#allocation33_spill] sm:$0xff] %v5483_v51 }
 0x178   :  { %v2405_v25 = vld [vmem:[#allocation2 + $0x98] sm:$0xff]  ;;  %v2116_v35 = vmax.f32 %v2098_v56, %v2115_v14  ;;  %v2131_v24 = vadd.f32 %v2130_v5, %v2129_v13  ;;  %v2145_v44 = vadd.f32 %v2144_v8, %v2143_v38  ;;  %v2150_v63 = vmul.f32 %v5078_v39, %v5347_v32  ;;  %v5476_v39 = vld [vmem:[%s6410_s2 + $0x50] sm:$0x7f] }
 0x179   :  { %2492 = vmatpush.msra.mxu1 %v2405_v25  ;;  %v1604_v34 = vadd.f32 %v1603_v60, %v1602_v48  ;;  %v1607_v41 = vmul.f32 %v5467_v15, %v6647_v30  ;;  %v1617_v4 = vadd.f32 %v1616_v37, %v1615_v58  ;;  %v1620_v57 = vmul.f32 %v5447_v55, %v6643_v40 }
 0x17a   :  { %v2133_v56 = vadd.f32 %v2132_v33, %v2131_v24  ;;  %v2147_v5 = vadd.f32 %v2146_v31, %v2145_v44  ;;  %v1609_v8 = vmul.f32 %v5476_v39, %v6648_v0  ;;  %v1611_v46 = vmul.f32 %v5483_v51, %v6650_v10  ;;  %2783 = vmatpush.msra.mxu2 %v2405_v25 }
 0x17b   :  { %v1606_v20 = vadd.f32 %v1605_v26, %v1604_v34  ;;  %v1619_v33 = vadd.f32 %v1618_v1, %v1617_v4  ;;  %v1622_v31 = vmul.f32 %v5467_v15, %v6644_v42  ;;  %v1633_v60 = vmul.f32 %v5440_v7, %v6636_v45  ;;  %v5498_v26 = vld [vmem:[%s6410_s2 + $0x51] sm:$0x7f] }
 0x17c   :  { %v2134_v14 = vmax.f32 %v2116_v35, %v2133_v56  ;;  %v2149_v13 = vadd.f32 %v2148_v54, %v2147_v5  ;;  %v1634_v38 = vmul.f32 %v5447_v55, %v6638_v62  ;;  %v1636_v48 = vmul.f32 %v5467_v15, %v6640_v47  ;;  %v5505_v54 = vld [vmem:[%s6411_s3 + $0x49] sm:$0x7f] }
 0x17d   :  { %v1608_v58 = vadd.f32 %v1607_v41, %v1606_v20  ;;  %v1613_v37 = vmul.f32 %v5498_v26, %v6652_v36  ;;  %v1621_v1 = vadd.f32 %v1620_v57, %v1619_v33  ;;  %6676 = vst [vmem:[#allocation14_spill] sm:$0xff] %v5505_v54  ;;  %v1624_v25 = vmul.f32 %v5505_v54, %v6647_v30 }
 0x17e   :  { %v2151_v35 = vadd.f32 %v2150_v63, %v2149_v13  ;;  %v1626_v24 = vmul.f32 %v5483_v51, %v6648_v0  ;;  %v1635_v44 = vadd.f32 %v1634_v38, %v1633_v60  ;;  %v1638_v34 = vmul.f32 %v5476_v39, %v6643_v40 }
 0x17f   :  { %v1610_v41 = vadd.f32 %v1609_v8, %v1608_v58  ;;  %v1623_v4 = vadd.f32 %v1622_v31, %v1621_v1  ;;  %v1628_v57 = vmul.f32 %v5498_v26, %v6650_v10  ;;  %v1640_v56 = vmul.f32 %v5483_v51, %v6644_v42 }
 0x180   :  { %v2152_v5 = vmax.f32 %v2134_v14, %v2151_v35  ;;  %v1637_v20 = vadd.f32 %v1636_v48, %v1635_v44  ;;  %v1651_v63 = vmul.f32 %v5447_v55, %v6636_v45  ;;  %v1652_v33 = vmul.f32 %v5467_v15, %v6638_v62  ;;  %v5531_v35 = vld [vmem:[%s6411_s3 + $0x51] sm:$0x7f] }
 0x181   :  { %v1612_v60 = vadd.f32 %v1611_v46, %v1610_v41  ;;  %v1625_v13 = vadd.f32 %v1624_v25, %v1623_v4  ;;  %v1642_v8 = vmul.f32 %v5498_v26, %v6647_v30  ;;  %v1654_v31 = vmul.f32 %v5505_v54, %v6640_v47  ;;  %v5538_v25 = vld [vmem:[%s6410_s2 + $0x58] sm:$0x7f] }
 0x182   :  { %v2153_v38 = vadd.f32 %v2152_v5, %v5358_v3  ;;  %v1639_v58 = vadd.f32 %v1638_v34, %v1637_v20  ;;  %v1653_v1 = vadd.f32 %v1652_v33, %v1651_v63  ;;  %v1656_v14 = vmul.f32 %v5483_v51, %v6643_v40  ;;  %6677 = vst [vmem:[#allocation15_spill] sm:$0xff] %v5538_v25 }
 0x183   :  { %v1627_v48 = vadd.f32 %v1626_v24, %v1625_v13  ;;  %v1630_v46 = vmul.f32 %v5531_v35, %v6652_v36  ;;  %v1644_v44 = vmul.f32 %v5538_v25, %v6648_v0  ;;  %v5545_v24 = vld [vmem:[%s6411_s3 + $0x58] sm:$0x7f]  ;;  %v1658_v20 = vmul.f32 %v5498_v26, %v6644_v42 }
 0x184   :  { %v1646_v34 = vmul.f32 %v5545_v24, %v6650_v10  ;;  %v2154_v41 = vmax.f32 %v2153_v38, 0.0  ;;  %v1641_v4 = vadd.f32 %v1640_v56, %v1639_v58  ;;  %v1655_v5 = vadd.f32 %v1654_v31, %v1653_v1 }
 0x185   :  { %v1614_v63 = vadd.f32 %v1613_v37, %v1612_v60  ;;  %v1629_v33 = vadd.f32 %v1628_v57, %v1627_v48  ;;  %v1766_v13 = vmul.f32 %v5134_v23, %v5281_v11  ;;  %v1767_v25 = vmul.f32 %v5141_v28, %v5300_v2  ;;  %v5563_v37 = vld [vmem:[%s6410_s2 + $0x59] sm:$0x7f] }
 0x186   :  { %2155 = vst.msk [vmem:[#allocation2 + $0x30] sm:$0x7f] %vm228_vm1, %v2154_v41  ;;  %v1643_v54 = vadd.f32 %v1642_v8, %v1641_v4  ;;  %v1657_v51 = vadd.f32 %v1656_v14, %v1655_v5  ;;  %v1660_v38 = vmul.f32 %v5531_v35, %v6647_v30  ;;  %v1769_v56 = vmul.f32 %v5148_v19, %v5303_v16 }
 0x187   :  { %v1631_v31 = vadd.f32 %v1630_v46, %v1629_v33  ;;  %v1648_v23 = vmul.f32 %v5563_v37, %v6652_v36  ;;  %v1768_v57 = vadd.f32 %v1767_v25, %v1766_v13  ;;  %v1771_v60 = vmul.f32 %v5160_v17, %v5324_v21 }
 0x188   :  { %v1645_v8 = vadd.f32 %v1644_v44, %v1643_v54  ;;  %v1659_v58 = vadd.f32 %v1658_v20, %v1657_v51  ;;  %v1662_v1 = vmul.f32 %v5545_v24, %v6648_v0  ;;  %v1664_v14 = vmul.f32 %v5563_v37, %v6650_v10  ;;  %v5584_v44 = vld [vmem:[%s6411_s3 + $0x59] sm:$0x7f] }
 0x189   :  { %v1632_v48 = vmax.f32 %v1614_v63, %v1631_v31  ;;  %v1770_v46 = vadd.f32 %v1769_v56, %v1768_v57  ;;  %v1773_v41 = vmul.f32 %v5171_v22, %v5327_v29  ;;  %v1783_v4 = vmul.f32 %v5141_v28, %v5281_v11 }
 0x18a   :  { %v1647_v25 = vadd.f32 %v1646_v34, %v1645_v8  ;;  %v1661_v5 = vadd.f32 %v1660_v38, %v1659_v58  ;;  %v1784_v54 = vmul.f32 %v5148_v19, %v5300_v2  ;;  %v1786_v51 = vmul.f32 %v5182_v43, %v5303_v16 }
 0x18b   :  { %v1666_v20 = vmul.f32 %v5584_v44, %v6652_v36  ;;  %v1772_v63 = vadd.f32 %v1771_v60, %v1770_v46  ;;  %v1775_v28 = vmul.f32 %v5189_v27, %v5336_v12  ;;  %v1777_v34 = vmul.f32 %v5198_v59, %v5339_v50  ;;  %v6678_v46 = vld [vmem:[#allocation25_spill] sm:$0xff] }
 0x18c   :  { %v1649_v33 = vadd.f32 %v1648_v23, %v1647_v25  ;;  %v1663_v19 = vadd.f32 %v1662_v1, %v1661_v5  ;;  %v1785_v13 = vadd.f32 %v1784_v54, %v1783_v4  ;;  %v1788_v43 = vmul.f32 %v5171_v22, %v5324_v21 }
 0x18d   :  { %v2392_v38 = vld [vmem:[#allocation2 + $0x30] sm:$0xff]  ;;  %v1774_v56 = vadd.f32 %v1773_v41, %v1772_v63  ;;  %v1779_v31 = vmul.f32 %v5205_v9, %v5342_v49  ;;  %v1790_v57 = vmul.f32 %v5189_v27, %v5327_v29  ;;  %v1801_v60 = vmul.f32 %v5160_v17, %v5281_v11  ;;  %v6679_v63 = vld [vmem:[#allocation9_spill] sm:$0xff] }
 0x18e   :  { %2460 = vmatpush.msra.mxu0 %v2392_v38  ;;  %2768 = vmatpush.msra.mxu3 %v2392_v38  ;;  %v1650_v8 = vmax.f32 %v1632_v48, %v1649_v33  ;;  %v1665_v23 = vadd.f32 %v1664_v14, %v1663_v19  ;;  %v1787_v58 = vadd.f32 %v1786_v51, %v1785_v13  ;;  %v6680_v38 = vld [vmem:[#allocation10_spill] sm:$0xff] }
 0x18f   :  { %v1776_v1 = vadd.f32 %v1775_v28, %v1774_v56  ;;  %v1781_v4 = vmul.f32 %v6678_v46, %v5347_v32  ;;  %v1802_v41 = vmul.f32 %v5171_v22, %v5300_v2  ;;  %v1804_v25 = vmul.f32 %v5189_v27, %v5303_v16 }
 0x190   :  { %v1667_v5 = vadd.f32 %v1666_v20, %v1665_v23  ;;  %v1789_v54 = vadd.f32 %v1788_v43, %v1787_v58  ;;  %v1792_v17 = vmul.f32 %v6679_v63, %v5336_v12  ;;  %v1794_v48 = vmul.f32 %v5205_v9, %v5339_v50 }
 0x191   :  { %v1778_v14 = vadd.f32 %v1777_v34, %v1776_v1  ;;  %v1796_v51 = vmul.f32 %v6678_v46, %v5342_v49  ;;  %v1803_v28 = vadd.f32 %v1802_v41, %v1801_v60  ;;  %v1806_v33 = vmul.f32 %v5198_v59, %v5324_v21 }
 0x192   :  { %v1668_v19 = vmax.f32 %v1650_v8, %v1667_v5  ;;  %v1791_v13 = vadd.f32 %v1790_v57, %v1789_v54  ;;  %v1798_v20 = vmul.f32 %v6680_v38, %v5347_v32  ;;  %v1819_v43 = vmul.f32 %v5171_v22, %v5281_v11  ;;  %v6681_v22 = vld [vmem:[#allocation11_spill] sm:$0xff] }
 0x193   :  { %v1805_v56 = vadd.f32 %v1804_v25, %v1803_v28  ;;  %v1808_v23 = vmul.f32 %v5205_v9, %v5327_v29  ;;  %v1820_v34 = vmul.f32 %v5189_v27, %v5300_v2  ;;  %v1822_v60 = vmul.f32 %v6679_v63, %v5303_v16  ;;  %v6682_v28 = vld [vmem:[#allocation32_spill] sm:$0xff] }
 0x194   :  { %v1669_v59 = vadd.f32 %v1668_v19, %v6656_v61  ;;  %v1780_v8 = vadd.f32 %v1779_v31, %v1778_v14  ;;  %v1793_v57 = vadd.f32 %v1792_v17, %v1791_v13  ;;  %v1810_v58 = vmul.f32 %v6678_v46, %v5336_v12  ;;  %v6683_v19 = vld [vmem:[#allocation12_spill] sm:$0xff]  ;;  %v5640_v13 = vld [vmem:[%s6410_s2 + $0x30] sm:$0x7f] }
 0x195   :  { %v1807_v1 = vadd.f32 %v1806_v33, %v1805_v56  ;;  %v1812_v41 = vmul.f32 %v6681_v22, %v5339_v50  ;;  %v1821_v25 = vadd.f32 %v1820_v34, %v1819_v43  ;;  %v1824_v5 = vmul.f32 %v5205_v9, %v5324_v21  ;;  %v5648_v56 = vld [vmem:[%s6411_s3 + $0x30] sm:$0x7f]  ;;  %v5668_v22 = vld [vmem:[%s6410_s2 + $0x38] sm:$0x7f] }
 0x196   :  { %v1670_v54 = vmax.f32 %v1669_v59, 0.0  ;;  %v1795_v27 = vadd.f32 %v1794_v48, %v1793_v57  ;;  %v1814_v63 = vmul.f32 %v6682_v28, %v5342_v49  ;;  %v1816_v31 = vmul.f32 %v6683_v19, %v5347_v32  ;;  %6684 = vst [vmem:[#allocation16_spill] sm:$0xff] %v5648_v56 }
 0x197   :  { %v1809_v17 = vadd.f32 %v1808_v23, %v1807_v1  ;;  %v1823_v14 = vadd.f32 %v1822_v60, %v1821_v25  ;;  %v1826_v33 = vmul.f32 %v6678_v46, %v5327_v29  ;;  %v1282_v9 = vmul.f32 %v5640_v13, %v6636_v45  ;;  %v5655_v23 = vld [vmem:[%s6410_s2 + $0x31] sm:$0x7f]  ;;  %6686 = vst [vmem:[#allocation26_spill] sm:$0xff] %v5668_v22 }
 0x198   :  { %1671 = vst.msk [vmem:[#allocation2 + $0x90] sm:$0x7f] %vm228_vm1, %v1670_v54  ;;  %v1782_v48 = vadd.f32 %v1781_v4, %v1780_v8  ;;  %v1797_v43 = vadd.f32 %v1796_v51, %v1795_v27  ;;  %v1283_v46 = vmul.f32 %v5648_v56, %v6638_v62  ;;  %v1285_v34 = vmul.f32 %v5655_v23, %v6640_v47 }
 0x199   :  { %6685 = vst [vmem:[#allocation17_spill] sm:$0xff] %v5655_v23  ;;  %v1811_v60 = vadd.f32 %v1810_v58, %v1809_v17  ;;  %v1825_v59 = vadd.f32 %v1824_v5, %v1823_v14  ;;  %v1828_v4 = vmul.f32 %v6680_v38, %v5336_v12  ;;  %v1830_v51 = vmul.f32 %v6682_v28, %v5339_v50  ;;  %v6687_v38 = vld [vmem:[#allocation13_spill] sm:$0xff]  ;;  %v5679_v28 = vld [vmem:[%s6411_s3 + $0x38] sm:$0x7f] }
 0x19a   :  { %v1799_v8 = vadd.f32 %v1798_v20, %v1797_v43  ;;  %v1832_v57 = vmul.f32 %v6683_v19, %v5342_v49  ;;  %v1284_v1 = vadd.f32 %v1283_v46, %v1282_v9  ;;  %v1287_v58 = vmul.f32 %v5668_v22, %v6643_v40  ;;  %v5695_v46 = vld [vmem:[%s6410_s2 + $0x39] sm:$0x7f] }
 0x19b   :  { %v1813_v25 = vadd.f32 %v1812_v41, %v1811_v60  ;;  %v1827_v5 = vadd.f32 %v1826_v33, %v1825_v59  ;;  %v1834_v54 = vmul.f32 %v6687_v38, %v5347_v32  ;;  %v1299_v20 = vmul.f32 %v5648_v56, %v6636_v45  ;;  %v5688_v41 = vld [vmem:[%s6411_s3 + $0x31] sm:$0x7f]  ;;  %v5702_v59 = vld [vmem:[%s6410_s2 + $0x40] sm:$0x7f] }
 0x19c   :  { %v1286_v27 = vadd.f32 %v1285_v34, %v1284_v1  ;;  %v1289_v19 = vmul.f32 %v5679_v28, %v6644_v42  ;;  %v1300_v17 = vmul.f32 %v5655_v23, %v6638_v62  ;;  %6688 = vst [vmem:[#allocation18_spill] sm:$0xff] %v5688_v41  ;;  %v1302_v14 = vmul.f32 %v5688_v41, %v6640_v47 }
 0x19d   :  { %v1800_v33 = vmax.f32 %v1782_v48, %v1799_v8  ;;  %v1815_v9 = vadd.f32 %v1814_v63, %v1813_v25  ;;  %v1829_v43 = vadd.f32 %v1828_v4, %v1827_v5  ;;  %v1291_v34 = vmul.f32 %v5695_v46, %v6647_v30  ;;  %6689 = vst [vmem:[#allocation19_spill] sm:$0xff] %v5702_v59  ;;  %v5711_v5 = vld [vmem:[%s6411_s3 + $0x40] sm:$0x7f] }
 0x19e   :  { %v1288_v60 = vadd.f32 %v1287_v58, %v1286_v27  ;;  %v1293_v1 = vmul.f32 %v5702_v59, %v6648_v0  ;;  %v1301_v48 = vadd.f32 %v1300_v17, %v1299_v20  ;;  %v1304_v63 = vmul.f32 %v5679_v28, %v6643_v40 }
 0x19f   :  { %v2404_v4 = vld [vmem:[#allocation2 + $0x90] sm:$0xff]  ;;  %v1817_v8 = vadd.f32 %v1816_v31, %v1815_v9  ;;  %v1831_v25 = vadd.f32 %v1830_v51, %v1829_v43  ;;  %v1295_v58 = vmul.f32 %v5711_v5, %v6650_v10  ;;  %v1306_v38 = vmul.f32 %v5695_v46, %v6644_v42  ;;  %v5724_v43 = vld [vmem:[%s6411_s3 + $0x39] sm:$0x7f] }
 0x1a0   :  { %2493 = vmatpush.msra.mxu1 %v2404_v4  ;;  %v1290_v27 = vadd.f32 %v1289_v19, %v1288_v60  ;;  %v1303_v20 = vadd.f32 %v1302_v14, %v1301_v48  ;;  %v1317_v17 = vmul.f32 %v5668_v22, %v6636_v45  ;;  %v1318_v31 = vmul.f32 %v5679_v28, %v6638_v62 }
 0x1a1   :  { %v1818_v51 = vmax.f32 %v1800_v33, %v1817_v8  ;;  %v1833_v9 = vadd.f32 %v1832_v57, %v1831_v25  ;;  %6690 = vst [vmem:[#allocation20_spill] sm:$0xff] %v5724_v43  ;;  %v1308_v41 = vmul.f32 %v5724_v43, %v6647_v30  ;;  %v1320_v19 = vmul.f32 %v5695_v46, %v6640_v47  ;;  %v5735_v57 = vld [vmem:[%s6410_s2 + $0x41] sm:$0x7f] }
 0x1a2   :  { %2784 = vmatpush.msra.mxu2 %v2404_v4  ;;  %v1292_v14 = vadd.f32 %v1291_v34, %v1290_v27  ;;  %v1305_v60 = vadd.f32 %v1304_v63, %v1303_v20  ;;  %v1319_v48 = vadd.f32 %v1318_v31, %v1317_v17  ;;  %v1322_v22 = vmul.f32 %v5702_v59, %v6643_v40 }
 0x1a3   :  { %v1835_v33 = vadd.f32 %v1834_v54, %v1833_v9  ;;  %v1297_v8 = vmul.f32 %v5735_v57, %v6652_v36  ;;  %v1310_v25 = vmul.f32 %v5711_v5, %v6648_v0  ;;  %v1312_v34 = vmul.f32 %v5735_v57, %v6650_v10 }
 0x1a4   :  { %v1294_v63 = vadd.f32 %v1293_v1, %v1292_v14  ;;  %v1307_v4 = vadd.f32 %v1306_v38, %v1305_v60  ;;  %v1321_v27 = vadd.f32 %v1320_v19, %v1319_v48  ;;  %v1324_v54 = vmul.f32 %v5711_v5, %v6644_v42 }
 0x1a5   :  { %v1836_v20 = vmax.f32 %v1818_v51, %v1835_v33  ;;  %v1335_v17 = vmul.f32 %v5679_v28, %v6636_v45  ;;  %v1336_v31 = vmul.f32 %v5695_v46, %v6638_v62  ;;  %v1338_v9 = vmul.f32 %v5724_v43, %v6640_v47  ;;  %v5757_v51 = vld [vmem:[%s6411_s3 + $0x41] sm:$0x7f]  ;;  %v5773_v33 = vld [vmem:[%s6411_s3 + $0x48] sm:$0x7f] }
 0x1a6   :  { %v1296_v59 = vadd.f32 %v1295_v58, %v1294_v63  ;;  %v1309_v23 = vadd.f32 %v1308_v41, %v1307_v4  ;;  %v1323_v56 = vadd.f32 %v1322_v22, %v1321_v27  ;;  %v1326_v1 = vmul.f32 %v5735_v57, %v6647_v30  ;;  %6691 = vst [vmem:[#allocation21_spill] sm:$0xff] %v5757_v51  ;;  %v5766_v22 = vld [vmem:[%s6410_s2 + $0x48] sm:$0x7f] }
 0x1a7   :  { %v1837_v38 = vadd.f32 %v1836_v20, %v5358_v3  ;;  %v1314_v19 = vmul.f32 %v5757_v51, %v6652_v36  ;;  %v1337_v14 = vadd.f32 %v1336_v31, %v1335_v17  ;;  %v1340_v60 = vmul.f32 %v5711_v5, %v6643_v40  ;;  %6692 = vst [vmem:[#allocation28_spill] sm:$0xff] %v5766_v22  ;;  %v5787_v31 = vld [vmem:[%s6410_s2 + $0x49] sm:$0x7f] }
 0x1a8   :  { %v1311_v58 = vadd.f32 %v1310_v25, %v1309_v23  ;;  %v1325_v41 = vadd.f32 %v1324_v54, %v1323_v56  ;;  %v1328_v48 = vmul.f32 %v5766_v22, %v6648_v0  ;;  %v1330_v63 = vmul.f32 %v5773_v33, %v6650_v10 }
 0x1a9   :  { %v1838_v4 = vmax.f32 %v1837_v38, 0.0  ;;  %v1298_v27 = vadd.f32 %v1297_v8, %v1296_v59  ;;  %v1339_v23 = vadd.f32 %v1338_v9, %v1337_v14  ;;  %v1342_v56 = vmul.f32 %v5735_v57, %v6644_v42 }
 0x1aa   :  { %v1313_v25 = vadd.f32 %v1312_v34, %v1311_v58  ;;  %v1327_v54 = vadd.f32 %v1326_v1, %v1325_v41  ;;  %v1450_v20 = vmul.f32 %v5415_v18, %v5281_v11  ;;  %v1451_v17 = vmul.f32 %v5422_v53, %v5300_v2 }
 0x1ab   :  { %1839 = vst.msk [vmem:[#allocation2 + $0x28] sm:$0x7f] %vm228_vm1, %v1838_v4  ;;  %v1332_v59 = vmul.f32 %v5787_v31, %v6652_v36  ;;  %v1341_v8 = vadd.f32 %v1340_v60, %v1339_v23  ;;  %v1344_v34 = vmul.f32 %v5757_v51, %v6647_v30  ;;  %v1453_v18 = vmul.f32 %v5429_v52, %v5303_v16 }
 0x1ac   :  { %v1315_v9 = vadd.f32 %v1314_v19, %v1313_v25  ;;  %v1329_v1 = vadd.f32 %v1328_v48, %v1327_v54  ;;  %v1452_v38 = vadd.f32 %v1451_v17, %v1450_v20  ;;  %v1455_v14 = vmul.f32 %v5440_v7, %v5324_v21 }
 0x1ad   :  { %v1343_v58 = vadd.f32 %v1342_v56, %v1341_v8  ;;  %v1346_v41 = vmul.f32 %v5773_v33, %v6648_v0  ;;  %v1457_v4 = vmul.f32 %v5447_v55, %v5327_v29  ;;  %v1467_v51 = vmul.f32 %v5422_v53, %v5281_v11 }
 0x1ae   :  { %v1316_v60 = vmax.f32 %v1298_v27, %v1315_v9  ;;  %v1331_v23 = vadd.f32 %v1330_v63, %v1329_v1  ;;  %v1454_v22 = vadd.f32 %v1453_v18, %v1452_v38  ;;  %v1348_v19 = vmul.f32 %v5787_v31, %v6650_v10  ;;  %v5812_v27 = vld [vmem:[%s6411_s3 + $0x49] sm:$0x7f]  ;;  %v6693_v38 = vld [vmem:[#allocation33_spill] sm:$0xff] }
 0x1af   :  { %v1345_v43 = vadd.f32 %v1344_v34, %v1343_v58  ;;  %v1468_v48 = vmul.f32 %v5429_v52, %v5300_v2  ;;  %v1470_v56 = vmul.f32 %v5458_v6, %v5303_v16  ;;  %v1350_v63 = vmul.f32 %v5812_v27, %v6652_v36  ;;  %v6694_v58 = vld [vmem:[#allocation14_spill] sm:$0xff] }
 0x1b0   :  { %v1333_v25 = vadd.f32 %v1332_v59, %v1331_v23  ;;  %v1456_v53 = vadd.f32 %v1455_v14, %v1454_v22  ;;  %v1459_v54 = vmul.f32 %v5467_v15, %v5336_v12  ;;  %v1461_v52 = vmul.f32 %v5476_v39, %v5339_v50 }
 0x1b1   :  { %v1347_v20 = vadd.f32 %v1346_v41, %v1345_v43  ;;  %v1469_v17 = vadd.f32 %v1468_v48, %v1467_v51  ;;  %v1472_v6 = vmul.f32 %v5447_v55, %v5324_v21  ;;  %v1474_v18 = vmul.f32 %v5467_v15, %v5327_v29 }
 0x1b2   :  { %v2391_v59 = vld [vmem:[#allocation2 + $0x28] sm:$0xff]  ;;  %v1334_v8 = vmax.f32 %v1316_v60, %v1333_v25  ;;  %v1458_v34 = vadd.f32 %v1457_v4, %v1456_v53  ;;  %v1485_v22 = vmul.f32 %v5440_v7, %v5281_v11  ;;  %v1486_v1 = vmul.f32 %v5447_v55, %v5300_v2 }
 0x1b3   :  { %2461 = vmatpush.msra.mxu0 %v2391_v59  ;;  %2769 = vmatpush.msra.mxu3 %v2391_v59  ;;  %v1349_v9 = vadd.f32 %v1348_v19, %v1347_v20  ;;  %v1471_v43 = vadd.f32 %v1470_v56, %v1469_v17  ;;  %v1463_v14 = vmul.f32 %v6693_v38, %v5342_v49 }
 0x1b4   :  { %v1460_v51 = vadd.f32 %v1459_v54, %v1458_v34  ;;  %v1476_v41 = vmul.f32 %v6694_v58, %v5336_v12  ;;  %v1488_v4 = vmul.f32 %v5467_v15, %v5303_v16  ;;  %v1487_v7 = vadd.f32 %v1486_v1, %v1485_v22 }
 0x1b5   :  { %v1351_v60 = vadd.f32 %v1350_v63, %v1349_v9  ;;  %v1473_v23 = vadd.f32 %v1472_v6, %v1471_v43  ;;  %v1490_v19 = vmul.f32 %v5476_v39, %v5324_v21  ;;  %v1465_v56 = vmul.f32 %v5498_v26, %v5347_v32  ;;  %v6695_v9 = vld [vmem:[#allocation15_spill] sm:$0xff] }
 0x1b6   :  { %v1462_v48 = vadd.f32 %v1461_v52, %v1460_v51  ;;  %v1478_v25 = vmul.f32 %v6693_v38, %v5339_v50  ;;  %v1492_v53 = vmul.f32 %v6693_v38, %v5327_v29  ;;  %v1489_v17 = vadd.f32 %v1488_v4, %v1487_v7 }
 0x1b7   :  { %v1352_v54 = vmax.f32 %v1334_v8, %v1351_v60  ;;  %v1475_v20 = vadd.f32 %v1474_v18, %v1473_v23  ;;  %v1503_v63 = vmul.f32 %v5447_v55, %v5281_v11  ;;  %v1480_v6 = vmul.f32 %v5498_v26, %v5342_v49 }
 0x1b8   :  { %v1494_v39 = vmul.f32 %v5498_v26, %v5336_v12  ;;  %v1504_v52 = vmul.f32 %v5467_v15, %v5300_v2  ;;  %v1506_v59 = vmul.f32 %v6694_v58, %v5303_v16  ;;  %v1464_v8 = vadd.f32 %v1463_v14, %v1462_v48 }
 0x1b9   :  { %v1353_v34 = vadd.f32 %v1352_v54, %v6656_v61  ;;  %v1477_v18 = vadd.f32 %v1476_v41, %v1475_v20  ;;  %v1491_v22 = vadd.f32 %v1490_v19, %v1489_v17  ;;  %v1482_v55 = vmul.f32 %v5531_v35, %v5347_v32  ;;  %v5866_v41 = vld [vmem:[%s6410_s2 + $0x20] sm:$0x7f] }
 0x1ba   :  { %v1496_v43 = vmul.f32 %v6695_v9, %v5339_v50  ;;  %v1505_v1 = vadd.f32 %v1504_v52, %v1503_v63  ;;  %v1508_v51 = vmul.f32 %v6693_v38, %v5324_v21  ;;  %v1498_v58 = vmul.f32 %v5545_v24, %v5342_v49  ;;  %v5873_v38 = vld [vmem:[%s6411_s3 + $0x20] sm:$0x7f]  ;;  %v5890_v52 = vld [vmem:[%s6410_s2 + $0x28] sm:$0x7f] }
 0x1bb   :  { %v1354_v4 = vmax.f32 %v1353_v34, 0.0  ;;  %v1479_v15 = vadd.f32 %v1478_v25, %v1477_v18  ;;  %v1493_v60 = vadd.f32 %v1492_v53, %v1491_v22  ;;  %v1510_v14 = vmul.f32 %v5498_v26, %v5327_v29  ;;  %v5881_v53 = vld [vmem:[%s6410_s2 + $0x21] sm:$0x7f] }
 0x1bc   :  { %v1507_v23 = vadd.f32 %v1506_v59, %v1505_v1  ;;  %v966_v7 = vmul.f32 %v5866_v41, %v6636_v45  ;;  %v967_v19 = vmul.f32 %v5873_v38, %v6638_v62  ;;  %v1466_v48 = vadd.f32 %v1465_v56, %v1464_v8  ;;  %v5914_v1 = vld [vmem:[%s6411_s3 + $0x21] sm:$0x7f] }
 0x1bd   :  { %1355 = vst.msk [vmem:[#allocation2 + $0x88] sm:$0x7f] %vm228_vm1, %v1354_v4  ;;  %v1481_v26 = vadd.f32 %v1480_v6, %v1479_v15  ;;  %v1495_v25 = vadd.f32 %v1494_v39, %v1493_v60  ;;  %v969_v54 = vmul.f32 %v5881_v53, %v6640_v47  ;;  %v1512_v17 = vmul.f32 %v5531_v35, %v5336_v12  ;;  %v5901_v35 = vld [vmem:[%s6411_s3 + $0x28] sm:$0x7f] }
 0x1be   :  { %v1509_v20 = vadd.f32 %v1508_v51, %v1507_v23  ;;  %v968_v63 = vadd.f32 %v967_v19, %v966_v7  ;;  %v971_v56 = vmul.f32 %v5890_v52, %v6643_v40  ;;  %v1500_v59 = vmul.f32 %v5563_v37, %v5347_v32 }
 0x1bf   :  { %v1483_v6 = vadd.f32 %v1482_v55, %v1481_v26  ;;  %v1497_v39 = vadd.f32 %v1496_v43, %v1495_v25  ;;  %v1514_v34 = vmul.f32 %v5545_v24, %v5339_v50  ;;  %v973_v22 = vmul.f32 %v5901_v35, %v6644_v42 }
 0x1c0   :  { %v1511_v8 = vadd.f32 %v1510_v14, %v1509_v20  ;;  %v970_v18 = vadd.f32 %v969_v54, %v968_v63  ;;  %v983_v55 = vmul.f32 %v5873_v38, %v6636_v45  ;;  %v1516_v43 = vmul.f32 %v5563_v37, %v5342_v49  ;;  %v5932_v54 = vld [vmem:[%s6410_s2 + $0x30] sm:$0x7f] }
 0x1c1   :  { %v1499_v9 = vadd.f32 %v1498_v58, %v1497_v39  ;;  %v984_v24 = vmul.f32 %v5881_v53, %v6638_v62  ;;  %v986_v51 = vmul.f32 %v5914_v1, %v6640_v47  ;;  %v1484_v4 = vmax.f32 %v1466_v48, %v1483_v6  ;;  %v5921_v58 = vld [vmem:[%s6410_s2 + $0x29] sm:$0x7f] }
 0x1c2   :  { %v1513_v15 = vadd.f32 %v1512_v17, %v1511_v8  ;;  %v972_v60 = vadd.f32 %v971_v56, %v970_v18  ;;  %v975_v37 = vmul.f32 %v5921_v58, %v6647_v30  ;;  %v1518_v14 = vmul.f32 %v5584_v44, %v5347_v32  ;;  %v5939_v17 = vld [vmem:[%s6411_s3 + $0x30] sm:$0x7f] }
 0x1c3   :  { %v1501_v23 = vadd.f32 %v1500_v59, %v1499_v9  ;;  %v985_v7 = vadd.f32 %v984_v24, %v983_v55  ;;  %v988_v19 = vmul.f32 %v5901_v35, %v6643_v40  ;;  %v977_v20 = vmul.f32 %v5932_v54, %v6648_v0  ;;  %v5954_v55 = vld [vmem:[%s6411_s3 + $0x29] sm:$0x7f] }
 0x1c4   :  { %v2403_v26 = vld [vmem:[#allocation2 + $0x88] sm:$0xff]  ;;  %v1515_v48 = vadd.f32 %v1514_v34, %v1513_v15  ;;  %v974_v25 = vadd.f32 %v973_v22, %v972_v60  ;;  %v979_v44 = vmul.f32 %v5939_v17, %v6650_v10  ;;  %v990_v56 = vmul.f32 %v5921_v58, %v6644_v42  ;;  %v5963_v15 = vld [vmem:[%s6410_s2 + $0x31] sm:$0x7f] }
 0x1c5   :  { %2494 = vmatpush.msra.mxu1 %v2403_v26  ;;  %v987_v63 = vadd.f32 %v986_v51, %v985_v7  ;;  %v1001_v6 = vmul.f32 %v5890_v52, %v6636_v45  ;;  %v1002_v39 = vmul.f32 %v5901_v35, %v6638_v62  ;;  %v1502_v59 = vmax.f32 %v1484_v4, %v1501_v23 }
 0x1c6   :  { %v1517_v34 = vadd.f32 %v1516_v43, %v1515_v48  ;;  %v976_v8 = vadd.f32 %v975_v37, %v974_v25  ;;  %v1004_v18 = vmul.f32 %v5921_v58, %v6640_v47  ;;  %2785 = vmatpush.msra.mxu2 %v2403_v26  ;;  %v992_v9 = vmul.f32 %v5954_v55, %v6647_v30 }
 0x1c7   :  { %v989_v22 = vadd.f32 %v988_v19, %v987_v63  ;;  %v1003_v24 = vadd.f32 %v1002_v39, %v1001_v6  ;;  %v1006_v51 = vmul.f32 %v5932_v54, %v6643_v40  ;;  %v981_v60 = vmul.f32 %v5963_v15, %v6652_v36 }
 0x1c8   :  { %v1519_v4 = vadd.f32 %v1518_v14, %v1517_v34  ;;  %v978_v43 = vadd.f32 %v977_v20, %v976_v8  ;;  %v994_v37 = vmul.f32 %v5939_v17, %v6648_v0  ;;  %v1008_v19 = vmul.f32 %v5939_v17, %v6644_v42 }
 0x1c9   :  { %v991_v23 = vadd.f32 %v990_v56, %v989_v22  ;;  %v1005_v7 = vadd.f32 %v1004_v18, %v1003_v24  ;;  %v1019_v14 = vmul.f32 %v5901_v35, %v6636_v45  ;;  %v1020_v25 = vmul.f32 %v5921_v58, %v6638_v62  ;;  %v5985_v45 = vld [vmem:[%s6411_s3 + $0x31] sm:$0x7f]  ;;  %v5994_v18 = vld [vmem:[%s6410_s2 + $0x38] sm:$0x7f] }
 0x1ca   :  { %v1520_v26 = vmax.f32 %v1502_v59, %v1519_v4  ;;  %v980_v48 = vadd.f32 %v979_v44, %v978_v43  ;;  %v1022_v20 = vmul.f32 %v5954_v55, %v6640_v47  ;;  %v996_v6 = vmul.f32 %v5963_v15, %v6650_v10 }
 0x1cb   :  { %v993_v63 = vadd.f32 %v992_v9, %v991_v23  ;;  %v1007_v56 = vadd.f32 %v1006_v51, %v1005_v7  ;;  %v1010_v39 = vmul.f32 %v5963_v15, %v6647_v30  ;;  %v998_v62 = vmul.f32 %v5985_v45, %v6652_v36  ;;  %v6001_v9 = vld [vmem:[%s6411_s3 + $0x38] sm:$0x7f] }
 0x1cc   :  { %v1521_v34 = vadd.f32 %v1520_v26, %v5358_v3  ;;  %v1021_v44 = vadd.f32 %v1020_v25, %v1019_v14  ;;  %v1024_v47 = vmul.f32 %v5939_v17, %v6643_v40  ;;  %v1012_v22 = vmul.f32 %v5994_v18, %v6648_v0  ;;  %v6015_v26 = vld [vmem:[%s6410_s2 + $0x39] sm:$0x7f]  ;;  %v6697_v25 = vld [vmem:[#allocation17_spill] sm:$0xff] }
 0x1cd   :  { %v995_v59 = vadd.f32 %v994_v37, %v993_v63  ;;  %v1009_v8 = vadd.f32 %v1008_v19, %v1007_v56  ;;  %v1014_v24 = vmul.f32 %v6001_v9, %v6650_v10  ;;  %v982_v40 = vadd.f32 %v981_v60, %v980_v48  ;;  %v6696_v19 = vld [vmem:[#allocation16_spill] sm:$0xff]  ;;  %v6698_v56 = vld [vmem:[#allocation26_spill] sm:$0xff] }
 0x1ce   :  { %v1522_v51 = vmax.f32 %v1521_v34, 0.0  ;;  %v1023_v4 = vadd.f32 %v1022_v20, %v1021_v44  ;;  %v1026_v43 = vmul.f32 %v5963_v15, %v6644_v42  ;;  %v1134_v7 = vmul.f32 %v5640_v13, %v5281_v11 }
 0x1cf   :  { %v997_v37 = vadd.f32 %v996_v6, %v995_v59  ;;  %v1011_v23 = vadd.f32 %v1010_v39, %v1009_v8  ;;  %v1135_v14 = vmul.f32 %v6696_v19, %v5300_v2  ;;  %v1016_v60 = vmul.f32 %v6015_v26, %v6652_v36 }
 0x1d0   :  { %1523 = vst.msk [vmem:[#allocation2 + $0x20] sm:$0x7f] %vm228_vm1, %v1522_v51  ;;  %v1025_v48 = vadd.f32 %v1024_v47, %v1023_v4  ;;  %v1028_v42 = vmul.f32 %v5985_v45, %v6647_v30  ;;  %v1137_v13 = vmul.f32 %v6697_v25, %v5303_v16  ;;  %v1139_v39 = vmul.f32 %v6698_v56, %v5324_v21  ;;  %v6036_v4 = vld [vmem:[%s6411_s3 + $0x39] sm:$0x7f] }
 0x1d1   :  { %v999_v20 = vadd.f32 %v998_v62, %v997_v37  ;;  %v1013_v63 = vadd.f32 %v1012_v22, %v1011_v23  ;;  %v1136_v6 = vadd.f32 %v1135_v14, %v1134_v7  ;;  %v1030_v44 = vmul.f32 %v6001_v9, %v6648_v0  ;;  %v6700_v7 = vld [vmem:[#allocation19_spill] sm:$0xff] }
 0x1d2   :  { %v1027_v34 = vadd.f32 %v1026_v43, %v1025_v48  ;;  %v1032_v59 = vmul.f32 %v6015_v26, %v6650_v10  ;;  %v1141_v47 = vmul.f32 %v5679_v28, %v5327_v29  ;;  %v1151_v62 = vmul.f32 %v6696_v19, %v5281_v11  ;;  %v6699_v43 = vld [vmem:[#allocation18_spill] sm:$0xff] }
 0x1d3   :  { %v1000_v30 = vmax.f32 %v982_v40, %v999_v20  ;;  %v1015_v8 = vadd.f32 %v1014_v24, %v1013_v63  ;;  %v1138_v51 = vadd.f32 %v1137_v13, %v1136_v6  ;;  %v1034_v0 = vmul.f32 %v6036_v4, %v6652_v36 }
 0x1d4   :  { %v1029_v22 = vadd.f32 %v1028_v42, %v1027_v34  ;;  %v1152_v10 = vmul.f32 %v6697_v25, %v5300_v2  ;;  %v1154_v40 = vmul.f32 %v6699_v43, %v5303_v16  ;;  %v1143_v23 = vmul.f32 %v5695_v46, %v5336_v12 }
 0x1d5   :  { %v1017_v24 = vadd.f32 %v1016_v60, %v1015_v8  ;;  %v1140_v37 = vadd.f32 %v1139_v39, %v1138_v51  ;;  %v1145_v19 = vmul.f32 %v6700_v7, %v5339_v50  ;;  %v1147_v48 = vmul.f32 %v5711_v5, %v5342_v49 }
 0x1d6   :  { %v1031_v14 = vadd.f32 %v1030_v44, %v1029_v22  ;;  %v1153_v42 = vadd.f32 %v1152_v10, %v1151_v62  ;;  %v1156_v36 = vmul.f32 %v5679_v28, %v5324_v21  ;;  %v1158_v60 = vmul.f32 %v5695_v46, %v5327_v29 }
 0x1d7   :  { %v2390_v25 = vld [vmem:[#allocation2 + $0x20] sm:$0xff]  ;;  %v1018_v13 = vmax.f32 %v1000_v30, %v1017_v24  ;;  %v1142_v20 = vadd.f32 %v1141_v47, %v1140_v37  ;;  %v1169_v63 = vmul.f32 %v6698_v56, %v5281_v11  ;;  %v1170_v34 = vmul.f32 %v5679_v28, %v5300_v2  ;;  %v6701_v30 = vld [vmem:[#allocation20_spill] sm:$0xff] }
 0x1d8   :  { %2462 = vmatpush.msra.mxu0 %v2390_v25  ;;  %2770 = vmatpush.msra.mxu3 %v2390_v25  ;;  %v1033_v6 = vadd.f32 %v1032_v59, %v1031_v14  ;;  %v1155_v39 = vadd.f32 %v1154_v40, %v1153_v42  ;;  %v1149_v8 = vmul.f32 %v5735_v57, %v5347_v32  ;;  %v6702_v42 = vld [vmem:[#allocation21_spill] sm:$0xff] }
 0x1d9   :  { %v1144_v44 = vadd.f32 %v1143_v23, %v1142_v20  ;;  %v1160_v47 = vmul.f32 %v6701_v30, %v5336_v12  ;;  %v1172_v51 = vmul.f32 %v5695_v46, %v5303_v16  ;;  %v1171_v56 = vadd.f32 %v1170_v34, %v1169_v63 }
 0x1da   :  { %v1035_v62 = vadd.f32 %v1034_v0, %v1033_v6  ;;  %v1157_v22 = vadd.f32 %v1156_v36, %v1155_v39  ;;  %v1174_v59 = vmul.f32 %v6700_v7, %v5324_v21  ;;  %v1162_v43 = vmul.f32 %v5711_v5, %v5339_v50  ;;  %v6703_v6 = vld [vmem:[#allocation28_spill] sm:$0xff] }
 0x1db   :  { %v1146_v10 = vadd.f32 %v1145_v19, %v1144_v44  ;;  %v1164_v40 = vmul.f32 %v5735_v57, %v5342_v49  ;;  %v1176_v24 = vmul.f32 %v5711_v5, %v5327_v29  ;;  %v1173_v14 = vadd.f32 %v1172_v51, %v1171_v56 }
 0x1dc   :  { %v1036_v37 = vmax.f32 %v1018_v13, %v1035_v62  ;;  %v1159_v23 = vadd.f32 %v1158_v60, %v1157_v22  ;;  %v1187_v0 = vmul.f32 %v5679_v28, %v5281_v11  ;;  %v1166_v36 = vmul.f32 %v6702_v42, %v5347_v32 }
 0x1dd   :  { %v1178_v7 = vmul.f32 %v5735_v57, %v5336_v12  ;;  %v1188_v19 = vmul.f32 %v5695_v46, %v5300_v2  ;;  %v1190_v25 = vmul.f32 %v6701_v30, %v5303_v16  ;;  %v1148_v13 = vadd.f32 %v1147_v48, %v1146_v10 }
 0x1de   :  { %v1037_v20 = vadd.f32 %v1036_v37, %v6656_v61  ;;  %v1161_v60 = vadd.f32 %v1160_v47, %v1159_v23  ;;  %v1175_v63 = vadd.f32 %v1174_v59, %v1173_v14  ;;  %v1180_v28 = vmul.f32 %v6703_v6, %v5339_v50 }
 0x1df   :  { %v1182_v39 = vmul.f32 %v5773_v33, %v5342_v49  ;;  %v1189_v34 = vadd.f32 %v1188_v19, %v1187_v0  ;;  %v1192_v44 = vmul.f32 %v5711_v5, %v5324_v21  ;;  %v1184_v61 = vmul.f32 %v5787_v31, %v5347_v32 }
 0x1e0   :  { %v1038_v51 = vmax.f32 %v1037_v20, 0.0  ;;  %v1163_v46 = vadd.f32 %v1162_v43, %v1161_v60  ;;  %v1177_v62 = vadd.f32 %v1176_v24, %v1175_v63  ;;  %v1194_v30 = vmul.f32 %v5735_v57, %v5327_v29 }
 0x1e1   :  { %v1191_v48 = vadd.f32 %v1190_v25, %v1189_v34  ;;  %v818_v47 = vmul.f32 %v5866_v41, %v5281_v11  ;;  %v819_v22 = vmul.f32 %v5873_v38, %v5300_v2  ;;  %v1150_v5 = vadd.f32 %v1149_v8, %v1148_v13 }
 0x1e2   :  { %1039 = vst.msk [vmem:[#allocation2 + $0x80] sm:$0x7f] %vm228_vm1, %v1038_v51  ;;  %v1165_v56 = vadd.f32 %v1164_v40, %v1163_v46  ;;  %v1179_v59 = vadd.f32 %v1178_v7, %v1177_v62  ;;  %v821_v10 = vmul.f32 %v5881_v53, %v5303_v16  ;;  %v1196_v24 = vmul.f32 %v6702_v42, %v5336_v12 }
 0x1e3   :  { %v1193_v43 = vadd.f32 %v1192_v44, %v1191_v48  ;;  %v820_v37 = vadd.f32 %v819_v22, %v818_v47  ;;  %v823_v57 = vmul.f32 %v5890_v52, %v5324_v21  ;;  %v1198_v14 = vmul.f32 %v5773_v33, %v5339_v50 }
 0x1e4   :  { %v1167_v41 = vadd.f32 %v1166_v36, %v1165_v56  ;;  %v1181_v23 = vadd.f32 %v1180_v28, %v1179_v59  ;;  %v1200_v8 = vmul.f32 %v5787_v31, %v5342_v49  ;;  %v825_v7 = vmul.f32 %v5901_v35, %v5327_v29 }
 0x1e5   :  { %v1195_v40 = vadd.f32 %v1194_v30, %v1193_v43  ;;  %v822_v0 = vadd.f32 %v821_v10, %v820_v37  ;;  %v835_v42 = vmul.f32 %v5873_v38, %v5281_v11  ;;  %v1202_v25 = vmul.f32 %v5812_v27, %v5347_v32  ;;  %v2379_v38 = vld [vmem:[%s6412_s4 + $0x8] sm:$0xff] }
 0x1e6   :  { %v1183_v19 = vadd.f32 %v1182_v39, %v1181_v23  ;;  %v836_v36 = vmul.f32 %v5881_v53, %v5300_v2  ;;  %v838_v33 = vmul.f32 %v5914_v1, %v5303_v16  ;;  %v1168_v20 = vmax.f32 %v1150_v5, %v1167_v41 }
 0x1e7   :  { %v1197_v31 = vadd.f32 %v1196_v24, %v1195_v40  ;;  %v824_v13 = vadd.f32 %v823_v57, %v822_v0  ;;  %v827_v60 = vmul.f32 %v5921_v58, %v5336_v12  ;;  %v829_v27 = vmul.f32 %v5932_v54, %v5339_v50 }
 0x1e8   :  { %v1185_v63 = vadd.f32 %v1184_v61, %v1183_v19  ;;  %v837_v6 = vadd.f32 %v836_v36, %v835_v42  ;;  %v840_v53 = vmul.f32 %v5901_v35, %v5324_v21  ;;  %v831_v34 = vmul.f32 %v5939_v17, %v5342_v49 }
 0x1e9   :  { %v2402_v28 = vld [vmem:[#allocation2 + $0x80] sm:$0xff]  ;;  %v1199_v1 = vadd.f32 %v1198_v14, %v1197_v31  ;;  %v826_v39 = vadd.f32 %v825_v7, %v824_v13  ;;  %v833_v44 = vmul.f32 %v5963_v15, %v5347_v32  ;;  %v842_v46 = vmul.f32 %v5921_v58, %v5327_v29 }
 0x1ea   :  { %2495 = vmatpush.msra.mxu1 %v2402_v28  ;;  %v839_v51 = vadd.f32 %v838_v33, %v837_v6  ;;  %v853_v62 = vmul.f32 %v5890_v52, %v5281_v11  ;;  %v854_v61 = vmul.f32 %v5901_v35, %v5300_v2  ;;  %v1186_v48 = vmax.f32 %v1168_v20, %v1185_v63 }
 0x1eb   :  { %2751 = vmatmul.msk.f32.vlgmr.msra.gmra.mxu1 %vm2438_vm2, %v2379_v38  ;;  %v1201_v30 = vadd.f32 %v1200_v8, %v1199_v1  ;;  %v828_v47 = vadd.f32 %v827_v60, %v826_v39  ;;  %v856_v22 = vmul.f32 %v5921_v58, %v5303_v16  ;;  %v844_v56 = vmul.f32 %v5954_v55, %v5336_v12 }
 0x1ec   :  { %v841_v5 = vadd.f32 %v840_v53, %v839_v51  ;;  %v855_v59 = vadd.f32 %v854_v61, %v853_v62  ;;  %v858_v10 = vmul.f32 %v5932_v54, %v5324_v21  ;;  %2786 = vmatpush.msra.mxu2 %v2402_v28  ;;  %v846_v24 = vmul.f32 %v5939_v17, %v5339_v50 }
 0x1ed   :  { %v1203_v52 = vadd.f32 %v1202_v25, %v1201_v30  ;;  %v830_v43 = vadd.f32 %v829_v27, %v828_v47  ;;  %v848_v37 = vmul.f32 %v5963_v15, %v5342_v49  ;;  %v860_v23 = vmul.f32 %v5939_v17, %v5327_v29  ;;  %v2914_v27 = vld [vmem:[%s6410_s2 + $0x10] sm:$0x7f] }
 0x1ee   :  { %v843_v57 = vadd.f32 %v842_v46, %v841_v5  ;;  %v857_v41 = vadd.f32 %v856_v22, %v855_v59  ;;  %v871_v14 = vmul.f32 %v5901_v35, %v5281_v11  ;;  %v872_v54 = vmul.f32 %v5921_v58, %v5300_v2 }
 0x1ef   :  { %v1204_v8 = vmax.f32 %v1186_v48, %v1203_v52  ;;  %v832_v40 = vadd.f32 %v831_v34, %v830_v43  ;;  %v874_v0 = vmul.f32 %v5954_v55, %v5303_v16  ;;  %v850_v42 = vmul.f32 %v5985_v45, %v5347_v32  ;;  %v2917_v48 = vld [vmem:[%s6410_s2 + $0x18] sm:$0x7f] }
 0x1f0   :  { %v845_v7 = vadd.f32 %v844_v56, %v843_v57  ;;  %v859_v19 = vadd.f32 %v858_v10, %v857_v41  ;;  %v862_v25 = vmul.f32 %v5963_v15, %v5336_v12  ;;  %v864_v35 = vmul.f32 %v5994_v18, %v5339_v50  ;;  %v2920_v57 = vld [vmem:[%s6411_s3 + $0x11] sm:$0x7f] }
 0x1f1   :  { %v1205_v36 = vadd.f32 %v1204_v8, %v5358_v3  ;;  %v873_v33 = vadd.f32 %v872_v54, %v871_v14  ;;  %v876_v58 = vmul.f32 %v5939_v17, %v5324_v21  ;;  %v866_v55 = vmul.f32 %v6001_v9, %v5342_v49  ;;  %v2915_v17 = vld [vmem:[%s6411_s3 + $0x10] sm:$0x7f] }
 0x1f2   :  { %v847_v20 = vadd.f32 %v846_v24, %v845_v7  ;;  %v861_v31 = vadd.f32 %v860_v23, %v859_v19  ;;  %v878_v13 = vmul.f32 %v5963_v15, %v5327_v29  ;;  %v834_v38 = vadd.f32 %v833_v44, %v832_v40  ;;  %v2916_v15 = vld [vmem:[%s6410_s2 + $0x11] sm:$0x7f]  ;;  %v2922_v7 = vld [vmem:[%s6411_s3 + $0x20] sm:$0x7f] }
 0x1f3   :  { %v1206_v60 = vmax.f32 %v1205_v36, 0.0  ;;  %v875_v63 = vadd.f32 %v874_v0, %v873_v33  ;;  %v502_v18 = vmul.f32 %v2914_v27, %v5281_v11  ;;  %v503_v28 = vmul.f32 %v2915_v17, %v5300_v2  ;;  %v2924_v27 = vld [vmem:[%s6411_s3 + $0x19] sm:$0x7f] }
 0x1f4   :  { %v849_v6 = vadd.f32 %v848_v37, %v847_v20  ;;  %v863_v53 = vadd.f32 %v862_v25, %v861_v31  ;;  %v505_v1 = vmul.f32 %v2916_v15, %v5303_v16  ;;  %v868_v39 = vmul.f32 %v6015_v26, %v5347_v32 }
 0x1f5   :  { %1207 = vst.msk [vmem:[#allocation2 + $0x18] sm:$0x7f] %vm228_vm1, %v1206_v60  ;;  %v877_v34 = vadd.f32 %v876_v58, %v875_v63  ;;  %v880_v44 = vmul.f32 %v5985_v45, %v5336_v12  ;;  %v882_v51 = vmul.f32 %v6001_v9, %v5339_v50  ;;  %v504_v61 = vadd.f32 %v503_v28, %v502_v18  ;;  %v2918_v45 = vld [vmem:[%s6411_s3 + $0x18] sm:$0x7f]  ;;  %v2923_v60 = vld [vmem:[%s6410_s2 + $0x21] sm:$0x7f] }
 0x1f6   :  { %v851_v46 = vadd.f32 %v850_v42, %v849_v6  ;;  %v865_v62 = vadd.f32 %v864_v35, %v863_v53  ;;  %v507_v30 = vmul.f32 %v2917_v48, %v5324_v21  ;;  %v884_v22 = vmul.f32 %v6015_v26, %v5342_v49  ;;  %v2919_v26 = vld [vmem:[%s6410_s2 + $0x19] sm:$0x7f] }
 0x1f7   :  { %v879_v47 = vadd.f32 %v878_v13, %v877_v34  ;;  %v509_v5 = vmul.f32 %v2918_v45, %v5327_v29  ;;  %v519_v9 = vmul.f32 %v2915_v17, %v5281_v11  ;;  %v506_v10 = vadd.f32 %v505_v1, %v504_v61 }
 0x1f8   :  { %v852_v56 = vmax.f32 %v834_v38, %v851_v46  ;;  %v867_v59 = vadd.f32 %v866_v55, %v865_v62  ;;  %v520_v52 = vmul.f32 %v2916_v15, %v5300_v2  ;;  %v886_v24 = vmul.f32 %v6036_v4, %v5347_v32  ;;  %v2921_v4 = vld [vmem:[%s6410_s2 + $0x20] sm:$0x7f] }
 0x1f9   :  { %v881_v43 = vadd.f32 %v880_v44, %v879_v47  ;;  %v511_v37 = vmul.f32 %v2919_v26, %v5336_v12  ;;  %v522_v41 = vmul.f32 %v2920_v57, %v5303_v16  ;;  %v508_v14 = vadd.f32 %v507_v30, %v506_v10  ;;  %v2925_v10 = vld [vmem:[%s6411_s3 + $0x21] sm:$0x7f] }
 0x1fa   :  { %v869_v23 = vadd.f32 %v868_v39, %v867_v59  ;;  %v521_v8 = vadd.f32 %v520_v52, %v519_v9  ;;  %v524_v40 = vmul.f32 %v2918_v45, %v5324_v21  ;;  %v513_v0 = vmul.f32 %v2921_v4, %v5339_v50  ;;  %v2926_v52 = vld [vmem:[%s6410_s2 + $0x28] sm:$0x7f] }
 0x1fb   :  { %v883_v54 = vadd.f32 %v882_v51, %v881_v43  ;;  %v515_v42 = vmul.f32 %v2922_v7, %v5342_v49  ;;  %v526_v19 = vmul.f32 %v2919_v26, %v5327_v29  ;;  %v510_v35 = vadd.f32 %v509_v5, %v508_v14 }
 0x1fc   :  { %v2389_v25 = vld [vmem:[#allocation2 + $0x18] sm:$0xff]  ;;  %v870_v36 = vmax.f32 %v852_v56, %v869_v23  ;;  %v523_v33 = vadd.f32 %v522_v41, %v521_v8  ;;  %v537_v58 = vmul.f32 %v2917_v48, %v5281_v11  ;;  %v538_v31 = vmul.f32 %v2918_v45, %v5300_v2 }
 0x1fd   :  { %2463 = vmatpush.msra.mxu0 %v2389_v25  ;;  %2771 = vmatpush.msra.mxu3 %v2389_v25  ;;  %v885_v20 = vadd.f32 %v884_v22, %v883_v54  ;;  %v540_v55 = vmul.f32 %v2919_v26, %v5303_v16  ;;  %v512_v13 = vadd.f32 %v511_v37, %v510_v35  ;;  %v2930_v25 = vld [vmem:[%s6410_s2 + $0x1] sm:$0x7f] }
 0x1fe   :  { %v517_v38 = vmul.f32 %v2923_v60, %v5347_v32  ;;  %v525_v63 = vadd.f32 %v524_v40, %v523_v33  ;;  %v528_v18 = vmul.f32 %v2924_v27, %v5336_v12  ;;  %v530_v53 = vmul.f32 %v2922_v7, %v5339_v50  ;;  %v2928_v40 = vld [vmem:[%s6410_s2] sm:$0x7f]  ;;  %v2931_v33 = vld [vmem:[%s6410_s2 + $0x29] sm:$0x7f] }
 0x1ff   :  { %v887_v6 = vadd.f32 %v886_v24, %v885_v20  ;;  %v539_v17 = vadd.f32 %v538_v31, %v537_v58  ;;  %v542_v28 = vmul.f32 %v2921_v4, %v5324_v21  ;;  %v514_v15 = vadd.f32 %v513_v0, %v512_v13  ;;  %v2927_v24 = vld [vmem:[%s6411_s3 + $0x28] sm:$0x7f]  ;;  %v2929_v4 = vld [vmem:[%s6411_s3] sm:$0x7f] }
 0x200   :  { %v527_v1 = vadd.f32 %v526_v19, %v525_v63  ;;  %v532_v39 = vmul.f32 %v2923_v60, %v5342_v49  ;;  %v544_v34 = vmul.f32 %v2922_v7, %v5327_v29  ;;  %v555_v46 = vmul.f32 %v2918_v45, %v5281_v11  ;;  %v2932_v31 = vld [vmem:[%s6410_s2 + $0x8] sm:$0x7f] }
 0x201   :  { %v888_v44 = vmax.f32 %v870_v36, %v887_v6  ;;  %v541_v51 = vadd.f32 %v540_v55, %v539_v17  ;;  %v556_v62 = vmul.f32 %v2919_v26, %v5300_v2  ;;  %v516_v61 = vadd.f32 %v515_v42, %v514_v15  ;;  %v2933_v6 = vld [vmem:[%s6411_s3 + $0x8] sm:$0x7f] }
 0x202   :  { %v529_v48 = vadd.f32 %v528_v18, %v527_v1  ;;  %v546_v30 = vmul.f32 %v2923_v60, %v5336_v12  ;;  %v558_v47 = vmul.f32 %v2924_v27, %v5303_v16  ;;  %v560_v56 = vmul.f32 %v2922_v7, %v5324_v21 }
 0x203   :  { %v889_v22 = vadd.f32 %v888_v44, %v5358_v3  ;;  %v543_v5 = vadd.f32 %v542_v28, %v541_v51  ;;  %v557_v9 = vadd.f32 %v556_v62, %v555_v46  ;;  %v534_v45 = vmul.f32 %v2925_v10, %v5347_v32  ;;  %v2935_v44 = vld [vmem:[%s6411_s3 + $0x29] sm:$0x7f] }
 0x204   :  { %v531_v59 = vadd.f32 %v530_v53, %v529_v48  ;;  %v548_v43 = vmul.f32 %v2926_v52, %v5339_v50  ;;  %v550_v26 = vmul.f32 %v2927_v24, %v5342_v49  ;;  %v562_v23 = vmul.f32 %v2923_v60, %v5327_v29  ;;  %v2936_v62 = vld [vmem:[%s6410_s2 + $0x9] sm:$0x7f] }
 0x205   :  { %v890_v37 = vmax.f32 %v889_v22, 0.0  ;;  %v545_v57 = vadd.f32 %v544_v34, %v543_v5  ;;  %v559_v41 = vadd.f32 %v558_v47, %v557_v9  ;;  %v518_v14 = vadd.f32 %v517_v38, %v516_v61 }
 0x206   :  { %v533_v8 = vadd.f32 %v532_v39, %v531_v59  ;;  %v146_v54 = vmul.f32 %v2928_v40, %v5281_v11  ;;  %v148_v0 = vmul.f32 %v2929_v4, %v5300_v2  ;;  %v564_v19 = vmul.f32 %v2925_v10, %v5336_v12  ;;  %v2934_v39 = vld [vmem:[%s6411_s3 + $0x1] sm:$0x7f]  ;;  %v2939_v40 = vld [vmem:[%s6411_s3 + $0x9] sm:$0x7f] }
 0x207   :  { %891 = vst.msk [vmem:[#allocation2 + $0x10] sm:$0x7f] %vm228_vm1, %v890_v37  ;;  %v547_v7 = vadd.f32 %v546_v30, %v545_v57  ;;  %v561_v42 = vadd.f32 %v560_v56, %v559_v41  ;;  %v151_v36 = vmul.f32 %v2930_v25, %v5303_v16  ;;  %v552_v58 = vmul.f32 %v2931_v33, %v5347_v32  ;;  %v2937_v56 = vld [vmem:[%s6410_s2 + $0x10] sm:$0x7f] }
 0x208   :  { %v535_v35 = vadd.f32 %v534_v45, %v533_v8  ;;  %v149_v20 = vadd.f32 %v148_v0, %v146_v54  ;;  %v154_v55 = vmul.f32 %v2932_v31, %v5324_v21  ;;  %v566_v38 = vmul.f32 %v2927_v24, %v5339_v50  ;;  %v2940_v0 = vld [vmem:[%s6410_s2 + $0x11] sm:$0x7f] }
 0x209   :  { %v549_v13 = vadd.f32 %v548_v43, %v547_v7  ;;  %v563_v60 = vadd.f32 %v562_v23, %v561_v42  ;;  %v568_v63 = vmul.f32 %v2931_v33, %v5342_v49  ;;  %v157_v53 = vmul.f32 %v2933_v6, %v5327_v29  ;;  %v2938_v23 = vld [vmem:[%s6411_s3 + $0x10] sm:$0x7f] }
 0x20a   :  { %v536_v27 = vmax.f32 %v518_v14, %v535_v35  ;;  %v152_v18 = vadd.f32 %v151_v36, %v149_v20  ;;  %v171_v17 = vmul.f32 %v2929_v4, %v5281_v11  ;;  %v172_v1 = vmul.f32 %v2930_v25, %v5300_v2 }
 0x20b   :  { %v551_v28 = vadd.f32 %v550_v26, %v549_v13  ;;  %v565_v15 = vadd.f32 %v564_v19, %v563_v60  ;;  %v174_v34 = vmul.f32 %v2934_v39, %v5303_v16  ;;  %v570_v51 = vmul.f32 %v2935_v44, %v5347_v32  ;;  %v2381_v13 = vld [vmem:[%s6412_s4 + $0x18] sm:$0xff]  ;;  %v2415_v39 = vld [vmem:[%s6413_s5 + $0x8] sm:$0xff] }
 0x20c   :  { %v155_v46 = vadd.f32 %v154_v55, %v152_v18  ;;  %v160_v61 = vmul.f32 %v2936_v62, %v5336_v12  ;;  %v173_v47 = vadd.f32 %v172_v1, %v171_v17  ;;  %v176_v22 = vmul.f32 %v2933_v6, %v5324_v21  ;;  %2752 = vmatmul.msk.f32.gmra.mxu1 %vm2438_vm2, %v2381_v13  ;;  %v2941_v17 = vld [vmem:[%s6411_s3 + $0x11] sm:$0x7f] }
 0x20d   :  { %v553_v48 = vadd.f32 %v552_v58, %v551_v28  ;;  %v567_v30 = vadd.f32 %v566_v38, %v565_v15  ;;  %v163_v59 = vmul.f32 %v2937_v56, %v5339_v50  ;;  %v178_v10 = vmul.f32 %v2936_v62, %v5327_v29  ;;  %v2942_v15 = vld [vmem:[%s6410_s2 + $0x18] sm:$0x7f] }
 0x20e   :  { %v2388_v5 = vld [vmem:[#allocation2 + $0x10] sm:$0xff]  ;;  %v158_v9 = vadd.f32 %v157_v53, %v155_v46  ;;  %v189_v45 = vmul.f32 %v2932_v31, %v5281_v11  ;;  %v175_v24 = vadd.f32 %v174_v34, %v173_v47  ;;  %v190_v37 = vmul.f32 %v2933_v6, %v5300_v2 }
 0x20f   :  { %2464 = vmatpush.msra.mxu0 %v2388_v5  ;;  %2772 = vmatpush.msra.mxu3 %v2388_v5  ;;  %v554_v52 = vmax.f32 %v536_v27, %v553_v48  ;;  %v569_v43 = vadd.f32 %v568_v63, %v567_v30  ;;  %v192_v57 = vmul.f32 %v2936_v62, %v5303_v16  ;;  %v2977_v48 = vmov 0  }
 0x210   :  { %v161_v26 = vadd.f32 %v160_v61, %v158_v9  ;;  %v166_v14 = vmul.f32 %v2938_v23, %v5342_v49  ;;  %v177_v8 = vadd.f32 %v176_v22, %v175_v24  ;;  %v180_v54 = vmul.f32 %v2939_v40, %v5336_v12  ;;  %2792 = vset.pattern.permute.xlu1 %v2977_v48  ;;  %v2944_v9 = vld [vmem:[%s6410_s2 + $0x19] sm:$0x7f] }
 0x211   :  { %v571_v41 = vadd.f32 %v570_v51, %v569_v43  ;;  %v169_v7 = vmul.f32 %v2940_v0, %v5347_v32  ;;  %v191_v42 = vadd.f32 %v190_v37, %v189_v45  ;;  %v194_v19 = vmul.f32 %v2937_v56, %v5324_v21  ;;  %2791 = vset.pattern.permute.xlu0 %v2977_v48  ;;  %v2383_v45 = vld [vmem:[%s6412_s4 + $0x28] sm:$0xff]  ;;  %v2385_v43 = vld [vmem:[%s6412_s4 + $0x38] sm:$0xff] }
 0x212   :  { %v164_v4 = vadd.f32 %v163_v59, %v161_v26  ;;  %v179_v36 = vadd.f32 %v178_v10, %v177_v8  ;;  %v182_v35 = vmul.f32 %v2938_v23, %v5339_v50  ;;  %v207_v33 = vmul.f32 %v2933_v6, %v5281_v11  ;;  %2425 = vperm.xlu1 %2792, %v2415_v39  }
 0x213   :  { %v572_v25 = vmax.f32 %v554_v52, %v571_v41  ;;  %v193_v58 = vadd.f32 %v192_v57, %v191_v42  ;;  %v196_v20 = vmul.f32 %v2938_v23, %v5327_v29  ;;  %v208_v31 = vmul.f32 %v2936_v62, %v5300_v2  ;;  %v2943_v62 = vld [vmem:[%s6411_s3 + $0x18] sm:$0x7f]  ;;  %2793 = vset.pattern.permute.xlu2 %v2977_v48 }
 0x214   :  { %v210_v55 = vmul.f32 %v2939_v40, %v5303_v16  ;;  %v167_v38 = vadd.f32 %v166_v14, %v164_v4  ;;  %v181_v63 = vadd.f32 %v180_v54, %v179_v36  ;;  %v184_v27 = vmul.f32 %v2940_v0, %v5342_v49  ;;  %2753 = vmatmul.msk.f32.gmra.mxu1 %vm2438_vm2, %v2383_v45  ;;  %v2416_v54 = vld [vmem:[%s6413_s5 + $0x10] sm:$0xff] }
 0x215   :  { %v573_v60 = vadd.f32 %v572_v25, %v5358_v3  ;;  %v195_v11 = vadd.f32 %v194_v19, %v193_v58  ;;  %v198_v18 = vmul.f32 %v2940_v0, %v5336_v12  ;;  %v209_v6 = vadd.f32 %v208_v31, %v207_v33  ;;  %2754 = vmatmul.msk.f32.vlgmr.msra.gmra.mxu2 %vm2438_vm2, %v2385_v43  ;;  %v2382_v19 = vld [vmem:[%s6412_s4 + $0x20] sm:$0xff]  ;;  %v2384_v36 = vld [vmem:[%s6412_s4 + $0x30] sm:$0xff] }
 0x216   :  { %v212_v2 = vmul.f32 %v2938_v23, %v5324_v21  ;;  %v183_v16 = vadd.f32 %v182_v35, %v181_v63  ;;  %v186_v28 = vmul.f32 %v2941_v17, %v5347_v32  ;;  %v200_v1 = vmul.f32 %v2942_v15, %v5339_v50  ;;  %v2945_v23 = vld [vmem:[%s6411_s3 + $0x19] sm:$0x7f] }
 0x217   :  { %v574_v53 = vmax.f32 %v573_v60, 0.0  ;;  %v197_v34 = vadd.f32 %v196_v20, %v195_v11  ;;  %v211_v21 = vadd.f32 %v210_v55, %v209_v6  ;;  %v214_v44 = vmul.f32 %v2940_v0, %v5327_v29  ;;  %v2515_v55 = vld [vmem:[%s6415_s7] sm:$0xff] }
 0x218   :  { %v170_v51 = vadd.f32 %v169_v7, %v167_v38  ;;  %v185_v46 = vadd.f32 %v184_v27, %v183_v16  ;;  %v202_v61 = vmul.f32 %v2943_v62, %v5342_v49  ;;  %v216_v22 = vmul.f32 %v2941_v17, %v5336_v12  ;;  %v2417_v12 = vld [vmem:[%s6413_s5 + $0x18] sm:$0xff]  ;;  %2519 = vperm.xlu2 %2793, %v2515_v55   ;;  %v2516_v38 = vld [vmem:[%s6415_s7 + $0x8] sm:$0x3] }
 0x219   :  { %575 = vst.msk [vmem:[#allocation2 + $0x8] sm:$0x7f] %vm228_vm1, %v574_v53  ;;  %v199_v30 = vadd.f32 %v198_v18, %v197_v34  ;;  %v213_v47 = vadd.f32 %v212_v2, %v211_v21  ;;  %v204_v56 = vmul.f32 %v2944_v9, %v5347_v32  ;;  %v218_v10 = vmul.f32 %v2943_v62, %v5339_v50  ;;  %v2414_v50 = vld [vmem:[%s6413_s5] sm:$0xff]  ;;  %v2514_v62 = vld [vmem:[%s6414_s6 + $0x8] sm:$0x3] }
 0x21a   :  { %v187_v29 = vadd.f32 %v186_v28, %v185_v46  ;;  %v220_v52 = vmul.f32 %v2944_v9, %v5342_v49  ;;  %2435 = vperm.xlu0 %2791, %v2417_v12   ;;  %v222_v14 = vmul.f32 %v2945_v23, %v5347_v32  ;;  %2420 = vperm.xlu1 %2792, %v2414_v50   ;;  %v2378_v32 = vld [vmem:[%s6412_s4] sm:$0xff] }
 0x21b   :  { %v201_v5 = vadd.f32 %v200_v1, %v199_v30  ;;  %v215_v59 = vadd.f32 %v214_v44, %v213_v47  ;;  %v2513_v46 = vld [vmem:[%s6414_s6] sm:$0xff] }
 0x21c   :  { %v188_v24 = vmax.f32 %v170_v51, %v187_v29 }
 0x21d   :  { %v203_v26 = vadd.f32 %v202_v61, %v201_v5  ;;  %v217_v37 = vadd.f32 %v216_v22, %v215_v59 }
 0x21f   :  { %v205_v57 = vadd.f32 %v204_v56, %v203_v26  ;;  %v219_v41 = vadd.f32 %v218_v10, %v217_v37 }
 0x220   :  { %v2387_v49 = vld [vmem:[#allocation2 + $0x8] sm:$0xff]  ;;  %2524 = vperm.xlu2 %2793, %v2516_v38  }
 0x221   :  { %2465 = vmatpush.msra.mxu0 %v2387_v49  ;;  %2773 = vmatpush.msra.mxu3 %v2387_v49  ;;  %v206_v8 = vmax.f32 %v188_v24, %v205_v57  ;;  %v221_v40 = vadd.f32 %v220_v52, %v219_v41 }
 0x222   :  { %2430 = vperm.xlu0 %2791, %v2416_v54  }
 0x223   :  { %v223_v4 = vadd.f32 %v222_v14, %v221_v40 }
 0x225   :  { %v224_v0 = vmax.f32 %v206_v8, %v223_v4 }
 0x227   :  { %v226_v7 = vadd.f32 %v5358_v3, %v224_v0  ;;  %v2380_v3 = vld [vmem:[%s6412_s4 + $0x10] sm:$0xff] }
 0x229   :  { %v227_v42 = vmax.f32 %v226_v7, 0.0 }
 0x22b   :  { %229 = vst.msk [vmem:[#allocation2] sm:$0x7f] %vm228_vm1, %v227_v42 }
 0x232   :  { %v2386_v25 = vld [vmem:[#allocation2] sm:$0xff] }
 0x233   :  { %2466 = vmatpush.msra.mxu0 %v2386_v25  ;;  %2774 = vmatpush.msra.mxu3 %v2386_v25 }
 0x234   :  { %2467 = vmatmul.f32.vlgmr.msra.gmra.mxu0 %v2378_v32  ;;  %2473 = vmatmul.f32.vlgmr.msra.gmra.mxu3 %v2382_v19 }
 0x23c   :  { %2470 = vmatmul.f32.gmra.mxu0 %v2380_v3  ;;  %2476 = vmatmul.f32.gmra.mxu3 %v2384_v36 }
 0x268   :  { %v2497_v35 = vpop.f32.mrf.mxu1 }
 0x272   :  { %v2520_v61 = vpop.permute.xlu2 %2519 }
 0x27a   :  { %v2525_v22 = vpop.permute.xlu2 %2524 }
 0x284   :  { %v2426_v20 = vpop.permute.xlu1 %2425 }
 0x289   :  { %v2500_v31 = vpop.f32.mrf.mxu1 }
 0x28c   :  { %v2436_v33 = vpop.permute.xlu0 %2435  ;;  %v2421_v27 = vpop.permute.xlu1 %2420 }
 0x291   :  { %v2503_v18 = vpop.f32.mrf.mxu1 }
 0x294   :  { %v2431_v60 = vpop.permute.xlu0 %2430 }
 0x298   :  { %v2506_v2 = vpop.f32.mrf.mxu2 }
 0x2b1   :  { %v2468_v58 = vpop.f32.mrf.mxu0 }
 0x2b2   :  { %v2469_v17 = vadd.f32 %v2468_v58, %v2421_v27 }
 0x2b4   :  { %v2498_v21 = vadd.f32 %v2497_v35, %v2469_v17 }
 0x2b6   :  { %v2509_v51 = vmax.f32 %v2498_v21, 0.0 }
 0x2b7   :  { %v2474_v13 = vpop.f32.mrf.mxu3 }
 0x2b8   :  { %v2475_v11 = vadd.f32 %v2474_v13, %v2431_v60 }
 0x2b9   :  { %v2471_v63 = vpop.f32.mrf.mxu0 }
 0x2ba   :  { %v2472_v53 = vadd.f32 %v2471_v63, %v2426_v20  ;;  %v2504_v28 = vadd.f32 %v2503_v18, %v2475_v11 }
 0x2bc   :  { %v2501_v39 = vadd.f32 %v2500_v31, %v2472_v53  ;;  %v2511_v34 = vmax.f32 %v2504_v28, 0.0 }
 0x2be   :  { %v2510_v44 = vmax.f32 %v2501_v39, 0.0 }
 0x2bf   :  { %v2477_v6 = vpop.f32.mrf.mxu3 }
 0x2c0   :  { %v2478_v16 = vadd.f32 %v2477_v6, %v2436_v33 }
 0x2c2   :  { %v2507_v15 = vadd.f32 %v2506_v2, %v2478_v16 }
 0x2c4   :  { %v2512_v1 = vmax.f32 %v2507_v15, 0.0 }
 0x2c6   :  { %2546 = vmatpush.msrb.mxu2 %v2512_v1 }
 0x2c8   :  { %2547 = vmatpush.msrb.mxu2 %v2511_v34 }
 0x2ca   :  { %2548 = vmatpush.msrb.mxu2 %v2510_v44 }
 0x2cc   :  { %2549 = vmatpush.msrb.mxu2 %v2509_v51 }
 0x2cd   :  { %2755 = vmatmul.msk.f32.vlgmr.msrb.gmra.mxu2 %vm2527_vm3, %v2513_v46 }
 0x2d5   :  { %2756 = vmatmul.msk.f32.gmra.mxu2 %vm2527_vm3, %v2514_v62 }
 0x350   :  { %v2551_v48 = vpop.f32.mrf.mxu2 }
 0x351   :  { %v2552_v30 = vadd.f32 %v2551_v48, %v2520_v61 }
 0x353   :  { %v2757_v47 = vmul.f32 -1.442695, %v2552_v30 }
 0x355   :  { %2794 = vpow2.f32 %v2757_v47 }
 0x358   :  { %v2554_v29 = vpop.f32.mrf.mxu2 }
 0x359   :  { %v2555_v5 = vadd.f32 %v2554_v29, %v2525_v22 }
 0x35b   :  { %v2795_v9 = vpop.eup %2794  ;;  %v2758_v56 = vmul.f32 -1.442695, %v2555_v5 }
 0x35c   :  { %v2563_v59 = vadd.f32 1.0, %v2795_v9 }
 0x35d   :  { %2796 = vpow2.f32 %v2758_v56 }
 0x35e   :  { %2798 = vrcp.f32 %v2563_v59  ;;  %v2576_v24 = vand.u32 2147483648, %v2563_v59  ;;  %v2574_v37 = vand.u32 2147483647, %v2563_v59  ;;  %vm2570_vm5 = vweird.f32 %v2563_v59 }
 0x360   :  { %v2577_v57 = vor.u32 1.1754944e-38, %v2576_v24  ;;  %vm2575_vm8 = vcmp.eq.f32.partialorder %v2574_v37, 8.507059e+37 }
 0x363   :  { %v2797_v10 = vpop.eup %2796 }
 0x364   :  { %v2799_v45 = vpop.eup %2798  ;;  %v2564_v52 = vadd.f32 1.0, %v2797_v10 }
 0x365   :  { %v2566_v12 = vmul.f32 %v2799_v45, %v2563_v59  ;;  %vm2571_vm4 = vweird.f32 %v2799_v45 }
 0x366   :  { %2800 = vrcp.f32 %v2564_v52  ;;  %vm2572_vm6 = vmor %vm2570_vm5, %vm2571_vm4  ;;  %v2591_v40 = vand.u32 2147483648, %v2564_v52  ;;  %v2589_v4 = vand.u32 2147483647, %v2564_v52  ;;  %vm2585_vm10 = vweird.f32 %v2564_v52 }
 0x367   :  { %v2567_v43 = vsub.f32 1.0, %v2566_v12 }
 0x368   :  { %v2592_v7 = vor.u32 1.1754944e-38, %v2591_v40  ;;  %vm2590_vm13 = vcmp.eq.f32.partialorder %v2589_v4, 8.507059e+37 }
 0x369   :  { %v2568_v26 = vmul.f32 %v2799_v45, %v2567_v43 }
 0x36b   :  { %v2569_v50 = vadd.f32 %v2799_v45, %v2568_v26 }
 0x36c   :  { %v2801_v49 = vpop.eup %2800 }
 0x36d   :  { %v2573_v41 = vsel %vm2572_vm6, %v2799_v45, %v2569_v50  ;;  %v2581_v23 = vmul.f32 %v2801_v49, %v2564_v52  ;;  %vm2586_vm9 = vweird.f32 %v2801_v49 }
 0x36e   :  { %v2578_v14 = vsel %vm2575_vm8, %v2577_v57, %v2573_v41  ;;  %vm2587_vm11 = vmor %vm2585_vm10, %vm2586_vm9 }
 0x36f   :  { %2596 = vst.msk [vmem:[%s6416_s8] sm:$0xff] %vm2595_vm7, %v2578_v14  ;;  %v2582_v8 = vsub.f32 1.0, %v2581_v23 }
 0x371   :  { %v2583_v54 = vmul.f32 %v2801_v49, %v2582_v8 }
 0x373   :  { %v2584_v0 = vadd.f32 %v2801_v49, %v2583_v54 }
 0x375   :  { %v2588_v42 = vsel %vm2587_vm11, %v2801_v49, %v2584_v0 }
 0x376   :  { %v2593_v32 = vsel %vm2590_vm13, %v2592_v7, %v2588_v42 }
 0x377   :  { %2598 = vst.msk [vmem:[%s6416_s8 + $0x8] sm:$0x3] %vm2597_vm12, %v2593_v32 }
 0x378   :  { %2603 = vsyncpa [#allocation4], 1 }
 0x379   :  { %2604 = vsyncpa [#allocation6], 1 }

</bundles_post_ra>
